<compile_context>
chip_gen: v7x
topology: tpu7x:2x2x1
jax: 0.10.0
libtpu: 0.0.40
codegen_flags: <defaults>
</compile_context>

<pallas_src>
import jax
import jax.numpy as jnp
from jax.experimental import pallas as pl
from jax.experimental.pallas import tpu as pltpu

NUM_DOMAINS = 55
IN_CHANNELS = 64      # LTAE in_channels (encoder_widths[-1])
D_MODEL = 256         # LTAE d_model
N_HEAD = 16
D_K = 4
MLP_OUT = 128         # LTAE mlp[-1] == classifier feature width
EPS = 1e-5


# --------------------------------------------------------------------------------------
# wrapper-side helpers
# --------------------------------------------------------------------------------------
def _group_onehot(n_rows, n_groups):
    """(n_rows, n_groups) one-hot: row r belongs to group r // (n_rows // n_groups)."""
    gs = n_rows // n_groups
    r = jnp.arange(n_rows)[:, None]
    g = jnp.arange(n_groups)[None, :]
    return (r // gs == g).astype(jnp.float32)


def _bn_affine(g, b, rm, rv):
    scale = g * jax.lax.rsqrt(rv + EPS)
    return scale, b - rm * scale


def _pick_pixel_tile(P, T, target_rows=2048):
    """Largest divisor of P with tile_pixels * T ~<= target_rows (bounds VMEM per step)."""
    tp = max(1, min(P, max(8, target_rows // max(T, 1))))
    while P % tp:
        tp -= 1
    return tp


def positional_encoding(batch_positions, d_model=D_MODEL, n_head=N_HEAD, T_const=1000.0):
    d = d_model // n_head                                       # 16
    idx = jnp.arange(d)
    denom = jnp.power(T_const, 2.0 * (idx // 2).astype(jnp.float32) / d)
    table = batch_positions[:, :, None].astype(jnp.float32) / denom[None, None, :]
    pe = jnp.where(idx % 2 == 0, jnp.sin(table), jnp.cos(table))
    return jnp.tile(pe, (1, 1, n_head))                         # (B, T, d_model)


# --------------------------------------------------------------------------------------
# Pallas kernel: grid = (B, P // TP); one step processes a TP-pixel slab of one image and
# accumulates the spatially-pooled 128-d feature into the resident (1,1,128) output block.
# --------------------------------------------------------------------------------------
def _ltae_pool_kernel(
    x_ref,            # (1, TP, T, C)   bf16
    pev_ref,          # (1, T, D)       f32   pe + b_in + gn1_b @ w_in
    pes_ref,          # (1, T, NH)      f32   per-head score bias (q & scale folded)
    gc_ref,           # (C, NH)         f32   group one-hot (in_norm groups == heads)
    gct_ref,          # (NH, C)         f32
    w_in_ref,         # (C, D)          bf16  gn1_g-scaled inconv weight
    w_s_ref,          # (C, NH)         bf16  key/query/scale folded score weight
    ghd_ref,          # (NH, D)         bf16  head -> d_model block one-hot
    w_m_ref,          # (D, MLP_OUT)    bf16  mlp weight with eval-BN folded in
    b_m_ref,          # (1, MLP_OUT)    f32
    gc2_ref,          # (MLP_OUT, NH)   f32
    gc2t_ref,         # (NH, MLP_OUT)   f32
    out_ref,          # (1, 1, MLP_OUT) f32   running spatial sum of normalized features
):
    f32 = jnp.float32
    bf16 = jnp.bfloat16
    pt = pl.program_id(1)

    x = x_ref[0]                                    # (TP, T, C) bf16
    TP, T, C = x.shape
    D = pev_ref.shape[-1]
    NH = N_HEAD
    DK = C // NH                                    # group size of in_norm (== d_k == 4)

    # ---- LTAE in_norm: GroupNorm(NH, C) per pixel, stats over (T, group channels) ----
    xf = x.astype(f32)
    xs = jnp.sum(xf, axis=1)                        # (TP, C)
    xq = jnp.sum(xf * xf, axis=1)                   # (TP, C)
    Gc = gc_ref[...]
    GcT = gct_ref[...]
    cnt = float(T * DK)
    gmean = jnp.dot(xs, Gc, preferred_element_type=f32) / cnt              # (TP, NH)
    gvar = jnp.dot(xq, Gc, preferred_element_type=f32) / cnt - gmean * gmean
    gvar = jnp.maximum(gvar, 0.0)                   # guard single-pass cancellation
    mean_c = jnp.dot(gmean, GcT, preferred_element_type=f32)               # (TP, C)
    inv_c = jnp.dot(jax.lax.rsqrt(gvar + EPS), GcT, preferred_element_type=f32)
    xn = (xf - mean_c[:, None, :]) * inv_c[:, None, :]                     # (TP, T, C)
    xn_b = xn.astype(bf16).reshape(TP * T, C)       # GN affine folded into the weights

    # ---- values: h = xn @ (gn1_g * w_in) + (pe + b_in + gn1_b @ w_in) ----
    h3 = (jnp.dot(xn_b, w_in_ref[...], preferred_element_type=f32).reshape(TP, T, D)
          + pev_ref[0][None, :, :])                 # (TP, T, D) f32

    # ---- attention scores, fully folded: s = xn @ w_score + pe_score ----
    s3 = (jnp.dot(xn_b, w_s_ref[...], preferred_element_type=f32).reshape(TP, T, NH)
          + pes_ref[0][None, :, :])                 # (TP, T, NH) f32
    m = jnp.max(s3, axis=1, keepdims=True)
    e = jnp.exp(s3 - m)
    attn = e / jnp.sum(e, axis=1, keepdims=True)    # (TP, T, NH) f32

    # expand head weights to d_model blocks via one-hot MXU matmul, then weighted T-sum
    a_c = jnp.dot(attn.astype(bf16).reshape(TP * T, NH), ghd_ref[...],
                  preferred_element_type=f32).reshape(TP, T, D)
    attn_out = jnp.sum(a_c * h3, axis=1)            # (TP, D) f32

    # ---- LTAE mlp: Linear(D,128) with eval-BN folded, ReLU (dropout == identity) ----
    z = jnp.dot(attn_out.astype(bf16), w_m_ref[...],
                preferred_element_type=f32) + b_m_ref[0, :]
    z = jnp.maximum(z, 0.0)                         # (TP, MLP_OUT)

    # ---- out_norm GroupNorm(NH,128): normalize only (affine commutes with mean-pool) ----
    C2 = z.shape[-1]
    DG = C2 // NH
    Gc2 = gc2_ref[...]
    Gc2T = gc2t_ref[...]
    gm2 = jnp.dot(z, Gc2, preferred_element_type=f32) / float(DG)
    gv2 = jnp.maximum(jnp.dot(z * z, Gc2, preferred_element_type=f32) / float(DG)
                      - gm2 * gm2, 0.0)
    mc2 = jnp.dot(gm2, Gc2T, preferred_element_type=f32)
    ic2 = jnp.dot(jax.lax.rsqrt(gv2 + EPS), Gc2T, preferred_element_type=f32)
    featn = (z - mc2) * ic2                         # (TP, MLP_OUT) f32

    # ---- accumulate the spatial sum into the resident output block ----
    @pl.when(pt == 0)
    def _():
        out_ref[...] = jnp.zeros_like(out_ref)

    out_ref[...] += jnp.sum(featn, axis=0, keepdims=True)[None, :, :]


# --------------------------------------------------------------------------------------
# JAX glue: layout conversion, weight folding, pallas_call, batched classifier head.
# --------------------------------------------------------------------------------------
def domain_classifier_forward(x, batch_positions, p):
    f32 = jnp.float32
    bf16 = jnp.bfloat16
    B, T, C, H, W = x.shape
    P = H * W
    D = D_MODEL

    # pixel-major layout (B, P, T, C); bf16 halves HBM traffic for the dominant input
    xr = jnp.transpose(x, (0, 3, 4, 1, 2)).reshape(B, P, T, C).astype(bf16)

    # ---- fold parameters (all in f32, then cast matmul operands to bf16) ----
    gn1_g = p["gn1_g"].astype(f32)
    gn1_b = p["gn1_b"].astype(f32)
    w_in = p["w_in"].astype(f32)
    b_in = p["b_in"].astype(f32)
    w_k = p["w_k"].astype(f32)
    b_k = p["b_k"].astype(f32)
    q = p["q"].astype(f32)                                           # (NH, DK)
    scale = 1.0 / (D_K ** 0.5)

    pe = positional_encoding(batch_positions)                        # (B, T, D)
    pe_v = pe + b_in[None, None, :] + (gn1_b @ w_in)[None, None, :]  # value-path bias/PE
    w_in_eff = gn1_g[:, None] * w_in                                 # (C, D)

    # keys folded through the inconv, then master query + 1/sqrt(d_k) folded into scores
    w_ink = w_in_eff @ w_k                                           # (C, NH*DK)
    w_score = jnp.einsum("chd,hd->ch", w_ink.reshape(C, N_HEAD, D_K), q) * scale  # (C, NH)
    pe_k = pe_v @ w_k + b_k[None, None, :]                           # (B, T, NH*DK)
    pe_score = jnp.einsum("bthd,hd->bth",
                          pe_k.reshape(B, T, N_HEAD, D_K), q) * scale            # (B, T, NH)

    bnm_s, bnm_sh = _bn_affine(p["bnm_g"], p["bnm_b"], p["bnm_rm"], p["bnm_rv"])
    w_m_eff = p["w_m"].astype(f32) * bnm_s[None, :]
    b_m_eff = p["b_m"].astype(f32) * bnm_s + bnm_sh

    Gc = _group_onehot(C, N_HEAD)                                    # (C, NH)
    Gc2 = _group_onehot(MLP_OUT, N_HEAD)                             # (MLP_OUT, NH)
    Ghd = _group_onehot(D, N_HEAD).T                                 # (NH, D)

    weights = [
        Gc, Gc.T,
        w_in_eff.astype(bf16), w_score.astype(bf16),
        Ghd.astype(bf16),
        w_m_eff.astype(bf16), b_m_eff.reshape(1, MLP_OUT).astype(f32),
        Gc2, Gc2.T,
    ]

    TP = _pick_pixel_tile(P, T)       # pixel tile: TP*T ~ 2K rows -> bounded VMEM per step
    NPT = P // TP

    def wspec(a):
        zeros = (0,) * a.ndim
        return pl.BlockSpec(a.shape, lambda b, pt: zeros)

    in_specs = ([
        pl.BlockSpec((1, TP, T, C), lambda b, pt: (b, pt, 0, 0)),
        pl.BlockSpec((1, T, D), lambda b, pt: (b, 0, 0)),
        pl.BlockSpec((1, T, N_HEAD), lambda b, pt: (b, 0, 0)),
    ] + [wspec(w) for w in weights])

    pooled_sum = pl.pallas_call(
        _ltae_pool_kernel,
        out_shape=jax.ShapeDtypeStruct((B, 1, MLP_OUT), f32),
        grid=(B, NPT),
        in_specs=in_specs,
        out_specs=pl.BlockSpec((1, 1, MLP_OUT), lambda b, pt: (b, 0, 0)),
        compiler_params=pltpu.CompilerParams(
            dimension_semantics=("parallel", "arbitrary"),
            vmem_limit_bytes=48 * 1024 * 1024,
        ),
    )(xr, pe_v.astype(f32), pe_score.astype(f32), *weights)

    # ---- batched classifier head in plain XLA (M=1 per image inside the kernel is waste) ----
    pooled = pooled_sum.reshape(B, MLP_OUT) / float(P)               # spatial mean
    feat = pooled * p["gn2_g"] + p["gn2_b"]                          # GroupNorm-2 affine
    bnh_s, bnh_sh = _bn_affine(p["bnh_g"], p["bnh_b"], p["bnh_rm"], p["bnh_rv"])
    y = feat * bnh_s + bnh_sh
    y = jnp.maximum(y @ p["w1"] + p["b1"], 0.0)
    return y @ p["w2"] + p["b2"]                                     # (B, NUM_DOMAINS)


# --------------------------------------------------------------------------------------
# Deterministic parameter init (shapes follow the PyTorch module's __init__)
# --------------------------------------------------------------------------------------
def init_params(key):
    ks = jax.random.split(key, 23)
    n = lambda k, s, sc: (sc * jax.random.normal(k, s)).astype(jnp.float32)
    p = {}
    p["gn1_g"] = 1.0 + n(ks[0], (IN_CHANNELS,), 0.1)                 # GroupNorm(16,64)
    p["gn1_b"] = n(ks[1], (IN_CHANNELS,), 0.1)
    p["w_in"] = n(ks[2], (IN_CHANNELS, D_MODEL), IN_CHANNELS ** -0.5)  # Conv1d(64,256,1).weight.T
    p["b_in"] = n(ks[3], (D_MODEL,), 0.05)
    p["w_k"] = n(ks[4], (D_MODEL, N_HEAD * D_K), D_MODEL ** -0.5)    # fc1_k.weight.T
    p["b_k"] = n(ks[5], (N_HEAD * D_K,), 0.05)
    p["q"] = n(ks[6], (N_HEAD, D_K), (2.0 / D_K) ** 0.5)             # learned master query
    p["w_m"] = n(ks[7], (D_MODEL, MLP_OUT), D_MODEL ** -0.5)         # mlp Linear(256,128).weight.T
    p["b_m"] = n(ks[8], (MLP_OUT,), 0.05)
    p["bnm_g"] = 1.0 + n(ks[9], (MLP_OUT,), 0.1)                     # mlp BatchNorm1d(128)
    p["bnm_b"] = n(ks[10], (MLP_OUT,), 0.1)
    p["bnm_rm"] = n(ks[11], (MLP_OUT,), 0.1)
    p["bnm_rv"] = 1.0 + 0.1 * jnp.abs(jax.random.normal(ks[12], (MLP_OUT,))).astype(jnp.float32)
    p["gn2_g"] = 1.0 + n(ks[13], (MLP_OUT,), 0.1)                    # GroupNorm(16,128)
    p["gn2_b"] = n(ks[14], (MLP_OUT,), 0.1)
    p["bnh_g"] = 1.0 + n(ks[15], (MLP_OUT,), 0.1)                    # head BatchNorm1d(128)
    p["bnh_b"] = n(ks[16], (MLP_OUT,), 0.1)
    p["bnh_rm"] = n(ks[17], (MLP_OUT,), 0.1)
    p["bnh_rv"] = 1.0 + 0.1 * jnp.abs(jax.random.normal(ks[18], (MLP_OUT,))).astype(jnp.float32)
    p["w1"] = n(ks[19], (MLP_OUT, MLP_OUT), MLP_OUT ** -0.5)         # fc1.weight.T
    p["b1"] = n(ks[20], (MLP_OUT,), 0.05)
    p["w2"] = n(ks[21], (MLP_OUT, NUM_DOMAINS), MLP_OUT ** -0.5)     # fc2.weight.T
    p["b2"] = n(ks[22], (NUM_DOMAINS,), 0.05)
    return p


# --------------------------------------------------------------------------------------
# Pure-JAX reference (same eval-mode semantics, no folding, f32) for correctness check.
# --------------------------------------------------------------------------------------
def reference_forward(x, batch_positions, p):
    B, T, C, H, W = x.shape
    P = H * W
    NH, DK, DH, D = N_HEAD, D_K, D_MODEL // N_HEAD, D_MODEL
    xr = jnp.transpose(x, (0, 3, 4, 1, 2)).reshape(B, P, T, C).astype(jnp.float32)
    pe = positional_encoding(batch_positions)

    g = xr.reshape(B, P, T, NH, C // NH)
    mu = g.mean(axis=(2, 4), keepdims=True)
    var = ((g - mu) ** 2).mean(axis=(2, 4), keepdims=True)
    xn = ((g - mu) / jnp.sqrt(var + EPS)).reshape(B, P, T, C)
    xn = xn * p["gn1_g"] + p["gn1_b"]

    h = xn @ p["w_in"] + p["b_in"]
    h = h + pe[:, None, :, :]

    k = h @ p["w_k"] + p["b_k"]
    scores = (k.reshape(B, P, T, NH, DK) * p["q"]).sum(-1) / (DK ** 0.5)
    a = jax.nn.softmax(scores, axis=2)
    attn_out = (a[..., None] * h.reshape(B, P, T, NH, DH)).sum(axis=2).reshape(B, P, D)

    bnm_s, bnm_sh = _bn_affine(p["bnm_g"], p["bnm_b"], p["bnm_rm"], p["bnm_rv"])
    z = jnp.maximum((attn_out @ p["w_m"] + p["b_m"]) * bnm_s + bnm_sh, 0.0)

    zg = z.reshape(B, P, NH, MLP_OUT // NH)
    mu2 = zg.mean(axis=-1, keepdims=True)
    var2 = ((zg - mu2) ** 2).mean(axis=-1, keepdims=True)
    feat = ((zg - mu2) / jnp.sqrt(var2 + EPS)).reshape(B, P, MLP_OUT)
    feat = feat * p["gn2_g"] + p["gn2_b"]

    pooled = feat.mean(axis=1)
    bnh_s, bnh_sh = _bn_affine(p["bnh_g"], p["bnh_b"], p["bnh_rm"], p["bnh_rv"])
    y = pooled * bnh_s + bnh_sh
    y = jnp.maximum(y @ p["w1"] + p["b1"], 0.0)
    return y @ p["w2"] + p["b2"]


if __name__ == "__main__":
    B, T, H, W = 2, 8, 8, 8
    key = jax.random.PRNGKey(0)
    kx, kp, kparam = jax.random.split(key, 3)
    x = jax.random.normal(kx, (B, T, IN_CHANNELS, H, W), jnp.float32)
    batch_positions = jax.random.randint(kp, (B, T), 0, 365).astype(jnp.float32)
    params = init_params(kparam)

    out = jax.jit(domain_classifier_forward)(x, batch_positions, params)
    out = jax.block_until_ready(out)

    with jax.default_matmul_precision("highest"):
        ref = jax.block_until_ready(jax.jit(reference_forward)(x, batch_positions, params))

    assert out.shape == (B, NUM_DOMAINS)
    max_err = float(jnp.max(jnp.abs(out - ref)))
    scale = float(jnp.max(jnp.abs(ref))) + 1.0
    if not bool(jnp.all(jnp.isfinite(out))) or max_err > 5e-2 * scale:
        raise AssertionError(f"kernel/reference mismatch: max_err={max_err}")
    print("KERNEL_OK")
</pallas_src>

<mosaic_0001>
module attributes {stable_mosaic.version = 11 : i64} {
  func.func @_ltae_pool_kernel(%arg0: i32, %arg1: i32, %arg2: memref<1x64x8x64xbf16, #tpu.memory_space<vmem>>, %arg3: memref<1x8x256xf32, #tpu.memory_space<vmem>>, %arg4: memref<1x8x16xf32, #tpu.memory_space<vmem>>, %arg5: memref<64x16xf32, #tpu.memory_space<vmem>>, %arg6: memref<16x64xf32, #tpu.memory_space<vmem>>, %arg7: memref<64x256xbf16, #tpu.memory_space<vmem>>, %arg8: memref<64x16xbf16, #tpu.memory_space<vmem>>, %arg9: memref<16x256xbf16, #tpu.memory_space<vmem>>, %arg10: memref<256x128xbf16, #tpu.memory_space<vmem>>, %arg11: memref<1x128xf32, #tpu.memory_space<vmem>>, %arg12: memref<128x16xf32, #tpu.memory_space<vmem>>, %arg13: memref<16x128xf32, #tpu.memory_space<vmem>>, %arg14: memref<1x1x128xf32, #tpu.memory_space<vmem>>) attributes {dimension_semantics = [#tpu.dimension_semantics<parallel>, #tpu.dimension_semantics<arbitrary>], iteration_bounds = array<i64: 2, 1>, scalar_prefetch = 0 : i64, scratch_operands = 0 : i64, tpu.core_type = #tpu.core_type<tc>, window_params = [{transform_indices = @transform_0, window_bounds = array<i64: 1, 64, 8, 64>}, {transform_indices = @transform_1, window_bounds = array<i64: 1, 8, 256>}, {transform_indices = @transform_2, window_bounds = array<i64: 1, 8, 16>}, {pipeline_mode = #tpu.pipeline_mode<synchronous>, transform_indices = @transform_3, window_bounds = array<i64: 64, 16>}, {pipeline_mode = #tpu.pipeline_mode<synchronous>, transform_indices = @transform_4, window_bounds = array<i64: 16, 64>}, {pipeline_mode = #tpu.pipeline_mode<synchronous>, transform_indices = @transform_5, window_bounds = array<i64: 64, 256>}, {pipeline_mode = #tpu.pipeline_mode<synchronous>, transform_indices = @transform_6, window_bounds = array<i64: 64, 16>}, {pipeline_mode = #tpu.pipeline_mode<synchronous>, transform_indices = @transform_7, window_bounds = array<i64: 16, 256>}, {pipeline_mode = #tpu.pipeline_mode<synchronous>, transform_indices = @transform_8, window_bounds = array<i64: 256, 128>}, {pipeline_mode = #tpu.pipeline_mode<synchronous>, transform_indices = @transform_9, window_bounds = array<i64: 1, 128>}, {pipeline_mode = #tpu.pipeline_mode<synchronous>, transform_indices = @transform_10, window_bounds = array<i64: 128, 16>}, {pipeline_mode = #tpu.pipeline_mode<synchronous>, transform_indices = @transform_11, window_bounds = array<i64: 16, 128>}, {transform_indices = @transform_12, window_bounds = array<i64: 1, 1, 128>}]} {
    %c0 = arith.constant 0 : index
    %c0_0 = arith.constant 0 : index
    %c0_1 = arith.constant 0 : index
    %c0_2 = arith.constant 0 : index
    %0 = vector.load %arg2[%c0, %c0_0, %c0_1, %c0_2] : memref<1x64x8x64xbf16, #tpu.memory_space<vmem>>, vector<1x64x8x64xbf16>
    %1 = vector.shape_cast %0 : vector<1x64x8x64xbf16> to vector<64x8x64xbf16>
    %2 = arith.extf %1 : vector<64x8x64xbf16> to vector<64x8x64xf32>
    %cst = arith.constant dense<0.000000e+00> : vector<64x64xf32>
    %3 = vector.multi_reduction <add>, %2, %cst [1] : vector<64x8x64xf32> to vector<64x64xf32>
    %4 = arith.mulf %2, %2 : vector<64x8x64xf32>
    %cst_3 = arith.constant dense<0.000000e+00> : vector<64x64xf32>
    %5 = vector.multi_reduction <add>, %4, %cst_3 [1] : vector<64x8x64xf32> to vector<64x64xf32>
    %c0_4 = arith.constant 0 : index
    %c0_5 = arith.constant 0 : index
    %6 = vector.load %arg5[%c0_4, %c0_5] : memref<64x16xf32, #tpu.memory_space<vmem>>, vector<64x16xf32>
    %c0_6 = arith.constant 0 : index
    %c0_7 = arith.constant 0 : index
    %7 = vector.load %arg6[%c0_6, %c0_7] : memref<16x64xf32, #tpu.memory_space<vmem>>, vector<16x64xf32>
    %cst_8 = arith.constant dense<0.000000e+00> : vector<64x16xf32>
    %8 = tpu.matmul %3, %6, %cst_8 {dimension_numbers = #tpu.dot_dimension_numbers<[1], [0], [0], [1], [0, 0, 1, 1], [], []>} : vector<64x64xf32>, vector<64x16xf32>, vector<64x16xf32> -> vector<64x16xf32>
    %cst_9 = arith.constant 3.200000e+01 : f32
    %9 = vector.broadcast %cst_9 : f32 to vector<64x16xf32>
    %10 = arith.divf %8, %9 : vector<64x16xf32>
    %cst_10 = arith.constant dense<0.000000e+00> : vector<64x16xf32>
    %11 = tpu.matmul %5, %6, %cst_10 {dimension_numbers = #tpu.dot_dimension_numbers<[1], [0], [0], [1], [0, 0, 1, 1], [], []>} : vector<64x64xf32>, vector<64x16xf32>, vector<64x16xf32> -> vector<64x16xf32>
    %cst_11 = arith.constant 3.200000e+01 : f32
    %12 = vector.broadcast %cst_11 : f32 to vector<64x16xf32>
    %13 = arith.divf %11, %12 : vector<64x16xf32>
    %14 = arith.mulf %10, %10 : vector<64x16xf32>
    %15 = arith.subf %13, %14 : vector<64x16xf32>
    %cst_12 = arith.constant 0.000000e+00 : f32
    %16 = vector.broadcast %cst_12 : f32 to vector<64x16xf32>
    %17 = arith.maximumf %15, %16 : vector<64x16xf32>
    %cst_13 = arith.constant dense<0.000000e+00> : vector<64x64xf32>
    %18 = tpu.matmul %10, %7, %cst_13 {dimension_numbers = #tpu.dot_dimension_numbers<[1], [0], [0], [1], [0, 0, 1, 1], [], []>} : vector<64x16xf32>, vector<16x64xf32>, vector<64x64xf32> -> vector<64x64xf32>
    %cst_14 = arith.constant 9.99999974E-6 : f32
    %19 = vector.broadcast %cst_14 : f32 to vector<64x16xf32>
    %20 = arith.addf %17, %19 : vector<64x16xf32>
    %21 = math.rsqrt %20 : vector<64x16xf32>
    %cst_15 = arith.constant dense<0.000000e+00> : vector<64x64xf32>
    %22 = tpu.matmul %21, %7, %cst_15 {dimension_numbers = #tpu.dot_dimension_numbers<[1], [0], [0], [1], [0, 0, 1, 1], [], []>} : vector<64x16xf32>, vector<16x64xf32>, vector<64x64xf32> -> vector<64x64xf32>
    %23 = vector.shape_cast %18 : vector<64x64xf32> to vector<64x1x64xf32>
    %24 = vector.broadcast %23 : vector<64x1x64xf32> to vector<64x8x64xf32>
    %25 = arith.subf %2, %24 : vector<64x8x64xf32>
    %26 = vector.shape_cast %22 : vector<64x64xf32> to vector<64x1x64xf32>
    %27 = vector.broadcast %26 : vector<64x1x64xf32> to vector<64x8x64xf32>
    %28 = arith.mulf %25, %27 : vector<64x8x64xf32>
    %29 = arith.truncf %28 : vector<64x8x64xf32> to vector<64x8x64xbf16>
    %30 = vector.shape_cast %29 : vector<64x8x64xbf16> to vector<512x64xbf16>
    %c0_16 = arith.constant 0 : index
    %c0_17 = arith.constant 0 : index
    %31 = vector.load %arg7[%c0_16, %c0_17] : memref<64x256xbf16, #tpu.memory_space<vmem>>, vector<64x256xbf16>
    %cst_18 = arith.constant dense<0.000000e+00> : vector<512x256xf32>
    %32 = tpu.matmul %30, %31, %cst_18 {dimension_numbers = #tpu.dot_dimension_numbers<[1], [0], [0], [1], [0, 0, 1, 1], [], []>} : vector<512x64xbf16>, vector<64x256xbf16>, vector<512x256xf32> -> vector<512x256xf32>
    %33 = vector.shape_cast %32 : vector<512x256xf32> to vector<64x8x256xf32>
    %c0_19 = arith.constant 0 : index
    %c0_20 = arith.constant 0 : index
    %c0_21 = arith.constant 0 : index
    %34 = vector.load %arg3[%c0_19, %c0_20, %c0_21] : memref<1x8x256xf32, #tpu.memory_space<vmem>>, vector<1x8x256xf32>
    %35 = vector.shape_cast %34 : vector<1x8x256xf32> to vector<8x256xf32>
    %36 = vector.shape_cast %35 : vector<8x256xf32> to vector<1x8x256xf32>
    %37 = vector.broadcast %36 : vector<1x8x256xf32> to vector<64x8x256xf32>
    %38 = arith.addf %33, %37 : vector<64x8x256xf32>
    %c0_22 = arith.constant 0 : index
    %c0_23 = arith.constant 0 : index
    %39 = vector.load %arg8[%c0_22, %c0_23] : memref<64x16xbf16, #tpu.memory_space<vmem>>, vector<64x16xbf16>
    %cst_24 = arith.constant dense<0.000000e+00> : vector<512x16xf32>
    %40 = tpu.matmul %30, %39, %cst_24 {dimension_numbers = #tpu.dot_dimension_numbers<[1], [0], [0], [1], [0, 0, 1, 1], [], []>} : vector<512x64xbf16>, vector<64x16xbf16>, vector<512x16xf32> -> vector<512x16xf32>
    %41 = vector.shape_cast %40 : vector<512x16xf32> to vector<64x8x16xf32>
    %c0_25 = arith.constant 0 : index
    %c0_26 = arith.constant 0 : index
    %c0_27 = arith.constant 0 : index
    %42 = vector.load %arg4[%c0_25, %c0_26, %c0_27] : memref<1x8x16xf32, #tpu.memory_space<vmem>>, vector<1x8x16xf32>
    %43 = vector.shape_cast %42 : vector<1x8x16xf32> to vector<8x16xf32>
    %44 = vector.shape_cast %43 : vector<8x16xf32> to vector<1x8x16xf32>
    %45 = vector.broadcast %44 : vector<1x8x16xf32> to vector<64x8x16xf32>
    %46 = arith.addf %41, %45 : vector<64x8x16xf32>
    %cst_28 = arith.constant dense<0xFF800000> : vector<64x16xf32>
    %47 = vector.multi_reduction <maximumf>, %46, %cst_28 [1] : vector<64x8x16xf32> to vector<64x16xf32>
    %48 = vector.shape_cast %47 : vector<64x16xf32> to vector<64x1x16xf32>
    %49 = vector.broadcast %48 : vector<64x1x16xf32> to vector<64x8x16xf32>
    %50 = arith.subf %46, %49 : vector<64x8x16xf32>
    %51 = math.exp %50 : vector<64x8x16xf32>
    %cst_29 = arith.constant dense<0.000000e+00> : vector<64x16xf32>
    %52 = vector.multi_reduction <add>, %51, %cst_29 [1] : vector<64x8x16xf32> to vector<64x16xf32>
    %53 = vector.shape_cast %52 : vector<64x16xf32> to vector<64x1x16xf32>
    %54 = vector.broadcast %53 : vector<64x1x16xf32> to vector<64x8x16xf32>
    %55 = arith.divf %51, %54 : vector<64x8x16xf32>
    %56 = arith.truncf %55 : vector<64x8x16xf32> to vector<64x8x16xbf16>
    %57 = vector.shape_cast %56 : vector<64x8x16xbf16> to vector<512x16xbf16>
    %c0_30 = arith.constant 0 : index
    %c0_31 = arith.constant 0 : index
    %58 = vector.load %arg9[%c0_30, %c0_31] : memref<16x256xbf16, #tpu.memory_space<vmem>>, vector<16x256xbf16>
    %cst_32 = arith.constant dense<0.000000e+00> : vector<512x256xf32>
    %59 = tpu.matmul %57, %58, %cst_32 {dimension_numbers = #tpu.dot_dimension_numbers<[1], [0], [0], [1], [0, 0, 1, 1], [], []>} : vector<512x16xbf16>, vector<16x256xbf16>, vector<512x256xf32> -> vector<512x256xf32>
    %60 = vector.shape_cast %59 : vector<512x256xf32> to vector<64x8x256xf32>
    %61 = arith.mulf %60, %38 : vector<64x8x256xf32>
    %cst_33 = arith.constant dense<0.000000e+00> : vector<64x256xf32>
    %62 = vector.multi_reduction <add>, %61, %cst_33 [1] : vector<64x8x256xf32> to vector<64x256xf32>
    %63 = arith.truncf %62 : vector<64x256xf32> to vector<64x256xbf16>
    %c0_34 = arith.constant 0 : index
    %c0_35 = arith.constant 0 : index
    %64 = vector.load %arg10[%c0_34, %c0_35] : memref<256x128xbf16, #tpu.memory_space<vmem>>, vector<256x128xbf16>
    %cst_36 = arith.constant dense<0.000000e+00> : vector<64x128xf32>
    %65 = tpu.matmul %63, %64, %cst_36 {dimension_numbers = #tpu.dot_dimension_numbers<[1], [0], [0], [1], [0, 0, 1, 1], [], []>} : vector<64x256xbf16>, vector<256x128xbf16>, vector<64x128xf32> -> vector<64x128xf32>
    %c0_37 = arith.constant 0 : index
    %c0_38 = arith.constant 0 : index
    %66 = vector.load %arg11[%c0_37, %c0_38] : memref<1x128xf32, #tpu.memory_space<vmem>>, vector<1x128xf32>
    %67 = vector.shape_cast %66 : vector<1x128xf32> to vector<128xf32>
    %68 = vector.shape_cast %67 : vector<128xf32> to vector<1x128xf32>
    %69 = vector.broadcast %68 : vector<1x128xf32> to vector<64x128xf32>
    %70 = arith.addf %65, %69 : vector<64x128xf32>
    %cst_39 = arith.constant 0.000000e+00 : f32
    %71 = vector.broadcast %cst_39 : f32 to vector<64x128xf32>
    %72 = arith.maximumf %70, %71 : vector<64x128xf32>
    %c0_40 = arith.constant 0 : index
    %c0_41 = arith.constant 0 : index
    %73 = vector.load %arg12[%c0_40, %c0_41] : memref<128x16xf32, #tpu.memory_space<vmem>>, vector<128x16xf32>
    %c0_42 = arith.constant 0 : index
    %c0_43 = arith.constant 0 : index
    %74 = vector.load %arg13[%c0_42, %c0_43] : memref<16x128xf32, #tpu.memory_space<vmem>>, vector<16x128xf32>
    %cst_44 = arith.constant dense<0.000000e+00> : vector<64x16xf32>
    %75 = tpu.matmul %72, %73, %cst_44 {dimension_numbers = #tpu.dot_dimension_numbers<[1], [0], [0], [1], [0, 0, 1, 1], [], []>} : vector<64x128xf32>, vector<128x16xf32>, vector<64x16xf32> -> vector<64x16xf32>
    %cst_45 = arith.constant 8.000000e+00 : f32
    %76 = vector.broadcast %cst_45 : f32 to vector<64x16xf32>
    %77 = arith.divf %75, %76 : vector<64x16xf32>
    %78 = arith.mulf %72, %72 : vector<64x128xf32>
    %cst_46 = arith.constant dense<0.000000e+00> : vector<64x16xf32>
    %79 = tpu.matmul %78, %73, %cst_46 {dimension_numbers = #tpu.dot_dimension_numbers<[1], [0], [0], [1], [0, 0, 1, 1], [], []>} : vector<64x128xf32>, vector<128x16xf32>, vector<64x16xf32> -> vector<64x16xf32>
    %cst_47 = arith.constant 8.000000e+00 : f32
    %80 = vector.broadcast %cst_47 : f32 to vector<64x16xf32>
    %81 = arith.divf %79, %80 : vector<64x16xf32>
    %82 = arith.mulf %77, %77 : vector<64x16xf32>
    %83 = arith.subf %81, %82 : vector<64x16xf32>
    %cst_48 = arith.constant 0.000000e+00 : f32
    %84 = vector.broadcast %cst_48 : f32 to vector<64x16xf32>
    %85 = arith.maximumf %83, %84 : vector<64x16xf32>
    %cst_49 = arith.constant dense<0.000000e+00> : vector<64x128xf32>
    %86 = tpu.matmul %77, %74, %cst_49 {dimension_numbers = #tpu.dot_dimension_numbers<[1], [0], [0], [1], [0, 0, 1, 1], [], []>} : vector<64x16xf32>, vector<16x128xf32>, vector<64x128xf32> -> vector<64x128xf32>
    %cst_50 = arith.constant 9.99999974E-6 : f32
    %87 = vector.broadcast %cst_50 : f32 to vector<64x16xf32>
    %88 = arith.addf %85, %87 : vector<64x16xf32>
    %89 = math.rsqrt %88 : vector<64x16xf32>
    %cst_51 = arith.constant dense<0.000000e+00> : vector<64x128xf32>
    %90 = tpu.matmul %89, %74, %cst_51 {dimension_numbers = #tpu.dot_dimension_numbers<[1], [0], [0], [1], [0, 0, 1, 1], [], []>} : vector<64x16xf32>, vector<16x128xf32>, vector<64x128xf32> -> vector<64x128xf32>
    %91 = arith.subf %72, %86 : vector<64x128xf32>
    %92 = arith.mulf %91, %90 : vector<64x128xf32>
    %c0_i32 = arith.constant 0 : i32
    %93 = arith.cmpi eq, %arg1, %c0_i32 : i32
    %94 = arith.extui %93 : i1 to i32
    %c0_i32_52 = arith.constant 0 : i32
    %95 = arith.cmpi ne, %94, %c0_i32_52 : i32
    scf.if %95 {
      %cst_60 = arith.constant 0.000000e+00 : f32
      %102 = vector.broadcast %cst_60 : f32 to vector<1x1x128xf32>
      %c0_61 = arith.constant 0 : index
      %c0_62 = arith.constant 0 : index
      %c0_63 = arith.constant 0 : index
      %103 = vector.load %arg14[%c0_61, %c0_62, %c0_63] : memref<1x1x128xf32, #tpu.memory_space<vmem>>, vector<1x1x128xf32>
      tpu.vector_store %arg14[%c0_61, %c0_62, %c0_63], %102 {strides = array<i32>} : memref<1x1x128xf32, #tpu.memory_space<vmem>>, vector<1x1x128xf32>,
    } else {
    }
    %c0_53 = arith.constant 0 : index
    %c0_54 = arith.constant 0 : index
    %c0_55 = arith.constant 0 : index
    %96 = vector.load %arg14[%c0_53, %c0_54, %c0_55] : memref<1x1x128xf32, #tpu.memory_space<vmem>>, vector<1x1x128xf32>
    %cst_56 = arith.constant dense<0.000000e+00> : vector<128xf32>
    %97 = vector.multi_reduction <add>, %92, %cst_56 [0] : vector<64x128xf32> to vector<128xf32>
    %98 = vector.shape_cast %97 : vector<128xf32> to vector<1x128xf32>
    %99 = vector.shape_cast %98 : vector<1x128xf32> to vector<1x1x128xf32>
    %100 = arith.addf %96, %99 : vector<1x1x128xf32>
    %c0_57 = arith.constant 0 : index
    %c0_58 = arith.constant 0 : index
    %c0_59 = arith.constant 0 : index
    %101 = vector.load %arg14[%c0_57, %c0_58, %c0_59] : memref<1x1x128xf32, #tpu.memory_space<vmem>>, vector<1x1x128xf32>
    tpu.vector_store %arg14[%c0_57, %c0_58, %c0_59], %100 {strides = array<i32>} : memref<1x1x128xf32, #tpu.memory_space<vmem>>, vector<1x1x128xf32>,
    return
  }
  func.func @transform_0(%arg0: i32, %arg1: i32) -> (i32, i32, i32, i32) {
    %c0_i32 = arith.constant 0 : i32
    %c0_i32_0 = arith.constant 0 : i32
    %c0_i32_1 = arith.constant 0 : i32
    return %arg0, %arg1, %c0_i32, %c0_i32_0 : i32, i32, i32, i32
  }
  func.func @transform_1(%arg0: i32, %arg1: i32) -> (i32, i32, i32) {
    %c0_i32 = arith.constant 0 : i32
    %c0_i32_0 = arith.constant 0 : i32
    %c0_i32_1 = arith.constant 0 : i32
    return %arg0, %c0_i32, %c0_i32_0 : i32, i32, i32
  }
  func.func @transform_2(%arg0: i32, %arg1: i32) -> (i32, i32, i32) {
    %c0_i32 = arith.constant 0 : i32
    %c0_i32_0 = arith.constant 0 : i32
    %c0_i32_1 = arith.constant 0 : i32
    return %arg0, %c0_i32, %c0_i32_0 : i32, i32, i32
  }
  func.func @transform_3(%arg0: i32, %arg1: i32) -> (i32, i32) {
    %c0_i32 = arith.constant 0 : i32
    %c0_i32_0 = arith.constant 0 : i32
    %c0_i32_1 = arith.constant 0 : i32
    return %c0_i32, %c0_i32_0 : i32, i32
  }
  func.func @transform_4(%arg0: i32, %arg1: i32) -> (i32, i32) {
    %c0_i32 = arith.constant 0 : i32
    %c0_i32_0 = arith.constant 0 : i32
    %c0_i32_1 = arith.constant 0 : i32
    return %c0_i32, %c0_i32_0 : i32, i32
  }
  func.func @transform_5(%arg0: i32, %arg1: i32) -> (i32, i32) {
    %c0_i32 = arith.constant 0 : i32
    %c0_i32_0 = arith.constant 0 : i32
    %c0_i32_1 = arith.constant 0 : i32
    return %c0_i32, %c0_i32_0 : i32, i32
  }
  func.func @transform_6(%arg0: i32, %arg1: i32) -> (i32, i32) {
    %c0_i32 = arith.constant 0 : i32
    %c0_i32_0 = arith.constant 0 : i32
    %c0_i32_1 = arith.constant 0 : i32
    return %c0_i32, %c0_i32_0 : i32, i32
  }
  func.func @transform_7(%arg0: i32, %arg1: i32) -> (i32, i32) {
    %c0_i32 = arith.constant 0 : i32
    %c0_i32_0 = arith.constant 0 : i32
    %c0_i32_1 = arith.constant 0 : i32
    return %c0_i32, %c0_i32_0 : i32, i32
  }
  func.func @transform_8(%arg0: i32, %arg1: i32) -> (i32, i32) {
    %c0_i32 = arith.constant 0 : i32
    %c0_i32_0 = arith.constant 0 : i32
    %c0_i32_1 = arith.constant 0 : i32
    return %c0_i32, %c0_i32_0 : i32, i32
  }
  func.func @transform_9(%arg0: i32, %arg1: i32) -> (i32, i32) {
    %c0_i32 = arith.constant 0 : i32
    %c0_i32_0 = arith.constant 0 : i32
    %c0_i32_1 = arith.constant 0 : i32
    return %c0_i32, %c0_i32_0 : i32, i32
  }
  func.func @transform_10(%arg0: i32, %arg1: i32) -> (i32, i32) {
    %c0_i32 = arith.constant 0 : i32
    %c0_i32_0 = arith.constant 0 : i32
    %c0_i32_1 = arith.constant 0 : i32
    return %c0_i32, %c0_i32_0 : i32, i32
  }
  func.func @transform_11(%arg0: i32, %arg1: i32) -> (i32, i32) {
    %c0_i32 = arith.constant 0 : i32
    %c0_i32_0 = arith.constant 0 : i32
    %c0_i32_1 = arith.constant 0 : i32
    return %c0_i32, %c0_i32_0 : i32, i32
  }
  func.func @transform_12(%arg0: i32, %arg1: i32) -> (i32, i32, i32) {
    %c0_i32 = arith.constant 0 : i32
    %c0_i32_0 = arith.constant 0 : i32
    %c0_i32_1 = arith.constant 0 : i32
    return %arg0, %c0_i32, %c0_i32_0 : i32, i32, i32
  }
}

</mosaic_0001>

<bundles_post_ra>
// kernel: tile.9
= control target key start
LH: loop header
LB: loop body
LE: loop exit
PB: predicated region body
PF: predicated region fallthrough
CT: control target
= control target key end

     0   :  { %vm65_vm0 = vcmask 1043458   ;;  %s105_s6 = smov 3  ;;  %vm70_vm1 = vcmask 1045508   ;;  %vm75_vm2 = vcmask 1047558   ;;  %s108_s9 = smov 12  ;;  %vm4_vm3 = vcmask 1047556   ;;  %s1498_s0 = inlined_call_operand.vmem [shape: f32[2,8,16,16], index: 0, kind: input, shape index: {}]   ;;  %s1499_s1 = inlined_call_operand.vmem [shape: f32[2,8,256], index: 1, kind: output, shape index: {}]  }
   0x1   :  { %v726_v0 = vld [vmem:[%s1498_s0 + $0x87] ss:$16 sm:%s105_s6]   ;;  %s113_s10 = smov 48  ;;  %s118_s15 = smov 192  ;;  %vm6_vm4 = vcmask 130048   ;;  %vm79_vm5 = vcmask 1048448  }
   0x2   :  { %v727_v1 = vld [vmem:[%s1498_s0 + $0x87] ss:$16 sm:%s108_s9]   ;;  %s60_s16 = smov 3  ;;  %s63_s21 = smov 12  ;;  %vm170_vm6 = vcmask 917248   ;;  %vm261_vm7 = vcmask 786048  }
   0x3   :  { %v728_v2 = vld [vmem:[%s1498_s0 + $0x87] ss:$16 sm:%s113_s10]   ;;  %v111_v3 = vsel %vm65_vm0, %v727_v1, %v726_v0  ;;  %s68_s22 = smov 48  ;;  %s73_s27 = smov 192  ;;  %vm352_vm8 = vcmask 654848   ;;  %vm443_vm9 = vcmask 523648  }
   0x4   :  { %v729_v4 = vld [vmem:[%s1498_s0 + $0x87] ss:$16 sm:%s118_s15]   ;;  %v116_v6 = vsel %vm70_vm1, %v728_v2, %v111_v3  ;;  %s128_s28 = smov 3  ;;  %s131_s4 = smov 12  ;;  %vm534_vm10 = vcmask 392448   ;;  %vm625_vm11 = vcmask 261248  }
   0x5   :  { %v717_v5 = vld [vmem:[%s1498_s0 + $0x7] ss:$16 sm:%s60_s16]   ;;  %v121_v9 = vsel %vm75_vm2, %v729_v4, %v116_v6  ;;  %v731_v12 = vld [vmem:[%s1498_s0 + $0x8f] ss:$16 sm:%s128_s28]   ;;  %s136_s5 = smov 48  ;;  %s857_s6 = smov 112  }
   0x6   :  { %v718_v7 = vld [vmem:[%s1498_s0 + $0x7] ss:$16 sm:%s63_s21]   ;;  %122 = vrot.lane.b32.xlu1 %v121_v9, %s857_s6  ;;  %s141_s9 = smov 192  ;;  %s82_s10 = smov 3 }
   0x7   :  { %v719_v8 = vld [vmem:[%s1498_s0 + $0x7] ss:$16 sm:%s68_s22]   ;;  %v66_v10 = vsel %vm65_vm0, %v718_v7, %v717_v5  ;;  %v732_v14 = vld [vmem:[%s1498_s0 + $0x8f] ss:$16 sm:%s131_s4]   ;;  %s85_s15 = smov 12  ;;  %s90_s16 = smov 48 }
   0x8   :  { %v720_v11 = vld [vmem:[%s1498_s0 + $0x7] ss:$16 sm:%s73_s27]   ;;  %v71_v13 = vsel %vm70_vm1, %v719_v8, %v66_v10  ;;  %v134_v16 = vsel %vm65_vm0, %v732_v14, %v731_v12  ;;  %v733_v17 = vld [vmem:[%s1498_s0 + $0x8f] ss:$16 sm:%s136_s5]   ;;  %s95_s19 = smov 192  ;;  %s173_s24 = smov 3 }
   0x9   :  { %v76_v15 = vsel %vm75_vm2, %v720_v11, %v71_v13  ;;  %v734_v18 = vld [vmem:[%s1498_s0 + $0x8f] ss:$16 sm:%s141_s9]   ;;  %v139_v19 = vsel %vm70_vm1, %v733_v17, %v134_v16  ;;  %s176_s25 = smov 12  ;;  %s181_s28 = smov 48  ;;  %v740_v27 = vld [vmem:[%s1498_s0 + $0xe] ss:$16 sm:%s173_s24]  }
   0xa   :  { %77 = vrot.lane.b32.xlu0 %v76_v15, %s857_s6  ;;  %v721_v20 = vld [vmem:[%s1498_s0 + $0xf] ss:$16 sm:%s82_s10]   ;;  %v144_v21 = vsel %vm75_vm2, %v734_v18, %v139_v19  ;;  %s186_s29 = smov 192  ;;  %s151_s5 = smov 3 }
   0xb   :  { %v722_v22 = vld [vmem:[%s1498_s0 + $0xf] ss:$16 sm:%s85_s15]   ;;  %145 = vrot.lane.b32.xlu1 %v144_v21, %s857_s6  ;;  %s154_s7 = smov 12  ;;  %s159_s12 = smov 48 }
   0xc   :  { %v723_v23 = vld [vmem:[%s1498_s0 + $0xf] ss:$16 sm:%s90_s16]   ;;  %v88_v24 = vsel %vm65_vm0, %v722_v22, %v721_v20  ;;  %v741_v28 = vld [vmem:[%s1498_s0 + $0xe] ss:$16 sm:%s176_s25]   ;;  %s164_s13 = smov 192  ;;  %s219_s15 = smov 3 }
   0xd   :  { %v724_v25 = vld [vmem:[%s1498_s0 + $0xf] ss:$16 sm:%s95_s19]   ;;  %v93_v26 = vsel %vm70_vm1, %v723_v23, %v88_v24  ;;  %v179_v30 = vsel %vm65_vm0, %v741_v28, %v740_v27  ;;  %v742_v31 = vld [vmem:[%s1498_s0 + $0xe] ss:$16 sm:%s181_s28]   ;;  %s222_s16 = smov 12  ;;  %s227_s21 = smov 48 }
   0xe   :  { %v98_v29 = vsel %vm75_vm2, %v724_v25, %v93_v26  ;;  %v743_v32 = vld [vmem:[%s1498_s0 + $0xe] ss:$16 sm:%s186_s29]   ;;  %v184_v33 = vsel %vm70_vm1, %v742_v31, %v179_v30  ;;  %v736_v34 = vld [vmem:[%s1498_s0 + $0x6] ss:$16 sm:%s151_s5]   ;;  %s232_s22 = smov 192  ;;  %s858_s23 = smov 96  }
   0xf   :  { %99 = vrot.lane.b32.xlu0 %v98_v29, %s857_s6  ;;  %v189_v35 = vsel %vm75_vm2, %v743_v32, %v184_v33  ;;  %v737_v36 = vld [vmem:[%s1498_s0 + $0x6] ss:$16 sm:%s154_s7]   ;;  %s196_s26 = smov 3  ;;  %s199_s2 = smov 12 }
  0x10   :  { %v738_v37 = vld [vmem:[%s1498_s0 + $0x6] ss:$16 sm:%s159_s12]   ;;  %190 = vrot.lane.b32.xlu1 %v189_v35, %s858_s23  ;;  %v157_v38 = vsel %vm65_vm0, %v737_v36, %v736_v34  ;;  %s204_s3 = smov 48  ;;  %s209_s9 = smov 192 }
  0x11   :  { %v739_v39 = vld [vmem:[%s1498_s0 + $0x6] ss:$16 sm:%s164_s13]   ;;  %v162_v40 = vsel %vm70_vm1, %v738_v37, %v157_v38  ;;  %v750_v41 = vld [vmem:[%s1498_s0 + $0x8e] ss:$16 sm:%s219_s15]   ;;  %s264_s12 = smov 3  ;;  %s267_s13 = smov 12 }
  0x12   :  { %v751_v42 = vld [vmem:[%s1498_s0 + $0x8e] ss:$16 sm:%s222_s16]   ;;  %v167_v43 = vsel %vm75_vm2, %v739_v39, %v162_v40  ;;  %v745_v48 = vld [vmem:[%s1498_s0 + $0x86] ss:$16 sm:%s196_s26]   ;;  %s272_s17 = smov 48  ;;  %s277_s18 = smov 192 }
  0x13   :  { %v225_v44 = vsel %vm65_vm0, %v751_v42, %v750_v41  ;;  %v752_v45 = vld [vmem:[%s1498_s0 + $0x8e] ss:$16 sm:%s227_s21]   ;;  %168 = vrot.lane.b32.xlu0 %v167_v43, %s858_s23  ;;  %s242_s21 = smov 3  ;;  %s245_s27 = smov 12 }
  0x14   :  { %v753_v46 = vld [vmem:[%s1498_s0 + $0x8e] ss:$16 sm:%s232_s22]   ;;  %v230_v47 = vsel %vm70_vm1, %v752_v45, %v225_v44  ;;  %v746_v50 = vld [vmem:[%s1498_s0 + $0x86] ss:$16 sm:%s199_s2]   ;;  %s250_s28 = smov 48  ;;  %s255_s4 = smov 192 }
  0x15   :  { %v235_v49 = vsel %vm75_vm2, %v753_v46, %v230_v47  ;;  %v747_v51 = vld [vmem:[%s1498_s0 + $0x86] ss:$16 sm:%s204_s3]   ;;  %v202_v52 = vsel %vm65_vm0, %v746_v50, %v745_v48  ;;  %v759_v55 = vld [vmem:[%s1498_s0 + $0xd] ss:$16 sm:%s264_s12]   ;;  %s310_s7 = smov 3  ;;  %s313_s8 = smov 12 }
  0x16   :  { %236 = vrot.lane.b32.xlu1 %v235_v49, %s858_s23  ;;  %v748_v53 = vld [vmem:[%s1498_s0 + $0x86] ss:$16 sm:%s209_s9]   ;;  %v207_v54 = vsel %vm70_vm1, %v747_v51, %v202_v52  ;;  %s323_s6 = smov 192  ;;  %s859_s14 = smov 80  }
  0x17   :  { %v760_v56 = vld [vmem:[%s1498_s0 + $0xd] ss:$16 sm:%s267_s13]   ;;  %v212_v57 = vsel %vm75_vm2, %v748_v53, %v207_v54  ;;  %v755_v62 = vld [vmem:[%s1498_s0 + $0x5] ss:$16 sm:%s242_s21]   ;;  %s318_s13 = smov 48  ;;  %s290_s22 = smov 12 }
  0x18   :  { %v270_v58 = vsel %vm65_vm0, %v760_v56, %v759_v55  ;;  %v761_v59 = vld [vmem:[%s1498_s0 + $0xd] ss:$16 sm:%s272_s17]   ;;  %213 = vrot.lane.b32.xlu0 %v212_v57, %s858_s23  ;;  %s287_s17 = smov 3  ;;  %s295_s24 = smov 48 }
  0x19   :  { %v762_v60 = vld [vmem:[%s1498_s0 + $0xd] ss:$16 sm:%s277_s18]   ;;  %v275_v61 = vsel %vm70_vm1, %v761_v59, %v270_v58  ;;  %v756_v0 = vld [vmem:[%s1498_s0 + $0x5] ss:$16 sm:%s245_s27]   ;;  %s300_s29 = smov 192  ;;  %s355_s3 = smov 3 }
  0x1a   :  { %v280_v63 = vsel %vm75_vm2, %v762_v60, %v275_v61  ;;  %v757_v1 = vld [vmem:[%s1498_s0 + $0x5] ss:$16 sm:%s250_s28]   ;;  %v248_v2 = vsel %vm65_vm0, %v756_v0, %v755_v62  ;;  %v769_v5 = vld [vmem:[%s1498_s0 + $0x8d] ss:$16 sm:%s310_s7]   ;;  %s363_s9 = smov 48  ;;  %s368_s10 = smov 192 }
  0x1b   :  { %281 = vrot.lane.b32.xlu1 %v280_v63, %s859_s14  ;;  %v758_v3 = vld [vmem:[%s1498_s0 + $0x5] ss:$16 sm:%s255_s4]   ;;  %v253_v4 = vsel %vm70_vm1, %v757_v1, %v248_v2  ;;  %s358_s4 = smov 12  ;;  %s336_s18 = smov 12 }
  0x1c   :  { %v770_v6 = vld [vmem:[%s1498_s0 + $0x8d] ss:$16 sm:%s313_s8]   ;;  %v258_v7 = vsel %vm75_vm2, %v758_v3, %v253_v4  ;;  %v764_v12 = vld [vmem:[%s1498_s0 + $0x85] ss:$16 sm:%s287_s17]   ;;  %s341_s19 = smov 48  ;;  %s346_s25 = smov 192 }
  0x1d   :  { %v316_v8 = vsel %vm65_vm0, %v770_v6, %v769_v5  ;;  %v771_v9 = vld [vmem:[%s1498_s0 + $0x8d] ss:$16 sm:%s318_s13]   ;;  %259 = vrot.lane.b32.xlu0 %v258_v7, %s859_s14  ;;  %s333_s13 = smov 3  ;;  %s401_s27 = smov 3 }
  0x1e   :  { %v772_v10 = vld [vmem:[%s1498_s0 + $0x8d] ss:$16 sm:%s323_s6]   ;;  %v321_v11 = vsel %vm70_vm1, %v771_v9, %v316_v8  ;;  %v765_v14 = vld [vmem:[%s1498_s0 + $0x85] ss:$16 sm:%s290_s22]   ;;  %s404_s28 = smov 12  ;;  %s414_s23 = smov 192 }
  0x1f   :  { %v326_v13 = vsel %vm75_vm2, %v772_v10, %v321_v11  ;;  %v766_v15 = vld [vmem:[%s1498_s0 + $0x85] ss:$16 sm:%s295_s24]   ;;  %v293_v16 = vsel %vm65_vm0, %v765_v14, %v764_v12  ;;  %v778_v19 = vld [vmem:[%s1498_s0 + $0xc] ss:$16 sm:%s355_s3]   ;;  %s860_s5 = smov 64   ;;  %s381_s6 = smov 12 }
  0x20   :  { %327 = vrot.lane.b32.xlu1 %v326_v13, %s859_s14  ;;  %v767_v17 = vld [vmem:[%s1498_s0 + $0x85] ss:$16 sm:%s300_s29]   ;;  %v298_v18 = vsel %vm70_vm1, %v766_v15, %v293_v16  ;;  %s386_s15 = smov 48  ;;  %s391_s20 = smov 192 }
  0x21   :  { %v779_v20 = vld [vmem:[%s1498_s0 + $0xc] ss:$16 sm:%s358_s4]   ;;  %v303_v21 = vsel %vm75_vm2, %v767_v17, %v298_v18  ;;  %v774_v26 = vld [vmem:[%s1498_s0 + $0x4] ss:$16 sm:%s333_s13]   ;;  %s409_s4 = smov 48  ;;  %s446_s24 = smov 3 }
  0x22   :  { %v361_v22 = vsel %vm65_vm0, %v779_v20, %v778_v19  ;;  %v780_v23 = vld [vmem:[%s1498_s0 + $0xc] ss:$16 sm:%s363_s9]   ;;  %304 = vrot.lane.b32.xlu0 %v303_v21, %s859_s14  ;;  %s378_s9 = smov 3  ;;  %s454_s29 = smov 48 }
  0x23   :  { %v781_v24 = vld [vmem:[%s1498_s0 + $0xc] ss:$16 sm:%s368_s10]   ;;  %v366_v25 = vsel %vm70_vm1, %v780_v23, %v361_v22  ;;  %v775_v28 = vld [vmem:[%s1498_s0 + $0x4] ss:$16 sm:%s336_s18]   ;;  %s459_s30 = smov 192  ;;  %s427_s10 = smov 12 }
  0x24   :  { %v371_v27 = vsel %vm75_vm2, %v781_v24, %v366_v25  ;;  %v776_v29 = vld [vmem:[%s1498_s0 + $0x4] ss:$16 sm:%s341_s19]   ;;  %v339_v30 = vsel %vm65_vm0, %v775_v28, %v774_v26  ;;  %v788_v33 = vld [vmem:[%s1498_s0 + $0x8c] ss:$16 sm:%s401_s27]   ;;  %s432_s11 = smov 48  ;;  %s437_s16 = smov 192 }
  0x25   :  { %372 = vrot.lane.b32.xlu1 %v371_v27, %s860_s5  ;;  %v777_v31 = vld [vmem:[%s1498_s0 + $0x4] ss:$16 sm:%s346_s25]   ;;  %v344_v32 = vsel %vm70_vm1, %v776_v29, %v339_v30  ;;  %s449_s25 = smov 12  ;;  %s492_s18 = smov 3 }
  0x26   :  { %v789_v34 = vld [vmem:[%s1498_s0 + $0x8c] ss:$16 sm:%s404_s28]   ;;  %v349_v35 = vsel %vm75_vm2, %v777_v31, %v344_v32  ;;  %v783_v40 = vld [vmem:[%s1498_s0 + $0x84] ss:$16 sm:%s378_s9]   ;;  %s495_s19 = smov 12  ;;  %s505_s14 = smov 192 }
  0x27   :  { %v407_v36 = vsel %vm65_vm0, %v789_v34, %v788_v33  ;;  %v790_v37 = vld [vmem:[%s1498_s0 + $0x8c] ss:$16 sm:%s409_s4]   ;;  %350 = vrot.lane.b32.xlu0 %v349_v35, %s860_s5  ;;  %s424_s4 = smov 3  ;;  %s861_s26 = smov 48  }
  0x28   :  { %v791_v38 = vld [vmem:[%s1498_s0 + $0x8c] ss:$16 sm:%s414_s23]   ;;  %v412_v39 = vsel %vm70_vm1, %v790_v37, %v407_v36  ;;  %v784_v42 = vld [vmem:[%s1498_s0 + $0x84] ss:$16 sm:%s381_s6]   ;;  %s472_s23 = smov 12  ;;  %s477_s7 = smov 48 }
  0x29   :  { %v417_v41 = vsel %vm75_vm2, %v791_v38, %v412_v39  ;;  %v785_v43 = vld [vmem:[%s1498_s0 + $0x84] ss:$16 sm:%s386_s15]   ;;  %v384_v44 = vsel %vm65_vm0, %v784_v42, %v783_v40  ;;  %v797_v47 = vld [vmem:[%s1498_s0 + $0xb] ss:$16 sm:%s446_s24]   ;;  %s482_s12 = smov 192  ;;  %s537_s15 = smov 3 }
  0x2a   :  { %418 = vrot.lane.b32.xlu1 %v417_v41, %s860_s5  ;;  %v786_v45 = vld [vmem:[%s1498_s0 + $0x84] ss:$16 sm:%s391_s20]   ;;  %v389_v46 = vsel %vm70_vm1, %v785_v43, %v384_v44  ;;  %s545_s20 = smov 48  ;;  %s550_s21 = smov 192 }
  0x2b   :  { %v798_v48 = vld [vmem:[%s1498_s0 + $0xb] ss:$16 sm:%s449_s25]   ;;  %v394_v49 = vsel %vm75_vm2, %v786_v45, %v389_v46  ;;  %v793_v54 = vld [vmem:[%s1498_s0 + $0x3] ss:$16 sm:%s424_s4]   ;;  %s500_s25 = smov 48  ;;  %s523_s2 = smov 48 }
  0x2c   :  { %v452_v50 = vsel %vm65_vm0, %v798_v48, %v797_v47  ;;  %v799_v51 = vld [vmem:[%s1498_s0 + $0xb] ss:$16 sm:%s454_s29]   ;;  %395 = vrot.lane.b32.xlu0 %v394_v49, %s860_s5  ;;  %s469_s29 = smov 3  ;;  %s528_s8 = smov 192 }
  0x2d   :  { %v800_v52 = vld [vmem:[%s1498_s0 + $0xb] ss:$16 sm:%s459_s30]   ;;  %v457_v53 = vsel %vm70_vm1, %v799_v51, %v452_v50  ;;  %v794_v56 = vld [vmem:[%s1498_s0 + $0x3] ss:$16 sm:%s427_s10]   ;;  %s518_s30 = smov 12  ;;  %s583_s10 = smov 3 }
  0x2e   :  { %v462_v55 = vsel %vm75_vm2, %v800_v52, %v457_v53  ;;  %v795_v57 = vld [vmem:[%s1498_s0 + $0x3] ss:$16 sm:%s432_s11]   ;;  %v430_v58 = vsel %vm65_vm0, %v794_v56, %v793_v54  ;;  %v807_v61 = vld [vmem:[%s1498_s0 + $0x8b] ss:$16 sm:%s492_s18]   ;;  %s586_s11 = smov 12  ;;  %s596_s5 = smov 192 }
  0x2f   :  { %463 = vrot.lane.b32.xlu1 %v462_v55, %s861_s26  ;;  %v796_v59 = vld [vmem:[%s1498_s0 + $0x3] ss:$16 sm:%s437_s16]   ;;  %v435_v60 = vsel %vm70_vm1, %v795_v57, %v430_v58  ;;  %s540_s16 = smov 12  ;;  %s862_s17 = smov 32  }
  0x30   :  { %v808_v62 = vld [vmem:[%s1498_s0 + $0x8b] ss:$16 sm:%s495_s19]   ;;  %v440_v63 = vsel %vm75_vm2, %v796_v59, %v435_v60  ;;  %v802_v4 = vld [vmem:[%s1498_s0 + $0x83] ss:$16 sm:%s469_s29]   ;;  %s568_s27 = smov 48  ;;  %s573_s3 = smov 192 }
  0x31   :  { %v498_v0 = vsel %vm65_vm0, %v808_v62, %v807_v61  ;;  %v809_v1 = vld [vmem:[%s1498_s0 + $0x8b] ss:$16 sm:%s500_s25]   ;;  %441 = vrot.lane.b32.xlu0 %v440_v63, %s861_s26  ;;  %s515_s25 = smov 3  ;;  %s641_s13 = smov 192 }
  0x32   :  { %v810_v2 = vld [vmem:[%s1498_s0 + $0x8b] ss:$16 sm:%s505_s14]   ;;  %v503_v3 = vsel %vm70_vm1, %v809_v1, %v498_v0  ;;  %v803_v6 = vld [vmem:[%s1498_s0 + $0x83] ss:$16 sm:%s472_s23]   ;;  %s563_s14 = smov 12  ;;  %s609_s24 = smov 12 }
  0x33   :  { %v508_v5 = vsel %vm75_vm2, %v810_v2, %v503_v3  ;;  %v804_v7 = vld [vmem:[%s1498_s0 + $0x83] ss:$16 sm:%s477_s7]   ;;  %v475_v8 = vsel %vm65_vm0, %v803_v6, %v802_v4  ;;  %v816_v11 = vld [vmem:[%s1498_s0 + $0xa] ss:$16 sm:%s537_s15]   ;;  %s628_s7 = smov 3  ;;  %s677_s4 = smov 12 }
  0x34   :  { %509 = vrot.lane.b32.xlu1 %v508_v5, %s861_s26  ;;  %v805_v9 = vld [vmem:[%s1498_s0 + $0x83] ss:$16 sm:%s482_s12]   ;;  %v480_v10 = vsel %vm70_vm1, %v804_v7, %v475_v8  ;;  %s636_s12 = smov 48  ;;  %v2_v38 = vld [vmem:[%s1498_s0] ss:$8 sm:$0xf]  }
  0x35   :  { %v817_v12 = vld [vmem:[%s1498_s0 + $0xa] ss:$16 sm:%s540_s16]   ;;  %v485_v13 = vsel %vm75_vm2, %v805_v9, %v480_v10  ;;  %v812_v18 = vld [vmem:[%s1498_s0 + $0x2] ss:$16 sm:%s515_s25]   ;;  %s591_s16 = smov 48  ;;  %s614_s25 = smov 48 }
  0x36   :  { %v543_v14 = vsel %vm65_vm0, %v817_v12, %v816_v11  ;;  %v818_v15 = vld [vmem:[%s1498_s0 + $0xa] ss:$16 sm:%s545_s20]   ;;  %486 = vrot.lane.b32.xlu0 %v485_v13, %s861_s26  ;;  %s560_s20 = smov 3  ;;  %v3_v48 = vld [vmem:[%s1498_s0] ss:$8 sm:$0xf0]  }
  0x37   :  { %v819_v16 = vld [vmem:[%s1498_s0 + $0xa] ss:$16 sm:%s550_s21]   ;;  %v548_v17 = vsel %vm70_vm1, %v818_v15, %v543_v14  ;;  %v813_v20 = vld [vmem:[%s1498_s0 + $0x2] ss:$16 sm:%s518_s30]   ;;  %s619_s30 = smov 192  ;;  %v5_v52 = vsel %vm4_vm3, %v3_v48, %v2_v38  ;;  %s664_s26 = smov 192 }
  0x38   :  { %v553_v19 = vsel %vm75_vm2, %v819_v16, %v548_v17  ;;  %v814_v21 = vld [vmem:[%s1498_s0 + $0x2] ss:$16 sm:%s523_s2]   ;;  %v521_v22 = vsel %vm65_vm0, %v813_v20, %v812_v18  ;;  %v826_v25 = vld [vmem:[%s1498_s0 + $0x8a] ss:$16 sm:%s583_s10]   ;;  %s674_s2 = smov 3 }
  0x39   :  { %554 = vrot.lane.b32.xlu1 %v553_v19, %s862_s17  ;;  %v815_v23 = vld [vmem:[%s1498_s0 + $0x2] ss:$16 sm:%s528_s8]   ;;  %v526_v24 = vsel %vm70_vm1, %v814_v21, %v521_v22  ;;  %s631_s8 = smov 12  ;;  %7 = vst.msk [vmem:[%s1499_s1] ss:$8 sm:$0x3] %vm6_vm4, %v5_v52  }
  0x3a   :  { %v827_v26 = vld [vmem:[%s1498_s0 + $0x8a] ss:$16 sm:%s586_s11]   ;;  %v531_v27 = vsel %vm75_vm2, %v815_v23, %v526_v24  ;;  %v821_v32 = vld [vmem:[%s1498_s0 + $0x82] ss:$16 sm:%s560_s20]   ;;  %s682_s11 = smov 48 }
  0x3b   :  { %v589_v28 = vsel %vm65_vm0, %v827_v26, %v826_v25  ;;  %v828_v29 = vld [vmem:[%s1498_s0 + $0x8a] ss:$16 sm:%s591_s16]   ;;  %532 = vrot.lane.b32.xlu0 %v531_v27, %s862_s17  ;;  %s606_s16 = smov 3  ;;  %696 = vst.msk [vmem:[%s1499_s1 - $0xf] ss:$8 sm:$0xc] %vm6_vm4, %v5_v52  }
  0x3c   :  { %v829_v30 = vld [vmem:[%s1498_s0 + $0x8a] ss:$16 sm:%s596_s5]   ;;  %v594_v31 = vsel %vm70_vm1, %v828_v29, %v589_v28  ;;  %v822_v34 = vld [vmem:[%s1498_s0 + $0x82] ss:$16 sm:%s563_s14]  }
  0x3d   :  { %v599_v33 = vsel %vm75_vm2, %v829_v30, %v594_v31  ;;  %v823_v35 = vld [vmem:[%s1498_s0 + $0x82] ss:$16 sm:%s568_s27]   ;;  %v566_v36 = vsel %vm65_vm0, %v822_v34, %v821_v32  ;;  %v835_v40 = vld [vmem:[%s1498_s0 + $0x9] ss:$16 sm:%s628_s7]  }
  0x3e   :  { %600 = vrot.lane.b32.xlu1 %v599_v33, %s862_s17  ;;  %v824_v37 = vld [vmem:[%s1498_s0 + $0x82] ss:$16 sm:%s573_s3]   ;;  %v571_v39 = vsel %vm70_vm1, %v823_v35, %v566_v36  ;;  %697 = vst.msk [vmem:[%s1499_s1 - $0x1e] ss:$8 sm:$0x30] %vm6_vm4, %v5_v52   ;;  %s659_s3 = smov 48 }
  0x3f   :  { %v836_v41 = vld [vmem:[%s1498_s0 + $0x9] ss:$16 sm:%s631_s8]   ;;  %v576_v42 = vsel %vm75_vm2, %v824_v37, %v571_v39  ;;  %v831_v47 = vld [vmem:[%s1498_s0 + $0x1] ss:$16 sm:%s606_s16]   ;;  %s651_s16 = smov 3 }
  0x40   :  { %v634_v43 = vsel %vm65_vm0, %v836_v41, %v835_v40  ;;  %v837_v44 = vld [vmem:[%s1498_s0 + $0x9] ss:$16 sm:%s636_s12]   ;;  %577 = vrot.lane.b32.xlu0 %v576_v42, %s862_s17  ;;  %s687_s12 = smov 192  ;;  %698 = vst.msk [vmem:[%s1499_s1 - $0x2d] ss:$8 sm:$0xc0] %vm6_vm4, %v5_v52  }
  0x41   :  { %v838_v45 = vld [vmem:[%s1498_s0 + $0x9] ss:$16 sm:%s641_s13]   ;;  %v639_v46 = vsel %vm70_vm1, %v837_v44, %v634_v43  ;;  %v832_v50 = vld [vmem:[%s1498_s0 + $0x1] ss:$16 sm:%s609_s24]   ;;  %s863_s13 = smov 16   ;;  %s654_s17 = smov 12 }
  0x42   :  { %v644_v49 = vsel %vm75_vm2, %v838_v45, %v639_v46  ;;  %v833_v51 = vld [vmem:[%s1498_s0 + $0x1] ss:$16 sm:%s614_s25]   ;;  %v612_v53 = vsel %vm65_vm0, %v832_v50, %v831_v47  ;;  %v699_v55 = vld [vmem:[%s1498_s0 + $0x40] ss:$8 sm:$0xf]  }
  0x43   :  { %645 = vrot.lane.b32.xlu1 %v644_v49, %s863_s13  ;;  %v834_v54 = vld [vmem:[%s1498_s0 + $0x1] ss:$16 sm:%s619_s30]   ;;  %v617_v56 = vsel %vm70_vm1, %v833_v51, %v612_v53  ;;  %v700_v1 = vld [vmem:[%s1498_s0 + $0x40] ss:$8 sm:$0xf0]  }
  0x44   :  { %v845_v57 = vld [vmem:[%s1498_s0 + $0x89] ss:$16 sm:%s674_s2]   ;;  %v622_v59 = vsel %vm75_vm2, %v834_v54, %v617_v56  ;;  %v840_v0 = vld [vmem:[%s1498_s0 + $0x81] ss:$16 sm:%s651_s16]   ;;  %v19_v5 = vsel %vm4_vm3, %v700_v1, %v699_v55 }
  0x45   :  { %v846_v58 = vld [vmem:[%s1498_s0 + $0x89] ss:$16 sm:%s677_s4]   ;;  %623 = vrot.lane.b32.xlu0 %v622_v59, %s863_s13  ;;  %701 = vst.msk [vmem:[%s1499_s1 + $0x4] ss:$8 sm:$0x3] %vm6_vm4, %v19_v5  }
  0x46   :  { %v680_v60 = vsel %vm65_vm0, %v846_v58, %v845_v57  ;;  %v847_v61 = vld [vmem:[%s1498_s0 + $0x89] ss:$16 sm:%s682_s11]   ;;  %v841_v3 = vld [vmem:[%s1498_s0 + $0x81] ss:$16 sm:%s654_s17]  }
  0x47   :  { %v848_v62 = vld [vmem:[%s1498_s0 + $0x89] ss:$16 sm:%s687_s12]   ;;  %v685_v63 = vsel %vm70_vm1, %v847_v61, %v680_v60  ;;  %v842_v4 = vld [vmem:[%s1498_s0 + $0x81] ss:$16 sm:%s659_s3]   ;;  %v657_v6 = vsel %vm65_vm0, %v841_v3, %v840_v0 }
  0x48   :  { %v690_v2 = vsel %vm75_vm2, %v848_v62, %v685_v63  ;;  %v843_v7 = vld [vmem:[%s1498_s0 + $0x81] ss:$16 sm:%s664_s26]   ;;  %702 = vst.msk [vmem:[%s1499_s1 - $0xb] ss:$8 sm:$0xc] %vm6_vm4, %v19_v5   ;;  %v662_v9 = vsel %vm70_vm1, %v842_v4, %v657_v6 }
  0x49   :  { %691 = vrot.lane.b32.xlu1 %v690_v2, %s863_s13  ;;  %703 = vst.msk [vmem:[%s1499_s1 - $0x1a] ss:$8 sm:$0x30] %vm6_vm4, %v19_v5   ;;  %704 = vst.msk [vmem:[%s1499_s1 - $0x29] ss:$8 sm:$0xc0] %vm6_vm4, %v19_v5   ;;  %v667_v12 = vsel %vm75_vm2, %v843_v7, %v662_v9 }
  0x4a   :  { %v705_v8 = vld [vmem:[%s1498_s0 + $0x80] ss:$8 sm:$0xf]   ;;  %668 = vrot.lane.b32.xlu0 %v667_v12, %s863_s13 }
  0x4b   :  { %v706_v10 = vld [vmem:[%s1498_s0 + $0x80] ss:$8 sm:$0xf0]  }
  0x4c   :  { %v711_v11 = vld [vmem:[%s1498_s0 + $0xc0] ss:$8 sm:$0xf]   ;;  %v34_v13 = vsel %vm4_vm3, %v706_v10, %v705_v8 }
  0x4d   :  { %v712_v14 = vld [vmem:[%s1498_s0 + $0xc0] ss:$8 sm:$0xf0]   ;;  %707 = vst.msk [vmem:[%s1499_s1 + $0x10] ss:$8 sm:$0x3] %vm6_vm4, %v34_v13  }
  0x4e   :  { %708 = vst.msk [vmem:[%s1499_s1 + $0x1] ss:$8 sm:$0xc] %vm6_vm4, %v34_v13   ;;  %709 = vst.msk [vmem:[%s1499_s1 - $0xe] ss:$8 sm:$0x30] %vm6_vm4, %v34_v13   ;;  %v49_v15 = vsel %vm4_vm3, %v712_v14, %v711_v11 }
  0x4f   :  { %710 = vst.msk [vmem:[%s1499_s1 - $0x1d] ss:$8 sm:$0xc0] %vm6_vm4, %v34_v13   ;;  %713 = vst.msk [vmem:[%s1499_s1 + $0x14] ss:$8 sm:$0x3] %vm6_vm4, %v49_v15  }
  0x50   :  { %714 = vst.msk [vmem:[%s1499_s1 + $0x5] ss:$8 sm:$0xc] %vm6_vm4, %v49_v15   ;;  %715 = vst.msk [vmem:[%s1499_s1 - $0xa] ss:$8 sm:$0x30] %vm6_vm4, %v49_v15  }
  0x51   :  { %716 = vst.msk [vmem:[%s1499_s1 - $0x19] ss:$8 sm:$0xc0] %vm6_vm4, %v49_v15  }
  0x78   :  { %v123_v16 = vpop.permute.xlu1 %122  }
  0x79   :  { %730 = vst.msk [vmem:[%s1499_s1 + $0x10] sm:$0xff] %vm79_vm5, %v123_v16  }
  0x7c   :  { %v78_v17 = vpop.permute.xlu0 %77  }
  0x7d   :  { %80 = vst.msk [vmem:[%s1499_s1] sm:$0xff] %vm79_vm5, %v78_v17   ;;  %v146_v18 = vpop.permute.xlu1 %145  }
  0x7e   :  { %735 = vst.msk [vmem:[%s1499_s1 + $0x18] sm:$0xff] %vm79_vm5, %v146_v18  }
  0x81   :  { %v100_v19 = vpop.permute.xlu0 %99  }
  0x82   :  { %725 = vst.msk [vmem:[%s1499_s1 + $0x8] sm:$0xff] %vm79_vm5, %v100_v19   ;;  %v191_v20 = vpop.permute.xlu1 %190  }
  0x83   :  { %744 = vst.msk [vmem:[%s1499_s1 + $0x8] sm:$0xff] %vm170_vm6, %v191_v20  }
  0x85   :  { %v169_v21 = vpop.permute.xlu0 %168  }
  0x86   :  { %171 = vst.msk [vmem:[%s1499_s1] sm:$0xff] %vm170_vm6, %v169_v21  }
  0x88   :  { %v237_v22 = vpop.permute.xlu1 %236  }
  0x89   :  { %754 = vst.msk [vmem:[%s1499_s1 + $0x18] sm:$0xff] %vm170_vm6, %v237_v22  }
  0x8a   :  { %v214_v23 = vpop.permute.xlu0 %213  }
  0x8b   :  { %749 = vst.msk [vmem:[%s1499_s1 + $0x10] sm:$0xff] %vm170_vm6, %v214_v23  }
  0x8d   :  { %v282_v24 = vpop.permute.xlu1 %281  }
  0x8e   :  { %763 = vst.msk [vmem:[%s1499_s1 + $0x8] sm:$0xff] %vm261_vm7, %v282_v24  }
  0x8f   :  { %v260_v25 = vpop.permute.xlu0 %259  }
  0x90   :  { %262 = vst.msk [vmem:[%s1499_s1] sm:$0xff] %vm261_vm7, %v260_v25  }
  0x92   :  { %v328_v26 = vpop.permute.xlu1 %327  }
  0x93   :  { %773 = vst.msk [vmem:[%s1499_s1 + $0x18] sm:$0xff] %vm261_vm7, %v328_v26  }
  0x94   :  { %v305_v27 = vpop.permute.xlu0 %304  }
  0x95   :  { %768 = vst.msk [vmem:[%s1499_s1 + $0x10] sm:$0xff] %vm261_vm7, %v305_v27  }
  0x97   :  { %v373_v28 = vpop.permute.xlu1 %372  }
  0x98   :  { %782 = vst.msk [vmem:[%s1499_s1 + $0x8] sm:$0xff] %vm352_vm8, %v373_v28  }
  0x99   :  { %v351_v29 = vpop.permute.xlu0 %350  }
  0x9a   :  { %353 = vst.msk [vmem:[%s1499_s1] sm:$0xff] %vm352_vm8, %v351_v29  }
  0x9c   :  { %v419_v30 = vpop.permute.xlu1 %418  }
  0x9d   :  { %792 = vst.msk [vmem:[%s1499_s1 + $0x18] sm:$0xff] %vm352_vm8, %v419_v30  }
  0x9e   :  { %v396_v31 = vpop.permute.xlu0 %395  }
  0x9f   :  { %787 = vst.msk [vmem:[%s1499_s1 + $0x10] sm:$0xff] %vm352_vm8, %v396_v31  }
  0xa1   :  { %v464_v32 = vpop.permute.xlu1 %463  }
  0xa2   :  { %801 = vst.msk [vmem:[%s1499_s1 + $0x8] sm:$0xff] %vm443_vm9, %v464_v32  }
  0xa3   :  { %v442_v33 = vpop.permute.xlu0 %441  }
  0xa4   :  { %444 = vst.msk [vmem:[%s1499_s1] sm:$0xff] %vm443_vm9, %v442_v33  }
  0xa6   :  { %v510_v34 = vpop.permute.xlu1 %509  }
  0xa7   :  { %811 = vst.msk [vmem:[%s1499_s1 + $0x18] sm:$0xff] %vm443_vm9, %v510_v34  }
  0xa8   :  { %v487_v35 = vpop.permute.xlu0 %486  }
  0xa9   :  { %806 = vst.msk [vmem:[%s1499_s1 + $0x10] sm:$0xff] %vm443_vm9, %v487_v35  }
  0xab   :  { %v555_v36 = vpop.permute.xlu1 %554  }
  0xac   :  { %820 = vst.msk [vmem:[%s1499_s1 + $0x8] sm:$0xff] %vm534_vm10, %v555_v36  }
  0xad   :  { %v533_v37 = vpop.permute.xlu0 %532  }
  0xae   :  { %535 = vst.msk [vmem:[%s1499_s1] sm:$0xff] %vm534_vm10, %v533_v37  }
  0xb0   :  { %v601_v38 = vpop.permute.xlu1 %600  }
  0xb1   :  { %830 = vst.msk [vmem:[%s1499_s1 + $0x18] sm:$0xff] %vm534_vm10, %v601_v38  }
  0xb2   :  { %v578_v39 = vpop.permute.xlu0 %577  }
  0xb3   :  { %825 = vst.msk [vmem:[%s1499_s1 + $0x10] sm:$0xff] %vm534_vm10, %v578_v39  }
  0xb5   :  { %v646_v40 = vpop.permute.xlu1 %645  }
  0xb6   :  { %839 = vst.msk [vmem:[%s1499_s1 + $0x8] sm:$0xff] %vm625_vm11, %v646_v40  }
  0xb7   :  { %v624_v41 = vpop.permute.xlu0 %623  }
  0xb8   :  { %626 = vst.msk [vmem:[%s1499_s1] sm:$0xff] %vm625_vm11, %v624_v41  }
  0xbb   :  { %v692_v42 = vpop.permute.xlu1 %691  }
  0xbc   :  { %849 = vst.msk [vmem:[%s1499_s1 + $0x18] sm:$0xff] %vm625_vm11, %v692_v42   ;;  %v669_v43 = vpop.permute.xlu0 %668  }
  0xbd   :  { %844 = vst.msk [vmem:[%s1499_s1 + $0x10] sm:$0xff] %vm625_vm11, %v669_v43  }

// kernel: domain_classifier_forward.1
= control target key start
LH: loop header
LB: loop body
LE: loop exit
PB: predicated region body
PF: predicated region fallthrough
CT: control target
= control target key end

     0   :  { %s10893_s21 = smov 0   ;;  %s10895_s22 = smov 0   ;;  %s15611_s0 = inlined_call_operand.vmem [shape: bf16[2,64,8,64], index: 0, kind: input, shape index: {}]   ;;  %s15612_s1 = inlined_call_operand.vmem [shape: f32[2,8,256], index: 1, kind: input, shape index: {}]   ;;  %s15613_s2 = inlined_call_operand.vmem [shape: f32[2,8,16], index: 2, kind: input, shape index: {}]   ;;  %s15614_s3 = inlined_call_operand.vmem [shape: f32[64,16], index: 3, kind: input, shape index: {}]   ;;  %s15615_s4 = inlined_call_operand.vmem [shape: f32[16,64], index: 4, kind: input, shape index: {}]   ;;  %s15616_s5 = inlined_call_operand.vmem [shape: bf16[64,256], index: 5, kind: input, shape index: {}]   ;;  %s15617_s6 = inlined_call_operand.vmem [shape: bf16[64,16], index: 6, kind: input, shape index: {}]   ;;  %s15618_s7 = inlined_call_operand.vmem [shape: bf16[16,256], index: 7, kind: input, shape index: {}]   ;;  %s15619_s8 = inlined_call_operand.vmem [shape: bf16[256,128], index: 8, kind: input, shape index: {}]   ;;  %s15620_s9 = inlined_call_operand.vmem [shape: f32[1,128], index: 9, kind: input, shape index: {}]   ;;  %s15621_s10 = inlined_call_operand.vmem [shape: f32[128,16], index: 10, kind: input, shape index: {}]   ;;  %s15622_s11 = inlined_call_operand.vmem [shape: f32[16,128], index: 11, kind: input, shape index: {}]   ;;  %s15623_s12 = inlined_call_operand.vmem [shape: f32[2,1,128], index: 12, kind: output, shape index: {}]  }
   0x1   :  { %s10897_s23 = smov 0  }
   0x2 LB: > { %s34_s24 = sadd.s32 1, %s10819_s22  ;;  %p9379_p0 = scmp.ge.s32.totalorder %s10823_s23, 1  ;;  %s10823_s23 = sphi %s10897_s23, %s22_s23   ;;  %s10819_s22 = sphi %s10895_s22, %s16658_s22   ;;  %s10815_s21 = sphi %s10893_s21, %s16657_s21  }
   0x3   : > { %p36_p1 = scmp.ge.s32.totalorder %s34_s24, 2  ;;  %p400_p2 = scmp.lt.s32.totalorder %s10823_s23, 3 }
   0x5   : > { %s16660_s24 = smov (%p36_p1, %s34_s24), 0  ;;  %p401_p3 = pnand %p9379_p0, %p400_p2 }
   0x7   : > { %404 = sbr.rel (%p401_p3) target bundleno = 2421 (0x975), region = 68 }
   0xe   : > { %v1565_v0 = vld [vmem:[%s15614_s3] sm:$0xff]  ;;  %v1566_v1 = vld [vmem:[%s15614_s3 + $0x8] sm:$0xff]  ;;  %v1567_v2 = vld [vmem:[%s15614_s3 + $0x10] sm:$0xff]  ;;  %p454_p4 = scmp.lt.s32.totalorder %s10815_s21, 1  ;;  %vm604_vm0 = vcmask 523264   ;;  %vm1639_vm1 = vcmask 1041409  }
   0xf   : > { %v10920_v3 = vpack.c.bf16 %v1566_v1, %v1565_v0  ;;  %v1568_v4 = vld [vmem:[%s15614_s3 + $0x18] sm:$0xff]  ;;  %v1569_v5 = vld [vmem:[%s15614_s3 + $0x20] sm:$0xff]  ;;  %v1570_v6 = vld [vmem:[%s15614_s3 + $0x28] sm:$0xff]  ;;  %vm1641_vm2 = vcmask 1042434   ;;  %vm1643_vm3 = vcmask 1043459   ;;  %vm1645_vm4 = vcmask 1044484  }
  0x10   : > { %v10931_v7 = vpack.c.bf16 %v1568_v4, %v1567_v2  ;;  %v1571_v8 = vld [vmem:[%s15614_s3 + $0x30] sm:$0xff]  ;;  %v1572_v9 = vld [vmem:[%s15614_s3 + $0x38] sm:$0xff]  ;;  %s16662_s21 = smov (!%p454_p4, %s10815_s21), 1  ;;  %v10947_v10 = vpack.c.bf16 %v1570_v6, %v1569_v5  ;;  %vm1647_vm5 = vcmask 1045509   ;;  %vm1649_vm6 = vcmask 1046534  }
  0x11   : > { %10328 = vmatprep.subr.bf16.mxu0 %v10920_v3  ;;  %10439 = vmatprep.subr.bf16.mxu1 %v10920_v3  ;;  %s9626_s27 = sshll.u32 %s16662_s21, 8  ;;  %v10955_v11 = vpack.c.bf16 %v1572_v9, %v1571_v8  ;;  %vm1651_vm7 = vcmask 1047559   ;;  %vm2105_vm8 = vcmask 130048   ;;  %s9384_s17 = sshll.u32 %s16662_s21, 3 }
  0x12   : > { %10330 = vmatpush3.bf16.msra.mxu0 %v10920_v3  ;;  %10443 = vmatpush3.bf16.msra.mxu1 %v10920_v3  ;;  %s10953_s30 = scalar_lea.vmem %s15611_s0, %s9626_s27  ;;  %s12780_s20 = scalar_lea.vmem %s15613_s2, %s9384_s17 }
  0x13   : > { %10332 = vmatprep.subr.bf16.mxu0 %v10931_v7  ;;  %10440 = vmatprep.subr.bf16.mxu1 %v10931_v7  ;;  %v9693_v12 = vld [vmem:[%s10953_s30] sm:$0xff]   ;;  %v9820_v13 = vld [vmem:[%s10953_s30 + $0x8] sm:$0xff]   ;;  %v9821_v14 = vld [vmem:[%s10953_s30 + $0x10] sm:$0xff]   ;;  %s9627_s29 = sshll.u32 %s16662_s21, 4  ;;  %s15589_s15 = scalar_lea.vmem %s15623_s12, %s16662_s21 }
  0x14   : > { %v10960_v15 = vunpack.c.l.bf16 %v9693_v12  ;;  %v10962_v16 = vunpack.c.h.bf16 %v9693_v12  ;;  %v10964_v17 = vunpack.c.l.bf16 %v9820_v13  ;;  %v10966_v18 = vunpack.c.h.bf16 %v9820_v13  ;;  %v9822_v19 = vld [vmem:[%s10953_s30 + $0x18] sm:$0xff]   ;;  %v9823_v60 = vld [vmem:[%s10953_s30 + $0x20] sm:$0xff]   ;;  %v9824_v6 = vld [vmem:[%s10953_s30 + $0x28] sm:$0xff]   ;;  %s14155_s14 = scalar_lea.vmem %s15612_s1, %s9627_s29 }
  0x15   : > { %v10970_v20 = vunpack.c.l.bf16 %v9821_v14  ;;  %v10972_v21 = vunpack.c.h.bf16 %v9821_v14  ;;  %v10974_v22 = vunpack.c.l.bf16 %v9822_v19  ;;  %v10976_v23 = vunpack.c.h.bf16 %v9822_v19 }
  0x16   : > { %10334 = vmatpush3.bf16.msra.mxu0 %v10931_v7  ;;  %10444 = vmatpush3.bf16.msra.mxu1 %v10931_v7  ;;  %v605_v24 = vsel %vm604_vm0, %v10960_v15, 0.0  ;;  %v612_v25 = vsel %vm604_vm0, %v10962_v16, 0.0  ;;  %v619_v26 = vsel %vm604_vm0, %v10964_v17, 0.0  ;;  %v626_v27 = vsel %vm604_vm0, %v10966_v18, 0.0 }
  0x17   : > { %10336 = vmatprep.subr.bf16.mxu0 %v10947_v10  ;;  %10441 = vmatprep.subr.bf16.mxu1 %v10947_v10  ;;  %v606_v28 = vrot.slane %v605_v24, 4  ;;  %v613_v29 = vrot.slane %v612_v25, 4  ;;  %v620_v30 = vrot.slane %v619_v26, 4  ;;  %v627_v31 = vrot.slane %v626_v27, 4 }
  0x18   : > { %v633_v32 = vsel %vm604_vm0, %v10970_v20, 0.0  ;;  %v640_v33 = vsel %vm604_vm0, %v10972_v21, 0.0  ;;  %v647_v34 = vsel %vm604_vm0, %v10974_v22, 0.0  ;;  %v654_v35 = vsel %vm604_vm0, %v10976_v23, 0.0 }
  0x19   : > { %v607_v36 = vadd.f32 %v606_v28, %v605_v24  ;;  %v614_v37 = vadd.f32 %v613_v29, %v612_v25  ;;  %v621_v38 = vadd.f32 %v620_v30, %v619_v26  ;;  %v628_v39 = vadd.f32 %v627_v31, %v626_v27  ;;  %v9825_v26 = vld [vmem:[%s10953_s30 + $0x30] sm:$0xff]   ;;  %v9826_v27 = vld [vmem:[%s10953_s30 + $0x38] sm:$0xff]  }
  0x1a   : > { %10338 = vmatpush3.bf16.msra.mxu0 %v10947_v10  ;;  %v634_v40 = vrot.slane %v633_v32, 4  ;;  %v641_v41 = vrot.slane %v640_v33, 4  ;;  %v648_v42 = vrot.slane %v647_v34, 4  ;;  %v655_v43 = vrot.slane %v654_v35, 4  ;;  %10445 = vmatpush3.bf16.msra.mxu1 %v10947_v10 }
  0x1b   : > { %10340 = vmatprep.subr.bf16.mxu0 %v10955_v11  ;;  %v608_v44 = vrot.slane %v607_v36, 2  ;;  %v615_v45 = vrot.slane %v614_v37, 2  ;;  %v622_v46 = vrot.slane %v621_v38, 2  ;;  %v629_v47 = vrot.slane %v628_v39, 2  ;;  %10442 = vmatprep.subr.bf16.mxu1 %v10955_v11 }
  0x1c   : > { %v635_v48 = vadd.f32 %v634_v40, %v633_v32  ;;  %v642_v49 = vadd.f32 %v641_v41, %v640_v33  ;;  %v649_v50 = vadd.f32 %v648_v42, %v647_v34  ;;  %v656_v51 = vadd.f32 %v655_v43, %v654_v35 }
  0x1d   : > { %v609_v52 = vadd.f32 %v608_v44, %v607_v36  ;;  %v616_v53 = vadd.f32 %v615_v45, %v614_v37  ;;  %v623_v54 = vadd.f32 %v622_v46, %v621_v38  ;;  %v630_v55 = vadd.f32 %v629_v47, %v628_v39 }
  0x1e   : > { %10342 = vmatpush3.bf16.msra.mxu0 %v10955_v11  ;;  %v636_v56 = vrot.slane %v635_v48, 2  ;;  %v643_v57 = vrot.slane %v642_v49, 2  ;;  %v650_v58 = vrot.slane %v649_v50, 2  ;;  %v657_v59 = vrot.slane %v656_v51, 2  ;;  %10446 = vmatpush3.bf16.msra.mxu1 %v10955_v11 }
  0x1f   : > { %10344 = vmatprep.subr.bf16.mxu0 %v10920_v3  ;;  %v610_v61 = vrot.slane %v609_v52, 1  ;;  %v617_v62 = vrot.slane %v616_v53, 1  ;;  %v624_v63 = vrot.slane %v623_v54, 1  ;;  %v631_v0 = vrot.slane %v630_v55, 1 }
  0x20   : > { %v637_v1 = vadd.f32 %v636_v56, %v635_v48  ;;  %v644_v2 = vadd.f32 %v643_v57, %v642_v49  ;;  %v651_v4 = vadd.f32 %v650_v58, %v649_v50  ;;  %v658_v5 = vadd.f32 %v657_v59, %v656_v51 }
  0x21   : > { %v611_v8 = vadd.f32 %v610_v61, %v609_v52  ;;  %v618_v9 = vadd.f32 %v617_v62, %v616_v53  ;;  %v625_v12 = vadd.f32 %v624_v63, %v623_v54  ;;  %v632_v13 = vadd.f32 %v631_v0, %v630_v55 }
  0x22   : > { %v638_v14 = vrot.slane %v637_v1, 1  ;;  %v645_v19 = vrot.slane %v644_v2, 1  ;;  %v652_v24 = vrot.slane %v651_v4, 1  ;;  %v659_v25 = vrot.slane %v658_v5, 1 }
  0x23   : > { %v1640_v28 = vsel %vm1639_vm1, %v618_v9, %v611_v8  ;;  %v11009_v29 = vunpack.c.l.bf16 %v9823_v60  ;;  %v11011_v30 = vunpack.c.h.bf16 %v9823_v60  ;;  %v11013_v31 = vunpack.c.l.bf16 %v9824_v6 }
  0x24   : > { %v639_v32 = vadd.f32 %v638_v14, %v637_v1  ;;  %v646_v33 = vadd.f32 %v645_v19, %v644_v2  ;;  %v653_v34 = vadd.f32 %v652_v24, %v651_v4  ;;  %v660_v35 = vadd.f32 %v659_v25, %v658_v5 }
  0x25   : > { %v1642_v36 = vsel %vm1641_vm2, %v625_v12, %v1640_v28  ;;  %v11016_v37 = vunpack.c.h.bf16 %v9824_v6  ;;  %v11018_v38 = vunpack.c.l.bf16 %v9825_v26  ;;  %v11020_v39 = vunpack.c.h.bf16 %v9825_v26 }
  0x26   : > { %v1644_v40 = vsel %vm1643_vm3, %v632_v13, %v1642_v36  ;;  %v11023_v41 = vunpack.c.l.bf16 %v9826_v27  ;;  %v11025_v42 = vunpack.c.h.bf16 %v9826_v27  ;;  %v661_v43 = vsel %vm604_vm0, %v11009_v29, 0.0 }
  0x27   : > { %v1646_v44 = vsel %vm1645_vm4, %v639_v32, %v1644_v40  ;;  %v662_v45 = vrot.slane %v661_v43, 4  ;;  %v668_v46 = vsel %vm604_vm0, %v11011_v30, 0.0  ;;  %v675_v47 = vsel %vm604_vm0, %v11013_v31, 0.0 }
  0x28   : > { %15796 = vst [vmem:[#allocation2_spill] sm:$0xff] %v11023_v41  ;;  %15797 = vst [vmem:[#allocation3_spill] sm:$0xff] %v11025_v42  ;;  %v1648_v48 = vsel %vm1647_vm5, %v646_v33, %v1646_v44  ;;  %v669_v49 = vrot.slane %v668_v46, 4  ;;  %v676_v50 = vrot.slane %v675_v47, 4  ;;  %v682_v51 = vsel %vm604_vm0, %v11016_v37, 0.0 }
  0x29   : > { %v1650_v52 = vsel %vm1649_vm6, %v653_v34, %v1648_v48  ;;  %v663_v53 = vadd.f32 %v662_v45, %v661_v43  ;;  %v683_v54 = vrot.slane %v682_v51, 4  ;;  %v689_v55 = vsel %vm604_vm0, %v11018_v38, 0.0 }
  0x2a   : > { %v1652_v56 = vsel %vm1651_vm7, %v660_v35, %v1650_v52  ;;  %v670_v57 = vadd.f32 %v669_v49, %v668_v46  ;;  %v677_v58 = vadd.f32 %v676_v50, %v675_v47  ;;  %v690_v59 = vrot.slane %v689_v55, 4  ;;  %v9827_v35 = vld [vmem:[%s10953_s30 + $0x40] sm:$0xff]   ;;  %v9828_v49 = vld [vmem:[%s10953_s30 + $0x48] sm:$0xff]  }
  0x2b   : > { %10063 = vmatprep.mubr.msk.f32.mxu0 %vm604_vm0, %v1652_v56  ;;  %v664_v60 = vrot.slane %v663_v53, 2  ;;  %v684_v61 = vadd.f32 %v683_v54, %v682_v51  ;;  %v696_v62 = vsel %vm604_vm0, %v11020_v39, 0.0  ;;  %v703_v63 = vsel %vm604_vm0, %v11023_v41, 0.0  ;;  %v9829_v54 = vld [vmem:[%s10953_s30 + $0x50] sm:$0xff]  }
  0x2c   : > { %v671_v0 = vrot.slane %v670_v57, 2  ;;  %v678_v1 = vrot.slane %v677_v58, 2  ;;  %v691_v2 = vadd.f32 %v690_v59, %v689_v55  ;;  %v697_v4 = vrot.slane %v696_v62, 4 }
  0x2d   : > { %v665_v5 = vadd.f32 %v664_v60, %v663_v53  ;;  %v685_v6 = vrot.slane %v684_v61, 2  ;;  %v704_v8 = vrot.slane %v703_v63, 4  ;;  %v710_v9 = vsel %vm604_vm0, %v11025_v42, 0.0 }
  0x2e   : > { %v672_v12 = vadd.f32 %v671_v0, %v670_v57  ;;  %v679_v13 = vadd.f32 %v678_v1, %v677_v58  ;;  %v692_v14 = vrot.slane %v691_v2, 2  ;;  %v698_v19 = vadd.f32 %v697_v4, %v696_v62 }
  0x2f   : > { %v666_v24 = vrot.slane %v665_v5, 1  ;;  %v686_v25 = vadd.f32 %v685_v6, %v684_v61  ;;  %v705_v26 = vadd.f32 %v704_v8, %v703_v63  ;;  %v711_v27 = vrot.slane %v710_v9, 4  ;;  %v9830_v63 = vld [vmem:[%s10953_s30 + $0x58] sm:$0xff]  }
  0x30   : > { %v673_v28 = vrot.slane %v672_v12, 1  ;;  %v680_v32 = vrot.slane %v679_v13, 1  ;;  %v693_v33 = vadd.f32 %v692_v14, %v691_v2  ;;  %v699_v34 = vrot.slane %v698_v19, 2 }
  0x31   : > { %v667_v36 = vadd.f32 %v666_v24, %v665_v5  ;;  %v687_v40 = vrot.slane %v686_v25, 1  ;;  %v706_v43 = vrot.slane %v705_v26, 2  ;;  %v712_v44 = vadd.f32 %v711_v27, %v710_v9 }
  0x32   : > { %v674_v45 = vadd.f32 %v673_v28, %v672_v12  ;;  %v681_v46 = vadd.f32 %v680_v32, %v679_v13  ;;  %v694_v47 = vrot.slane %v693_v33, 1  ;;  %v700_v48 = vadd.f32 %v699_v34, %v698_v19 }
  0x33   : > { %v688_v50 = vadd.f32 %v687_v40, %v686_v25  ;;  %v707_v51 = vadd.f32 %v706_v43, %v705_v26  ;;  %v713_v52 = vrot.slane %v712_v44, 2  ;;  %v11050_v53 = vunpack.c.l.bf16 %v9827_v35 }
  0x34   : > { %v695_v55 = vadd.f32 %v694_v47, %v693_v33  ;;  %v701_v56 = vrot.slane %v700_v48, 1  ;;  %v1653_v57 = vsel %vm1639_vm1, %v674_v45, %v667_v36  ;;  %v11054_v58 = vunpack.c.h.bf16 %v9827_v35 }
  0x35   : > { %15798 = vst [vmem:[#allocation4_spill] sm:$0xff] %v11050_v53  ;;  %v708_v59 = vrot.slane %v707_v51, 1  ;;  %v714_v60 = vadd.f32 %v713_v52, %v712_v44  ;;  %v1654_v61 = vsel %vm1641_vm2, %v681_v46, %v1653_v57  ;;  %v11057_v62 = vunpack.c.l.bf16 %v9828_v49 }
  0x36   : > { %15799 = vst [vmem:[#allocation5_spill] sm:$0xff] %v11054_v58  ;;  %v702_v0 = vadd.f32 %v701_v56, %v700_v48  ;;  %v1655_v1 = vsel %vm1643_vm3, %v688_v50, %v1654_v61  ;;  %v11061_v2 = vunpack.c.h.bf16 %v9828_v49  ;;  %v11063_v4 = vunpack.c.l.bf16 %v9829_v54 }
  0x37   : > { %15800 = vst [vmem:[#allocation6_spill] sm:$0xff] %v11057_v62  ;;  %v709_v5 = vadd.f32 %v708_v59, %v707_v51  ;;  %v715_v6 = vrot.slane %v714_v60, 1  ;;  %v1656_v8 = vsel %vm1645_vm4, %v695_v55, %v1655_v1  ;;  %v11066_v9 = vunpack.c.h.bf16 %v9829_v54 }
  0x38   : > { %15801 = vst [vmem:[#allocation7_spill] sm:$0xff] %v11061_v2  ;;  %15802 = vst [vmem:[#allocation8_spill] sm:$0xff] %v11063_v4  ;;  %v1657_v12 = vsel %vm1647_vm5, %v702_v0, %v1656_v8  ;;  %v11069_v13 = vunpack.c.l.bf16 %v9830_v63  ;;  %v11071_v14 = vunpack.c.h.bf16 %v9830_v63  ;;  %v717_v19 = vsel %vm604_vm0, %v11050_v53, 0.0 }
  0x39   : > { %15803 = vst [vmem:[#allocation9_spill] sm:$0xff] %v11066_v9  ;;  %v716_v24 = vadd.f32 %v715_v6, %v714_v60  ;;  %v1658_v25 = vsel %vm1649_vm6, %v709_v5, %v1657_v12  ;;  %v718_v26 = vrot.slane %v717_v19, 4  ;;  %v724_v27 = vsel %vm604_vm0, %v11054_v58, 0.0 }
  0x3a   : > { %15804 = vst [vmem:[#allocation10_spill] sm:$0xff] %v11069_v13  ;;  %15805 = vst [vmem:[#allocation11_spill] sm:$0xff] %v11071_v14  ;;  %v725_v28 = vrot.slane %v724_v27, 4  ;;  %v731_v32 = vsel %vm604_vm0, %v11057_v62, 0.0  ;;  %v738_v33 = vsel %vm604_vm0, %v11061_v2, 0.0  ;;  %v745_v34 = vsel %vm604_vm0, %v11063_v4, 0.0 }
  0x3b   : > { %v1659_v35 = vsel %vm1651_vm7, %v716_v24, %v1658_v25  ;;  %v719_v36 = vadd.f32 %v718_v26, %v717_v19  ;;  %v732_v40 = vrot.slane %v731_v32, 4  ;;  %v739_v43 = vrot.slane %v738_v33, 4 }
  0x3c   : > { %10064 = vmatmul.mubr.msk.f32.vlgmr.msra.gmra.mrb[0].mxu0 %vm604_vm0, %v1659_v35  ;;  %v726_v44 = vadd.f32 %v725_v28, %v724_v27  ;;  %v746_v45 = vrot.slane %v745_v34, 4  ;;  %v752_v46 = vsel %vm604_vm0, %v11066_v9, 0.0  ;;  %v759_v47 = vsel %vm604_vm0, %v11069_v13, 0.0  ;;  %v9831_v27 = vld [vmem:[%s10953_s30 + $0x60] sm:$0xff]  }
  0x3d   : > { %10346 = vmatpush3.bf16.msra.mxu0 %v10920_v3  ;;  %v720_v48 = vrot.slane %v719_v36, 2  ;;  %v733_v49 = vadd.f32 %v732_v40, %v731_v32  ;;  %v740_v50 = vadd.f32 %v739_v43, %v738_v33  ;;  %v753_v51 = vrot.slane %v752_v46, 4 }
  0x3e   : > { %v727_v52 = vrot.slane %v726_v44, 2  ;;  %v747_v54 = vadd.f32 %v746_v45, %v745_v34  ;;  %v760_v55 = vrot.slane %v759_v47, 4  ;;  %v766_v56 = vsel %vm604_vm0, %v11071_v14, 0.0  ;;  %10348 = vmatprep.subr.bf16.mxu0 %v10931_v7 }
  0x3f   : > { %v721_v57 = vadd.f32 %v720_v48, %v719_v36  ;;  %v734_v59 = vrot.slane %v733_v49, 2  ;;  %v741_v60 = vrot.slane %v740_v50, 2  ;;  %v754_v61 = vadd.f32 %v753_v51, %v752_v46 }
  0x40   : > { %v728_v63 = vadd.f32 %v727_v52, %v726_v44  ;;  %v748_v0 = vrot.slane %v747_v54, 2  ;;  %v761_v3 = vadd.f32 %v760_v55, %v759_v47  ;;  %v767_v1 = vrot.slane %v766_v56, 4  ;;  %v9832_v44 = vld [vmem:[%s10953_s30 + $0x68] sm:$0xff]   ;;  %v9833_v52 = vld [vmem:[%s10953_s30 + $0x70] sm:$0xff]  }
  0x41   : > { %v722_v5 = vrot.slane %v721_v57, 1  ;;  %v735_v6 = vadd.f32 %v734_v59, %v733_v49  ;;  %v742_v8 = vadd.f32 %v741_v60, %v740_v50  ;;  %v755_v12 = vrot.slane %v754_v61, 2  ;;  %10350 = vmatpush3.bf16.msra.mxu0 %v10931_v7 }
  0x42   : > { %v729_v19 = vrot.slane %v728_v63, 1  ;;  %v749_v24 = vadd.f32 %v748_v0, %v747_v54  ;;  %v762_v25 = vrot.slane %v761_v3, 2  ;;  %v768_v26 = vadd.f32 %v767_v1, %v766_v56  ;;  %10352 = vmatprep.subr.bf16.mxu0 %v10947_v10  ;;  %v9834_v54 = vld [vmem:[%s10953_s30 + $0x78] sm:$0xff]  }
  0x43   : > { %v723_v28 = vadd.f32 %v722_v5, %v721_v57  ;;  %v736_v32 = vrot.slane %v735_v6, 1  ;;  %v743_v33 = vrot.slane %v742_v8, 1  ;;  %v756_v34 = vadd.f32 %v755_v12, %v754_v61 }
  0x44   : > { %v730_v35 = vadd.f32 %v729_v19, %v728_v63  ;;  %v750_v36 = vrot.slane %v749_v24, 1  ;;  %v763_v40 = vadd.f32 %v762_v25, %v761_v3  ;;  %v769_v43 = vrot.slane %v768_v26, 2 }
  0x45   : > { %v737_v45 = vadd.f32 %v736_v32, %v735_v6  ;;  %v744_v7 = vadd.f32 %v743_v33, %v742_v8  ;;  %v757_v46 = vrot.slane %v756_v34, 1  ;;  %v11098_v47 = vunpack.c.l.bf16 %v9831_v27  ;;  %10354 = vmatpush3.bf16.msra.mxu0 %v10947_v10 }
  0x46   : > { %v751_v48 = vadd.f32 %v750_v36, %v749_v24  ;;  %v764_v49 = vrot.slane %v763_v40, 1  ;;  %v770_v50 = vadd.f32 %v769_v43, %v768_v26  ;;  %v1660_v51 = vsel %vm1639_vm1, %v730_v35, %v723_v28  ;;  %10356 = vmatprep.subr.bf16.mxu0 %v10955_v11 }
  0x47   : > { %15806 = vst [vmem:[#allocation12_spill] sm:$0xff] %v11098_v47  ;;  %v758_v55 = vadd.f32 %v757_v46, %v756_v34  ;;  %v1661_v56 = vsel %vm1641_vm2, %v737_v45, %v1660_v51  ;;  %v11106_v57 = vunpack.c.h.bf16 %v9831_v27  ;;  %v11108_v59 = vunpack.c.l.bf16 %v9832_v44 }
  0x48   : > { %v765_v60 = vadd.f32 %v764_v49, %v763_v40  ;;  %v771_v61 = vrot.slane %v770_v50, 1  ;;  %v1662_v10 = vsel %vm1643_vm3, %v744_v7, %v1661_v56  ;;  %v11111_v63 = vunpack.c.h.bf16 %v9832_v44 }
  0x49   : > { %15807 = vst [vmem:[#allocation13_spill] sm:$0xff] %v11106_v57  ;;  %15808 = vst [vmem:[#allocation14_spill] sm:$0xff] %v11108_v59  ;;  %v1663_v0 = vsel %vm1645_vm4, %v751_v48, %v1662_v10  ;;  %v11114_v3 = vunpack.c.l.bf16 %v9833_v52  ;;  %v11116_v1 = vunpack.c.h.bf16 %v9833_v52  ;;  %v11118_v5 = vunpack.c.l.bf16 %v9834_v54  ;;  %10358 = vmatpush3.bf16.msra.mxu0 %v10955_v11 }
  0x4a   : > { %15809 = vst [vmem:[#allocation15_spill] sm:$0xff] %v11111_v63  ;;  %v772_v6 = vadd.f32 %v771_v61, %v770_v50  ;;  %v1664_v8 = vsel %vm1647_vm5, %v758_v55, %v1663_v0  ;;  %v11122_v12 = vunpack.c.h.bf16 %v9834_v54  ;;  %v773_v19 = vsel %vm604_vm0, %v11098_v47, 0.0 }
  0x4b   : > { %15810 = vst [vmem:[#allocation16_spill] sm:$0xff] %v11114_v3  ;;  %15811 = vst [vmem:[#allocation17_spill] sm:$0xff] %v11116_v1  ;;  %v1665_v24 = vsel %vm1649_vm6, %v765_v60, %v1664_v8  ;;  %v774_v25 = vrot.slane %v773_v19, 4  ;;  %v780_v26 = vsel %vm604_vm0, %v11106_v57, 0.0  ;;  %v787_v27 = vsel %vm604_vm0, %v11108_v59, 0.0  ;;  %v9839_v57 = vld [vmem:[%s10953_s30 + $0xa0] sm:$0xff]  }
  0x4c   : > { %15812 = vst [vmem:[#allocation18_spill] sm:$0xff] %v11118_v5  ;;  %15813 = vst [vmem:[#allocation19_spill] sm:$0xff] %v11122_v12  ;;  %v1666_v28 = vsel %vm1651_vm7, %v772_v6, %v1665_v24  ;;  %v781_v11 = vrot.slane %v780_v26, 4  ;;  %v788_v32 = vrot.slane %v787_v27, 4  ;;  %v794_v33 = vsel %vm604_vm0, %v11111_v63, 0.0 }
  0x4d   : > { %10066 = vmatprep.mubr.msk.f32.mxu0 %vm604_vm0, %v1666_v28  ;;  %v775_v34 = vadd.f32 %v774_v25, %v773_v19  ;;  %v795_v35 = vrot.slane %v794_v33, 4  ;;  %v801_v36 = vsel %vm604_vm0, %v11114_v3, 0.0  ;;  %v808_v40 = vsel %vm604_vm0, %v11116_v1, 0.0 }
  0x4e   : > { %v782_v43 = vadd.f32 %v781_v11, %v780_v26  ;;  %v789_v44 = vadd.f32 %v788_v32, %v787_v27  ;;  %v802_v45 = vrot.slane %v801_v36, 4  ;;  %v809_v7 = vrot.slane %v808_v40, 4 }
  0x4f   : > { %v776_v46 = vrot.slane %v775_v34, 2  ;;  %v796_v48 = vadd.f32 %v795_v35, %v794_v33  ;;  %v815_v49 = vsel %vm604_vm0, %v11118_v5, 0.0  ;;  %v822_v50 = vsel %vm604_vm0, %v11122_v12, 0.0  ;;  %v9835_v35 = vld [vmem:[%s10953_s30 + $0x80] sm:$0xff]  }
  0x50   : > { %v783_v51 = vrot.slane %v782_v43, 2  ;;  %v790_v52 = vrot.slane %v789_v44, 2  ;;  %v803_v54 = vadd.f32 %v802_v45, %v801_v36  ;;  %v810_v55 = vadd.f32 %v809_v7, %v808_v40 }
  0x51   : > { %v777_v56 = vadd.f32 %v776_v46, %v775_v34  ;;  %v797_v60 = vrot.slane %v796_v48, 2  ;;  %v816_v61 = vrot.slane %v815_v49, 4  ;;  %v823_v10 = vrot.slane %v822_v50, 4 }
  0x52   : > { %v784_v0 = vadd.f32 %v783_v51, %v782_v43  ;;  %v791_v6 = vadd.f32 %v790_v52, %v789_v44  ;;  %v804_v8 = vrot.slane %v803_v54, 2  ;;  %v811_v19 = vrot.slane %v810_v55, 2  ;;  %v9836_v51 = vld [vmem:[%s10953_s30 + $0x88] sm:$0xff]  }
  0x53   : > { %v778_v24 = vrot.slane %v777_v56, 1  ;;  %v798_v25 = vadd.f32 %v797_v60, %v796_v48  ;;  %v817_v26 = vadd.f32 %v816_v61, %v815_v49  ;;  %v824_v27 = vadd.f32 %v823_v10, %v822_v50  ;;  %v9837_v60 = vld [vmem:[%s10953_s30 + $0x90] sm:$0xff]   ;;  %v9838_v10 = vld [vmem:[%s10953_s30 + $0x98] sm:$0xff]  }
  0x54   : > { %v785_v28 = vrot.slane %v784_v0, 1  ;;  %v792_v11 = vrot.slane %v791_v6, 1  ;;  %v805_v32 = vadd.f32 %v804_v8, %v803_v54  ;;  %v812_v33 = vadd.f32 %v811_v19, %v810_v55 }
  0x55   : > { %v779_v34 = vadd.f32 %v778_v24, %v777_v56  ;;  %v799_v36 = vrot.slane %v798_v25, 1  ;;  %v818_v40 = vrot.slane %v817_v26, 2  ;;  %v825_v45 = vrot.slane %v824_v27, 2 }
  0x56   : > { %v786_v43 = vadd.f32 %v785_v28, %v784_v0  ;;  %v793_v44 = vadd.f32 %v792_v11, %v791_v6  ;;  %v806_v7 = vrot.slane %v805_v32, 1  ;;  %v813_v46 = vrot.slane %v812_v33, 1 }
  0x57   : > { %v800_v48 = vadd.f32 %v799_v36, %v798_v25  ;;  %v819_v52 = vadd.f32 %v818_v40, %v817_v26  ;;  %v826_v49 = vadd.f32 %v825_v45, %v824_v27  ;;  %v11145_v50 = vunpack.c.l.bf16 %v9835_v35 }
  0x58   : > { %v807_v54 = vadd.f32 %v806_v7, %v805_v32  ;;  %v814_v61 = vadd.f32 %v813_v46, %v812_v33  ;;  %v1667_v55 = vsel %vm1639_vm1, %v786_v43, %v779_v34  ;;  %v11149_v56 = vunpack.c.h.bf16 %v9835_v35 }
  0x59   : > { %15814 = vst [vmem:[#allocation20_spill] sm:$0xff] %v11145_v50  ;;  %v820_v8 = vrot.slane %v819_v52, 1  ;;  %v827_v19 = vrot.slane %v826_v49, 1  ;;  %v1668_v0 = vsel %vm1641_vm2, %v793_v44, %v1667_v55  ;;  %v11153_v6 = vunpack.c.l.bf16 %v9836_v51 }
  0x5a   : > { %15815 = vst [vmem:[#allocation21_spill] sm:$0xff] %v11149_v56  ;;  %v1669_v24 = vsel %vm1643_vm3, %v800_v48, %v1668_v0  ;;  %v11156_v25 = vunpack.c.h.bf16 %v9836_v51  ;;  %v11158_v26 = vunpack.c.l.bf16 %v9837_v60  ;;  %v11160_v27 = vunpack.c.h.bf16 %v9837_v60 }
  0x5b   : > { %15816 = vst [vmem:[#allocation22_spill] sm:$0xff] %v11153_v6  ;;  %v821_v28 = vadd.f32 %v820_v8, %v819_v52  ;;  %v828_v11 = vadd.f32 %v827_v19, %v826_v49  ;;  %v1670_v32 = vsel %vm1645_vm4, %v807_v54, %v1669_v24  ;;  %v11163_v33 = vunpack.c.l.bf16 %v9838_v10 }
  0x5c   : > { %15817 = vst [vmem:[#allocation23_spill] sm:$0xff] %v11156_v25  ;;  %15818 = vst [vmem:[#allocation24_spill] sm:$0xff] %v11158_v26  ;;  %v1671_v35 = vsel %vm1647_vm5, %v814_v61, %v1670_v32  ;;  %v11166_v34 = vunpack.c.h.bf16 %v9838_v10  ;;  %v829_v36 = vsel %vm604_vm0, %v11145_v50, 0.0  ;;  %v836_v40 = vsel %vm604_vm0, %v11149_v56, 0.0 }
  0x5d   : > { %15819 = vst [vmem:[#allocation25_spill] sm:$0xff] %v11160_v27  ;;  %15820 = vst [vmem:[#allocation26_spill] sm:$0xff] %v11163_v33  ;;  %v1672_v45 = vsel %vm1649_vm6, %v821_v28, %v1671_v35  ;;  %v830_v43 = vrot.slane %v829_v36, 4  ;;  %v837_v44 = vrot.slane %v836_v40, 4  ;;  %v843_v7 = vsel %vm604_vm0, %v11153_v6, 0.0 }
  0x5e   : > { %15821 = vst [vmem:[#allocation27_spill] sm:$0xff] %v11166_v34  ;;  %v1673_v46 = vsel %vm1651_vm7, %v828_v11, %v1672_v45  ;;  %v844_v51 = vrot.slane %v843_v7, 4  ;;  %v850_v48 = vsel %vm604_vm0, %v11156_v25, 0.0  ;;  %v857_v52 = vsel %vm604_vm0, %v11158_v26, 0.0 }
  0x5f   : > { %10067 = vmatmul.mubr.msk.f32.gmra.mrb[2].mxu0 %vm604_vm0, %v1673_v46  ;;  %v831_v49 = vadd.f32 %v830_v43, %v829_v36  ;;  %v838_v60 = vadd.f32 %v837_v44, %v836_v40  ;;  %v851_v54 = vrot.slane %v850_v48, 4  ;;  %v858_v61 = vrot.slane %v857_v52, 4 }
  0x60   : > { %v845_v55 = vadd.f32 %v844_v51, %v843_v7  ;;  %v864_v10 = vsel %vm604_vm0, %v11160_v27, 0.0  ;;  %v871_v8 = vsel %vm604_vm0, %v11163_v33, 0.0  ;;  %v878_v19 = vsel %vm604_vm0, %v11166_v34, 0.0 }
  0x61   : > { %v832_v0 = vrot.slane %v831_v49, 2  ;;  %v839_v24 = vrot.slane %v838_v60, 2  ;;  %v852_v28 = vadd.f32 %v851_v54, %v850_v48  ;;  %v859_v11 = vadd.f32 %v858_v61, %v857_v52 }
  0x62   : > { %v846_v32 = vrot.slane %v845_v55, 2  ;;  %v865_v35 = vrot.slane %v864_v10, 4  ;;  %v872_v36 = vrot.slane %v871_v8, 4  ;;  %v879_v40 = vrot.slane %v878_v19, 4 }
  0x63   : > { %v833_v45 = vadd.f32 %v832_v0, %v831_v49  ;;  %v840_v43 = vadd.f32 %v839_v24, %v838_v60  ;;  %v853_v44 = vrot.slane %v852_v28, 2  ;;  %v860_v7 = vrot.slane %v859_v11, 2  ;;  %v9840_v24 = vld [vmem:[%s10953_s30 + $0xa8] sm:$0xff]  }
  0x64   : > { %v847_v46 = vadd.f32 %v846_v32, %v845_v55  ;;  %v866_v51 = vadd.f32 %v865_v35, %v864_v10  ;;  %v873_v12 = vadd.f32 %v872_v36, %v871_v8  ;;  %v880_v5 = vadd.f32 %v879_v40, %v878_v19 }
  0x65   : > { %v834_v1 = vrot.slane %v833_v45, 1  ;;  %v841_v3 = vrot.slane %v840_v43, 1  ;;  %v854_v63 = vadd.f32 %v853_v44, %v852_v28  ;;  %v861_v59 = vadd.f32 %v860_v7, %v859_v11 }
  0x66   : > { %v848_v48 = vrot.slane %v847_v46, 1  ;;  %v867_v52 = vrot.slane %v866_v51, 2  ;;  %v874_v54 = vrot.slane %v873_v12, 2  ;;  %v881_v61 = vrot.slane %v880_v5, 2 }
  0x67   : > { %v835_v47 = vadd.f32 %v834_v1, %v833_v45  ;;  %v842_v49 = vadd.f32 %v841_v3, %v840_v43  ;;  %v855_v60 = vrot.slane %v854_v63, 1  ;;  %v862_v0 = vrot.slane %v861_v59, 1  ;;  %v9841_v1 = vld [vmem:[%s10953_s30 + $0xb0] sm:$0xff]   ;;  %v9842_v45 = vld [vmem:[%s10953_s30 + $0xb8] sm:$0xff]  }
  0x68   : > { %v849_v55 = vadd.f32 %v848_v48, %v847_v46  ;;  %v868_v10 = vadd.f32 %v867_v52, %v866_v51  ;;  %v875_v8 = vadd.f32 %v874_v54, %v873_v12  ;;  %v882_v19 = vadd.f32 %v881_v61, %v880_v5 }
  0x69   : > { %v856_v32 = vadd.f32 %v855_v60, %v854_v63  ;;  %v863_v35 = vadd.f32 %v862_v0, %v861_v59  ;;  %v1674_v28 = vsel %vm1639_vm1, %v842_v49, %v835_v47  ;;  %v11190_v11 = vunpack.c.l.bf16 %v9839_v57 }
  0x6a   : > { %v869_v36 = vrot.slane %v868_v10, 1  ;;  %v876_v40 = vrot.slane %v875_v8, 1  ;;  %v883_v44 = vrot.slane %v882_v19, 1  ;;  %v1675_v3 = vsel %vm1641_vm2, %v849_v55, %v1674_v28 }
  0x6b   : > { %15822 = vst [vmem:[#allocation28_spill] sm:$0xff] %v11190_v11  ;;  %v1676_v43 = vsel %vm1643_vm3, %v856_v32, %v1675_v3  ;;  %v11196_v7 = vunpack.c.h.bf16 %v9839_v57  ;;  %v11198_v12 = vunpack.c.l.bf16 %v9840_v24  ;;  %v11200_v5 = vunpack.c.h.bf16 %v9840_v24 }
  0x6c   : > { %v870_v59 = vadd.f32 %v869_v36, %v868_v10  ;;  %v877_v63 = vadd.f32 %v876_v40, %v875_v8  ;;  %v884_v47 = vadd.f32 %v883_v44, %v882_v19  ;;  %v1677_v46 = vsel %vm1645_vm4, %v863_v35, %v1676_v43 }
  0x6d   : > { %15823 = vst [vmem:[#allocation29_spill] sm:$0xff] %v11196_v7  ;;  %15824 = vst [vmem:[#allocation30_spill] sm:$0xff] %v11198_v12  ;;  %v11203_v51 = vunpack.c.l.bf16 %v9841_v1  ;;  %v11205_v48 = vunpack.c.h.bf16 %v9841_v1  ;;  %v11207_v52 = vunpack.c.l.bf16 %v9842_v45  ;;  %v11209_v54 = vunpack.c.h.bf16 %v9842_v45 }
  0x6e   : > { %15825 = vst [vmem:[#allocation31_spill] sm:$0xff] %v11200_v5  ;;  %v1678_v57 = vsel %vm1647_vm5, %v870_v59, %v1677_v46  ;;  %v885_v61 = vsel %vm604_vm0, %v11190_v11, 0.0  ;;  %v892_v49 = vsel %vm604_vm0, %v11196_v7, 0.0  ;;  %v899_v60 = vsel %vm604_vm0, %v11198_v12, 0.0 }
  0x6f   : > { %15826 = vst [vmem:[#allocation32_spill] sm:$0xff] %v11203_v51  ;;  %15827 = vst [vmem:[#allocation33_spill] sm:$0xff] %v11205_v48  ;;  %v1679_v0 = vsel %vm1649_vm6, %v877_v63, %v1678_v57  ;;  %v886_v55 = vrot.slane %v885_v61, 4  ;;  %v893_v10 = vrot.slane %v892_v49, 4  ;;  %v900_v8 = vrot.slane %v899_v60, 4 }
  0x70   : > { %15828 = vst [vmem:[#allocation34_spill] sm:$0xff] %v11207_v52  ;;  %15829 = vst [vmem:[#allocation35_spill] sm:$0xff] %v11209_v54  ;;  %v1680_v19 = vsel %vm1651_vm7, %v884_v47, %v1679_v0  ;;  %v906_v24 = vsel %vm604_vm0, %v11200_v5, 0.0  ;;  %v913_v32 = vsel %vm604_vm0, %v11203_v51, 0.0  ;;  %v920_v35 = vsel %vm604_vm0, %v11205_v48, 0.0 }
  0x71   : > { %10069 = vmatprep.mubr.msk.f32.mxu0 %vm604_vm0, %v1680_v19  ;;  %v887_v28 = vadd.f32 %v886_v55, %v885_v61  ;;  %v894_v36 = vadd.f32 %v893_v10, %v892_v49  ;;  %v901_v40 = vadd.f32 %v900_v8, %v899_v60  ;;  %v907_v44 = vrot.slane %v906_v24, 4 }
  0x72   : > { %v914_v3 = vrot.slane %v913_v32, 4  ;;  %v921_v1 = vrot.slane %v920_v35, 4  ;;  %v927_v45 = vsel %vm604_vm0, %v11207_v52, 0.0  ;;  %v934_v43 = vsel %vm604_vm0, %v11209_v54, 0.0 }
  0x73   : > { %v888_v59 = vrot.slane %v887_v28, 2  ;;  %v895_v63 = vrot.slane %v894_v36, 2  ;;  %v902_v47 = vrot.slane %v901_v40, 2  ;;  %v908_v46 = vadd.f32 %v907_v44, %v906_v24 }
  0x74   : > { %v915_v57 = vadd.f32 %v914_v3, %v913_v32  ;;  %v922_v0 = vadd.f32 %v921_v1, %v920_v35  ;;  %v928_v14 = vrot.slane %v927_v45, 4  ;;  %v935_v19 = vrot.slane %v934_v43, 4 }
  0x75   : > { %v889_v61 = vadd.f32 %v888_v59, %v887_v28  ;;  %v896_v49 = vadd.f32 %v895_v63, %v894_v36  ;;  %v903_v60 = vadd.f32 %v902_v47, %v901_v40  ;;  %v909_v55 = vrot.slane %v908_v46, 2 }
  0x76   : > { %v916_v10 = vrot.slane %v915_v57, 2  ;;  %v923_v8 = vrot.slane %v922_v0, 2  ;;  %v929_v13 = vadd.f32 %v928_v14, %v927_v45  ;;  %v936_v9 = vadd.f32 %v935_v19, %v934_v43 }
  0x77   : > { %v890_v4 = vrot.slane %v889_v61, 1  ;;  %v897_v2 = vrot.slane %v896_v49, 1  ;;  %v904_v62 = vrot.slane %v903_v60, 1  ;;  %v910_v58 = vadd.f32 %v909_v55, %v908_v46 }
  0x78   : > { %v917_v53 = vadd.f32 %v916_v10, %v915_v57  ;;  %v924_v42 = vadd.f32 %v923_v8, %v922_v0  ;;  %v930_v41 = vrot.slane %v929_v13, 2  ;;  %v937_v24 = vrot.slane %v936_v9, 2 }
  0x79   : > { %v891_v32 = vadd.f32 %v890_v4, %v889_v61  ;;  %v898_v35 = vadd.f32 %v897_v2, %v896_v49  ;;  %v905_v44 = vadd.f32 %v904_v62, %v903_v60  ;;  %v911_v3 = vrot.slane %v910_v58, 1 }
  0x7a   : > { %v918_v28 = vrot.slane %v917_v53, 1  ;;  %v925_v36 = vrot.slane %v924_v42, 1  ;;  %v931_v40 = vadd.f32 %v930_v41, %v929_v13  ;;  %v938_v1 = vadd.f32 %v937_v24, %v936_v9 }
  0x7b   : > { %v912_v59 = vadd.f32 %v911_v3, %v910_v58  ;;  %v1681_v14 = vsel %vm1639_vm1, %v898_v35, %v891_v32  ;;  %v1085_v45 = vmul.f32 %v11145_v50, %v11145_v50  ;;  %v1086_v43 = vmul.f32 %v11149_v56, %v11149_v56 }
  0x7c   : > { %v919_v63 = vadd.f32 %v918_v28, %v917_v53  ;;  %v926_v47 = vadd.f32 %v925_v36, %v924_v42  ;;  %v932_v46 = vrot.slane %v931_v40, 1  ;;  %v939_v4 = vrot.slane %v938_v1, 1 }
  0x7d   : > { %v1682_v62 = vsel %vm1641_vm2, %v905_v44, %v1681_v14  ;;  %v1087_v2 = vmul.f32 %v11153_v6, %v11153_v6  ;;  %v1088_v41 = vmul.f32 %v11156_v25, %v11156_v25  ;;  %v1089_v58 = vmul.f32 %v11158_v26, %v11158_v26 }
  0x7e   : > { %v933_v9 = vadd.f32 %v932_v46, %v931_v40  ;;  %v940_v13 = vadd.f32 %v939_v4, %v938_v1  ;;  %v1683_v57 = vsel %vm1643_vm3, %v912_v59, %v1682_v62  ;;  %v1090_v42 = vmul.f32 %v11160_v27, %v11160_v27 }
  0x7f   : > { %v1684_v53 = vsel %vm1645_vm4, %v919_v63, %v1683_v57  ;;  %v1091_v0 = vmul.f32 %v11163_v33, %v11163_v33  ;;  %v1092_v19 = vmul.f32 %v11166_v34, %v11166_v34  ;;  %v1341_v61 = vsel %vm604_vm0, %v1085_v45, 0.0  ;;  %v9847_v34 = vld [vmem:[%s10953_s30 + $0xe0] sm:$0xff]  }
  0x80   : > { %v1685_v49 = vsel %vm1647_vm5, %v926_v47, %v1684_v53  ;;  %v1342_v60 = vrot.slane %v1341_v61, 4  ;;  %v1348_v55 = vsel %vm604_vm0, %v1086_v43, 0.0  ;;  %v1355_v10 = vsel %vm604_vm0, %v1087_v2, 0.0 }
  0x81   : > { %v1686_v8 = vsel %vm1649_vm6, %v933_v9, %v1685_v49  ;;  %v1349_v24 = vrot.slane %v1348_v55, 4  ;;  %v1356_v32 = vrot.slane %v1355_v10, 4  ;;  %v1362_v35 = vsel %vm604_vm0, %v1088_v41, 0.0 }
  0x82   : > { %v1687_v44 = vsel %vm1651_vm7, %v940_v13, %v1686_v8  ;;  %v1343_v3 = vadd.f32 %v1342_v60, %v1341_v61  ;;  %v1363_v28 = vrot.slane %v1362_v35, 4  ;;  %v1369_v36 = vsel %vm604_vm0, %v1089_v58, 0.0 }
  0x83   : > { %10070 = vmatmul.mubr.msk.f32.gmra.mrb[4].mxu0 %vm604_vm0, %v1687_v44  ;;  %v1350_v40 = vadd.f32 %v1349_v24, %v1348_v55  ;;  %v1357_v1 = vadd.f32 %v1356_v32, %v1355_v10  ;;  %v1370_v59 = vrot.slane %v1369_v36, 4  ;;  %v1376_v14 = vsel %vm604_vm0, %v1090_v42, 0.0 }
  0x84   : > { %v1344_v45 = vrot.slane %v1343_v3, 2  ;;  %v1364_v43 = vadd.f32 %v1363_v28, %v1362_v35  ;;  %v1377_v63 = vrot.slane %v1376_v14, 4  ;;  %v1383_v47 = vsel %vm604_vm0, %v1091_v0, 0.0 }
  0x85   : > { %v1351_v46 = vrot.slane %v1350_v40, 2  ;;  %v1358_v4 = vrot.slane %v1357_v1, 2  ;;  %v1371_v62 = vadd.f32 %v1370_v59, %v1369_v36  ;;  %v1384_v2 = vrot.slane %v1383_v47, 4 }
  0x86   : > { %v1345_v41 = vadd.f32 %v1344_v45, %v1343_v3  ;;  %v1365_v9 = vrot.slane %v1364_v43, 2  ;;  %v1378_v13 = vadd.f32 %v1377_v63, %v1376_v14  ;;  %v1390_v58 = vsel %vm604_vm0, %v1092_v19, 0.0 }
  0x87   : > { %v1352_v57 = vadd.f32 %v1351_v46, %v1350_v40  ;;  %v1359_v53 = vadd.f32 %v1358_v4, %v1357_v1  ;;  %v1372_v61 = vrot.slane %v1371_v62, 2  ;;  %v1385_v49 = vadd.f32 %v1384_v2, %v1383_v47 }
  0x88   : > { %v1346_v60 = vrot.slane %v1345_v41, 1  ;;  %v1366_v42 = vadd.f32 %v1365_v9, %v1364_v43  ;;  %v1379_v55 = vrot.slane %v1378_v13, 2  ;;  %v1391_v10 = vrot.slane %v1390_v58, 4 }
  0x89   : > { %v1353_v8 = vrot.slane %v1352_v57, 1  ;;  %v1360_v24 = vrot.slane %v1359_v53, 1  ;;  %v1373_v0 = vadd.f32 %v1372_v61, %v1371_v62  ;;  %v1386_v32 = vrot.slane %v1385_v49, 2 }
  0x8a   : > { %v1347_v35 = vadd.f32 %v1346_v60, %v1345_v41  ;;  %v1367_v44 = vrot.slane %v1366_v42, 1  ;;  %v1380_v28 = vadd.f32 %v1379_v55, %v1378_v13  ;;  %v1392_v3 = vadd.f32 %v1391_v10, %v1390_v58 }
  0x8b   : > { %v1354_v36 = vadd.f32 %v1353_v8, %v1352_v57  ;;  %v1361_v59 = vadd.f32 %v1360_v24, %v1359_v53  ;;  %v1374_v14 = vrot.slane %v1373_v0, 1  ;;  %v1387_v19 = vadd.f32 %v1386_v32, %v1385_v49 }
  0x8c   : > { %v1368_v40 = vadd.f32 %v1367_v44, %v1366_v42  ;;  %v1381_v1 = vrot.slane %v1380_v28, 1  ;;  %v1393_v45 = vrot.slane %v1392_v3, 2  ;;  %v1093_v43 = vmul.f32 %v11190_v11, %v11190_v11 }
  0x8d   : > { %v1375_v63 = vadd.f32 %v1374_v14, %v1373_v0  ;;  %v1388_v47 = vrot.slane %v1387_v19, 1  ;;  %v1924_v46 = vsel %vm1639_vm1, %v1354_v36, %v1347_v35  ;;  %v1094_v4 = vmul.f32 %v11196_v7, %v11196_v7 }
  0x8e   : > { %v1382_v62 = vadd.f32 %v1381_v1, %v1380_v28  ;;  %v1394_v2 = vadd.f32 %v1393_v45, %v1392_v3  ;;  %v1925_v41 = vsel %vm1641_vm2, %v1361_v59, %v1924_v46  ;;  %v1095_v9 = vmul.f32 %v11198_v12, %v11198_v12 }
  0x8f   : > { %v1389_v13 = vadd.f32 %v1388_v47, %v1387_v19  ;;  %v1926_v58 = vsel %vm1643_vm3, %v1368_v40, %v1925_v41  ;;  %v1096_v57 = vmul.f32 %v11200_v5, %v11200_v5  ;;  %v1097_v53 = vmul.f32 %v11203_v51, %v11203_v51 }
  0x90   : > { %v1395_v61 = vrot.slane %v1394_v2, 1  ;;  %v1927_v49 = vsel %vm1645_vm4, %v1375_v63, %v1926_v58  ;;  %v1098_v60 = vmul.f32 %v11205_v48, %v11205_v48  ;;  %v1099_v42 = vmul.f32 %v11207_v52, %v11207_v52 }
  0x91   : > { %v1928_v55 = vsel %vm1647_vm5, %v1382_v62, %v1927_v49  ;;  %v1100_v10 = vmul.f32 %v11209_v54, %v11209_v54  ;;  %v1397_v8 = vsel %vm604_vm0, %v1093_v43, 0.0  ;;  %v1404_v24 = vsel %vm604_vm0, %v1094_v4, 0.0 }
  0x92   : > { %v1396_v0 = vadd.f32 %v1395_v61, %v1394_v2  ;;  %v1929_v32 = vsel %vm1649_vm6, %v1389_v13, %v1928_v55  ;;  %v1398_v35 = vrot.slane %v1397_v8, 4  ;;  %v1405_v44 = vrot.slane %v1404_v24, 4 }
  0x93   : > { %v1411_v28 = vsel %vm604_vm0, %v1095_v9, 0.0  ;;  %v1418_v3 = vsel %vm604_vm0, %v1096_v57, 0.0  ;;  %v1425_v36 = vsel %vm604_vm0, %v1097_v53, 0.0  ;;  %v1432_v59 = vsel %vm604_vm0, %v1098_v60, 0.0 }
  0x94   : > { %v1930_v14 = vsel %vm1651_vm7, %v1396_v0, %v1929_v32  ;;  %v1399_v19 = vadd.f32 %v1398_v35, %v1397_v8  ;;  %v1406_v40 = vadd.f32 %v1405_v44, %v1404_v24  ;;  %v1412_v1 = vrot.slane %v1411_v28, 4 }
  0x95   : > { %10097 = vmatprep.mubr.msk.f32.mxu1 %vm604_vm0, %v1930_v14  ;;  %v1419_v45 = vrot.slane %v1418_v3, 4  ;;  %v1426_v43 = vrot.slane %v1425_v36, 4  ;;  %v1433_v63 = vrot.slane %v1432_v59, 4  ;;  %v1439_v47 = vsel %vm604_vm0, %v1099_v42, 0.0 }
  0x96   : > { %v1400_v46 = vrot.slane %v1399_v19, 2  ;;  %v1407_v4 = vrot.slane %v1406_v40, 2  ;;  %v1413_v62 = vadd.f32 %v1412_v1, %v1411_v28  ;;  %v1440_v2 = vrot.slane %v1439_v47, 4 }
  0x97   : > { %v1420_v41 = vadd.f32 %v1419_v45, %v1418_v3  ;;  %v1427_v9 = vadd.f32 %v1426_v43, %v1425_v36  ;;  %v1434_v13 = vadd.f32 %v1433_v63, %v1432_v59  ;;  %v1446_v58 = vsel %vm604_vm0, %v1100_v10, 0.0  ;;  %v9843_v10 = vld [vmem:[%s10953_s30 + $0xc0] sm:$0xff]  }
  0x98   : > { %v1401_v57 = vadd.f32 %v1400_v46, %v1399_v19  ;;  %v1408_v53 = vadd.f32 %v1407_v4, %v1406_v40  ;;  %v1414_v61 = vrot.slane %v1413_v62, 2  ;;  %v1441_v49 = vadd.f32 %v1440_v2, %v1439_v47  ;;  %v9844_v47 = vld [vmem:[%s10953_s30 + $0xc8] sm:$0xff]  }
  0x99   : > { %v1421_v60 = vrot.slane %v1420_v41, 2  ;;  %v1428_v55 = vrot.slane %v1427_v9, 2  ;;  %v1435_v8 = vrot.slane %v1434_v13, 2  ;;  %v1447_v24 = vrot.slane %v1446_v58, 4 }
  0x9a   : > { %v1402_v0 = vrot.slane %v1401_v57, 1  ;;  %v1409_v42 = vrot.slane %v1408_v53, 1  ;;  %v1415_v32 = vadd.f32 %v1414_v61, %v1413_v62  ;;  %v1442_v35 = vrot.slane %v1441_v49, 2 }
  0x9b   : > { %v1422_v44 = vadd.f32 %v1421_v60, %v1420_v41  ;;  %v1429_v28 = vadd.f32 %v1428_v55, %v1427_v9  ;;  %v1436_v3 = vadd.f32 %v1435_v8, %v1434_v13  ;;  %v1448_v36 = vadd.f32 %v1447_v24, %v1446_v58  ;;  %v9845_v41 = vld [vmem:[%s10953_s30 + $0xd0] sm:$0xff]  }
  0x9c   : > { %v1403_v59 = vadd.f32 %v1402_v0, %v1401_v57  ;;  %v1410_v14 = vadd.f32 %v1409_v42, %v1408_v53  ;;  %v1416_v19 = vrot.slane %v1415_v32, 1  ;;  %v1443_v40 = vadd.f32 %v1442_v35, %v1441_v49  ;;  %v9846_v53 = vld [vmem:[%s10953_s30 + $0xd8] sm:$0xff]  }
  0x9d   : > { %v1423_v1 = vrot.slane %v1422_v44, 1  ;;  %v1430_v45 = vrot.slane %v1429_v28, 1  ;;  %v1437_v43 = vrot.slane %v1436_v3, 1  ;;  %v1449_v63 = vrot.slane %v1448_v36, 2 }
  0x9e   : > { %v1417_v46 = vadd.f32 %v1416_v19, %v1415_v32  ;;  %v1444_v4 = vrot.slane %v1443_v40, 1  ;;  %v1931_v62 = vsel %vm1639_vm1, %v1410_v14, %v1403_v59  ;;  %v11298_v2 = vunpack.c.l.bf16 %v9843_v10 }
  0x9f   : > { %v1424_v9 = vadd.f32 %v1423_v1, %v1422_v44  ;;  %v1431_v13 = vadd.f32 %v1430_v45, %v1429_v28  ;;  %v1438_v58 = vadd.f32 %v1437_v43, %v1436_v3  ;;  %v1450_v57 = vadd.f32 %v1449_v63, %v1448_v36 }
  0xa0   : > { %15830 = vst [vmem:[#allocation36_spill] sm:$0xff] %v11298_v2  ;;  %v1445_v61 = vadd.f32 %v1444_v4, %v1443_v40  ;;  %v1932_v49 = vsel %vm1641_vm2, %v1417_v46, %v1931_v62  ;;  %v11303_v60 = vunpack.c.h.bf16 %v9843_v10  ;;  %v11305_v55 = vunpack.c.l.bf16 %v9844_v47 }
  0xa1   : > { %v1451_v8 = vrot.slane %v1450_v57, 1  ;;  %v1933_v24 = vsel %vm1643_vm3, %v1424_v9, %v1932_v49  ;;  %v11308_v0 = vunpack.c.h.bf16 %v9844_v47  ;;  %v11310_v42 = vunpack.c.l.bf16 %v9845_v41 }
  0xa2   : > { %15831 = vst [vmem:[#allocation37_spill] sm:$0xff] %v11303_v60  ;;  %15832 = vst [vmem:[#allocation38_spill] sm:$0xff] %v11305_v55  ;;  %v1934_v32 = vsel %vm1645_vm4, %v1431_v13, %v1933_v24  ;;  %v11313_v35 = vunpack.c.h.bf16 %v9845_v41  ;;  %v11315_v44 = vunpack.c.l.bf16 %v9846_v53  ;;  %v11317_v28 = vunpack.c.h.bf16 %v9846_v53 }
  0xa3   : > { %15833 = vst [vmem:[#allocation39_spill] sm:$0xff] %v11308_v0  ;;  %15834 = vst [vmem:[#allocation40_spill] sm:$0xff] %v11310_v42  ;;  %v1452_v3 = vadd.f32 %v1451_v8, %v1450_v57  ;;  %v1935_v36 = vsel %vm1647_vm5, %v1438_v58, %v1934_v32  ;;  %v941_v10 = vsel %vm604_vm0, %v11298_v2, 0.0  ;;  %v948_v59 = vsel %vm604_vm0, %v11303_v60, 0.0 }
  0xa4   : > { %15835 = vst [vmem:[#allocation41_spill] sm:$0xff] %v11313_v35  ;;  %15836 = vst [vmem:[#allocation42_spill] sm:$0xff] %v11315_v44  ;;  %v1936_v14 = vsel %vm1649_vm6, %v1445_v61, %v1935_v36  ;;  %v942_v19 = vrot.slane %v941_v10, 4  ;;  %v949_v40 = vrot.slane %v948_v59, 4  ;;  %v955_v1 = vsel %vm604_vm0, %v11305_v55, 0.0 }
  0xa5   : > { %15837 = vst [vmem:[#allocation43_spill] sm:$0xff] %v11317_v28  ;;  %v1937_v45 = vsel %vm1651_vm7, %v1452_v3, %v1936_v14  ;;  %v956_v43 = vrot.slane %v955_v1, 4  ;;  %v962_v63 = vsel %vm604_vm0, %v11308_v0, 0.0  ;;  %v969_v47 = vsel %vm604_vm0, %v11310_v42, 0.0 }
  0xa6   : > { %10098 = vmatmul.mubr.msk.f32.vlgmr.msra.gmra.mrb[0].mxu1 %vm604_vm0, %v1937_v45  ;;  %v943_v46 = vadd.f32 %v942_v19, %v941_v10  ;;  %v950_v4 = vadd.f32 %v949_v40, %v948_v59  ;;  %v963_v62 = vrot.slane %v962_v63, 4  ;;  %v970_v41 = vrot.slane %v969_v47, 4 }
  0xa7   : > { %v957_v9 = vadd.f32 %v956_v43, %v955_v1  ;;  %v976_v13 = vsel %vm604_vm0, %v11313_v35, 0.0  ;;  %v983_v58 = vsel %vm604_vm0, %v11315_v44, 0.0  ;;  %v990_v57 = vsel %vm604_vm0, %v11317_v28, 0.0 }
  0xa8   : > { %v944_v53 = vrot.slane %v943_v46, 2  ;;  %v951_v61 = vrot.slane %v950_v4, 2  ;;  %v964_v49 = vadd.f32 %v963_v62, %v962_v63  ;;  %v971_v8 = vadd.f32 %v970_v41, %v969_v47 }
  0xa9   : > { %v958_v24 = vrot.slane %v957_v9, 2  ;;  %v977_v32 = vrot.slane %v976_v13, 4  ;;  %v984_v3 = vrot.slane %v983_v58, 4  ;;  %v991_v36 = vrot.slane %v990_v57, 4 }
  0xaa   : > { %v945_v10 = vadd.f32 %v944_v53, %v943_v46  ;;  %v952_v59 = vadd.f32 %v951_v61, %v950_v4  ;;  %v965_v14 = vrot.slane %v964_v49, 2  ;;  %v972_v19 = vrot.slane %v971_v8, 2  ;;  %v9848_v61 = vld [vmem:[%s10953_s30 + $0xe8] sm:$0xff]  }
  0xab   : > { %v959_v40 = vadd.f32 %v958_v24, %v957_v9  ;;  %v978_v1 = vadd.f32 %v977_v32, %v976_v13  ;;  %v985_v45 = vadd.f32 %v984_v3, %v983_v58  ;;  %v992_v43 = vadd.f32 %v991_v36, %v990_v57 }
  0xac   : > { %v946_v54 = vrot.slane %v945_v10, 1  ;;  %v953_v52 = vrot.slane %v952_v59, 1  ;;  %v966_v48 = vadd.f32 %v965_v14, %v964_v49  ;;  %v973_v5 = vadd.f32 %v972_v19, %v971_v8 }
  0xad   : > { %v960_v63 = vrot.slane %v959_v40, 1  ;;  %v979_v47 = vrot.slane %v978_v1, 2  ;;  %v986_v62 = vrot.slane %v985_v45, 2  ;;  %v993_v41 = vrot.slane %v992_v43, 2 }
  0xae   : > { %v947_v33 = vadd.f32 %v946_v54, %v945_v10  ;;  %v954_v46 = vadd.f32 %v953_v52, %v952_v59  ;;  %v967_v4 = vrot.slane %v966_v48, 1  ;;  %v974_v53 = vrot.slane %v973_v5, 1  ;;  %v9849_v54 = vld [vmem:[%s10953_s30 + $0xf0] sm:$0xff]   ;;  %v9850_v10 = vld [vmem:[%s10953_s30 + $0xf8] sm:$0xff]  }
  0xaf   : > { %v961_v9 = vadd.f32 %v960_v63, %v959_v40  ;;  %v980_v13 = vadd.f32 %v979_v47, %v978_v1  ;;  %v987_v58 = vadd.f32 %v986_v62, %v985_v45  ;;  %v994_v57 = vadd.f32 %v993_v41, %v992_v43 }
  0xb0   : > { %v968_v24 = vadd.f32 %v967_v4, %v966_v48  ;;  %v975_v32 = vadd.f32 %v974_v53, %v973_v5  ;;  %v1688_v49 = vsel %vm1639_vm1, %v954_v46, %v947_v33  ;;  %v11342_v8 = vunpack.c.l.bf16 %v9847_v34 }
  0xb1   : > { %v981_v3 = vrot.slane %v980_v13, 1  ;;  %v988_v36 = vrot.slane %v987_v58, 1  ;;  %v995_v14 = vrot.slane %v994_v57, 1  ;;  %v1689_v52 = vsel %vm1641_vm2, %v961_v9, %v1688_v49 }
  0xb2   : > { %15838 = vst [vmem:[#allocation44_spill] sm:$0xff] %v11342_v8  ;;  %v1690_v59 = vsel %vm1643_vm3, %v968_v24, %v1689_v52  ;;  %v11348_v19 = vunpack.c.h.bf16 %v9847_v34  ;;  %v11350_v40 = vunpack.c.l.bf16 %v9848_v61  ;;  %v11352_v1 = vunpack.c.h.bf16 %v9848_v61 }
  0xb3   : > { %v982_v5 = vadd.f32 %v981_v3, %v980_v13  ;;  %v989_v48 = vadd.f32 %v988_v36, %v987_v58  ;;  %v996_v33 = vadd.f32 %v995_v14, %v994_v57  ;;  %v1691_v45 = vsel %vm1645_vm4, %v975_v32, %v1690_v59 }
  0xb4   : > { %15839 = vst [vmem:[#allocation45_spill] sm:$0xff] %v11348_v19  ;;  %15840 = vst [vmem:[#allocation46_spill] sm:$0xff] %v11350_v40  ;;  %v11355_v43 = vunpack.c.l.bf16 %v9849_v54  ;;  %v11357_v63 = vunpack.c.h.bf16 %v9849_v54  ;;  %v11359_v47 = vunpack.c.l.bf16 %v9850_v10  ;;  %v11361_v62 = vunpack.c.h.bf16 %v9850_v10 }
  0xb5   : > { %15841 = vst [vmem:[#allocation47_spill] sm:$0xff] %v11352_v1  ;;  %v1692_v34 = vsel %vm1647_vm5, %v982_v5, %v1691_v45  ;;  %v997_v41 = vsel %vm604_vm0, %v11342_v8, 0.0  ;;  %v1004_v46 = vsel %vm604_vm0, %v11348_v19, 0.0  ;;  %v1011_v4 = vsel %vm604_vm0, %v11350_v40, 0.0 }
  0xb6   : > { %15842 = vst [vmem:[#allocation48_spill] sm:$0xff] %v11355_v43  ;;  %15843 = vst [vmem:[#allocation49_spill] sm:$0xff] %v11357_v63  ;;  %v1693_v53 = vsel %vm1649_vm6, %v989_v48, %v1692_v34  ;;  %v998_v9 = vrot.slane %v997_v41, 4  ;;  %v1005_v13 = vrot.slane %v1004_v46, 4  ;;  %v1012_v58 = vrot.slane %v1011_v4, 4 }
  0xb7   : > { %15844 = vst [vmem:[#allocation50_spill] sm:$0xff] %v11359_v47  ;;  %15845 = vst [vmem:[#allocation51_spill] sm:$0xff] %v11361_v62  ;;  %v1694_v57 = vsel %vm1651_vm7, %v996_v33, %v1693_v53  ;;  %v1018_v61 = vsel %vm604_vm0, %v11352_v1, 0.0  ;;  %v1025_v24 = vsel %vm604_vm0, %v11355_v43, 0.0  ;;  %v1032_v32 = vsel %vm604_vm0, %v11357_v63, 0.0 }
  0xb8   : > { %10072 = vmatprep.mubr.msk.f32.mxu0 %vm604_vm0, %v1694_v57  ;;  %v999_v49 = vadd.f32 %v998_v9, %v997_v41  ;;  %v1006_v3 = vadd.f32 %v1005_v13, %v1004_v46  ;;  %v1013_v36 = vadd.f32 %v1012_v58, %v1011_v4  ;;  %v1019_v14 = vrot.slane %v1018_v61, 4 }
  0xb9   : > { %v1026_v52 = vrot.slane %v1025_v24, 4  ;;  %v1033_v54 = vrot.slane %v1032_v32, 4  ;;  %v1039_v10 = vsel %vm604_vm0, %v11359_v47, 0.0  ;;  %v1046_v59 = vsel %vm604_vm0, %v11361_v62, 0.0 }
  0xba   : > { %v1000_v5 = vrot.slane %v999_v49, 2  ;;  %v1007_v48 = vrot.slane %v1006_v3, 2  ;;  %v1014_v33 = vrot.slane %v1013_v36, 2  ;;  %v1020_v45 = vadd.f32 %v1019_v14, %v1018_v61 }
  0xbb   : > { %v1027_v34 = vadd.f32 %v1026_v52, %v1025_v24  ;;  %v1034_v53 = vadd.f32 %v1033_v54, %v1032_v32  ;;  %v1040_v27 = vrot.slane %v1039_v10, 4  ;;  %v1047_v57 = vrot.slane %v1046_v59, 4 }
  0xbc   : > { %v1001_v41 = vadd.f32 %v1000_v5, %v999_v49  ;;  %v1008_v46 = vadd.f32 %v1007_v48, %v1006_v3  ;;  %v1015_v4 = vadd.f32 %v1014_v33, %v1013_v36  ;;  %v1021_v9 = vrot.slane %v1020_v45, 2 }
  0xbd   : > { %v1028_v13 = vrot.slane %v1027_v34, 2  ;;  %v1035_v58 = vrot.slane %v1034_v53, 2  ;;  %v1041_v25 = vadd.f32 %v1040_v27, %v1039_v10  ;;  %v1048_v26 = vadd.f32 %v1047_v57, %v1046_v59 }
  0xbe   : > { %v1002_v6 = vrot.slane %v1001_v41, 1  ;;  %v1009_v56 = vrot.slane %v1008_v46, 1  ;;  %v1016_v50 = vrot.slane %v1015_v4, 1  ;;  %v1022_v51 = vadd.f32 %v1021_v9, %v1020_v45 }
  0xbf   : > { %v1029_v12 = vadd.f32 %v1028_v13, %v1027_v34  ;;  %v1036_v7 = vadd.f32 %v1035_v58, %v1034_v53  ;;  %v1042_v11 = vrot.slane %v1041_v25, 2  ;;  %v1049_v61 = vrot.slane %v1048_v26, 2 }
  0xc0   : > { %v1003_v24 = vadd.f32 %v1002_v6, %v1001_v41  ;;  %v1010_v32 = vadd.f32 %v1009_v56, %v1008_v46  ;;  %v1017_v14 = vadd.f32 %v1016_v50, %v1015_v4  ;;  %v1023_v52 = vrot.slane %v1022_v51, 1 }
  0xc1   : > { %v1030_v49 = vrot.slane %v1029_v12, 1  ;;  %v1037_v3 = vrot.slane %v1036_v7, 1  ;;  %v1043_v36 = vadd.f32 %v1042_v11, %v1041_v25  ;;  %v1050_v54 = vadd.f32 %v1049_v61, %v1048_v26 }
  0xc2   : > { %v1024_v5 = vadd.f32 %v1023_v52, %v1022_v51  ;;  %v1695_v27 = vsel %vm1639_vm1, %v1010_v32, %v1003_v24  ;;  %v1101_v10 = vmul.f32 %v11298_v2, %v11298_v2  ;;  %v1102_v59 = vmul.f32 %v11303_v60, %v11303_v60 }
  0xc3   : > { %v1031_v48 = vadd.f32 %v1030_v49, %v1029_v12  ;;  %v1038_v33 = vadd.f32 %v1037_v3, %v1036_v7  ;;  %v1044_v45 = vrot.slane %v1043_v36, 1  ;;  %v1051_v6 = vrot.slane %v1050_v54, 1 }
  0xc4   : > { %v1696_v50 = vsel %vm1641_vm2, %v1017_v14, %v1695_v27  ;;  %v1103_v56 = vmul.f32 %v11305_v55, %v11305_v55  ;;  %v1104_v25 = vmul.f32 %v11308_v0, %v11308_v0  ;;  %v1105_v26 = vmul.f32 %v11310_v42, %v11310_v42 }
  0xc5   : > { %v1045_v11 = vadd.f32 %v1044_v45, %v1043_v36  ;;  %v1052_v51 = vadd.f32 %v1051_v6, %v1050_v54  ;;  %v1697_v34 = vsel %vm1643_vm3, %v1024_v5, %v1696_v50  ;;  %v1106_v7 = vmul.f32 %v11313_v35, %v11313_v35 }
  0xc6   : > { %v1698_v12 = vsel %vm1645_vm4, %v1031_v48, %v1697_v34  ;;  %v1107_v53 = vmul.f32 %v11315_v44, %v11315_v44  ;;  %v1108_v57 = vmul.f32 %v11317_v28, %v11317_v28  ;;  %v1453_v41 = vsel %vm604_vm0, %v1101_v10, 0.0 }
  0xc7   : > { %v1699_v46 = vsel %vm1647_vm5, %v1038_v33, %v1698_v12  ;;  %v1454_v4 = vrot.slane %v1453_v41, 4  ;;  %v1460_v9 = vsel %vm604_vm0, %v1102_v59, 0.0  ;;  %v1467_v13 = vsel %vm604_vm0, %v1103_v56, 0.0 }
  0xc8   : > { %v1700_v58 = vsel %vm1649_vm6, %v1045_v11, %v1699_v46  ;;  %v1461_v61 = vrot.slane %v1460_v9, 4  ;;  %v1468_v24 = vrot.slane %v1467_v13, 4  ;;  %v1474_v32 = vsel %vm604_vm0, %v1104_v25, 0.0 }
  0xc9   : > { %v1701_v14 = vsel %vm1651_vm7, %v1052_v51, %v1700_v58  ;;  %v1455_v52 = vadd.f32 %v1454_v4, %v1453_v41  ;;  %v1475_v49 = vrot.slane %v1474_v32, 4  ;;  %v1481_v3 = vsel %vm604_vm0, %v1105_v26, 0.0 }
  0xca   : > { %10073 = vmatmul.mubr.msk.f32.gmra.mrb[6].mxu0 %vm604_vm0, %v1701_v14  ;;  %v1462_v36 = vadd.f32 %v1461_v61, %v1460_v9  ;;  %v1469_v54 = vadd.f32 %v1468_v24, %v1467_v13  ;;  %v1482_v5 = vrot.slane %v1481_v3, 4  ;;  %v1488_v27 = vsel %vm604_vm0, %v1106_v7, 0.0 }
  0xcb   : > { %v1456_v10 = vrot.slane %v1455_v52, 2  ;;  %v1476_v59 = vadd.f32 %v1475_v49, %v1474_v32  ;;  %v1489_v48 = vrot.slane %v1488_v27, 4  ;;  %v1495_v33 = vsel %vm604_vm0, %v1107_v53, 0.0 }
  0xcc   : > { %v1463_v45 = vrot.slane %v1462_v36, 2  ;;  %v1470_v6 = vrot.slane %v1469_v54, 2  ;;  %v1483_v50 = vadd.f32 %v1482_v5, %v1481_v3  ;;  %v1496_v56 = vrot.slane %v1495_v33, 4 }
  0xcd   : > { %v1457_v25 = vadd.f32 %v1456_v10, %v1455_v52  ;;  %v1477_v11 = vrot.slane %v1476_v59, 2  ;;  %v1490_v51 = vadd.f32 %v1489_v48, %v1488_v27  ;;  %v1502_v26 = vsel %vm604_vm0, %v1108_v57, 0.0 }
  0xce   : > { %v1464_v34 = vadd.f32 %v1463_v45, %v1462_v36  ;;  %v1471_v12 = vadd.f32 %v1470_v6, %v1469_v54  ;;  %v1484_v41 = vrot.slane %v1483_v50, 2  ;;  %v1497_v46 = vadd.f32 %v1496_v56, %v1495_v33 }
  0xcf   : > { %v1458_v4 = vrot.slane %v1457_v25, 1  ;;  %v1478_v7 = vadd.f32 %v1477_v11, %v1476_v59  ;;  %v1491_v9 = vrot.slane %v1490_v51, 2  ;;  %v1503_v13 = vrot.slane %v1502_v26, 4 }
  0xd0   : > { %v1465_v58 = vrot.slane %v1464_v34, 1  ;;  %v1472_v61 = vrot.slane %v1471_v12, 1  ;;  %v1485_v53 = vadd.f32 %v1484_v41, %v1483_v50  ;;  %v1498_v24 = vrot.slane %v1497_v46, 2 }
  0xd1   : > { %v1459_v32 = vadd.f32 %v1458_v4, %v1457_v25  ;;  %v1479_v14 = vrot.slane %v1478_v7, 1  ;;  %v1492_v49 = vadd.f32 %v1491_v9, %v1490_v51  ;;  %v1504_v52 = vadd.f32 %v1503_v13, %v1502_v26 }
  0xd2   : > { %v1466_v3 = vadd.f32 %v1465_v58, %v1464_v34  ;;  %v1473_v5 = vadd.f32 %v1472_v61, %v1471_v12  ;;  %v1486_v27 = vrot.slane %v1485_v53, 1  ;;  %v1499_v57 = vadd.f32 %v1498_v24, %v1497_v46 }
  0xd3   : > { %v1480_v36 = vadd.f32 %v1479_v14, %v1478_v7  ;;  %v1493_v54 = vrot.slane %v1492_v49, 1  ;;  %v1505_v10 = vrot.slane %v1504_v52, 2  ;;  %v1109_v59 = vmul.f32 %v11342_v8, %v11342_v8 }
  0xd4   : > { %v1487_v48 = vadd.f32 %v1486_v27, %v1485_v53  ;;  %v1500_v33 = vrot.slane %v1499_v57, 1  ;;  %v1938_v45 = vsel %vm1639_vm1, %v1466_v3, %v1459_v32  ;;  %v1110_v6 = vmul.f32 %v11348_v19, %v11348_v19 }
  0xd5   : > { %v1494_v50 = vadd.f32 %v1493_v54, %v1492_v49  ;;  %v1506_v56 = vadd.f32 %v1505_v10, %v1504_v52  ;;  %v1939_v25 = vsel %vm1641_vm2, %v1473_v5, %v1938_v45  ;;  %v1111_v11 = vmul.f32 %v11350_v40, %v11350_v40 }
  0xd6   : > { %v1501_v51 = vadd.f32 %v1500_v33, %v1499_v57  ;;  %v1940_v26 = vsel %vm1643_vm3, %v1480_v36, %v1939_v25  ;;  %v1112_v34 = vmul.f32 %v11352_v1, %v11352_v1  ;;  %v1113_v12 = vmul.f32 %v11355_v43, %v11355_v43 }
  0xd7   : > { %v1507_v41 = vrot.slane %v1506_v56, 1  ;;  %v1941_v46 = vsel %vm1645_vm4, %v1487_v48, %v1940_v26  ;;  %v1114_v4 = vmul.f32 %v11357_v63, %v11357_v63  ;;  %v1115_v7 = vmul.f32 %v11359_v47, %v11359_v47 }
  0xd8   : > { %v1942_v9 = vsel %vm1647_vm5, %v1494_v50, %v1941_v46  ;;  %v1116_v13 = vmul.f32 %v11361_v62, %v11361_v62  ;;  %v1509_v58 = vsel %vm604_vm0, %v1109_v59, 0.0  ;;  %v1516_v61 = vsel %vm604_vm0, %v1110_v6, 0.0 }
  0xd9   : > { %v1508_v53 = vadd.f32 %v1507_v41, %v1506_v56  ;;  %v1943_v24 = vsel %vm1649_vm6, %v1501_v51, %v1942_v9  ;;  %v1510_v32 = vrot.slane %v1509_v58, 4  ;;  %v1517_v14 = vrot.slane %v1516_v61, 4 }
  0xda   : > { %v1523_v49 = vsel %vm604_vm0, %v1111_v11, 0.0  ;;  %v1530_v52 = vsel %vm604_vm0, %v1112_v34, 0.0  ;;  %v1537_v3 = vsel %vm604_vm0, %v1113_v12, 0.0  ;;  %v1544_v5 = vsel %vm604_vm0, %v1114_v4, 0.0 }
  0xdb   : > { %v1944_v27 = vsel %vm1651_vm7, %v1508_v53, %v1943_v24  ;;  %v1511_v57 = vadd.f32 %v1510_v32, %v1509_v58  ;;  %v1518_v36 = vadd.f32 %v1517_v14, %v1516_v61  ;;  %v1524_v54 = vrot.slane %v1523_v49, 4 }
  0xdc   : > { %10100 = vmatprep.mubr.msk.f32.mxu1 %vm604_vm0, %v1944_v27  ;;  %v1531_v10 = vrot.slane %v1530_v52, 4  ;;  %v1538_v59 = vrot.slane %v1537_v3, 4  ;;  %v1545_v48 = vrot.slane %v1544_v5, 4  ;;  %v1551_v33 = vsel %vm604_vm0, %v1115_v7, 0.0 }
  0xdd   : > { %v1512_v45 = vrot.slane %v1511_v57, 2  ;;  %v1519_v6 = vrot.slane %v1518_v36, 2  ;;  %v1525_v50 = vadd.f32 %v1524_v54, %v1523_v49  ;;  %v1552_v56 = vrot.slane %v1551_v33, 4 }
  0xde   : > { %v1532_v25 = vadd.f32 %v1531_v10, %v1530_v52  ;;  %v1539_v11 = vadd.f32 %v1538_v59, %v1537_v3  ;;  %v1546_v51 = vadd.f32 %v1545_v48, %v1544_v5  ;;  %v1558_v26 = vsel %vm604_vm0, %v1116_v13, 0.0 }
  0xdf   : > { %v1513_v34 = vadd.f32 %v1512_v45, %v1511_v57  ;;  %v1520_v12 = vadd.f32 %v1519_v6, %v1518_v36  ;;  %v1526_v41 = vrot.slane %v1525_v50, 2  ;;  %v1553_v46 = vadd.f32 %v1552_v56, %v1551_v33 }
  0xe0   : > { %v1533_v4 = vrot.slane %v1532_v25, 2  ;;  %v1540_v9 = vrot.slane %v1539_v11, 2  ;;  %v1547_v58 = vrot.slane %v1546_v51, 2  ;;  %v1559_v61 = vrot.slane %v1558_v26, 4 }
  0xe1   : > { %v1514_v53 = vrot.slane %v1513_v34, 1  ;;  %v1521_v24 = vrot.slane %v1520_v12, 1  ;;  %v1527_v7 = vadd.f32 %v1526_v41, %v1525_v50  ;;  %v1554_v32 = vrot.slane %v1553_v46, 2 }
  0xe2   : > { %v1534_v14 = vadd.f32 %v1533_v4, %v1532_v25  ;;  %v1541_v49 = vadd.f32 %v1540_v9, %v1539_v11  ;;  %v1548_v27 = vadd.f32 %v1547_v58, %v1546_v51  ;;  %v1560_v52 = vadd.f32 %v1559_v61, %v1558_v26 }
  0xe3   : > { %v1515_v3 = vadd.f32 %v1514_v53, %v1513_v34  ;;  %v1522_v5 = vadd.f32 %v1521_v24, %v1520_v12  ;;  %v1528_v54 = vrot.slane %v1527_v7, 1  ;;  %v1555_v13 = vadd.f32 %v1554_v32, %v1553_v46 }
  0xe4   : > { %v1535_v57 = vrot.slane %v1534_v14, 1  ;;  %v1542_v36 = vrot.slane %v1541_v49, 1  ;;  %v1549_v10 = vrot.slane %v1548_v27, 1  ;;  %v1561_v59 = vrot.slane %v1560_v52, 2 }
  0xe5   : > { %v1529_v48 = vadd.f32 %v1528_v54, %v1527_v7  ;;  %v1556_v33 = vrot.slane %v1555_v13, 1  ;;  %v1945_v45 = vsel %vm1639_vm1, %v1522_v5, %v1515_v3  ;;  %v1053_v6 = vmul.f32 %v10960_v15, %v10960_v15 }
  0xe6   : > { %v1536_v50 = vadd.f32 %v1535_v57, %v1534_v14  ;;  %v1543_v56 = vadd.f32 %v1542_v36, %v1541_v49  ;;  %v1550_v25 = vadd.f32 %v1549_v10, %v1548_v27  ;;  %v1562_v11 = vadd.f32 %v1561_v59, %v1560_v52 }
  0xe7   : > { %v1557_v51 = vadd.f32 %v1556_v33, %v1555_v13  ;;  %v1946_v26 = vsel %vm1641_vm2, %v1529_v48, %v1945_v45  ;;  %v1054_v34 = vmul.f32 %v10962_v16, %v10962_v16  ;;  %v1055_v12 = vmul.f32 %v10964_v17, %v10964_v17 }
  0xe8   : > { %v1563_v41 = vrot.slane %v1562_v11, 1  ;;  %v1947_v46 = vsel %vm1643_vm3, %v1536_v50, %v1946_v26  ;;  %v1056_v4 = vmul.f32 %v10966_v18, %v10966_v18  ;;  %v1057_v9 = vmul.f32 %v10970_v20, %v10970_v20 }
  0xe9   : > { %v1948_v58 = vsel %vm1645_vm4, %v1543_v56, %v1947_v46  ;;  %v1058_v61 = vmul.f32 %v10972_v21, %v10972_v21  ;;  %v1059_v53 = vmul.f32 %v10974_v22, %v10974_v22  ;;  %v1060_v24 = vmul.f32 %v10976_v23, %v10976_v23 }
  0xea   : > { %v1564_v7 = vadd.f32 %v1563_v41, %v1562_v11  ;;  %v1949_v32 = vsel %vm1647_vm5, %v1550_v25, %v1948_v58  ;;  %v1117_v14 = vsel %vm604_vm0, %v1053_v6, 0.0  ;;  %v1124_v49 = vsel %vm604_vm0, %v1054_v34, 0.0 }
  0xeb   : > { %v1950_v27 = vsel %vm1649_vm6, %v1557_v51, %v1949_v32  ;;  %v1118_v52 = vrot.slane %v1117_v14, 4  ;;  %v1125_v3 = vrot.slane %v1124_v49, 4  ;;  %v1131_v5 = vsel %vm604_vm0, %v1055_v12, 0.0 }
  0xec   : > { %v1951_v54 = vsel %vm1651_vm7, %v1564_v7, %v1950_v27  ;;  %v1132_v13 = vrot.slane %v1131_v5, 4  ;;  %v1138_v57 = vsel %vm604_vm0, %v1056_v4, 0.0  ;;  %v1145_v36 = vsel %vm604_vm0, %v1057_v9, 0.0 }
  0xed   : > { %10101 = vmatmul.mubr.msk.f32.gmra.mrb[2].mxu1 %vm604_vm0, %v1951_v54  ;;  %v1119_v10 = vadd.f32 %v1118_v52, %v1117_v14  ;;  %v1126_v59 = vadd.f32 %v1125_v3, %v1124_v49  ;;  %v1139_v48 = vrot.slane %v1138_v57, 4  ;;  %v1146_v33 = vrot.slane %v1145_v36, 4 }
  0xee   : > { %v1133_v45 = vadd.f32 %v1132_v13, %v1131_v5  ;;  %v1152_v6 = vsel %vm604_vm0, %v1058_v61, 0.0  ;;  %v1159_v50 = vsel %vm604_vm0, %v1059_v53, 0.0  ;;  %v1166_v56 = vsel %vm604_vm0, %v1060_v24, 0.0 }
  0xef   : > { %v1120_v25 = vrot.slane %v1119_v10, 2  ;;  %v1127_v11 = vrot.slane %v1126_v59, 2  ;;  %v1140_v51 = vadd.f32 %v1139_v48, %v1138_v57  ;;  %v1147_v26 = vadd.f32 %v1146_v33, %v1145_v36 }
  0xf0   : > { %v1134_v34 = vrot.slane %v1133_v45, 2  ;;  %v1153_v12 = vrot.slane %v1152_v6, 4  ;;  %v1160_v41 = vrot.slane %v1159_v50, 4  ;;  %v1167_v46 = vrot.slane %v1166_v56, 4 }
  0xf1   : > { %v1121_v4 = vadd.f32 %v1120_v25, %v1119_v10  ;;  %v1128_v9 = vadd.f32 %v1127_v11, %v1126_v59  ;;  %v1141_v58 = vrot.slane %v1140_v51, 2  ;;  %v1148_v7 = vrot.slane %v1147_v26, 2 }
  0xf2   : > { %v1135_v32 = vadd.f32 %v1134_v34, %v1133_v45  ;;  %v1154_v14 = vadd.f32 %v1153_v12, %v1152_v6  ;;  %v1161_v49 = vadd.f32 %v1160_v41, %v1159_v50  ;;  %v1168_v61 = vadd.f32 %v1167_v46, %v1166_v56 }
  0xf3   : > { %v1122_v27 = vrot.slane %v1121_v4, 1  ;;  %v1129_v53 = vrot.slane %v1128_v9, 1  ;;  %v1142_v52 = vadd.f32 %v1141_v58, %v1140_v51  ;;  %v1149_v24 = vadd.f32 %v1148_v7, %v1147_v26 }
  0xf4   : > { %v1136_v3 = vrot.slane %v1135_v32, 1  ;;  %v1155_v5 = vrot.slane %v1154_v14, 2  ;;  %v1162_v54 = vrot.slane %v1161_v49, 2  ;;  %v1169_v13 = vrot.slane %v1168_v61, 2 }
  0xf5   : > { %v1123_v57 = vadd.f32 %v1122_v27, %v1121_v4  ;;  %v1130_v36 = vadd.f32 %v1129_v53, %v1128_v9  ;;  %v1143_v48 = vrot.slane %v1142_v52, 1  ;;  %v1150_v33 = vrot.slane %v1149_v24, 1  ;;  %v15846_v27 = vld [vmem:[#allocation2_spill] sm:$0xff] }
  0xf6   : > { %v1137_v10 = vadd.f32 %v1136_v3, %v1135_v32  ;;  %v1156_v59 = vadd.f32 %v1155_v5, %v1154_v14  ;;  %v1163_v25 = vadd.f32 %v1162_v54, %v1161_v49  ;;  %v1170_v11 = vadd.f32 %v1169_v13, %v1168_v61 }
  0xf7   : > { %v1144_v45 = vadd.f32 %v1143_v48, %v1142_v52  ;;  %v1151_v6 = vadd.f32 %v1150_v33, %v1149_v24  ;;  %v1896_v50 = vsel %vm1639_vm1, %v1130_v36, %v1123_v57  ;;  %v1061_v56 = vmul.f32 %v11009_v29, %v11009_v29  ;;  %v15847_v52 = vld [vmem:[#allocation3_spill] sm:$0xff] }
  0xf8   : > { %v1157_v51 = vrot.slane %v1156_v59, 1  ;;  %v1164_v26 = vrot.slane %v1163_v25, 1  ;;  %v1171_v34 = vrot.slane %v1170_v11, 1  ;;  %v1897_v12 = vsel %vm1641_vm2, %v1137_v10, %v1896_v50 }
  0xf9   : > { %v1898_v41 = vsel %vm1643_vm3, %v1144_v45, %v1897_v12  ;;  %v1062_v46 = vmul.f32 %v11011_v30, %v11011_v30  ;;  %v1063_v4 = vmul.f32 %v11013_v31, %v11013_v31  ;;  %v1064_v9 = vmul.f32 %v11016_v37, %v11016_v37 }
  0xfa   : > { %v1158_v58 = vadd.f32 %v1157_v51, %v1156_v59  ;;  %v1165_v7 = vadd.f32 %v1164_v26, %v1163_v25  ;;  %v1172_v32 = vadd.f32 %v1171_v34, %v1170_v11  ;;  %v1899_v14 = vsel %vm1645_vm4, %v1151_v6, %v1898_v41 }
  0xfb   : > { %v1065_v49 = vmul.f32 %v11018_v38, %v11018_v38  ;;  %v1066_v61 = vmul.f32 %v11020_v39, %v11020_v39  ;;  %v1067_v53 = vmul.f32 %v15846_v27, %v15846_v27  ;;  %v1068_v24 = vmul.f32 %v15847_v52, %v15847_v52 }
  0xfc   : > { %v1900_v3 = vsel %vm1647_vm5, %v1158_v58, %v1899_v14  ;;  %v1173_v5 = vsel %vm604_vm0, %v1061_v56, 0.0  ;;  %v1180_v54 = vsel %vm604_vm0, %v1062_v46, 0.0  ;;  %v1187_v13 = vsel %vm604_vm0, %v1063_v4, 0.0 }
  0xfd   : > { %v1901_v57 = vsel %vm1649_vm6, %v1165_v7, %v1900_v3  ;;  %v1174_v36 = vrot.slane %v1173_v5, 4  ;;  %v1181_v48 = vrot.slane %v1180_v54, 4  ;;  %v1188_v33 = vrot.slane %v1187_v13, 4 }
  0xfe   : > { %v1902_v10 = vsel %vm1651_vm7, %v1172_v32, %v1901_v57  ;;  %v1194_v59 = vsel %vm604_vm0, %v1064_v9, 0.0  ;;  %v1201_v25 = vsel %vm604_vm0, %v1065_v49, 0.0  ;;  %v1208_v11 = vsel %vm604_vm0, %v1066_v61, 0.0 }
  0xff   : > { %10091 = vmatprep.mubr.msk.f32.mxu0 %vm604_vm0, %v1902_v10  ;;  %v1175_v45 = vadd.f32 %v1174_v36, %v1173_v5  ;;  %v1182_v6 = vadd.f32 %v1181_v48, %v1180_v54  ;;  %v1189_v50 = vadd.f32 %v1188_v33, %v1187_v13  ;;  %v1195_v56 = vrot.slane %v1194_v59, 4 }
 0x100   : > { %v1202_v51 = vrot.slane %v1201_v25, 4  ;;  %v1209_v26 = vrot.slane %v1208_v11, 4  ;;  %v1215_v34 = vsel %vm604_vm0, %v1067_v53, 0.0  ;;  %v1222_v12 = vsel %vm604_vm0, %v1068_v24, 0.0 }
 0x101   : > { %v1176_v41 = vrot.slane %v1175_v45, 2  ;;  %v1183_v46 = vrot.slane %v1182_v6, 2  ;;  %v1190_v4 = vrot.slane %v1189_v50, 2  ;;  %v1196_v9 = vadd.f32 %v1195_v56, %v1194_v59 }
 0x102   : > { %v1203_v58 = vadd.f32 %v1202_v51, %v1201_v25  ;;  %v1210_v7 = vadd.f32 %v1209_v26, %v1208_v11  ;;  %v1216_v32 = vrot.slane %v1215_v34, 4  ;;  %v1223_v14 = vrot.slane %v1222_v12, 4 }
 0x103   : > { %v1177_v49 = vadd.f32 %v1176_v41, %v1175_v45  ;;  %v1184_v61 = vadd.f32 %v1183_v46, %v1182_v6  ;;  %v1191_v3 = vadd.f32 %v1190_v4, %v1189_v50  ;;  %v1197_v5 = vrot.slane %v1196_v9, 2  ;;  %v15849_v4 = vld [vmem:[#allocation5_spill] sm:$0xff] }
 0x104   : > { %v1204_v54 = vrot.slane %v1203_v58, 2  ;;  %v1211_v13 = vrot.slane %v1210_v7, 2  ;;  %v1217_v57 = vadd.f32 %v1216_v32, %v1215_v34  ;;  %v1224_v36 = vadd.f32 %v1223_v14, %v1222_v12  ;;  %v15848_v12 = vld [vmem:[#allocation4_spill] sm:$0xff] }
 0x105   : > { %v1178_v48 = vrot.slane %v1177_v49, 1  ;;  %v1185_v53 = vrot.slane %v1184_v61, 1  ;;  %v1192_v33 = vrot.slane %v1191_v3, 1  ;;  %v1198_v24 = vadd.f32 %v1197_v5, %v1196_v9 }
 0x106   : > { %v1205_v10 = vadd.f32 %v1204_v54, %v1203_v58  ;;  %v1212_v62 = vadd.f32 %v1211_v13, %v1210_v7  ;;  %v1218_v47 = vrot.slane %v1217_v57, 2  ;;  %v1225_v59 = vrot.slane %v1224_v36, 2  ;;  %v15852_v54 = vld [vmem:[#allocation8_spill] sm:$0xff] }
 0x107   : > { %v1179_v25 = vadd.f32 %v1178_v48, %v1177_v49  ;;  %v1186_v11 = vadd.f32 %v1185_v53, %v1184_v61  ;;  %v1193_v56 = vadd.f32 %v1192_v33, %v1191_v3  ;;  %v1199_v51 = vrot.slane %v1198_v24, 1  ;;  %v15850_v61 = vld [vmem:[#allocation6_spill] sm:$0xff]  ;;  %v15853_v53 = vld [vmem:[#allocation9_spill] sm:$0xff] }
 0x108   : > { %v1206_v45 = vrot.slane %v1205_v10, 1  ;;  %v1213_v6 = vrot.slane %v1212_v62, 1  ;;  %v1219_v50 = vadd.f32 %v1218_v47, %v1217_v57  ;;  %v1226_v26 = vadd.f32 %v1225_v59, %v1224_v36  ;;  %v15851_v47 = vld [vmem:[#allocation7_spill] sm:$0xff] }
 0x109   : > { %v1200_v41 = vadd.f32 %v1199_v51, %v1198_v24  ;;  %v1903_v34 = vsel %vm1639_vm1, %v1186_v11, %v1179_v25  ;;  %v1069_v46 = vmul.f32 %v15848_v12, %v15848_v12  ;;  %v1070_v9 = vmul.f32 %v15849_v4, %v15849_v4  ;;  %v15854_v24 = vld [vmem:[#allocation10_spill] sm:$0xff]  ;;  %v15855_v59 = vld [vmem:[#allocation11_spill] sm:$0xff] }
 0x10a   : > { %v1207_v58 = vadd.f32 %v1206_v45, %v1205_v10  ;;  %v1214_v7 = vadd.f32 %v1213_v6, %v1212_v62  ;;  %v1220_v32 = vrot.slane %v1219_v50, 1  ;;  %v1227_v14 = vrot.slane %v1226_v26, 1 }
 0x10b   : > { %v1904_v49 = vsel %vm1641_vm2, %v1193_v56, %v1903_v34  ;;  %v1071_v3 = vmul.f32 %v15850_v61, %v15850_v61  ;;  %v1072_v5 = vmul.f32 %v15851_v47, %v15851_v47  ;;  %v1073_v13 = vmul.f32 %v15852_v54, %v15852_v54  ;;  %v15888_v61 = vld [vmem:[#allocation32_spill] sm:$0xff] }
 0x10c   : > { %v1221_v57 = vadd.f32 %v1220_v32, %v1219_v50  ;;  %v1228_v36 = vadd.f32 %v1227_v14, %v1226_v26  ;;  %v1905_v48 = vsel %vm1643_vm3, %v1200_v41, %v1904_v49  ;;  %v1074_v62 = vmul.f32 %v15853_v53, %v15853_v53 }
 0x10d   : > { %v1906_v33 = vsel %vm1645_vm4, %v1207_v58, %v1905_v48  ;;  %v1075_v10 = vmul.f32 %v15854_v24, %v15854_v24  ;;  %v1076_v25 = vmul.f32 %v15855_v59, %v15855_v59  ;;  %v1229_v11 = vsel %vm604_vm0, %v1069_v46, 0.0 }
 0x10e   : > { %v1907_v56 = vsel %vm1647_vm5, %v1214_v7, %v1906_v33  ;;  %v1230_v51 = vrot.slane %v1229_v11, 4  ;;  %v1236_v45 = vsel %vm604_vm0, %v1070_v9, 0.0  ;;  %v1243_v6 = vsel %vm604_vm0, %v1071_v3, 0.0 }
 0x10f   : > { %v1908_v50 = vsel %vm1649_vm6, %v1221_v57, %v1907_v56  ;;  %v1237_v26 = vrot.slane %v1236_v45, 4  ;;  %v1244_v41 = vrot.slane %v1243_v6, 4  ;;  %v1250_v34 = vsel %vm604_vm0, %v1072_v5, 0.0  ;;  %v11537_v58 = vpop.f32.mrb[0].mxu0 }
 0x110   : > { %v1909_v32 = vsel %vm1651_vm7, %v1228_v36, %v1908_v50  ;;  %v1231_v14 = vadd.f32 %v1230_v51, %v1229_v11  ;;  %v1251_v49 = vrot.slane %v1250_v34, 4  ;;  %v1257_v46 = vsel %vm604_vm0, %v1073_v13, 0.0  ;;  %v11541_v7 = vpop.f32.mrb[1].mxu0 }
 0x111   : > { %10092 = vmatmul.mubr.msk.f32.vlgmr.msra.gmra.mrb[8].mxu0 %vm604_vm0, %v1909_v32  ;;  %v1238_v9 = vadd.f32 %v1237_v26, %v1236_v45  ;;  %v1245_v3 = vadd.f32 %v1244_v41, %v1243_v6  ;;  %v1258_v48 = vrot.slane %v1257_v46, 4  ;;  %v1264_v57 = vsel %vm604_vm0, %v1074_v62, 0.0 }
 0x112   : > { %v1232_v33 = vrot.slane %v1231_v14, 2  ;;  %v1252_v56 = vadd.f32 %v1251_v49, %v1250_v34  ;;  %v1265_v5 = vrot.slane %v1264_v57, 4  ;;  %v1271_v63 = vsel %vm604_vm0, %v1075_v10, 0.0 }
 0x113   : > { %v1239_v1 = vrot.slane %v1238_v9, 2  ;;  %v1246_v36 = vrot.slane %v1245_v3, 2  ;;  %v1259_v11 = vadd.f32 %v1258_v48, %v1257_v46  ;;  %v1272_v51 = vrot.slane %v1271_v63, 4 }
 0x114   : > { %v1233_v50 = vadd.f32 %v1232_v33, %v1231_v14  ;;  %v1253_v13 = vrot.slane %v1252_v56, 2  ;;  %v1266_v28 = vadd.f32 %v1265_v5, %v1264_v57  ;;  %v1278_v44 = vsel %vm604_vm0, %v1076_v25, 0.0 }
 0x115   : > { %v1240_v32 = vadd.f32 %v1239_v1, %v1238_v9  ;;  %v1247_v45 = vadd.f32 %v1246_v36, %v1245_v3  ;;  %v1260_v6 = vrot.slane %v1259_v11, 2  ;;  %v1273_v26 = vadd.f32 %v1272_v51, %v1271_v63  ;;  %v15856_v63 = vld [vmem:[#allocation12_spill] sm:$0xff] }
 0x116   : > { %v1234_v41 = vrot.slane %v1233_v50, 1  ;;  %v1254_v62 = vadd.f32 %v1253_v13, %v1252_v56  ;;  %v1267_v35 = vrot.slane %v1266_v28, 2  ;;  %v1279_v34 = vrot.slane %v1278_v44, 4 }
 0x117   : > { %v1241_v49 = vrot.slane %v1240_v32, 1  ;;  %v1248_v0 = vrot.slane %v1247_v45, 1  ;;  %v1261_v10 = vadd.f32 %v1260_v6, %v1259_v11  ;;  %v1274_v42 = vrot.slane %v1273_v26, 2  ;;  %v15857_v11 = vld [vmem:[#allocation13_spill] sm:$0xff] }
 0x118   : > { %v1235_v55 = vadd.f32 %v1234_v41, %v1233_v50  ;;  %v1255_v46 = vrot.slane %v1254_v62, 1  ;;  %v1268_v48 = vadd.f32 %v1267_v35, %v1266_v28  ;;  %v1280_v14 = vadd.f32 %v1279_v34, %v1278_v44  ;;  %v15860_v41 = vld [vmem:[#allocation16_spill] sm:$0xff] }
 0x119   : > { %v1242_v33 = vadd.f32 %v1241_v49, %v1240_v32  ;;  %v1249_v57 = vadd.f32 %v1248_v0, %v1247_v45  ;;  %v1262_v5 = vrot.slane %v1261_v10, 1  ;;  %v1275_v25 = vadd.f32 %v1274_v42, %v1273_v26  ;;  %v15858_v0 = vld [vmem:[#allocation14_spill] sm:$0xff]  ;;  %v15859_v45 = vld [vmem:[#allocation15_spill] sm:$0xff]  ;;  %v15861_v49 = vld [vmem:[#allocation17_spill] sm:$0xff] }
 0x11a   : > { %v1256_v1 = vadd.f32 %v1255_v46, %v1254_v62  ;;  %v1269_v9 = vrot.slane %v1268_v48, 1  ;;  %v1281_v3 = vrot.slane %v1280_v14, 2  ;;  %v1077_v56 = vmul.f32 %v15856_v63, %v15856_v63  ;;  %v15862_v46 = vld [vmem:[#allocation18_spill] sm:$0xff] }
 0x11b   : > { %v1263_v36 = vadd.f32 %v1262_v5, %v1261_v10  ;;  %v1276_v51 = vrot.slane %v1275_v25, 1  ;;  %v1910_v13 = vsel %vm1639_vm1, %v1242_v33, %v1235_v55  ;;  %v1078_v50 = vmul.f32 %v15857_v11, %v15857_v11  ;;  %v15863_v33 = vld [vmem:[#allocation19_spill] sm:$0xff] }
 0x11c   : > { %v1270_v6 = vadd.f32 %v1269_v9, %v1268_v48  ;;  %v1282_v35 = vadd.f32 %v1281_v3, %v1280_v14  ;;  %v1911_v44 = vsel %vm1641_vm2, %v1249_v57, %v1910_v13  ;;  %v1079_v42 = vmul.f32 %v15858_v0, %v15858_v0 }
 0x11d   : > { %v1277_v28 = vadd.f32 %v1276_v51, %v1275_v25  ;;  %v1912_v32 = vsel %vm1643_vm3, %v1256_v1, %v1911_v44  ;;  %v1080_v26 = vmul.f32 %v15859_v45, %v15859_v45  ;;  %v1081_v62 = vmul.f32 %v15860_v41, %v15860_v41 }
 0x11e   : > { %v1283_v55 = vrot.slane %v1282_v35, 1  ;;  %v1913_v34 = vsel %vm1645_vm4, %v1263_v36, %v1912_v32  ;;  %v1082_v10 = vmul.f32 %v15861_v49, %v15861_v49  ;;  %v1083_v48 = vmul.f32 %v15862_v46, %v15862_v46 }
 0x11f   : > { %v1914_v14 = vsel %vm1647_vm5, %v1270_v6, %v1913_v34  ;;  %v1084_v57 = vmul.f32 %v15863_v33, %v15863_v33  ;;  %v1285_v5 = vsel %vm604_vm0, %v1077_v56, 0.0  ;;  %v1292_v25 = vsel %vm604_vm0, %v1078_v50, 0.0 }
 0x120   : > { %v1284_v1 = vadd.f32 %v1283_v55, %v1282_v35  ;;  %v1915_v9 = vsel %vm1649_vm6, %v1277_v28, %v1914_v14  ;;  %v1286_v3 = vrot.slane %v1285_v5, 4  ;;  %v1293_v36 = vrot.slane %v1292_v25, 4 }
 0x121   : > { %v1299_v51 = vsel %vm604_vm0, %v1079_v42, 0.0  ;;  %v1306_v13 = vsel %vm604_vm0, %v1080_v26, 0.0  ;;  %v1313_v44 = vsel %vm604_vm0, %v1081_v62, 0.0  ;;  %v1320_v6 = vsel %vm604_vm0, %v1082_v10, 0.0 }
 0x122   : > { %v1916_v32 = vsel %vm1651_vm7, %v1284_v1, %v1915_v9  ;;  %v1287_v34 = vadd.f32 %v1286_v3, %v1285_v5  ;;  %v1294_v60 = vadd.f32 %v1293_v36, %v1292_v25  ;;  %v1300_v56 = vrot.slane %v1299_v51, 4 }
 0x123   : > { %10094 = vmatprep.mubr.msk.f32.mxu0 %vm604_vm0, %v1916_v32  ;;  %v1307_v50 = vrot.slane %v1306_v13, 4  ;;  %v1314_v35 = vrot.slane %v1313_v44, 4  ;;  %v1321_v28 = vrot.slane %v1320_v6, 4  ;;  %v1327_v55 = vsel %vm604_vm0, %v1083_v48, 0.0 }
 0x124   : > { %v1288_v14 = vrot.slane %v1287_v34, 2  ;;  %v1295_v42 = vrot.slane %v1294_v60, 2  ;;  %v1301_v2 = vadd.f32 %v1300_v56, %v1299_v51  ;;  %v1328_v26 = vrot.slane %v1327_v55, 4 }
 0x125   : > { %v1308_v43 = vadd.f32 %v1307_v50, %v1306_v13  ;;  %v1315_v62 = vadd.f32 %v1314_v35, %v1313_v44  ;;  %v1322_v40 = vadd.f32 %v1321_v28, %v1320_v6  ;;  %v1334_v10 = vsel %vm604_vm0, %v1084_v57, 0.0 }
 0x126   : > { %v1289_v1 = vadd.f32 %v1288_v14, %v1287_v34  ;;  %v1296_v5 = vadd.f32 %v1295_v42, %v1294_v60  ;;  %v1302_v25 = vrot.slane %v1301_v2, 2  ;;  %v1329_v9 = vadd.f32 %v1328_v26, %v1327_v55 }
 0x127   : > { %v1309_v3 = vrot.slane %v1308_v43, 2  ;;  %v1316_v36 = vrot.slane %v1315_v62, 2  ;;  %v1323_v32 = vrot.slane %v1322_v40, 2  ;;  %v1335_v19 = vrot.slane %v1334_v10, 4 }
 0x128   : > { %v1290_v8 = vrot.slane %v1289_v1, 1  ;;  %v1297_v33 = vrot.slane %v1296_v5, 1  ;;  %v1303_v48 = vadd.f32 %v1302_v25, %v1301_v2  ;;  %v1330_v46 = vrot.slane %v1329_v9, 2  ;;  %v1573_v2 = vld [vmem:[%s15615_s4] sm:$0xff] }
 0x129   : > { %v1310_v49 = vadd.f32 %v1309_v3, %v1308_v43  ;;  %v1317_v51 = vadd.f32 %v1316_v36, %v1315_v62  ;;  %v1324_v56 = vadd.f32 %v1323_v32, %v1322_v40  ;;  %v1336_v13 = vadd.f32 %v1335_v19, %v1334_v10  ;;  %v1574_v19 = vld [vmem:[%s15615_s4 + $0x8] sm:$0xff] }
 0x12a   : > { %v1291_v44 = vadd.f32 %v1290_v8, %v1289_v1  ;;  %v1298_v6 = vadd.f32 %v1297_v33, %v1296_v5  ;;  %v1304_v50 = vrot.slane %v1303_v48, 1  ;;  %v1331_v57 = vadd.f32 %v1330_v46, %v1329_v9 }
 0x12b   : > { %v1311_v34 = vrot.slane %v1310_v49, 1  ;;  %v1318_v60 = vrot.slane %v1317_v51, 1  ;;  %v1325_v35 = vrot.slane %v1324_v56, 1  ;;  %v1337_v28 = vrot.slane %v1336_v13, 2 }
 0x12c   : > { %v1305_v55 = vadd.f32 %v1304_v50, %v1303_v48  ;;  %v1332_v14 = vrot.slane %v1331_v57, 1  ;;  %v1917_v42 = vsel %vm1639_vm1, %v1298_v6, %v1291_v44  ;;  %v10359_v1 = vpack.c.bf16 %v1574_v19, %v1573_v2 }
 0x12d   : > { %v1312_v8 = vadd.f32 %v1311_v34, %v1310_v49  ;;  %v1319_v40 = vadd.f32 %v1318_v60, %v1317_v51  ;;  %v1326_v43 = vadd.f32 %v1325_v35, %v1324_v56  ;;  %v1338_v46 = vadd.f32 %v1337_v28, %v1336_v13 }
 0x12e   : > { %v1333_v33 = vadd.f32 %v1332_v14, %v1331_v57  ;;  %v1918_v26 = vsel %vm1641_vm2, %v1305_v55, %v1917_v42  ;;  %v1824_v3 = vmul.f32 0.03125, %v11541_v7  ;;  %10360 = vmatprep.subr.bf16.mxu0 %v10359_v1  ;;  %10364 = vmatprep.subr.bf16.mxu1 %v10359_v1  ;;  %v1825_v56 = vmul.f32 0.03125, %v11537_v58 }
 0x12f   : > { %v1339_v62 = vrot.slane %v1338_v46, 1  ;;  %v1919_v10 = vsel %vm1643_vm3, %v1312_v8, %v1918_v26  ;;  %10362 = vmatpush3.bf16.msra.mxu0 %v10359_v1  ;;  %10366 = vmatpush3.bf16.msra.mxu1 %v10359_v1 }
 0x130   : > { %v1920_v5 = vsel %vm1645_vm4, %v1319_v40, %v1919_v10 }
 0x131   : > { %v1340_v25 = vadd.f32 %v1339_v62, %v1338_v46  ;;  %v1921_v9 = vsel %vm1647_vm5, %v1326_v43, %v1920_v5 }
 0x132   : > { %v1922_v49 = vsel %vm1649_vm6, %v1333_v33, %v1921_v9  ;;  %v10068_v36 = vpop.f32.mrb[2].mxu0 }
 0x133   : > { %v1923_v32 = vsel %vm1651_vm7, %v1340_v25, %v1922_v49  ;;  %v1794_v48 = vpop.f32.mrb[3].mxu0  ;;  %v1827_v7 = vmul.f32 0.03125, %v10068_v36  ;;  %v2082_v25 = vmul.f32 %v1825_v56, %v1825_v56  ;;  %v2081_v36 = vmul.f32 %v1824_v3, %v1824_v3 }
 0x134   : > { %10095 = vmatmul.mubr.msk.f32.gmra.mrb[10].mxu0 %vm604_vm0, %v1923_v32  ;;  %v1826_v51 = vmul.f32 0.03125, %v1794_v48 }
 0x135   : > { %10107 = vmatprep.mubr.msk.f32.mxu0 %vm2105_vm8, %v1824_v3  ;;  %v10476_v3 = vld [vmem:[%s15616_s5 + $0x4] ss:$8 sps:$4 sm:$0xff]  }
 0x136   : > { %4316 = vmatprep.subr.bf16.mxu0 %v10476_v3  ;;  %v10480_v3 = vld [vmem:[%s15616_s5 + $0x14] ss:$8 sps:$4 sm:$0xff]  }
 0x138   : > { %10108 = vmatmul.mubr.msk.f32.vlgmr.msra.gmra.mrb[12].mxu0 %vm2105_vm8, %v1825_v56  ;;  %v10474_v56 = vld [vmem:[%s15616_s5] ss:$8 sps:$4 sm:$0xff]  }
 0x139   : > { %10110 = vmatprep.mubr.msk.f32.mxu0 %vm2105_vm8, %v1826_v51  ;;  %4317 = vmatpush1.bf16.msra.mxu0 %v10474_v56  ;;  %v10478_v56 = vld [vmem:[%s15616_s5 + $0x10] ss:$8 sps:$4 sm:$0xff]  }
 0x13a   : > { %4318 = vmatprep.subr.bf16.mxu0 %v10480_v3 }
 0x13c   : > { %10111 = vmatmul.mubr.msk.f32.gmra.mrb[14].mxu0 %vm2105_vm8, %v1827_v7 }
 0x13d   : > { %4319 = vmatpush1.bf16.msra.mxu0 %v10478_v56 }
 0x156   : > { %v10071_v13 = vpop.f32.mrb[4].mxu0 }
 0x157   : > { %v1804_v44 = vpop.f32.mrb[5].mxu0  ;;  %v1829_v50 = vmul.f32 0.03125, %v10071_v13 }
 0x158   : > { %v1828_v6 = vmul.f32 0.03125, %v1804_v44 }
 0x159   : > { %v2086_v57 = vmul.f32 %v1829_v50, %v1829_v50 }
 0x15a   : > { %10113 = vmatprep.mubr.msk.f32.mxu0 %vm2105_vm8, %v1828_v6  ;;  %v2085_v34 = vmul.f32 %v1828_v6, %v1828_v6 }
 0x15b   : > { %10114 = vmatmul.mubr.msk.f32.gmra.mrb[16].mxu0 %vm2105_vm8, %v1829_v50 }
 0x179   : > { %v10099_v60 = vpop.f32.mrb[0].mxu1 }
 0x17a   : > { %v2078_v35 = vmul.f32 0.03125, %v10099_v60  ;;  %v2054_v58 = vpop.f32.mrb[1].mxu1 }
 0x17b   : > { %v2077_v28 = vmul.f32 0.03125, %v2054_v58 }
 0x17c   : > { %v2094_v55 = vsub.f32 %v2078_v35, %v2086_v57  ;;  %v10477_v35 = vld [vmem:[%s15617_s6] sm:$0xff]  }
 0x17d   : > { %v2093_v14 = vsub.f32 %v2077_v28, %v2085_v34  ;;  %10135 = vmatprep.subr.bf16.mxu1 %v10477_v35  ;;  %v2084_v28 = vmul.f32 %v1827_v7, %v1827_v7 }
 0x19d   : > { %v10074_v42 = vpop.f32.mrb[6].mxu0 }
 0x19e   : > { %v1814_v2 = vpop.f32.mrb[7].mxu0  ;;  %v1831_v8 = vmul.f32 0.03125, %v10074_v42 }
 0x19f   : > { %v1830_v19 = vmul.f32 0.03125, %v1814_v2 }
 0x1a0   : > { %v2088_v40 = vmul.f32 %v1831_v8, %v1831_v8 }
 0x1a1   : > { %10116 = vmatprep.mubr.msk.f32.mxu0 %vm2105_vm8, %v1830_v19  ;;  %v2087_v43 = vmul.f32 %v1830_v19, %v1830_v19  ;;  %v2083_v19 = vmul.f32 %v1826_v51, %v1826_v51 }
 0x1a2   : > { %10117 = vmatmul.mubr.msk.f32.gmra.mrb[18].mxu0 %vm2105_vm8, %v1831_v8 }
 0x1c0   : > { %v10102_v46 = vpop.f32.mrb[2].mxu1 }
 0x1c1   : > { %v2080_v33 = vmul.f32 0.03125, %v10102_v46  ;;  %v2064_v26 = vpop.f32.mrb[3].mxu1 }
 0x1c2   : > { %v2079_v62 = vmul.f32 0.03125, %v2064_v26 }
 0x1c3   : > { %v2096_v10 = vsub.f32 %v2080_v33, %v2088_v40 }
 0x1c4   : > { %v2095_v1 = vsub.f32 %v2079_v62, %v2087_v43  ;;  %v2101_v43 = vmax.f32 %v2093_v14, 0.0 }
 0x1e4   : > { %v10093_v5 = vpop.f32.mrb[8].mxu0 }
 0x1e5   : > { %v2074_v9 = vmul.f32 0.03125, %v10093_v5  ;;  %v2034_v49 = vpop.f32.mrb[9].mxu0 }
 0x1e6   : > { %v2073_v32 = vmul.f32 0.03125, %v2034_v49  ;;  %v2239_v49 = vadd.f32 1e-05, %v2101_v43  ;;  %v10489_v43 = vld [vmem:[%s15617_s6 + $0x18] sm:$0xff]  }
 0x1e7   : > { %v2090_v48 = vsub.f32 %v2074_v9, %v2082_v25  ;;  %v2102_v25 = vmax.f32 %v2094_v55, 0.0 }
 0x1e8   : > { %v2089_v13 = vsub.f32 %v2073_v32, %v2081_v36  ;;  %v2103_v36 = vmax.f32 %v2095_v1, 0.0 }
 0x1e9   : > { %v2098_v44 = vmax.f32 %v2090_v48, 0.0  ;;  %v2240_v51 = vadd.f32 1e-05, %v2102_v25  ;;  %v2392_v25 = vlaneseq }
 0x1ea   : > { %v2097_v6 = vmax.f32 %v2089_v13, 0.0  ;;  %v2104_v13 = vmax.f32 %v2096_v10, 0.0  ;;  %v2241_v14 = vadd.f32 1e-05, %v2103_v36 }
 0x1eb   : > { %v2236_v50 = vadd.f32 1e-05, %v2098_v44 }
 0x1ec   : > { %v2235_v57 = vadd.f32 1e-05, %v2097_v6  ;;  %v2242_v44 = vadd.f32 1e-05, %v2104_v13 }
 0x1ee   : > { %10509 = vrsqrt.f32 %v2235_v57 }
 0x1ef   : > { %10511 = vrsqrt.f32 %v2236_v50 }
 0x1f8   : > { %v10510_v34 = vpop.eup %10509 }
 0x1f9   : > { %v10512_v60 = vpop.eup %10511  ;;  %10123 = vmatprep.mubr.msk.f32.mxu1 %vm2105_vm8, %v10510_v34 }
 0x1fa   : > { %10124 = vmatmul.mubr.msk.f32.vlgmr.msra.gmra.mrb[4].mxu1 %vm2105_vm8, %v10512_v60 }
 0x1fb   : > { %10136 = vmatpush3.bf16.msra.mxu1 %v10477_v35  ;;  %v10481_v35 = vld [vmem:[%s15617_s6 + $0x8] sm:$0xff]  }
 0x1fc   : > { %10137 = vmatprep.subr.bf16.mxu1 %v10481_v35 }
 0x1ff   : > { %10138 = vmatpush3.bf16.msra.mxu1 %v10481_v35 }
 0x207   : > { %v10096_v58 = vpop.f32.mrb[10].mxu0 }
 0x208   : > { %v2076_v42 = vmul.f32 0.03125, %v10096_v58  ;;  %v2044_v2 = vpop.f32.mrb[11].mxu0 }
 0x209   : > { %v2075_v8 = vmul.f32 0.03125, %v2044_v2  ;;  %v10482_v2 = vld [vmem:[%s15616_s5 + $0x20] ss:$8 sps:$4 sm:$0xff]  }
 0x20a   : > { %v2092_v40 = vsub.f32 %v2076_v42, %v2084_v28  ;;  %v10484_v28 = vld [vmem:[%s15616_s5 + $0x24] ss:$8 sps:$4 sm:$0xff]  }
 0x20b   : > { %v2091_v46 = vsub.f32 %v2075_v8, %v2083_v19  ;;  %v11614_v33 = vpop.f32.mrb[12].mxu0  ;;  %4320 = vmatprep.subr.bf16.mxu0 %v10484_v28  ;;  %v10485_v19 = vld [vmem:[%s15617_s6 + $0x10] sm:$0xff]  }
 0x20c   : > { %v2100_v26 = vmax.f32 %v2092_v40, 0.0  ;;  %v11616_v62 = vpop.f32.mrb[13].mxu0  ;;  %4321 = vmatpush1.bf16.msra.mxu0 %v10482_v2  ;;  %10139 = vmatprep.subr.bf16.mxu1 %v10485_v19  ;;  %v10488_v8 = vld [vmem:[%s15616_s5 + $0x34] ss:$8 sps:$4 sm:$0xff]   ;;  %v10486_v40 = vld [vmem:[%s15616_s5 + $0x30] ss:$8 sps:$4 sm:$0xff]  }
 0x20d   : > { %v2099_v5 = vmax.f32 %v2091_v46, 0.0  ;;  %10140 = vmatpush3.bf16.msra.mxu1 %v10485_v19  ;;  %4322 = vmatprep.subr.bf16.mxu0 %v10488_v8  ;;  %v15708_v46 = vmov 0  }
 0x20e   : > { %v2238_v9 = vadd.f32 1e-05, %v2100_v26  ;;  %10141 = vmatprep.subr.bf16.mxu1 %v10489_v43  ;;  %4348 = vmatprep.mubr.bf16.mxu0 %v15708_v46  ;;  %v10826_v26 = vmov 1966171168  }
 0x20f   : > { %v2237_v32 = vadd.f32 1e-05, %v2099_v5  ;;  %v11618_v48 = vpop.f32.mrb[14].mxu0  ;;  %v2390_v5 = vunpack.c.l.s4 %v10826_v26 }
 0x210   : > { %v11620_v7 = vpop.f32.mrb[15].mxu0  ;;  %4323 = vmatpush1.bf16.msra.mxu0 %v10486_v40  ;;  %v2535_v26 = vcombine.high %v11618_v48, %v11618_v48 }
 0x211   : > { %10513 = vrsqrt.f32 %v2237_v32  ;;  %10142 = vmatpush3.bf16.msra.mxu1 %v10489_v43  ;;  %v2437_v32 = vcombine.high %v11614_v33, %v11614_v33 }
 0x212   : > { %10515 = vrsqrt.f32 %v2238_v9  ;;  %v2391_v9 = vunpack.c.0.s8 %v2390_v5 }
 0x213   : > { %10517 = vrsqrt.f32 %v2239_v49  ;;  %v2393_v49 = vshrl.u32 %v2392_v25, 7 }
 0x214   : > { %10519 = vrsqrt.f32 %v2240_v51 }
 0x215   : > { %10521 = vrsqrt.f32 %v2241_v14  ;;  %v11664_v36 = vsub.s32 %v2391_v9, %v2393_v49 }
 0x216   : > { %10523 = vrsqrt.f32 %v2242_v44  ;;  %v2388_v44 = vcombine.high %v11616_v62, %v11616_v62 }
 0x217   : > { %v2444_v51 = vrot.slane %v11614_v33, %v11664_v36  ;;  %v2451_v13 = vrot.slane %v2437_v32, %v11664_v36  ;;  %v2542_v9 = vrot.slane %v11618_v48, %v11664_v36 }
 0x218   : > { %v2402_v33 = vrot.slane %v2388_v44, %v11664_v36 }
 0x219   : > { %v2452_v14 = vcombine.high %v2444_v51, %v2444_v51 }
 0x21a   : > { %v2404_v8 = vcombine.high %v2402_v33, %v2402_v33  ;;  %v2418_v43 = vrot.slane %v2402_v33, %v11664_v36 }
 0x21b   : > { %v10514_v6 = vpop.eup %10513 }
 0x21c   : > { %v10516_v55 = vpop.eup %10515  ;;  %10126 = vmatprep.mubr.msk.f32.mxu1 %vm2105_vm8, %v10514_v6  ;;  %v2460_v6 = vrot.slane %v2444_v51, %v11664_v36 }
 0x21d   : > { %v10518_v1 = vpop.eup %10517  ;;  %10127 = vmatmul.mubr.msk.f32.gmra.mrb[6].mxu1 %vm2105_vm8, %v10516_v55  ;;  %v2395_v55 = vrot.slane %v11616_v62, %v11664_v36 }
 0x21e   : > { %10129 = vmatprep.mubr.msk.f32.mxu1 %vm2105_vm8, %v10518_v1  ;;  %v10520_v50 = vpop.eup %10519  ;;  %v2453_v1 = vcombine.high %v2451_v13, %v2451_v13  ;;  %v2482_v56 = vcombine.high %v2460_v6, %v2460_v6 }
 0x21f   : > { %v10522_v57 = vpop.eup %10521  ;;  %v2403_v3 = vcombine.high %v2395_v55, %v2395_v55  ;;  %v2411_v62 = vrot.slane %v2395_v55, %v11664_v36 }
 0x220   : > { %v10524_v10 = vpop.eup %10523  ;;  %v11682_v35 = vrot.slane %v2453_v1, %v11664_v36  ;;  %v2434_v1 = vcombine.high %v2418_v43, %v2418_v43 }
 0x221   : > { %10130 = vmatmul.mubr.msk.f32.gmra.mrb[8].mxu1 %vm2105_vm8, %v10520_v50  ;;  %v2474_v50 = vrot.slane %v2452_v14, %v11664_v36  ;;  %v2425_v25 = vrot.slane %v2403_v3, %v11664_v36  ;;  %v2433_v48 = vcombine.high %v2411_v62, %v2411_v62  ;;  %v2550_v3 = vcombine.high %v2542_v9, %v2542_v9 }
 0x222   : > { %10132 = vmatprep.mubr.msk.f32.mxu1 %vm2105_vm8, %v10522_v57  ;;  %v11677_v57 = vsub.s32 0, %v2393_v49  ;;  %v2485_v49 = vcombine.high %v11682_v35, %v11682_v35 }
 0x223   : > { %v2484_v28 = vcombine.high %v2474_v50, %v2474_v50  ;;  %v2435_v33 = vcombine.high %v2425_v25, %v2425_v25  ;;  %v2572_v46 = vrot.slane %v2550_v3, %v11664_v36 }
 0x224   : > { %v2815_v2 = vrot.slane %v2460_v6, %v11677_v57  ;;  %v2819_v40 = vrot.slane %v2474_v50, %v11677_v57  ;;  %v11691_v5 = vrot.slane %v2482_v56, %v11677_v57  ;;  %v11711_v6 = vrot.slane %v2404_v8, %v11664_v36 }
 0x225   : > { %10133 = vmatmul.mubr.msk.f32.gmra.mrb[10].mxu1 %vm2105_vm8, %v10524_v10  ;;  %v2467_v10 = vrot.slane %v2451_v13, %v11664_v36  ;;  %v11699_v32 = vrot.slane %v2484_v28, %v11677_v57  ;;  %v2549_v50 = vrot.slane %v2535_v26, %v11664_v36  ;;  %v2783_v56 = vrot.slane %v2411_v62, %v11677_v57 }
 0x226   : > { %v11703_v13 = vsub.f32 %v11009_v29, %v2815_v2  ;;  %v11714_v55 = vsub.f32 %v11011_v30, %v2819_v40  ;;  %v2486_v29 = vcombine.high %v11620_v7, %v11620_v7  ;;  %v2787_v2 = vrot.slane %v2425_v25, %v11677_v57 }
 0x227   : > { %v2483_v19 = vcombine.high %v2467_v10, %v2467_v10  ;;  %v2831_v51 = vrot.slane %v2467_v10, %v11677_v57  ;;  %v2799_v30 = vrot.slane %v2418_v43, %v11677_v57  ;;  %v11730_v8 = vrot.slane %v2485_v49, %v11677_v57 }
 0x228   : > { %v2436_v40 = vcombine.high %v11711_v6, %v11711_v6  ;;  %v11735_v26 = vrot.slane %v2433_v48, %v11677_v57  ;;  %v2558_v62 = vrot.slane %v2542_v9, %v11664_v36  ;;  %v11741_v25 = vrot.slane %v2434_v1, %v11677_v57 }
 0x229   : > { %v11708_v44 = vrot.slane %v2483_v19, %v11677_v57  ;;  %v11723_v28 = vsub.f32 %v11018_v38, %v2831_v51  ;;  %v2493_v19 = vrot.slane %v11620_v7, %v11664_v36  ;;  %v2551_v43 = vcombine.high %v2549_v50, %v2549_v50 }
 0x22a   : > { %v2500_v7 = vrot.slane %v2486_v29, %v11664_v36  ;;  %v11745_v49 = vrot.slane %v2435_v33, %v11677_v57  ;;  %v11748_v51 = vsub.f32 %v10960_v15, %v2783_v56  ;;  %v2565_v48 = vrot.slane %v2549_v50, %v11664_v36 }
 0x22b   : > { %v11753_v9 = vsub.f32 %v10962_v16, %v2787_v2  ;;  %v11756_v10 = vsub.f32 %v10970_v20, %v2799_v30  ;;  %v2501_v1 = vcombine.high %v2493_v19, %v2493_v19  ;;  %v11761_v33 = vrot.slane %v2436_v40, %v11677_v57 }
 0x22c   : > { %v2580_v56 = vcombine.high %v2558_v62, %v2558_v62  ;;  %v2879_v50 = vrot.slane %v2558_v62, %v11677_v57  ;;  %v11767_v3 = vrot.slane %v2551_v43, %v11664_v36  ;;  %v2502_v16 = vcombine.high %v2500_v7, %v2500_v7 }
 0x22d   : > { %v2581_v40 = vcombine.high %v2565_v48, %v2565_v48  ;;  %v2582_v38 = vcombine.high %v2572_v46, %v2572_v46  ;;  %v2509_v15 = vrot.slane %v2493_v19, %v11664_v36  ;;  %v2883_v14 = vrot.slane %v2572_v46, %v11677_v57 }
 0x22e   : > { %v11628_v34 = vpop.f32.mrb[16].mxu0  ;;  %15864 = vst [vmem:[#allocation2_spill] sm:$0xff] %v11767_v3  ;;  %v2516_v62 = vrot.slane %v2500_v7, %v11664_v36  ;;  %v2523_v43 = vrot.slane %v2501_v1, %v11664_v36  ;;  %v2895_v59 = vrot.slane %v2565_v48, %v11677_v57  ;;  %v11785_v24 = vsub.f32 %v15856_v63, %v2879_v50 }
 0x22f   : > { %v11630_v60 = vpop.f32.mrb[17].mxu0  ;;  %v2633_v29 = vcombine.high %v11628_v34, %v11628_v34  ;;  %v2640_v20 = vrot.slane %v11628_v34, %v11664_v36  ;;  %v11781_v34 = vrot.slane %v2580_v56, %v11677_v57  ;;  %v2583_v46 = vcombine.high %v11767_v3, %v11767_v3 }
 0x230   : > { %v2584_v2 = vcombine.high %v11630_v60, %v11630_v60  ;;  %15866 = vst [vmem:[#allocation4_spill] sm:$0xff] %v11785_v24  ;;  %v2591_v30 = vrot.slane %v11630_v60, %v11664_v36  ;;  %v11792_v19 = vrot.slane %v2502_v16, %v11664_v36  ;;  %v11801_v63 = vrot.slane %v2581_v40, %v11677_v57 }
 0x231   : > { %v2647_v45 = vrot.slane %v2633_v29, %v11664_v36  ;;  %15865 = vst [vmem:[#allocation3_spill] sm:$0xff] %v11781_v34  ;;  %v2648_v7 = vcombine.high %v2640_v20, %v2640_v20  ;;  %v11796_v29 = vrot.slane %v2582_v38, %v11677_v57  ;;  %v2531_v56 = vcombine.high %v2509_v15, %v2509_v15 }
 0x232   : > { %v2598_v1 = vrot.slane %v2584_v2, %v11664_v36  ;;  %15868 = vst [vmem:[#allocation7_spill] sm:$0xff] %v11801_v63  ;;  %v11804_v60 = vsub.f32 %v15857_v11, %v2883_v14  ;;  %v2533_v50 = vcombine.high %v2523_v43, %v2523_v43  ;;  %v2656_v16 = vrot.slane %v2640_v20, %v11664_v36 }
 0x233   : > { %15867 = vst [vmem:[#allocation5_spill] sm:$0xff] %v11796_v29  ;;  %v2649_v24 = vcombine.high %v2647_v45, %v2647_v45  ;;  %v11810_v38 = vsub.f32 %v15860_v41, %v2895_v59  ;;  %v2532_v29 = vcombine.high %v2516_v62, %v2516_v62  ;;  %v2599_v53 = vcombine.high %v2591_v30, %v2591_v30 }
 0x234   : > { %15869 = vst [vmem:[#allocation8_spill] sm:$0xff] %v11804_v60  ;;  %v11813_v48 = vrot.slane %v2583_v46, %v11677_v57  ;;  %v2534_v40 = vcombine.high %v11792_v19, %v11792_v19  ;;  %v2670_v11 = vrot.slane %v2648_v7, %v11664_v36  ;;  %v2600_v14 = vcombine.high %v2598_v1, %v2598_v1 }
 0x235   : > { %15870 = vst [vmem:[#allocation12_spill] sm:$0xff] %v11810_v38  ;;  %v2847_v60 = vrot.slane %v2509_v15, %v11677_v57  ;;  %v2851_v20 = vrot.slane %v2523_v43, %v11677_v57  ;;  %v11821_v2 = vrot.slane %v2531_v56, %v11677_v57  ;;  %v2663_v59 = vrot.slane %v2647_v45, %v11664_v36 }
 0x236   : > { %15871 = vst [vmem:[#allocation13_spill] sm:$0xff] %v11813_v48  ;;  %v11825_v41 = vrot.slane %v2533_v50, %v11677_v57  ;;  %v2863_v46 = vrot.slane %v2516_v62, %v11677_v57  ;;  %v11829_v38 = vrot.slane %v2649_v24, %v11664_v36  ;;  %v2678_v34 = vcombine.high %v2656_v16, %v2656_v16 }
 0x237   : > { %15872 = vst [vmem:[#allocation16_spill] sm:$0xff] %v11821_v2  ;;  %v11834_v15 = vrot.slane %v2532_v29, %v11677_v57  ;;  %v2607_v43 = vrot.slane %v2591_v30, %v11664_v36  ;;  %v11838_v56 = vrot.slane %v2599_v53, %v11664_v36  ;;  %v2680_v45 = vcombine.high %v2670_v11, %v2670_v11 }
 0x238   : > { %15873 = vst [vmem:[#allocation52_spill] sm:$0xff] %v11829_v38  ;;  %v2943_v50 = vrot.slane %v2656_v16, %v11677_v57  ;;  %v11842_v62 = vrot.slane %v2598_v1, %v11664_v36  ;;  %v11845_v24 = vrot.slane %v2600_v14, %v11664_v36  ;;  %v11848_v0 = vrot.slane %v2534_v40, %v11677_v57  ;;  %v15884_v40 = vld [vmem:[#allocation29_spill] sm:$0xff] }
 0x239   : > { %v11851_v29 = vsub.f32 %v15848_v12, %v2847_v60  ;;  %v2679_v7 = vcombine.high %v2663_v59, %v2663_v59  ;;  %v2947_v30 = vrot.slane %v2670_v11, %v11677_v57  ;;  %v11855_v53 = vsub.f32 %v15849_v4, %v2851_v20  ;;  %v15881_v20 = vld [vmem:[#allocation28_spill] sm:$0xff] }
 0x23a   : > { %15874 = vst [vmem:[#allocation53_spill] sm:$0xff] %v11845_v24  ;;  %15875 = vst [vmem:[#allocation54_spill] sm:$0xff] %v11848_v0  ;;  %v2681_v16 = vcombine.high %v11829_v38, %v11829_v38  ;;  %v11860_v1 = vrot.slane %v2678_v34, %v11677_v57  ;;  %v2959_v14 = vrot.slane %v2663_v59, %v11677_v57 }
 0x23b   : > { %15876 = vst [vmem:[#allocation55_spill] sm:$0xff] %v11851_v29  ;;  %15877 = vst [vmem:[#allocation56_spill] sm:$0xff] %v11855_v53  ;;  %v11866_v12 = vsub.f32 %v15852_v54, %v2863_v46  ;;  %v2629_v60 = vcombine.high %v2607_v43, %v2607_v43  ;;  %v2631_v11 = vcombine.high %v11838_v56, %v11838_v56 }
 0x23c   : > { %15878 = vst [vmem:[#allocation57_spill] sm:$0xff] %v11860_v1  ;;  %v11871_v4 = vrot.slane %v2680_v45, %v11677_v57  ;;  %v11874_v53 = vsub.f32 %v15881_v20, %v2943_v50  ;;  %v2630_v34 = vcombine.high %v11842_v62, %v11842_v62  ;;  %v2632_v59 = vcombine.high %v11845_v24, %v11845_v24 }
 0x23d   : > { %15879 = vst [vmem:[#allocation58_spill] sm:$0xff] %v11866_v12  ;;  %v11883_v46 = vrot.slane %v2679_v7, %v11677_v57  ;;  %v11886_v12 = vsub.f32 %v15884_v40, %v2947_v30  ;;  %v2911_v45 = vrot.slane %v2607_v43, %v11677_v57  ;;  %v11890_v50 = vrot.slane %v2681_v16, %v11677_v57 }
 0x23e   : > { %15880 = vst [vmem:[#allocation59_spill] sm:$0xff] %v11871_v4  ;;  %15882 = vst [vmem:[#allocation28_spill] sm:$0xff] %v11874_v53  ;;  %v11895_v53 = vsub.f32 %v15888_v61, %v2959_v14  ;;  %v11900_v7 = vrot.slane %v2629_v60, %v11677_v57  ;;  %v11903_v30 = vrot.slane %v2631_v11, %v11677_v57  ;;  %v15893_v11 = vld [vmem:[#allocation20_spill] sm:$0xff] }
 0x23f   : > { %15883 = vst [vmem:[#allocation60_spill] sm:$0xff] %v11883_v46  ;;  %15885 = vst [vmem:[#allocation29_spill] sm:$0xff] %v11886_v12  ;;  %v11910_v40 = vrot.slane %v2630_v34, %v11677_v57  ;;  %v11913_v61 = vrot.slane %v2632_v59, %v11677_v57  ;;  %v11922_v2 = vsub.f32 %v15893_v11, %v2911_v45 }
 0x240   : > { %15886 = vst [vmem:[#allocation61_spill] sm:$0xff] %v11890_v50  ;;  %15889 = vst [vmem:[#allocation32_spill] sm:$0xff] %v11895_v53  ;;  %v15895_v34 = vrot.slane %v11682_v35, %v11677_v57  ;;  %v15896_v45 = vrot.slane %v11711_v6, %v11677_v57  ;;  %v3106_v43 = vsub.f32 %v10974_v22, %v11741_v25 }
 0x241   : > { %15890 = vst [vmem:[#allocation62_spill] sm:$0xff] %v11903_v30  ;;  %15891 = vst [vmem:[#allocation63_spill] sm:$0xff] %v11910_v40  ;;  %v3107_v1 = vsub.f32 %v10976_v23, %v11761_v33 }
 0x242   : > { %15892 = vst [vmem:[#allocation64_spill] sm:$0xff] %v11913_v61  ;;  %15894 = vst [vmem:[#allocation20_spill] sm:$0xff] %v11922_v2  ;;  %v11930_v16 = vsub.f32 %v11020_v39, %v15895_v34  ;;  %v3105_v11 = vsub.f32 %v10972_v21, %v15896_v45 }
 0x275   : > { %v11641_v58 = vpop.f32.mrb[18].mxu0 }
 0x276   : > { %v11646_v42 = vpop.f32.mrb[19].mxu0  ;;  %v2731_v14 = vcombine.high %v11641_v58, %v11641_v58  ;;  %v11919_v60 = vrot.slane %v11641_v58, %v11664_v36 }
 0x277   : > { %v2682_v54 = vcombine.high %v11646_v42, %v11646_v42  ;;  %v11946_v39 = vrot.slane %v11646_v42, %v11664_v36 }
 0x278   : > { %v11952_v6 = vrot.slane %v2731_v14, %v11664_v36  ;;  %v11959_v42 = vrot.slane %v11919_v60, %v11664_v36 }
 0x279   : > { %v11964_v23 = vrot.slane %v2682_v54, %v11664_v36 }
 0x2cd   : > { %v10125_v58 = vpop.f32.mrb[4].mxu1 }
 0x2ce   : > { %v3221_v34 = vcombine.high %v10125_v58, %v10125_v58  ;;  %v3228_v59 = vrot.slane %v10125_v58, %v11664_v36  ;;  %v2341_v53 = vpop.f32.mrb[5].mxu1 }
 0x2cf   : > { %v3172_v22 = vcombine.high %v2341_v53, %v2341_v53  ;;  %v3179_v25 = vrot.slane %v2341_v53, %v11664_v36 }
 0x2d0   : > { %v3235_v45 = vrot.slane %v3221_v34, %v11664_v36  ;;  %v3236_v58 = vcombine.high %v3228_v59, %v3228_v59  ;;  %v3244_v35 = vrot.slane %v3228_v59, %v11664_v36 }
 0x2d1   : > { %v3186_v33 = vrot.slane %v3172_v22, %v11664_v36  ;;  %v3187_v14 = vcombine.high %v3179_v25, %v3179_v25  ;;  %v3195_v21 = vrot.slane %v3179_v25, %v11664_v36 }
 0x2d2   : > { %v3237_v20 = vcombine.high %v3235_v45, %v3235_v45  ;;  %v3251_v53 = vrot.slane %v3235_v45, %v11664_v36  ;;  %v3258_v12 = vrot.slane %v3236_v58, %v11664_v36  ;;  %v3266_v2 = vcombine.high %v3244_v35, %v3244_v35 }
 0x2d3   : > { %v3599_v29 = vrot.slane %v3244_v35, %v11677_v57  ;;  %v3188_v34 = vcombine.high %v3186_v33, %v3186_v33  ;;  %v3202_v50 = vrot.slane %v3186_v33, %v11664_v36  ;;  %v3209_v59 = vrot.slane %v3187_v14, %v11664_v36 }
 0x2d4   : > { %v3265_v54 = vrot.slane %v3237_v20, %v11664_v36  ;;  %v3267_v46 = vcombine.high %v3251_v53, %v3251_v53  ;;  %v3268_v22 = vcombine.high %v3258_v12, %v3258_v12  ;;  %v3603_v38 = vrot.slane %v3258_v12, %v11677_v57 }
 0x2d5   : > { %v3607_v25 = vrot.slane %v3266_v2, %v11677_v57  ;;  %v3615_v45 = vrot.slane %v3251_v53, %v11677_v57  ;;  %v3892_v58 = vmul.f32 %v3599_v29, %v11703_v13  ;;  %v3216_v4 = vrot.slane %v3188_v34, %v11664_v36 }
 0x2d6   : > { %v3269_v35 = vcombine.high %v3265_v54, %v3265_v54  ;;  %v3611_v61 = vrot.slane %v3268_v22, %v11677_v57  ;;  %v3619_v33 = vrot.slane %v3265_v54, %v11677_v57  ;;  %v3623_v14 = vrot.slane %v3267_v46, %v11677_v57 }
 0x2d7   : > { %v3217_v20 = vcombine.high %v3195_v21, %v3195_v21  ;;  %v3218_v40 = vcombine.high %v3202_v50, %v3202_v50  ;;  %v3219_v24 = vcombine.high %v3209_v59, %v3209_v59  ;;  %v3220_v30 = vcombine.high %v3216_v4, %v3216_v4 }
 0x2d8   : > { %v3567_v12 = vrot.slane %v3195_v21, %v11677_v57  ;;  %v3571_v2 = vrot.slane %v3209_v59, %v11677_v57  ;;  %v3583_v53 = vrot.slane %v3202_v50, %v11677_v57  ;;  %v3587_v13 = vrot.slane %v3216_v4, %v11677_v57 }
 0x2d9   : > { %v3575_v29 = vrot.slane %v3217_v20, %v11677_v57  ;;  %v3579_v34 = vrot.slane %v3219_v24, %v11677_v57  ;;  %v3591_v54 = vrot.slane %v3218_v40, %v11677_v57  ;;  %v3595_v46 = vrot.slane %v3220_v30, %v11677_v57 }
 0x2da   : > { %v3884_v22 = vmul.f32 %v3567_v12, %v11748_v51  ;;  %v3885_v48 = vmul.f32 %v3571_v2, %v11753_v9  ;;  %v3888_v21 = vmul.f32 %v3583_v53, %v11756_v10  ;;  %v3889_v63 = vmul.f32 %v3587_v13, %v3105_v11 }
 0x2db   : > { %v15897_v50 = vsub.f32 %v10964_v17, %v11735_v26  ;;  %v15898_v4 = vsub.f32 %v10966_v18, %v11745_v49  ;;  %v3890_v24 = vmul.f32 %v3591_v54, %v3106_v43  ;;  %v3891_v3 = vmul.f32 %v3595_v46, %v3107_v1  ;;  %v15913_v46 = vld [vmem:[#allocation54_spill] sm:$0xff] }
 0x2dc   : > { %v9628_v40 = vpack.c.bf16 %v3885_v48, %v3884_v22  ;;  %v11999_v0 = vpack.c.bf16 %v3889_v63, %v3888_v21  ;;  %v3893_v51 = vmul.f32 %v3603_v38, %v11714_v55  ;;  %v15899_v9 = vsub.f32 %v11013_v31, %v11691_v5  ;;  %v15914_v22 = vld [vmem:[#allocation11_spill] sm:$0xff] }
 0x2dd   : > { %v3886_v59 = vmul.f32 %v3575_v29, %v15897_v50  ;;  %v3887_v20 = vmul.f32 %v3579_v34, %v15898_v4  ;;  %v12005_v11 = vpack.c.bf16 %v3891_v3, %v3890_v24  ;;  %v15900_v17 = vsub.f32 %v11016_v37, %v11699_v32  ;;  %v15916_v4 = vld [vmem:[#allocation15_spill] sm:$0xff] }
 0x2de   : > { %v3894_v10 = vmul.f32 %v3607_v25, %v15899_v9  ;;  %v3896_v18 = vmul.f32 %v3615_v45, %v11723_v28  ;;  %9457 = vmatmul.mubr.msk.bf16.vlgmr.msra.gmra.mrb[20].mxu0 %vm604_vm0, %v9628_v40  ;;  %10143 = vmatprep.mubr.msk.bf16.mxu1 %vm604_vm0, %v9628_v40  ;;  %v12013_v49 = vpack.c.bf16 %v3893_v51, %v3892_v58  ;;  %v15901_v3 = vmov 0   ;;  %v15908_v58 = vld [vmem:[#allocation24_spill] sm:$0xff]  ;;  %v15919_v40 = vld [vmem:[#allocation17_spill] sm:$0xff]  ;;  %v15920_v9 = vld [vmem:[#allocation7_spill] sm:$0xff] }
 0x2df   : > { %v9629_v30 = vpack.c.bf16 %v3887_v20, %v3886_v59  ;;  %v3895_v26 = vmul.f32 %v3611_v61, %v15900_v17  ;;  %v3897_v55 = vmul.f32 %v3619_v33, %v11930_v16  ;;  %v3627_v31 = vrot.slane %v3269_v35, %v11677_v57  ;;  %4358 = vmatprep.mubr.bf16.mxu0 %v15901_v3  ;;  %v15906_v61 = vld [vmem:[#allocation22_spill] sm:$0xff]  ;;  %v15915_v59 = vld [vmem:[#allocation5_spill] sm:$0xff] }
 0x2e0   : > { %v2747_v5 = vcombine.high %v11952_v6, %v11952_v6  ;;  %v15902_v32 = vsub.f32 %v15846_v27, %v11708_v44  ;;  %v2697_v48 = vcombine.high %v11946_v39, %v11946_v39  ;;  %v2698_v63 = vcombine.high %v11964_v23, %v11964_v23  ;;  %v15905_v27 = vld [vmem:[#allocation21_spill] sm:$0xff]  ;;  %v15917_v20 = vld [vmem:[#allocation2_spill] sm:$0xff] }
 0x2e1   : > { %10144 = vmatmul.mubr.msk.bf16.vlgmr.msra.gmra.mrb[12].mxu1 %vm604_vm0, %v9629_v30  ;;  %v12021_v37 = vpack.c.bf16 %v3895_v26, %v3894_v10  ;;  %v12032_v38 = vpack.c.bf16 %v3897_v55, %v3896_v18  ;;  %v15903_v1 = vsub.f32 %v15847_v52, %v11730_v8  ;;  %v15904_v16 = vrot.slane %v11838_v56, %v11677_v57  ;;  %v15921_v10 = vld [vmem:[#allocation18_spill] sm:$0xff] }
 0x2e2   : > { %v3898_v28 = vmul.f32 %v3623_v14, %v15902_v32  ;;  %10147 = vmatprep.mubr.msk.bf16.mxu1 %vm604_vm0, %v11999_v0  ;;  %v15907_v45 = vrot.slane %v11842_v62, %v11677_v57  ;;  %v2705_v33 = vrot.slane %v11946_v39, %v11664_v36  ;;  %v2761_v52 = vrot.slane %v11952_v6, %v11664_v36  ;;  %v15911_v6 = vld [vmem:[#allocation9_spill] sm:$0xff] }
 0x2e3   : > { %v3899_v43 = vmul.f32 %v3627_v31, %v15903_v1  ;;  %v12041_v44 = vsub.f32 %v15905_v27, %v15904_v16  ;;  %v15909_v8 = vcombine.high %v11919_v60, %v11919_v60  ;;  %v12064_v62 = vrot.slane %v2747_v5, %v11664_v36  ;;  %v15912_v60 = vld [vmem:[#allocation10_spill] sm:$0xff] }
 0x2e4   : > { %v12049_v35 = vsub.f32 %v15908_v58, %v15907_v45  ;;  %v2776_v2 = vcombine.high %v11959_v42, %v11959_v42  ;;  %v15910_v39 = vrot.slane %v11792_v19, %v11677_v57  ;;  %v2712_v29 = vrot.slane %v11964_v23, %v11664_v36  ;;  %v15958_v23 = vld [vmem:[#allocation33_spill] sm:$0xff] }
 0x2e5   : > { %v2768_v56 = vrot.slane %v15909_v8, %v11664_v36  ;;  %v12059_v14 = vpack.c.bf16 %v3899_v43, %v3898_v28  ;;  %v2719_v34 = vrot.slane %v2697_v48, %v11664_v36  ;;  %v2726_v54 = vrot.slane %v2698_v63, %v11664_v36  ;;  %v15924_v63 = vld [vmem:[#allocation19_spill] sm:$0xff] }
 0x2e6   : > { %v12072_v53 = vsub.f32 %v15911_v6, %v15910_v39  ;;  %v2727_v50 = vcombine.high %v2705_v33, %v2705_v33  ;;  %v15918_v24 = vrot.slane %v15917_v20, %v11677_v57  ;;  %v2777_v17 = vcombine.high %v2761_v52, %v2761_v52  ;;  %9458 = vmatmul.mubr.msk.bf16.gmra.mrb[24].mxu0 %vm604_vm0, %v9629_v30  ;;  %v15923_v30 = vld [vmem:[#allocation13_spill] sm:$0xff] }
 0x2e7   : > { %v2778_v26 = vcombine.high %v2768_v56, %v2768_v56  ;;  %v3007_v18 = vrot.slane %v11959_v42, %v11677_v57  ;;  %v3011_v55 = vrot.slane %v2768_v56, %v11677_v57  ;;  %v2779_v31 = vcombine.high %v12064_v62, %v12064_v62  ;;  %4368 = vmatprep.mubr.bf16.mxu0 %v15901_v3  ;;  %v15928_v56 = vld [vmem:[#allocation44_spill] sm:$0xff]  ;;  %v15930_v39 = vld [vmem:[#allocation45_spill] sm:$0xff] }
 0x2e8   : > { %v12088_v51 = vsub.f32 %v15919_v40, %v15918_v24  ;;  %v12099_v5 = vrot.slane %v2776_v2, %v11677_v57  ;;  %v3023_v32 = vrot.slane %v2761_v52, %v11677_v57  ;;  %v2728_v28 = vcombine.high %v2712_v29, %v2712_v29 }
 0x2e9   : > { %10148 = vmatmul.mubr.msk.bf16.gmra.mrb[16].mxu1 %vm604_vm0, %v12005_v11  ;;  %v2729_v48 = vcombine.high %v2719_v34, %v2719_v34  ;;  %v2730_v42 = vcombine.high %v2726_v54, %v2726_v54  ;;  %v2975_v43 = vrot.slane %v2705_v33, %v11677_v57  ;;  %v2979_v16 = vrot.slane %v2719_v34, %v11677_v57 }
 0x2ea   : > { %15922 = vst [vmem:[#allocation21_spill] sm:$0xff] %v12099_v5  ;;  %10151 = vmatprep.mubr.msk.bf16.mxu1 %vm604_vm0, %v12013_v49  ;;  %v12112_v27 = vrot.slane %v2727_v50, %v11677_v57  ;;  %v2991_v45 = vrot.slane %v2712_v29, %v11677_v57  ;;  %v12116_v58 = vrot.slane %v2778_v26, %v11677_v57  ;;  %v15933_v50 = vld [vmem:[#allocation48_spill] sm:$0xff] }
 0x2eb   : > { %v3027_v52 = vrot.slane %v12064_v62, %v11677_v57  ;;  %v12121_v8 = vrot.slane %v2777_v17, %v11677_v57  ;;  %v12124_v2 = vsub.f32 %v15928_v56, %v3007_v18  ;;  %v12127_v33 = vrot.slane %v2779_v31, %v11677_v57  ;;  %v15938_v26 = vld [vmem:[#allocation36_spill] sm:$0xff] }
 0x2ec   : > { %15925 = vst [vmem:[#allocation22_spill] sm:$0xff] %v12112_v27  ;;  %15926 = vst [vmem:[#allocation24_spill] sm:$0xff] %v12116_v58  ;;  %v12130_v6 = vsub.f32 %v15930_v39, %v3011_v55  ;;  %v12135_v20 = vsub.f32 %v15933_v50, %v3023_v32  ;;  %v12138_v62 = vrot.slane %v2729_v48, %v11677_v57  ;;  %v15939_v55 = vld [vmem:[#allocation37_spill] sm:$0xff]  ;;  %v15942_v39 = vld [vmem:[#allocation40_spill] sm:$0xff] }
 0x2ed   : > { %15927 = vst [vmem:[#allocation9_spill] sm:$0xff] %v12121_v8  ;;  %15929 = vst [vmem:[#allocation10_spill] sm:$0xff] %v12127_v33  ;;  %v2995_v24 = vrot.slane %v2726_v54, %v11677_v57  ;;  %v12142_v40 = vrot.slane %v2728_v28, %v11677_v57  ;;  %v12145_v17 = vrot.slane %v2730_v42, %v11677_v57  ;;  %v15944_v54 = vld [vmem:[#allocation62_spill] sm:$0xff]  ;;  %v15945_v28 = vld [vmem:[#allocation23_spill] sm:$0xff] }
 0x2ee   : > { %15931 = vst [vmem:[#allocation54_spill] sm:$0xff] %v12130_v6  ;;  %15934 = vst [vmem:[#allocation11_spill] sm:$0xff] %v12135_v20  ;;  %v12148_v18 = vsub.f32 %v15938_v26, %v2975_v43  ;;  %v12151_v31 = vsub.f32 %v15939_v55, %v2979_v16  ;;  %v12156_v48 = vsub.f32 %v15942_v39, %v2991_v45  ;;  %9459 = vmatmul.mubr.msk.bf16.gmra.mrb[28].mxu0 %vm604_vm0, %v11999_v0  ;;  %v15946_v42 = vld [vmem:[#allocation53_spill] sm:$0xff]  ;;  %v10490_v45 = vld [vmem:[%s15618_s7] ss:$8 sps:$4 sm:$0xff]  }
 0x2ef   : > { %15935 = vst [vmem:[#allocation5_spill] sm:$0xff] %v12138_v62  ;;  %15936 = vst [vmem:[#allocation15_spill] sm:$0xff] %v12142_v40  ;;  %v15947_v34 = vrot.slane %v15946_v42, %v11677_v57  ;;  %v15948_v43 = vld [vmem:[#allocation25_spill] sm:$0xff]  ;;  %v10492_v0 = vld [vmem:[%s15618_s7 + $0x4] ss:$8 sps:$4 sm:$0xff]   ;;  %4378 = vmatprep.mubr.bf16.mxu0 %v15901_v3 }
 0x2f0   : > { %15937 = vst [vmem:[#allocation2_spill] sm:$0xff] %v12145_v17  ;;  %15940 = vst [vmem:[#allocation17_spill] sm:$0xff] %v12151_v31  ;;  %v10128_v12 = vpop.f32.mrb[6].mxu1  ;;  %v15965_v42 = vld [vmem:[#allocation41_spill] sm:$0xff]  ;;  %6733 = vmatprep.subr.bf16.mxu1 %v10492_v0 }
 0x2f1   : > { %15943 = vst [vmem:[#allocation7_spill] sm:$0xff] %v12156_v48  ;;  %v12166_v26 = vsub.f32 %v15948_v43, %v15947_v34  ;;  %10152 = vmatmul.mubr.msk.bf16.gmra.mrb[20].mxu1 %vm604_vm0, %v12021_v37  ;;  %v15956_v43 = vld [vmem:[#allocation52_spill] sm:$0xff]  ;;  %v12198_v27 = vsub.f32 %v15965_v42, %v2995_v24  ;;  %v15970_v24 = vld [vmem:[#allocation49_spill] sm:$0xff] }
 0x2f2   : > { %v15957_v25 = vrot.slane %v15956_v43, %v11677_v57  ;;  %10155 = vmatprep.mubr.msk.bf16.mxu1 %vm604_vm0, %v12032_v38  ;;  %v3319_v43 = vcombine.high %v10128_v12, %v10128_v12  ;;  %6734 = vmatpush1.bf16.msra.mxu1 %v10490_v45  ;;  %v12209_v42 = vsub.f32 %v15970_v24, %v3027_v52 }
 0x2f3   : > { %15949 = vst [vmem:[#allocation18_spill] sm:$0xff] %v12166_v26  ;;  %15966 = vst [vmem:[#allocation19_spill] sm:$0xff] %v12198_v27 }
 0x2f4   : > { %v12187_v50 = vsub.f32 %v15958_v23, %v15957_v25  ;;  %v3326_v25 = vrot.slane %v10128_v12, %v11664_v36  ;;  %v2351_v23 = vpop.f32.mrb[7].mxu1  ;;  %15971 = vst [vmem:[#allocation44_spill] sm:$0xff] %v12209_v42  ;;  %v3333_v0 = vrot.slane %v3319_v43, %v11664_v36 }
 0x2f5   : > { %v3270_v19 = vcombine.high %v2351_v23, %v2351_v23  ;;  %v3277_v29 = vrot.slane %v2351_v23, %v11664_v36  ;;  %v10131_v23 = vpop.f32.mrb[8].mxu1 }
 0x2f6   : > { %15959 = vst [vmem:[#allocation13_spill] sm:$0xff] %v12187_v50  ;;  %v3334_v12 = vcombine.high %v3326_v25, %v3326_v25  ;;  %v3342_v27 = vrot.slane %v3326_v25, %v11664_v36  ;;  %v3335_v58 = vcombine.high %v3333_v0, %v3333_v0  ;;  %v12220_v52 = vrot.slane %v3333_v0, %v11664_v36  ;;  %v2361_v24 = vpop.f32.mrb[9].mxu1 }
 0x2f7   : > { %v3284_v21 = vrot.slane %v3270_v19, %v11664_v36  ;;  %v3285_v45 = vcombine.high %v3277_v29, %v3277_v29  ;;  %v3293_v17 = vrot.slane %v3277_v29, %v11664_v36  ;;  %9460 = vmatmul.mubr.msk.bf16.gmra.mrb[32].mxu0 %vm604_vm0, %v12005_v11  ;;  %v3368_v50 = vcombine.high %v2361_v24, %v2361_v24 }
 0x2f8   : > { %v12223_v43 = vrot.slane %v3334_v12, %v11664_v36  ;;  %v3364_v25 = vcombine.high %v3342_v27, %v3342_v27  ;;  %v3663_v40 = vrot.slane %v3342_v27, %v11677_v57  ;;  %v12235_v0 = vrot.slane %v3335_v58, %v11664_v36  ;;  %v15974_v58 = vld [vmem:[#allocation4_spill] sm:$0xff]  ;;  %v10134_v31 = vpop.f32.mrb[10].mxu1  ;;  %4388 = vmatprep.mubr.bf16.mxu0 %v15901_v3 }
 0x2f9   : > { %v3286_v8 = vcombine.high %v3284_v21, %v3284_v21  ;;  %v12227_v19 = vrot.slane %v3284_v21, %v11664_v36  ;;  %v12230_v29 = vrot.slane %v3285_v45, %v11664_v36  ;;  %v3365_v12 = vcombine.high %v12220_v52, %v12220_v52  ;;  %10156 = vmatmul.mubr.msk.bf16.gmra.mrb[24].mxu1 %vm604_vm0, %v12059_v14 }
 0x2fa   : > { %v3366_v62 = vcombine.high %v12223_v43, %v12223_v43  ;;  %v12246_v21 = vrot.slane %v3364_v25, %v11677_v57  ;;  %v12251_v45 = vmul.f32 %v3663_v40, %v15974_v58  ;;  %v12267_v40 = vpop.f32.mrb[11].mxu1  ;;  %v3315_v58 = vcombine.high %v3293_v17, %v3293_v17 }
 0x2fb   : > { %v12254_v33 = vrot.slane %v3286_v8, %v11664_v36  ;;  %v12265_v11 = vrot.slane %v3365_v12, %v11677_v57  ;;  %v3316_v8 = vcombine.high %v12227_v19, %v12227_v19  ;;  %v3317_v42 = vcombine.high %v12230_v29, %v12230_v29 }
 0x2fc   : > { %v12260_v32 = vrot.slane %v3366_v62, %v11677_v57  ;;  %v3631_v62 = vrot.slane %v3293_v17, %v11677_v57  ;;  %v12283_v13 = vrot.slane %v3315_v58, %v11677_v57  ;;  %v3417_v27 = vcombine.high %v10131_v23, %v10131_v23  ;;  %v15975_v17 = vld [vmem:[#allocation55_spill] sm:$0xff] }
 0x2fd   : > { %v12286_v6 = vrot.slane %v3317_v42, %v11677_v57  ;;  %v12289_v20 = vrot.slane %v3316_v8, %v11677_v57  ;;  %v3424_v25 = vrot.slane %v10131_v23, %v11664_v36  ;;  %v3375_v12 = vrot.slane %v2361_v24, %v11664_v36 }
 0x2fe   : > { %v12292_v5 = vmul.f32 %v3631_v62, %v15975_v17  ;;  %v3431_v48 = vrot.slane %v3417_v27, %v11664_v36  ;;  %v3515_v34 = vcombine.high %v10134_v31, %v10134_v31  ;;  %v3522_v58 = vrot.slane %v10134_v31, %v11664_v36 }
 0x2ff   : > { %v3466_v42 = vcombine.high %v12267_v40, %v12267_v40  ;;  %9461 = vmatmul.mubr.msk.bf16.gmra.mrb[36].mxu0 %vm604_vm0, %v12013_v49  ;;  %v3432_v8 = vcombine.high %v3424_v25, %v3424_v25  ;;  %v3440_v62 = vrot.slane %v3424_v25, %v11664_v36  ;;  %v3382_v17 = vrot.slane %v3368_v50, %v11664_v36 }
 0x300   : > { %v3383_v23 = vcombine.high %v3375_v12, %v3375_v12  ;;  %4398 = vmatprep.mubr.bf16.mxu0 %v15901_v3  ;;  %v3433_v24 = vcombine.high %v3431_v48, %v3431_v48  ;;  %v12306_v27 = vrot.slane %v3431_v48, %v11664_v36  ;;  %v3391_v31 = vrot.slane %v3375_v12, %v11664_v36 }
 0x301   : > { %v3529_v39 = vrot.slane %v3515_v34, %v11664_v36  ;;  %v12311_v1 = vrot.slane %v3432_v8, %v11664_v36  ;;  %v3462_v49 = vcombine.high %v3440_v62, %v3440_v62  ;;  %v3727_v56 = vrot.slane %v3440_v62, %v11677_v57 }
 0x302   : > { %15976 = vst [vmem:[#allocation45_spill] sm:$0xff] %v12306_v27  ;;  %v3384_v25 = vcombine.high %v3382_v17, %v3382_v17  ;;  %v12315_v50 = vrot.slane %v3433_v24, %v11664_v36  ;;  %v3463_v16 = vcombine.high %v12306_v27, %v12306_v27  ;;  %v12322_v12 = vrot.slane %v3382_v17, %v11664_v36  ;;  %v15980_v24 = vld [vmem:[#allocation28_spill] sm:$0xff] }
 0x303   : > { %15977 = vst [vmem:[#allocation48_spill] sm:$0xff] %v12311_v1  ;;  %v3464_v34 = vcombine.high %v12311_v1, %v12311_v1  ;;  %v12329_v62 = vrot.slane %v3462_v49, %v11677_v57  ;;  %v12332_v55 = vmul.f32 %v3727_v56, %v15980_v24  ;;  %v12342_v27 = vrot.slane %v3383_v23, %v11664_v36  ;;  %v15986_v23 = vld [vmem:[#allocation20_spill] sm:$0xff] }
 0x304   : > { %15978 = vst [vmem:[#allocation36_spill] sm:$0xff] %v12315_v50  ;;  %v12339_v17 = vrot.slane %v3463_v16, %v11677_v57  ;;  %v12348_v49 = vrot.slane %v3384_v25, %v11664_v36  ;;  %v3413_v56 = vcombine.high %v3391_v31, %v3391_v31  ;;  %v3414_v24 = vcombine.high %v12322_v12, %v12322_v12  ;;  %v15990_v1 = vld [vmem:[#allocation16_spill] sm:$0xff] }
 0x305   : > { %15979 = vst [vmem:[#allocation37_spill] sm:$0xff] %v12329_v62  ;;  %15981 = vst [vmem:[#allocation40_spill] sm:$0xff] %v12332_v55  ;;  %v12345_v8 = vrot.slane %v3464_v34, %v11677_v57  ;;  %v3415_v26 = vcombine.high %v12342_v27, %v12342_v27  ;;  %v3695_v48 = vrot.slane %v3391_v31, %v11677_v57 }
 0x306   : > { %15982 = vst [vmem:[#allocation62_spill] sm:$0xff] %v12339_v17  ;;  %15984 = vst [vmem:[#allocation53_spill] sm:$0xff] %v12348_v49  ;;  %v12364_v34 = vrot.slane %v3413_v56, %v11677_v57  ;;  %v12369_v31 = vrot.slane %v3414_v24, %v11677_v57  ;;  %v3531_v55 = vcombine.high %v3529_v39, %v3529_v39 }
 0x307   : > { %15983 = vst [vmem:[#allocation23_spill] sm:$0xff] %v12345_v8  ;;  %9462 = vmatmul.mubr.msk.bf16.gmra.mrb[40].mxu0 %vm604_vm0, %v12021_v37  ;;  %v12373_v16 = vrot.slane %v3415_v26, %v11677_v57  ;;  %v12376_v50 = vmul.f32 %v3695_v48, %v15986_v23  ;;  %v3530_v37 = vcombine.high %v3522_v58, %v3522_v58  ;;  %v15987_v48 = vld [vmem:[#allocation56_spill] sm:$0xff] }
 0x308   : > { %15985 = vst [vmem:[#allocation25_spill] sm:$0xff] %v12369_v31  ;;  %4408 = vmatprep.mubr.bf16.mxu0 %v15901_v3  ;;  %v3538_v25 = vrot.slane %v3522_v58, %v11664_v36  ;;  %v12380_v56 = vrot.slane %v3529_v39, %v11664_v36  ;;  %v3473_v17 = vrot.slane %v12267_v40, %v11664_v36  ;;  %v15989_v58 = vld [vmem:[#allocation6_spill] sm:$0xff] }
 0x309   : > { %v3480_v24 = vrot.slane %v3466_v42, %v11664_v36  ;;  %v12386_v8 = vrot.slane %v3530_v37, %v11664_v36  ;;  %v12389_v26 = vrot.slane %v3531_v55, %v11664_v36  ;;  %v15988_v23 = vrot.slane %v12230_v29, %v11677_v57 }
 0x30a   : > { %v15991_v39 = vsub.f32 %v15989_v58, %v15990_v1  ;;  %v3560_v49 = vcombine.high %v3538_v25, %v3538_v25  ;;  %v3561_v40 = vcombine.high %v12380_v56, %v12380_v56  ;;  %v3791_v42 = vrot.slane %v3538_v25, %v11677_v57 }
 0x30b   : > { %v3901_v62 = vmul.f32 %v15988_v23, %v15987_v48  ;;  %v3562_v37 = vcombine.high %v12386_v8, %v12386_v8  ;;  %v3481_v58 = vcombine.high %v3473_v17, %v3473_v17  ;;  %v3482_v29 = vcombine.high %v3480_v24, %v3480_v24 }
 0x30c   : > { %v3902_v31 = vmul.f32 %v12283_v13, %v15991_v39  ;;  %v12413_v48 = vrot.slane %v3560_v49, %v11677_v57  ;;  %v12416_v25 = vrot.slane %v3561_v40, %v11677_v57  ;;  %v12419_v23 = vmul.f32 %v3791_v42, %v12124_v2  ;;  %v16002_v13 = vld [vmem:[#allocation3_spill] sm:$0xff] }
 0x30d   : > { %v12422_v39 = vrot.slane %v3562_v37, %v11677_v57  ;;  %v3489_v55 = vrot.slane %v3473_v17, %v11664_v36  ;;  %v12426_v1 = vrot.slane %v3480_v24, %v11664_v36  ;;  %v12431_v49 = vrot.slane %v3481_v58, %v11664_v36  ;;  %v15993_v37 = vld [vmem:[#allocation58_spill] sm:$0xff] }
 0x30e   : > { %v12434_v40 = vpack.c.bf16 %v3901_v62, %v12292_v5  ;;  %v15992_v2 = vsub.f32 %v15851_v47, %v11825_v41  ;;  %v15994_v17 = vrot.slane %v12227_v19, %v11677_v57 }
 0x30f   : > { %9463 = vmatmul.mubr.msk.bf16.gmra.mrb[44].mxu0 %vm604_vm0, %v12032_v38  ;;  %v12446_v38 = vrot.slane %v3482_v29, %v11664_v36  ;;  %v3511_v58 = vcombine.high %v3489_v55, %v3489_v55  ;;  %v3512_v5 = vcombine.high %v12426_v1, %v12426_v1  ;;  %v3759_v62 = vrot.slane %v3489_v55, %v11677_v57 }
 0x310   : > { %v3903_v42 = vmul.f32 %v12286_v6, %v15992_v2  ;;  %v3904_v24 = vmul.f32 %v15994_v17, %v15993_v37  ;;  %4418 = vmatprep.mubr.bf16.mxu0 %v15901_v3  ;;  %v3513_v47 = vcombine.high %v12431_v49, %v12431_v49  ;;  %v3763_v41 = vrot.slane %v12431_v49, %v11677_v57 }
 0x311   : > { %v3775_v6 = vrot.slane %v12426_v1, %v11677_v57  ;;  %10159 = vmatprep.mubr.msk.bf16.mxu1 %vm604_vm0, %v12434_v40  ;;  %v3514_v19 = vcombine.high %v12446_v38, %v12446_v38  ;;  %v3767_v29 = vrot.slane %v3511_v58, %v11677_v57  ;;  %v3779_v55 = vrot.slane %v12446_v38, %v11677_v57 }
 0x312   : > { %v12459_v36 = vpack.c.bf16 %v3903_v42, %v3902_v31  ;;  %v3783_v2 = vrot.slane %v3512_v5, %v11677_v57  ;;  %v3771_v49 = vrot.slane %v3513_v47, %v11677_v57  ;;  %v3932_v37 = vmul.f32 %v3759_v62, %v12148_v18  ;;  %v15999_v5 = vld [vmem:[#allocation8_spill] sm:$0xff]  ;;  %v16001_v47 = vld [vmem:[#allocation14_spill] sm:$0xff] }
 0x313   : > { %v15996_v31 = vrot.slane %v12254_v33, %v11677_v57  ;;  %v15997_v42 = vcombine.high %v12254_v33, %v12254_v33  ;;  %v15998_v38 = vsub.f32 %v15912_v60, %v11834_v15  ;;  %v16000_v18 = vrot.slane %v12223_v43, %v11677_v57 }
 0x314   : > { %15995 = vst [vmem:[#allocation52_spill] sm:$0xff] %v12459_v36  ;;  %10160 = vmatmul.mubr.msk.bf16.gmra.mrb[28].mxu1 %vm604_vm0, %v12459_v36  ;;  %v16003_v36 = vsub.f32 %v16001_v47, %v16002_v13  ;;  %v16005_v15 = vsub.f32 %v15914_v22, %v15913_v46  ;;  %v16007_v43 = vrot.slane %v12220_v52, %v11677_v57 }
 0x315   : > { %v3905_v1 = vmul.f32 %v15996_v31, %v12072_v53  ;;  %v3659_v17 = vrot.slane %v15997_v42, %v11677_v57  ;;  %v3906_v58 = vmul.f32 %v12289_v20, %v15998_v38  ;;  %v3909_v62 = vmul.f32 %v16000_v18, %v15999_v5  ;;  %v16006_v20 = vld [vmem:[#allocation12_spill] sm:$0xff]  ;;  %v16023_v5 = vld [vmem:[#allocation25_spill] sm:$0xff] }
 0x316   : > { %v3910_v53 = vmul.f32 %v12246_v21, %v16003_v36  ;;  %v16004_v31 = vsub.f32 %v15916_v4, %v15915_v59  ;;  %v3912_v38 = vmul.f32 %v16007_v43, %v16006_v20  ;;  %v16008_v21 = vrot.slane %v12235_v0, %v11677_v57 }
 0x317   : > { %v12495_v42 = vpack.c.bf16 %v3905_v1, %v3904_v24  ;;  %v3907_v60 = vmul.f32 %v3659_v17, %v16005_v15  ;;  %v12509_v59 = vpack.c.bf16 %v3909_v62, %v12251_v45  ;;  %9464 = vmatmul.mubr.msk.bf16.gmra.mrb[48].mxu0 %vm604_vm0, %v12059_v14  ;;  %v16009_v46 = vcombine.high %v12235_v0, %v12235_v0  ;;  %v16025_v62 = vld [vmem:[#allocation48_spill] sm:$0xff] }
 0x318   : > { %v3911_v33 = vmul.f32 %v12260_v32, %v16004_v31  ;;  %v3913_v13 = vmul.f32 %v16008_v21, %v12088_v51  ;;  %v16010_v32 = vsub.f32 %v15921_v10, %v15920_v9  ;;  %v16011_v14 = vrot.slane %v12342_v27, %v11677_v57  ;;  %4428 = vmatprep.mubr.bf16.mxu0 %v15901_v3  ;;  %v16027_v31 = vld [vmem:[#allocation30_spill] sm:$0xff]  ;;  %v16032_v21 = vld [vmem:[#allocation64_spill] sm:$0xff] }
 0x319   : > { %v3691_v22 = vrot.slane %v16009_v46, %v11677_v57  ;;  %10163 = vmatprep.mubr.msk.bf16.mxu1 %vm604_vm0, %v12495_v42  ;;  %v12525_v51 = vpack.c.bf16 %v3907_v60, %v3906_v58  ;;  %v16012_v0 = vsub.f32 %v15924_v63, %v15923_v30  ;;  %v16013_v10 = vsub.f32 %v15906_v61, %v11900_v7  ;;  %v16016_v30 = vld [vmem:[#allocation18_spill] sm:$0xff]  ;;  %v16017_v63 = vld [vmem:[#allocation53_spill] sm:$0xff] }
 0x31a   : > { %v12511_v4 = vpack.c.bf16 %v3911_v33, %v3910_v53  ;;  %v3914_v52 = vmul.f32 %v12265_v11, %v16010_v32  ;;  %v12527_v45 = vpack.c.bf16 %v3913_v13, %v3912_v38  ;;  %v3917_v24 = vmul.f32 %v16011_v14, %v12041_v44  ;;  %v16028_v33 = vld [vmem:[#allocation57_spill] sm:$0xff]  ;;  %v16031_v38 = vld [vmem:[#allocation27_spill] sm:$0xff] }
 0x31b   : > { %v3915_v9 = vmul.f32 %v3691_v22, %v16012_v0  ;;  %v3918_v11 = vmul.f32 %v12364_v34, %v16013_v10  ;;  %v16014_v36 = vsub.f32 %v15945_v28, %v15944_v54  ;;  %v16015_v44 = vrot.slane %v12322_v12, %v11677_v57  ;;  %v16020_v28 = vld [vmem:[#allocation26_spill] sm:$0xff]  ;;  %v16030_v60 = vld [vmem:[#allocation37_spill] sm:$0xff]  ;;  %v16034_v22 = vld [vmem:[#allocation31_spill] sm:$0xff] }
 0x31c   : > { %v12550_v17 = vpack.c.bf16 %v3917_v24, %v12376_v50  ;;  %v16018_v58 = vrot.slane %v16017_v63, %v11677_v57  ;;  %v16019_v61 = vcombine.high %v16017_v63, %v16017_v63  ;;  %v16024_v50 = vld [vmem:[#allocation29_spill] sm:$0xff]  ;;  %v16026_v47 = vrot.slane %v16025_v62, %v11677_v57  ;;  %10164 = vmatmul.mubr.msk.bf16.gmra.mrb[32].mxu1 %vm604_vm0, %v12525_v51  ;;  %v16035_v32 = vld [vmem:[#allocation59_spill] sm:$0xff]  ;;  %v16038_v0 = vld [vmem:[#allocation32_spill] sm:$0xff] }
 0x31d   : > { %v3919_v1 = vmul.f32 %v12373_v16, %v16014_v36  ;;  %v3920_v27 = vmul.f32 %v16015_v44, %v12049_v35  ;;  %v16021_v16 = vld [vmem:[#allocation63_spill] sm:$0xff]  ;;  %v12564_v12 = vpack.c.bf16 %v3915_v9, %v3914_v52  ;;  %v16029_v15 = vsub.f32 %v16027_v31, %v16028_v33  ;;  %v16039_v9 = vld [vmem:[#allocation45_spill] sm:$0xff]  ;;  %10167 = vmatprep.mubr.msk.bf16.mxu1 %vm604_vm0, %v12509_v59  ;;  %v16041_v36 = vld [vmem:[#allocation40_spill] sm:$0xff] }
 0x31e   : > { %v3921_v7 = vmul.f32 %v16018_v58, %v16016_v30  ;;  %v3723_v54 = vrot.slane %v16019_v61, %v11677_v57  ;;  %v16022_v34 = vsub.f32 %v16020_v28, %v16021_v16  ;;  %v3925_v53 = vmul.f32 %v16026_v47, %v16024_v50  ;;  %v16037_v14 = vld [vmem:[#allocation23_spill] sm:$0xff]  ;;  %v16042_v44 = vld [vmem:[#allocation13_spill] sm:$0xff]  ;;  %v16046_v61 = vld [vmem:[#allocation34_spill] sm:$0xff] }
 0x31f   : > { %v12566_v35 = vpack.c.bf16 %v3919_v1, %v3918_v11  ;;  %v3926_v20 = vmul.f32 %v16030_v60, %v16029_v15  ;;  %v16033_v13 = vsub.f32 %v16031_v38, %v16032_v21  ;;  %v16036_v52 = vsub.f32 %v16034_v22, %v16035_v32  ;;  %v16049_v16 = vld [vmem:[#allocation62_spill] sm:$0xff]  ;;  %v16050_v62 = vld [vmem:[#allocation17_spill] sm:$0xff]  ;;  %9465 = vmatmul.mubr.msk.bf16.gmra.mrb[52].mxu0 %vm604_vm0, %v12434_v40  ;;  %v16054_v38 = vld [vmem:[#allocation35_spill] sm:$0xff] }
 0x320   : > { %v3922_v18 = vmul.f32 %v16023_v5, %v16022_v34  ;;  %v12578_v43 = vpack.c.bf16 %v3921_v7, %v3920_v27  ;;  %v16040_v10 = vrot.slane %v16039_v9, %v11677_v57  ;;  %v12594_v1 = vpack.c.bf16 %v3925_v53, %v16041_v36  ;;  %v16043_v27 = vld [vmem:[#allocation36_spill] sm:$0xff]  ;;  %v16051_v53 = vld [vmem:[#allocation38_spill] sm:$0xff]  ;;  %v16055_v21 = vld [vmem:[#allocation61_spill] sm:$0xff]  ;;  %4438 = vmatprep.mubr.bf16.mxu0 %v15901_v3 }
 0x321   : > { %v3923_v46 = vmul.f32 %v3723_v54, %v16033_v13  ;;  %v3927_v24 = vmul.f32 %v16037_v14, %v16036_v52  ;;  %v16044_v30 = vrot.slane %v16043_v27, %v11677_v57  ;;  %v16045_v58 = vcombine.high %v16043_v27, %v16043_v27  ;;  %v16047_v54 = vld [vmem:[#allocation60_spill] sm:$0xff]  ;;  %v16052_v31 = vld [vmem:[#allocation22_spill] sm:$0xff]  ;;  %v16057_v32 = vld [vmem:[#allocation39_spill] sm:$0xff] }
 0x322   : > { %v3928_v11 = vmul.f32 %v16040_v10, %v16038_v0  ;;  %v16048_v28 = vsub.f32 %v16046_v61, %v16047_v54  ;;  %v3933_v47 = vmul.f32 %v3763_v41, %v16050_v62  ;;  %v16053_v33 = vsub.f32 %v16051_v53, %v16052_v31  ;;  %v16060_v52 = vld [vmem:[#allocation7_spill] sm:$0xff]  ;;  %v16062_v0 = vld [vmem:[#allocation42_spill] sm:$0xff] }
 0x323   : > { %v3929_v63 = vmul.f32 %v16044_v30, %v16042_v44  ;;  %v3755_v7 = vrot.slane %v16045_v58, %v11677_v57  ;;  %v12608_v5 = vpack.c.bf16 %v3923_v46, %v3922_v18  ;;  %v12610_v50 = vpack.c.bf16 %v3927_v24, %v3926_v20  ;;  %v16058_v18 = vld [vmem:[#allocation5_spill] sm:$0xff]  ;;  %v16063_v9 = vld [vmem:[#allocation15_spill] sm:$0xff]  ;;  %v16065_v27 = vld [vmem:[#allocation54_spill] sm:$0xff] }
 0x324   : > { %v3930_v34 = vmul.f32 %v16049_v16, %v16048_v28  ;;  %v3934_v15 = vmul.f32 %v3767_v29, %v16053_v33  ;;  %v16056_v13 = vsub.f32 %v16054_v38, %v16055_v21  ;;  %v16059_v46 = vsub.f32 %v16057_v32, %v16058_v18  ;;  %v16061_v29 = vld [vmem:[#allocation19_spill] sm:$0xff]  ;;  %v16067_v30 = vld [vmem:[#allocation46_spill] sm:$0xff]  ;;  %v16074_v28 = vld [vmem:[#allocation24_spill] sm:$0xff]  ;;  %10168 = vmatmul.mubr.msk.bf16.gmra.mrb[36].mxu1 %vm604_vm0, %v12511_v4 }
 0x325   : > { %v12618_v60 = vpack.c.bf16 %v3929_v63, %v3928_v11  ;;  %v3936_v14 = vmul.f32 %v3775_v6, %v16060_v52  ;;  %v12628_v41 = vpack.c.bf16 %v3933_v47, %v3932_v37  ;;  %v3937_v24 = vmul.f32 %v3779_v55, %v16061_v29  ;;  %v16068_v37 = vld [vmem:[#allocation21_spill] sm:$0xff]  ;;  %v16073_v54 = vld [vmem:[#allocation47_spill] sm:$0xff]  ;;  %v16081_v21 = vld [vmem:[#allocation50_spill] sm:$0xff]  ;;  %10171 = vmatprep.mubr.msk.bf16.mxu1 %vm604_vm0, %v12527_v45 }
 0x326   : > { %v3931_v22 = vmul.f32 %v3755_v7, %v16056_v13  ;;  %v3935_v20 = vmul.f32 %v3771_v49, %v16059_v46  ;;  %v3787_v40 = vrot.slane %v3514_v19, %v11677_v57  ;;  %v16064_v10 = vsub.f32 %v16062_v0, %v16063_v9  ;;  %v16070_v19 = vld [vmem:[#allocation43_spill] sm:$0xff]  ;;  %v16071_v7 = vld [vmem:[#allocation2_spill] sm:$0xff] }
 0x327   : > { %v16066_v6 = vrot.slane %v12386_v8, %v11677_v57  ;;  %v16069_v63 = vsub.f32 %v16067_v30, %v16068_v37  ;;  %v12647_v58 = vpack.c.bf16 %v3937_v24, %v3936_v14  ;;  %v16072_v61 = vsub.f32 %v16070_v19, %v16071_v7  ;;  %v16076_v62 = vld [vmem:[#allocation11_spill] sm:$0xff] }
 0x328   : > { %v3938_v11 = vmul.f32 %v3783_v2, %v16064_v10  ;;  %v12635_v36 = vpack.c.bf16 %v3931_v22, %v3930_v34  ;;  %v12637_v44 = vpack.c.bf16 %v3935_v20, %v3934_v15  ;;  %v16075_v16 = vsub.f32 %v16073_v54, %v16074_v28  ;;  %v16084_v18 = vld [vmem:[#allocation51_spill] sm:$0xff]  ;;  %v16087_v20 = vld [vmem:[#allocation52_spill] sm:$0xff] }
 0x329   : > { %v3941_v49 = vmul.f32 %v16066_v6, %v16065_v27  ;;  %v3942_v55 = vmul.f32 %v12413_v48, %v16069_v63  ;;  %v3939_v2 = vmul.f32 %v3787_v40, %v16072_v61  ;;  %v16077_v8 = vrot.slane %v12380_v56, %v11677_v57  ;;  %v16078_v48 = vld [vmem:[#allocation44_spill] sm:$0xff]  ;;  %9466 = vmatmul.mubr.msk.bf16.gmra.mrb[56].mxu0 %vm604_vm0, %v16087_v20 }
 0x32a   : > { %v3943_v34 = vmul.f32 %v12422_v39, %v16075_v16  ;;  %v16079_v31 = vrot.slane %v12389_v26, %v11677_v57  ;;  %v16080_v15 = vcombine.high %v12389_v26, %v12389_v26  ;;  %v16082_v39 = vld [vmem:[#allocation9_spill] sm:$0xff]  ;;  %v16085_v26 = vld [vmem:[#allocation10_spill] sm:$0xff]  ;;  %4448 = vmatprep.mubr.bf16.mxu0 %v15901_v3 }
 0x32b   : > { %v3944_v47 = vmul.f32 %v16077_v8, %v16076_v62  ;;  %v12661_v53 = vpack.c.bf16 %v3941_v49, %v12419_v23  ;;  %v16083_v13 = vsub.f32 %v16081_v21, %v16082_v39  ;;  %v12677_v56 = vpack.c.bf16 %v3939_v2, %v3938_v11 }
 0x32c   : > { %v3945_v33 = vmul.f32 %v16079_v31, %v16078_v48  ;;  %v3819_v38 = vrot.slane %v16080_v15, %v11677_v57  ;;  %v12679_v23 = vpack.c.bf16 %v3943_v34, %v3942_v55  ;;  %v16086_v57 = vsub.f32 %v16084_v18, %v16085_v26  ;;  %10172 = vmatmul.mubr.msk.bf16.gmra.mrb[40].mxu1 %vm604_vm0, %v12564_v12 }
 0x32d   : > { %v3946_v22 = vmul.f32 %v12416_v25, %v16083_v13  ;;  %10175 = vmatprep.mubr.msk.bf16.mxu1 %vm604_vm0, %v12550_v17 }
 0x32e   : > { %v12683_v32 = vpack.c.bf16 %v3945_v33, %v3944_v47  ;;  %v3947_v46 = vmul.f32 %v3819_v38, %v16086_v57 }
 0x330   : > { %v12690_v25 = vpack.c.bf16 %v3947_v46, %v3946_v22 }
 0x331   : > { %9467 = vmatmul.mubr.msk.bf16.gmra.mrb[60].mxu0 %vm604_vm0, %v12495_v42  ;;  %v12786_v42 = vld [vmem:[%s12780_s20] sm:$0xff] }
 0x332   : > { %4458 = vmatprep.mubr.bf16.mxu0 %v15901_v3 }
 0x334   : > { %10176 = vmatmul.mubr.msk.bf16.gmra.mrb[44].mxu1 %vm604_vm0, %v12566_v35 }
 0x335   : > { %10179 = vmatprep.mubr.msk.bf16.mxu1 %vm604_vm0, %v12578_v43 }
 0x339   : > { %9468 = vmatmul.mubr.msk.bf16.gmra.mrb[64].mxu0 %vm604_vm0, %v12525_v51 }
 0x33a   : > { %4468 = vmatprep.mubr.bf16.mxu0 %v15901_v3 }
 0x33c   : > { %10180 = vmatmul.mubr.msk.bf16.gmra.mrb[48].mxu1 %vm604_vm0, %v12608_v5 }
 0x33d   : > { %10183 = vmatprep.mubr.msk.bf16.mxu1 %vm604_vm0, %v12594_v1 }
 0x341   : > { %9469 = vmatmul.mubr.msk.bf16.gmra.mrb[68].mxu0 %vm604_vm0, %v12509_v59 }
 0x342   : > { %4478 = vmatprep.mubr.bf16.mxu0 %v15901_v3 }
 0x344   : > { %10184 = vmatmul.mubr.msk.bf16.gmra.mrb[52].mxu1 %vm604_vm0, %v12610_v50 }
 0x345   : > { %10187 = vmatprep.mubr.msk.bf16.mxu1 %vm604_vm0, %v12618_v60 }
 0x349   : > { %9470 = vmatmul.mubr.msk.bf16.gmra.mrb[72].mxu0 %vm604_vm0, %v12511_v4 }
 0x34a   : > { %4488 = vmatprep.mubr.bf16.mxu0 %v15901_v3 }
 0x34c   : > { %10188 = vmatmul.mubr.msk.bf16.gmra.mrb[56].mxu1 %vm604_vm0, %v12635_v36 }
 0x34d   : > { %10191 = vmatprep.mubr.msk.bf16.mxu1 %vm604_vm0, %v12628_v41 }
 0x351   : > { %9471 = vmatmul.mubr.msk.bf16.gmra.mrb[76].mxu0 %vm604_vm0, %v12527_v45 }
 0x352   : > { %4498 = vmatprep.mubr.bf16.mxu0 %v15901_v3 }
 0x354   : > { %10192 = vmatmul.mubr.msk.bf16.gmra.mrb[60].mxu1 %vm604_vm0, %v12637_v44 }
 0x355   : > { %10195 = vmatprep.mubr.msk.bf16.mxu1 %vm604_vm0, %v12647_v58 }
 0x359   : > { %9472 = vmatmul.mubr.msk.bf16.gmra.mrb[80].mxu0 %vm604_vm0, %v12564_v12 }
 0x35a   : > { %4508 = vmatprep.mubr.bf16.mxu0 %v15901_v3 }
 0x35c   : > { %10196 = vmatmul.mubr.msk.bf16.gmra.mrb[64].mxu1 %vm604_vm0, %v12677_v56 }
 0x35d   : > { %10199 = vmatprep.mubr.msk.bf16.mxu1 %vm604_vm0, %v12661_v53 }
 0x361   : > { %9473 = vmatmul.mubr.msk.bf16.gmra.mrb[84].mxu0 %vm604_vm0, %v12550_v17 }
 0x362   : > { %4518 = vmatprep.mubr.bf16.mxu0 %v15901_v3 }
 0x364   : > { %10200 = vmatmul.mubr.msk.bf16.gmra.mrb[68].mxu1 %vm604_vm0, %v12679_v23 }
 0x365   : > { %10203 = vmatprep.mubr.msk.bf16.mxu1 %vm604_vm0, %v12683_v32 }
 0x369   : > { %9474 = vmatmul.mubr.msk.bf16.gmra.mrb[88].mxu0 %vm604_vm0, %v12566_v35 }
 0x36a   : > { %4528 = vmatprep.mubr.bf16.mxu0 %v15901_v3 }
 0x36c   : > { %10204 = vmatmul.mubr.msk.bf16.gmra.mrb[72].mxu1 %vm604_vm0, %v12690_v25 }
 0x36d   : > { %6765 = vmatprep.mubr.bf16.mxu1 %v15901_v3 }
 0x371   : > { %9475 = vmatmul.mubr.msk.bf16.gmra.mrb[92].mxu0 %vm604_vm0, %v12578_v43 }
 0x372   : > { %4538 = vmatprep.mubr.bf16.mxu0 %v15901_v3 }
 0x379   : > { %9476 = vmatmul.mubr.msk.bf16.gmra.mrb[96].mxu0 %vm604_vm0, %v12608_v5 }
 0x37a   : > { %4548 = vmatprep.mubr.bf16.mxu0 %v15901_v3 }
 0x381   : > { %9477 = vmatmul.mubr.msk.bf16.gmra.mrb[100].mxu0 %vm604_vm0, %v12594_v1 }
 0x382   : > { %4558 = vmatprep.mubr.bf16.mxu0 %v15901_v3 }
 0x389   : > { %9478 = vmatmul.mubr.msk.bf16.gmra.mrb[104].mxu0 %vm604_vm0, %v12610_v50 }
 0x38a   : > { %4568 = vmatprep.mubr.bf16.mxu0 %v15901_v3 }
 0x391   : > { %9479 = vmatmul.mubr.msk.bf16.gmra.mrb[108].mxu0 %vm604_vm0, %v12618_v60 }
 0x392   : > { %4578 = vmatprep.mubr.bf16.mxu0 %v15901_v3 }
 0x399   : > { %9480 = vmatmul.mubr.msk.bf16.gmra.mrb[112].mxu0 %vm604_vm0, %v12635_v36 }
 0x39a   : > { %4588 = vmatprep.mubr.bf16.mxu0 %v15901_v3 }
 0x3a1   : > { %9481 = vmatmul.mubr.msk.bf16.gmra.mrb[116].mxu0 %vm604_vm0, %v12628_v41 }
 0x3a2   : > { %4598 = vmatprep.mubr.bf16.mxu0 %v15901_v3 }
 0x3a9   : > { %9482 = vmatmul.mubr.msk.bf16.gmra.mrb[120].mxu0 %vm604_vm0, %v12637_v44 }
 0x3aa   : > { %4608 = vmatprep.mubr.bf16.mxu0 %v15901_v3 }
 0x3b1   : > { %9483 = vmatmul.mubr.msk.bf16.gmra.mrb[124].mxu0 %vm604_vm0, %v12647_v58  ;;  %v12788_v59 = vpop.f32.mrb[20].mxu0 }
 0x3b2   : > { %4618 = vmatprep.mubr.bf16.mxu0 %v15901_v3  ;;  %16088 = vst [vmem:[#allocation33_spill] sm:$0xff] %v12788_v59  ;;  %v12790_v4 = vpop.f32.mrb[21].mxu0 }
 0x3b3   : > { %16089 = vst [vmem:[#allocation41_spill] sm:$0xff] %v12790_v4  ;;  %v12792_v45 = vpop.f32.mrb[22].mxu0 }
 0x3b4   : > { %v10145_v51 = vpop.f32.mrb[12].mxu1  ;;  %16090 = vst [vmem:[#allocation49_spill] sm:$0xff] %v12792_v45  ;;  %v12797_v35 = vpop.f32.mrb[23].mxu0 }
 0x3b5   : > { %v12795_v17 = vadd.f32 %v10145_v51, %v12786_v42  ;;  %v4865_v12 = vpop.f32.mrb[13].mxu1  ;;  %16091 = vst [vmem:[#allocation4_spill] sm:$0xff] %v12797_v35 }
 0x3b6   : > { %v5121_v43 = vadd.f32 %v12786_v42, %v4865_v12  ;;  %v10146_v1 = vpop.f32.mrb[14].mxu1 }
 0x3b7   : > { %v5199_v5 = vsel %vm2105_vm8, %v12795_v17, -inf  ;;  %v12803_v50 = vadd.f32 %v10146_v1, %v12786_v42  ;;  %v4868_v60 = vpop.f32.mrb[15].mxu1 }
 0x3b8   : > { %v5200_v52 = vrot.slane %v5199_v5, 4  ;;  %v5185_v14 = vsel %vm2105_vm8, %v5121_v43, -inf  ;;  %v5122_v41 = vadd.f32 %v12786_v42, %v4868_v60 }
 0x3b9   : > { %9484 = vmatmul.mubr.msk.bf16.gmra.mrb[128].mxu0 %vm604_vm0, %v12677_v56  ;;  %v5186_v29 = vrot.slane %v5185_v14, 4  ;;  %v5206_v0 = vsel %vm2105_vm8, %v12803_v50, -inf  ;;  %v12813_v10 = vpop.f32.mrb[24].mxu0 }
 0x3ba   : > { %4628 = vmatprep.mubr.bf16.mxu0 %v15901_v3  ;;  %v5192_v24 = vsel %vm2105_vm8, %v5122_v41, -inf  ;;  %16092 = vst [vmem:[#allocation55_spill] sm:$0xff] %v12813_v10  ;;  %v5201_v11 = vmax.f32 %v5199_v5, %v5200_v52  ;;  %v12815_v36 = vpop.f32.mrb[25].mxu0  ;;  %v5207_v37 = vrot.slane %v5206_v0, 4 }
 0x3bb   : > { %v5187_v40 = vmax.f32 %v5185_v14, %v5186_v29  ;;  %v5193_v9 = vrot.slane %v5192_v24, 4  ;;  %16093 = vst [vmem:[#allocation28_spill] sm:$0xff] %v12815_v36  ;;  %v12817_v49 = vpop.f32.mrb[26].mxu0 }
 0x3bc   : > { %v10149_v44 = vpop.f32.mrb[16].mxu1  ;;  %16094 = vst [vmem:[#allocation20_spill] sm:$0xff] %v12817_v49  ;;  %v12819_v63 = vpop.f32.mrb[27].mxu0  ;;  %v5202_v2 = vrot.slane %v5201_v11, 2  ;;  %v5208_v34 = vmax.f32 %v5206_v0, %v5207_v37 }
 0x3bd   : > { %v5188_v27 = vrot.slane %v5187_v40, 2  ;;  %v5194_v6 = vmax.f32 %v5192_v24, %v5193_v9  ;;  %v4881_v30 = vpop.f32.mrb[17].mxu1  ;;  %16095 = vst [vmem:[#allocation56_spill] sm:$0xff] %v12819_v63  ;;  %v12822_v7 = vadd.f32 %v10149_v44, %v12786_v42 }
 0x3be   : > { %v10150_v55 = vpop.f32.mrb[18].mxu1  ;;  %v12825_v54 = vadd.f32 %v12786_v42, %v4881_v30  ;;  %v5203_v31 = vmax.f32 %v5201_v11, %v5202_v2  ;;  %v5209_v22 = vrot.slane %v5208_v34, 2 }
 0x3bf   : > { %v5189_v58 = vmax.f32 %v5187_v40, %v5188_v27  ;;  %v5195_v19 = vrot.slane %v5194_v6, 2  ;;  %v4884_v61 = vpop.f32.mrb[19].mxu1  ;;  %v5227_v47 = vsel %vm2105_vm8, %v12822_v7, -inf  ;;  %v12841_v18 = vadd.f32 %v10150_v55, %v12786_v42 }
 0x3c0   : > { %v5213_v33 = vsel %vm2105_vm8, %v12825_v54, -inf  ;;  %v5228_v56 = vrot.slane %v5227_v47, 4  ;;  %v5204_v1 = vrot.slane %v5203_v31, 1  ;;  %v5210_v5 = vmax.f32 %v5208_v34, %v5209_v22 }
 0x3c1   : > { %9485 = vmatmul.mubr.msk.bf16.gmra.mrb[132].mxu0 %vm604_vm0, %v12661_v53  ;;  %v5190_v28 = vrot.slane %v5189_v58, 1  ;;  %v5196_v16 = vmax.f32 %v5194_v6, %v5195_v19  ;;  %v12832_v48 = vpop.f32.mrb[28].mxu0  ;;  %v5214_v51 = vrot.slane %v5213_v33, 4  ;;  %v5234_v52 = vsel %vm2105_vm8, %v12841_v18, -inf }
 0x3c2   : > { %4638 = vmatprep.mubr.bf16.mxu0 %v15901_v3  ;;  %16096 = vst [vmem:[#allocation6_spill] sm:$0xff] %v12832_v48  ;;  %v12836_v15 = vpop.f32.mrb[29].mxu0  ;;  %v5229_v60 = vmax.f32 %v5227_v47, %v5228_v56  ;;  %v12855_v14 = vadd.f32 %v12786_v42, %v4884_v61  ;;  %v5205_v24 = vmax.f32 %v5203_v31, %v5204_v1  ;;  %v5235_v0 = vrot.slane %v5234_v52, 4 }
 0x3c3   : > { %v5191_v62 = vmax.f32 %v5189_v58, %v5190_v28  ;;  %v5197_v8 = vrot.slane %v5196_v16, 1  ;;  %16097 = vst [vmem:[#allocation16_spill] sm:$0xff] %v12836_v15  ;;  %v12838_v39 = vpop.f32.mrb[30].mxu0  ;;  %v5211_v44 = vrot.slane %v5210_v5, 1 }
 0x3c4   : > { %v10153_v38 = vpop.f32.mrb[20].mxu1  ;;  %16098 = vst [vmem:[#allocation58_spill] sm:$0xff] %v12838_v39  ;;  %v12843_v26 = vpop.f32.mrb[31].mxu0  ;;  %v5230_v27 = vrot.slane %v5229_v60, 2  ;;  %v5220_v6 = vsel %vm2105_vm8, %v12855_v14, -inf  ;;  %v5635_v19 = vsub.f32 %v12795_v17, %v5205_v24  ;;  %v5236_v61 = vmax.f32 %v5234_v52, %v5235_v0 }
 0x3c5   : > { %v5633_v53 = vsub.f32 %v5121_v43, %v5191_v62  ;;  %v5198_v21 = vmax.f32 %v5196_v16, %v5197_v8  ;;  %v4897_v13 = vpop.f32.mrb[21].mxu1  ;;  %16099 = vst [vmem:[#allocation8_spill] sm:$0xff] %v12843_v26  ;;  %v5221_v2 = vrot.slane %v5220_v6, 4  ;;  %v12879_v28 = vadd.f32 %v10153_v38, %v12786_v42 }
 0x3c6   : > { %v12845_v57 = vpop.f32.mrb[22].mxu1  ;;  %v5212_v16 = vmax.f32 %v5210_v5, %v5211_v44  ;;  %v5231_v34 = vmax.f32 %v5229_v60, %v5230_v27  ;;  %v5701_v31 = vmul.f32 1.442695, %v5635_v19 }
 0x3c7   : > { %v5697_v46 = vmul.f32 1.442695, %v5633_v53  ;;  %v5634_v20 = vsub.f32 %v5122_v41, %v5198_v21  ;;  %v12847_v12 = vpop.f32.mrb[23].mxu1  ;;  %v5215_v41 = vmax.f32 %v5213_v33, %v5214_v51  ;;  %v5237_v21 = vrot.slane %v5236_v61, 2 }
 0x3c8   : > { %v5222_v22 = vmax.f32 %v5220_v6, %v5221_v2  ;;  %v5255_v56 = vsel %vm2105_vm8, %v12879_v28, -inf  ;;  %v5232_v1 = vrot.slane %v5231_v34, 1 }
 0x3c9   : > { %9486 = vmatmul.mubr.msk.bf16.gmra.mrb[136].mxu0 %vm604_vm0, %v12679_v23  ;;  %10525 = vpow2.f32 %v5697_v46  ;;  %v5699_v43 = vmul.f32 1.442695, %v5634_v20  ;;  %v5216_v55 = vrot.slane %v5215_v41, 2  ;;  %v5636_v20 = vsub.f32 %v12803_v50, %v5212_v16 }
 0x3ca   : > { %4648 = vmatprep.mubr.bf16.mxu0 %v15901_v3  ;;  %v12857_v29 = vpop.f32.mrb[32].mxu0  ;;  %v5256_v52 = vrot.slane %v5255_v56, 4  ;;  %v5238_v50 = vmax.f32 %v5236_v61, %v5237_v21  ;;  %v5223_v44 = vrot.slane %v5222_v22, 2  ;;  %v5233_v6 = vmax.f32 %v5231_v34, %v5232_v1 }
 0x3cb   : > { %10527 = vpow2.f32 %v5699_v43  ;;  %16100 = vst [vmem:[#allocation14_spill] sm:$0xff] %v12857_v29  ;;  %v12859_v40 = vpop.f32.mrb[33].mxu0  ;;  %v5217_v8 = vmax.f32 %v5215_v41, %v5216_v55  ;;  %v5703_v27 = vmul.f32 1.442695, %v5636_v20 }
 0x3cc   : > { %16101 = vst [vmem:[#allocation3_spill] sm:$0xff] %v12859_v40  ;;  %v12861_v23 = vpop.f32.mrb[24].mxu1  ;;  %v12863_v9 = vpop.f32.mrb[34].mxu0  ;;  %10529 = vpow2.f32 %v5701_v31  ;;  %v5257_v31 = vmax.f32 %v5255_v56, %v5256_v52  ;;  %v5639_v61 = vsub.f32 %v12822_v7, %v5233_v6  ;;  %v12920_v56 = vadd.f32 %v12845_v57, %v12786_v42 }
 0x3cd   : > { %16102 = vst [vmem:[#allocation12_spill] sm:$0xff] %v12863_v9  ;;  %v12865_v11 = vpop.f32.mrb[25].mxu1  ;;  %v12869_v30 = vpop.f32.mrb[35].mxu0  ;;  %v5218_v60 = vrot.slane %v5217_v8, 1  ;;  %10531 = vpow2.f32 %v5703_v27  ;;  %v12930_v57 = vadd.f32 %v12786_v42, %v12847_v12 }
 0x3ce   : > { %16103 = vst [vmem:[#allocation18_spill] sm:$0xff] %v12869_v30  ;;  %v12871_v37 = vpop.f32.mrb[26].mxu1  ;;  %v5258_v1 = vrot.slane %v5257_v31, 2  ;;  %v5709_v52 = vmul.f32 1.442695, %v5639_v61 }
 0x3cf   : > { %v12873_v58 = vpop.f32.mrb[27].mxu1  ;;  %v5219_v2 = vmax.f32 %v5217_v8, %v5218_v60 }
 0x3d1   : > { %9487 = vmatmul.mubr.msk.bf16.gmra.mrb[140].mxu0 %vm604_vm0, %v12683_v32  ;;  %v12889_v32 = vadd.f32 %v12786_v42, %v4897_v13  ;;  %v5637_v8 = vsub.f32 %v12825_v54, %v5219_v2  ;;  %v5262_v54 = vsel %vm2105_vm8, %v12920_v56, -inf  ;;  %v5248_v2 = vsel %vm2105_vm8, %v12930_v57, -inf }
 0x3d2   : > { %4658 = vmatprep.mubr.bf16.mxu0 %v15901_v3  ;;  %v12884_v47 = vpop.f32.mrb[36].mxu0 }
 0x3d3   : > { %v12882_v62 = vpop.eup %10525  ;;  %16104 = vst [vmem:[#allocation53_spill] sm:$0xff] %v12884_v47  ;;  %v12891_v33 = vpop.f32.mrb[37].mxu0  ;;  %v5241_v41 = vsel %vm2105_vm8, %v12889_v32, -inf  ;;  %v5224_v47 = vmax.f32 %v5222_v22, %v5223_v44  ;;  %v5705_v7 = vmul.f32 1.442695, %v5637_v8  ;;  %v12958_v8 = vadd.f32 %v12786_v42, %v12865_v11 }
 0x3d4   : > { %v5825_v17 = vsel %vm2105_vm8, %v12882_v62, 0.0  ;;  %16105 = vst [vmem:[#allocation26_spill] sm:$0xff] %v12891_v33  ;;  %v12897_v46 = vpop.f32.mrb[38].mxu0  ;;  %v5242_v16 = vrot.slane %v5241_v41, 4  ;;  %v5239_v33 = vrot.slane %v5238_v50, 1 }
 0x3d5   : > { %v12893_v38 = vpop.eup %10527  ;;  %v5826_v53 = vrot.slane %v5825_v17, 4  ;;  %16106 = vst [vmem:[#allocation63_spill] sm:$0xff] %v12897_v46  ;;  %v12902_v13 = vpop.f32.mrb[39].mxu0 }
 0x3d6   : > { %v5832_v51 = vsel %vm2105_vm8, %v12893_v38, 0.0  ;;  %16107 = vst [vmem:[#allocation25_spill] sm:$0xff] %v12902_v13  ;;  %v5240_v22 = vmax.f32 %v5238_v50, %v5239_v33  ;;  %v12922_v60 = vpop.eup %10529 }
 0x3d7   : > { %v5827_v43 = vadd.f32 %v5826_v53, %v5825_v17  ;;  %v5833_v5 = vrot.slane %v5832_v51, 4  ;;  %v5839_v44 = vsel %vm2105_vm8, %v12922_v60, 0.0 }
 0x3d8   : > { %v5640_v33 = vsub.f32 %v12841_v18, %v5240_v22  ;;  %v12947_v18 = vadd.f32 %v12861_v23, %v12786_v42 }
 0x3d9   : > { %9488 = vmatmul.mubr.msk.bf16.gmra.mrb[144].mxu0 %vm604_vm0, %v12690_v25  ;;  %v5828_v24 = vrot.slane %v5827_v43, 2  ;;  %v5834_v0 = vadd.f32 %v5833_v5, %v5832_v51  ;;  %v5243_v51 = vmax.f32 %v5241_v41, %v5242_v16  ;;  %v5225_v5 = vrot.slane %v5224_v47, 1 }
 0x3da   : > { %v12908_v17 = vpop.f32.mrb[40].mxu0  ;;  %v5840_v16 = vrot.slane %v5839_v44, 4 }
 0x3db   : > { %v5829_v55 = vadd.f32 %v5828_v24, %v5827_v43  ;;  %v5835_v19 = vrot.slane %v5834_v0, 2  ;;  %16108 = vst [vmem:[#allocation29_spill] sm:$0xff] %v12908_v17  ;;  %v12910_v53 = vpop.f32.mrb[41].mxu0  ;;  %v5244_v24 = vrot.slane %v5243_v51, 2 }
 0x3dc   : > { %16109 = vst [vmem:[#allocation48_spill] sm:$0xff] %v12910_v53  ;;  %v12912_v25 = vpop.f32.mrb[42].mxu0  ;;  %v5841_v11 = vadd.f32 %v5840_v16, %v5839_v44 }
 0x3dd   : > { %v5830_v13 = vrot.slane %v5829_v55, 1  ;;  %v5836_v46 = vadd.f32 %v5835_v19, %v5834_v0  ;;  %16110 = vst [vmem:[#allocation30_spill] sm:$0xff] %v12912_v25  ;;  %v12915_v21 = vpop.f32.mrb[43].mxu0  ;;  %v5259_v0 = vmax.f32 %v5257_v31, %v5258_v1  ;;  %v5245_v6 = vmax.f32 %v5243_v51, %v5244_v24  ;;  %v12941_v19 = vpop.eup %10531 }
 0x3de   : > { %16111 = vst [vmem:[#allocation57_spill] sm:$0xff] %v12915_v21  ;;  %v5711_v31 = vmul.f32 1.442695, %v5640_v33  ;;  %v5846_v23 = vsel %vm2105_vm8, %v12941_v19, 0.0 }
 0x3df   : > { %v5831_v34 = vadd.f32 %v5830_v13, %v5829_v55  ;;  %v5837_v20 = vrot.slane %v5836_v46, 1  ;;  %v5263_v55 = vrot.slane %v5262_v54, 4  ;;  %v5260_v12 = vrot.slane %v5259_v0, 1 }
 0x3e1   : > { %10533 = vrcp.f32 %v5831_v34  ;;  %v5838_v43 = vadd.f32 %v5837_v20, %v5836_v46  ;;  %v5226_v46 = vmax.f32 %v5224_v47, %v5225_v5  ;;  %v5283_v20 = vsel %vm2105_vm8, %v12947_v18, -inf }
 0x3e2   : > { %v12924_v13 = vpop.f32.mrb[44].mxu0  ;;  %v5264_v22 = vmax.f32 %v5262_v54, %v5263_v55  ;;  %v5249_v5 = vrot.slane %v5248_v2, 4  ;;  %v5284_v24 = vrot.slane %v5283_v20, 4  ;;  %v5847_v55 = vrot.slane %v5846_v23, 4 }
 0x3e3   : > { %10535 = vrcp.f32 %v5838_v43  ;;  %16112 = vst [vmem:[#allocation37_spill] sm:$0xff] %v12924_v13  ;;  %v12932_v41 = vpop.f32.mrb[45].mxu0  ;;  %v5638_v61 = vsub.f32 %v12855_v14, %v5226_v46  ;;  %v5246_v43 = vrot.slane %v5245_v6, 1 }
 0x3e4   : > { %16113 = vst [vmem:[#allocation27_spill] sm:$0xff] %v12932_v41  ;;  %v12935_v50 = vpop.f32.mrb[46].mxu0  ;;  %10537 = vpow2.f32 %v5709_v52  ;;  %v5265_v44 = vrot.slane %v5264_v22, 2  ;;  %v5250_v16 = vmax.f32 %v5248_v2, %v5249_v5 }
 0x3e5   : > { %16114 = vst [vmem:[#allocation64_spill] sm:$0xff] %v12935_v50  ;;  %v12939_v27 = vpop.f32.mrb[47].mxu0  ;;  %10539 = vpow2.f32 %v5705_v7  ;;  %v5261_v7 = vmax.f32 %v5259_v0, %v5260_v12  ;;  %v12972_v50 = vadd.f32 %v12871_v37, %v12786_v42  ;;  %v5269_v0 = vsel %vm2105_vm8, %v12958_v8, -inf }
 0x3e6   : > { %16115 = vst [vmem:[#allocation31_spill] sm:$0xff] %v12939_v27  ;;  %10541 = vpow2.f32 %v5711_v31  ;;  %v5707_v27 = vmul.f32 1.442695, %v5638_v61 }
 0x3e7   : > { %v12949_v47 = vpop.f32.mrb[28].mxu1  ;;  %v5643_v37 = vsub.f32 %v12879_v28, %v5261_v7 }
 0x3e8   : > { %v12952_v34 = vpop.f32.mrb[29].mxu1  ;;  %10543 = vpow2.f32 %v5707_v27 }
 0x3e9   : > { %v12960_v51 = vpop.f32.mrb[30].mxu1 }
 0x3ea   : > { %v12964_v52 = vpop.f32.mrb[31].mxu1  ;;  %v12966_v14 = vpop.f32.mrb[48].mxu0 }
 0x3eb   : > { %v10534_v1 = vpop.eup %10533  ;;  %16116 = vst [vmem:[#allocation59_spill] sm:$0xff] %v12966_v14  ;;  %v12968_v33 = vpop.f32.mrb[49].mxu0  ;;  %v5285_v14 = vmax.f32 %v5283_v20, %v5284_v24  ;;  %v5266_v20 = vmax.f32 %v5264_v22, %v5265_v44 }
 0x3ec   : > { %16117 = vst [vmem:[#allocation23_spill] sm:$0xff] %v12968_v33  ;;  %v12974_v41 = vpop.f32.mrb[50].mxu0  ;;  %v6274_v54 = vmul.f32 %v10534_v1, %v12882_v62  ;;  %v5247_v33 = vmax.f32 %v5245_v6, %v5246_v43  ;;  %v5842_v1 = vrot.slane %v5841_v11, 2  ;;  %v5848_v6 = vadd.f32 %v5847_v55, %v5846_v23 }
 0x3ed   : > { %v10536_v46 = vpop.eup %10535  ;;  %16118 = vst [vmem:[#allocation32_spill] sm:$0xff] %v12974_v41  ;;  %v12980_v12 = vpop.f32.mrb[51].mxu0  ;;  %v5251_v43 = vrot.slane %v5250_v16, 2  ;;  %v5717_v23 = vmul.f32 1.442695, %v5643_v37  ;;  %v5286_v24 = vrot.slane %v5285_v14, 2 }
 0x3ee   : > { %v6276_v13 = vmul.f32 %v10536_v46, %v12893_v38  ;;  %16119 = vst [vmem:[#allocation45_spill] sm:$0xff] %v12980_v12  ;;  %v12982_v31 = vpop.eup %10537  ;;  %v5270_v38 = vrot.slane %v5269_v0, 4  ;;  %v5290_v46 = vsel %vm2105_vm8, %v12972_v50, -inf  ;;  %v5267_v17 = vrot.slane %v5266_v20, 1 }
 0x3ef   : > { %16120 = vst [vmem:[#allocation40_spill] sm:$0xff] %v12982_v31  ;;  %v12985_v41 = vpop.f32.mrb[32].mxu1  ;;  %v12987_v62 = vpop.eup %10539  ;;  %v5867_v28 = vsel %vm2105_vm8, %v12982_v31, 0.0  ;;  %v5252_v30 = vmax.f32 %v5250_v16, %v5251_v43  ;;  %10545 = vpow2.f32 %v5717_v23 }
 0x3f0   : > { %v9660_v61 = vpack.c.bf16 %v6276_v13, %v6274_v54  ;;  %16121 = vst [vmem:[#allocation13_spill] sm:$0xff] %v12987_v62  ;;  %v12991_v21 = vpop.f32.mrb[33].mxu1  ;;  %v5641_v13 = vsub.f32 %v12889_v32, %v5247_v33  ;;  %v5853_v27 = vsel %vm2105_vm8, %v12987_v62, 0.0  ;;  %v5291_v54 = vrot.slane %v5290_v46, 4 }
 0x3f1   : > { %v12993_v2 = vpop.f32.mrb[34].mxu1  ;;  %v5271_v12 = vmax.f32 %v5269_v0, %v5270_v38  ;;  %v5849_v32 = vrot.slane %v5848_v6, 2  ;;  %v5868_v22 = vrot.slane %v5867_v28, 4  ;;  %v13012_v33 = vadd.f32 %v12786_v42, %v12873_v58 }
 0x3f2   : > { %9559 = vmatmul.mubr.msk.bf16.vlgmr.msra.gmra.mrb[76].mxu1 %vm2105_vm8, %v9660_v61  ;;  %v12999_v5 = vpop.f32.mrb[35].mxu1  ;;  %v13001_v7 = vpop.f32.mrb[52].mxu0  ;;  %v5843_v61 = vadd.f32 %v5842_v1, %v5841_v11  ;;  %v5854_v53 = vrot.slane %v5853_v27, 4  ;;  %v5713_v37 = vmul.f32 1.442695, %v5641_v13  ;;  %v5292_v11 = vmax.f32 %v5290_v46, %v5291_v54 }
 0x3f3   : > { %16122 = vst [vmem:[#allocation36_spill] sm:$0xff] %v13001_v7  ;;  %6775 = vmatprep.mubr.bf16.mxu1 %v15901_v3  ;;  %v13006_v55 = vpop.f32.mrb[53].mxu0  ;;  %v13016_v7 = vpop.eup %10541  ;;  %v13020_v0 = vadd.f32 %v12949_v47, %v12786_v42  ;;  %v5272_v58 = vrot.slane %v5271_v12, 2  ;;  %v5869_v9 = vadd.f32 %v5868_v22, %v5867_v28  ;;  %v5276_v13 = vsel %vm2105_vm8, %v13012_v33, -inf }
 0x3f4   : > { %16123 = vst [vmem:[#allocation34_spill] sm:$0xff] %v13006_v55  ;;  %v13008_v25 = vpop.f32.mrb[54].mxu0  ;;  %16126 = vst [vmem:[#allocation17_spill] sm:$0xff] %v13016_v7  ;;  %v5287_v55 = vmax.f32 %v5285_v14, %v5286_v24  ;;  %v5844_v38 = vrot.slane %v5843_v61, 1  ;;  %v5874_v47 = vsel %vm2105_vm8, %v13016_v7, 0.0  ;;  %v5268_v46 = vmax.f32 %v5266_v20, %v5267_v17  ;;  %v13038_v54 = vpop.eup %10543 }
 0x3f5   : > { %16124 = vst [vmem:[#allocation60_spill] sm:$0xff] %v13008_v25  ;;  %v13014_v44 = vpop.f32.mrb[55].mxu0  ;;  %v5311_v16 = vsel %vm2105_vm8, %v13020_v0, -inf  ;;  %v5253_v43 = vrot.slane %v5252_v30, 1  ;;  %16128 = vst [vmem:[#allocation22_spill] sm:$0xff] %v13038_v54  ;;  %10547 = vpow2.f32 %v5713_v37  ;;  %v5273_v40 = vmax.f32 %v5271_v12, %v5272_v58 }
 0x3f6   : > { %16125 = vst [vmem:[#allocation62_spill] sm:$0xff] %v13014_v44  ;;  %v5850_v44 = vadd.f32 %v5849_v32, %v5848_v6  ;;  %v5855_v6 = vadd.f32 %v5854_v53, %v5853_v27  ;;  %v5288_v28 = vrot.slane %v5287_v55, 1  ;;  %v5293_v32 = vrot.slane %v5292_v11, 2 }
 0x3f7   : > { %v13022_v1 = vpop.f32.mrb[36].mxu1  ;;  %v5277_v29 = vrot.slane %v5276_v13, 4  ;;  %v5312_v26 = vrot.slane %v5311_v16, 4  ;;  %v5845_v15 = vadd.f32 %v5844_v38, %v5843_v61  ;;  %v5870_v20 = vrot.slane %v5869_v9, 2 }
 0x3f8   : > { %v13024_v25 = vpop.f32.mrb[37].mxu1  ;;  %v5851_v17 = vrot.slane %v5850_v44, 1  ;;  %v5875_v48 = vrot.slane %v5874_v47, 4  ;;  %v5644_v53 = vsub.f32 %v12920_v56, %v5268_v46  ;;  %v5254_v27 = vmax.f32 %v5252_v30, %v5253_v43 }
 0x3f9   : > { %v13030_v14 = vpop.f32.mrb[38].mxu1  ;;  %v13051_v37 = vadd.f32 %v12786_v42, %v12952_v34  ;;  %v5856_v12 = vrot.slane %v5855_v6, 2  ;;  %v5289_v58 = vmax.f32 %v5287_v55, %v5288_v28  ;;  %v13055_v61 = vadd.f32 %v12960_v51, %v12786_v42  ;;  %v13061_v56 = vpop.eup %10545 }
 0x3fa   : > { %v13034_v23 = vpop.f32.mrb[39].mxu1  ;;  %v5313_v49 = vmax.f32 %v5311_v16, %v5312_v26  ;;  %16132 = vst [vmem:[#allocation5_spill] sm:$0xff] %v13061_v56  ;;  %10549 = vrcp.f32 %v5845_v15  ;;  %v5871_v30 = vadd.f32 %v5870_v20, %v5869_v9  ;;  %v5876_v34 = vadd.f32 %v5875_v48, %v5874_v47 }
 0x3fb   : > { %v5852_v55 = vadd.f32 %v5851_v17, %v5850_v44  ;;  %v5642_v51 = vsub.f32 %v12930_v57, %v5254_v27  ;;  %v5297_v28 = vsel %vm2105_vm8, %v13051_v37, -inf  ;;  %v5318_v48 = vsel %vm2105_vm8, %v13055_v61, -inf }
 0x3fc   : > { %v13036_v24 = vpop.f32.mrb[56].mxu0  ;;  %v5895_v44 = vsel %vm2105_vm8, %v13061_v56, 0.0  ;;  %v5314_v47 = vrot.slane %v5313_v49, 2 }
 0x3fd   : > { %16127 = vst [vmem:[#allocation38_spill] sm:$0xff] %v13036_v24  ;;  %v13040_v22 = vpop.f32.mrb[57].mxu0  ;;  %v5860_v24 = vsel %vm2105_vm8, %v13038_v54, 0.0 }
 0x3fe   : > { %16129 = vst [vmem:[#allocation35_spill] sm:$0xff] %v13040_v22  ;;  %v13042_v39 = vpop.f32.mrb[58].mxu0  ;;  %v5294_v22 = vmax.f32 %v5292_v11, %v5293_v32  ;;  %v5861_v46 = vrot.slane %v5860_v24, 4  ;;  %v5719_v11 = vmul.f32 1.442695, %v5644_v53  ;;  %v5872_v53 = vrot.slane %v5871_v30, 1 }
 0x3ff   : > { %16130 = vst [vmem:[#allocation61_spill] sm:$0xff] %v13042_v39  ;;  %v13044_v63 = vpop.f32.mrb[59].mxu0  ;;  %v13057_v38 = vpop.f32.mrb[40].mxu1  ;;  %v5278_v39 = vmax.f32 %v5276_v13, %v5277_v29  ;;  %v5857_v29 = vadd.f32 %v5856_v12, %v5855_v6  ;;  %v5647_v13 = vsub.f32 %v12947_v18, %v5289_v58  ;;  %v5877_v6 = vrot.slane %v5876_v34, 2 }
 0x400   : > { %16131 = vst [vmem:[#allocation39_spill] sm:$0xff] %v13044_v63  ;;  %v5274_v63 = vrot.slane %v5273_v40, 1  ;;  %v13059_v36 = vpop.f32.mrb[41].mxu1  ;;  %v5295_v15 = vrot.slane %v5294_v22, 1  ;;  %v13081_v20 = vpop.eup %10547  ;;  %v5862_v27 = vadd.f32 %v5861_v46, %v5860_v24  ;;  %v5298_v18 = vrot.slane %v5297_v28, 4 }
 0x401   : > { %v13063_v43 = vpop.f32.mrb[42].mxu1  ;;  %v5279_v16 = vrot.slane %v5278_v39, 2  ;;  %16136 = vst [vmem:[#allocation15_spill] sm:$0xff] %v13081_v20  ;;  %10551 = vpow2.f32 %v5719_v11  ;;  %v5715_v58 = vmul.f32 1.442695, %v5642_v51  ;;  %v5881_v45 = vsel %vm2105_vm8, %v13081_v20, 0.0 }
 0x402   : > { %v13068_v32 = vpop.f32.mrb[43].mxu1  ;;  %v5275_v57 = vmax.f32 %v5273_v40, %v5274_v63  ;;  %v5858_v63 = vrot.slane %v5857_v29, 1  ;;  %v5896_v40 = vrot.slane %v5895_v44, 4  ;;  %v5725_v10 = vmul.f32 1.442695, %v5647_v13 }
 0x403   : > { %v5296_v35 = vmax.f32 %v5294_v22, %v5295_v15  ;;  %v5280_v46 = vmax.f32 %v5278_v39, %v5279_v16  ;;  %v5873_v51 = vadd.f32 %v5872_v53, %v5871_v30  ;;  %v5878_v4 = vadd.f32 %v5877_v6, %v5876_v34 }
 0x404   : > { %v13070_v26 = vpop.f32.mrb[60].mxu0  ;;  %v5645_v24 = vsub.f32 %v12958_v8, %v5275_v57  ;;  %v5299_v59 = vmax.f32 %v5297_v28, %v5298_v18  ;;  %v5863_v22 = vrot.slane %v5862_v27, 2  ;;  %10553 = vpow2.f32 %v5715_v58  ;;  %v13108_v39 = vpop.eup %10549 }
 0x405   : > { %16133 = vst [vmem:[#allocation7_spill] sm:$0xff] %v13070_v26  ;;  %v13075_v9 = vpop.f32.mrb[61].mxu0  ;;  %v5319_v26 = vrot.slane %v5318_v48, 4  ;;  %v5897_v30 = vadd.f32 %v5896_v40, %v5895_v44  ;;  %v5882_v34 = vrot.slane %v5881_v45, 4  ;;  %10555 = vpow2.f32 %v5725_v10 }
 0x406   : > { %16134 = vst [vmem:[#allocation19_spill] sm:$0xff] %v13075_v9  ;;  %v13079_v17 = vpop.f32.mrb[62].mxu0  ;;  %v13087_v9 = vadd.f32 %v12786_v42, %v12964_v52  ;;  %v13098_v52 = vadd.f32 %v12985_v41, %v12786_v42  ;;  %v5648_v41 = vsub.f32 %v12972_v50, %v5296_v35  ;;  %v5859_v28 = vadd.f32 %v5858_v63, %v5857_v29 }
 0x407   : > { %16135 = vst [vmem:[#allocation42_spill] sm:$0xff] %v13079_v17  ;;  %v13083_v12 = vpop.f32.mrb[63].mxu0  ;;  %v13089_v17 = vpop.f32.mrb[44].mxu1  ;;  %v5320_v15 = vmax.f32 %v5318_v48, %v5319_v26  ;;  %v5721_v57 = vmul.f32 1.442695, %v5645_v24  ;;  %v5281_v16 = vrot.slane %v5280_v46, 1  ;;  %10557 = vrcp.f32 %v5852_v55 }
 0x408   : > { %16137 = vst [vmem:[#allocation54_spill] sm:$0xff] %v13083_v12  ;;  %v5315_v12 = vmax.f32 %v5313_v49, %v5314_v47  ;;  %v13094_v11 = vpop.f32.mrb[45].mxu1  ;;  %v5304_v56 = vsel %vm2105_vm8, %v13087_v9, -inf  ;;  %v5879_v53 = vrot.slane %v5878_v4, 1  ;;  %v5300_v26 = vrot.slane %v5299_v59, 2 }
 0x409   : > { %v13100_v13 = vpop.f32.mrb[46].mxu1  ;;  %v5305_v48 = vrot.slane %v5304_v56, 4  ;;  %v5339_v6 = vsel %vm2105_vm8, %v13098_v52, -inf  ;;  %v5864_v18 = vadd.f32 %v5863_v22, %v5862_v27  ;;  %v5321_v58 = vrot.slane %v5320_v15, 2 }
 0x40a   : > { %v13104_v8 = vpop.f32.mrb[47].mxu1  ;;  %v5316_v47 = vrot.slane %v5315_v12, 1  ;;  %10559 = vrcp.f32 %v5873_v51  ;;  %v5883_v44 = vadd.f32 %v5882_v34, %v5881_v45  ;;  %v5727_v40 = vmul.f32 1.442695, %v5648_v41 }
 0x40b   : > { %v13115_v35 = vpop.eup %10551  ;;  %10561 = vpow2.f32 %v5721_v57  ;;  %v5282_v50 = vmax.f32 %v5280_v46, %v5281_v16  ;;  %v5340_v63 = vrot.slane %v5339_v6, 4  ;;  %v5880_v20 = vadd.f32 %v5879_v53, %v5878_v4 }
 0x40c   : > { %v13106_v49 = vpop.f32.mrb[64].mxu0  ;;  %16139 = vst [vmem:[#allocation21_spill] sm:$0xff] %v13115_v35  ;;  %v5317_v29 = vmax.f32 %v5315_v12, %v5316_v47  ;;  %10563 = vrcp.f32 %v5859_v28  ;;  %v5301_v7 = vmax.f32 %v5299_v59, %v5300_v26  ;;  %v5306_v55 = vmax.f32 %v5304_v56, %v5305_v48 }
 0x40d   : > { %16138 = vst [vmem:[#allocation46_spill] sm:$0xff] %v13106_v49  ;;  %v5898_v49 = vrot.slane %v5897_v30, 2  ;;  %v5865_v51 = vrot.slane %v5864_v18, 1  ;;  %v5322_v22 = vmax.f32 %v5320_v15, %v5321_v58  ;;  %v5341_v45 = vmax.f32 %v5339_v6, %v5340_v63  ;;  %v13145_v53 = vpop.f32.mrb[65].mxu0 }
 0x40e   : > { %v13123_v34 = vadd.f32 %v12786_v42, %v12991_v21  ;;  %v5884_v12 = vrot.slane %v5883_v44, 2  ;;  %v5902_v57 = vsel %vm2105_vm8, %v13115_v35, 0.0  ;;  %10565 = vpow2.f32 %v5727_v40  ;;  %v13129_v4 = vpop.eup %10553  ;;  %16143 = vst [vmem:[#allocation24_spill] sm:$0xff] %v13145_v53  ;;  %v13147_v48 = vpop.f32.mrb[66].mxu0 }
 0x40f   : > { %v13113_v10 = vpop.f32.mrb[48].mxu1  ;;  %v5899_v46 = vadd.f32 %v5898_v49, %v5897_v30  ;;  %16141 = vst [vmem:[#allocation2_spill] sm:$0xff] %v13129_v4  ;;  %v5646_v59 = vsub.f32 %v13012_v33, %v5282_v50  ;;  %v5651_v56 = vsub.f32 %v13020_v0, %v5317_v29  ;;  %v13137_v21 = vadd.f32 %v12993_v2, %v12786_v42  ;;  %v13139_v28 = vpop.eup %10555 }
 0x410   : > { %v13117_v24 = vpop.f32.mrb[49].mxu1  ;;  %v5325_v15 = vsel %vm2105_vm8, %v13123_v34, -inf  ;;  %16142 = vst [vmem:[#allocation47_spill] sm:$0xff] %v13139_v28  ;;  %v5302_v49 = vrot.slane %v5301_v7, 1  ;;  %v5307_v30 = vrot.slane %v5306_v55, 2  ;;  %v13143_v47 = vadd.f32 %v12786_v42, %v12999_v5  ;;  %16144 = vst [vmem:[#allocation11_spill] sm:$0xff] %v13147_v48 }
 0x411   : > { %v13119_v27 = vpop.f32.mrb[50].mxu1  ;;  %v5326_v16 = vrot.slane %v5325_v15, 4  ;;  %10567 = vrcp.f32 %v5880_v20  ;;  %v5903_v33 = vrot.slane %v5902_v57, 4  ;;  %v5323_v0 = vrot.slane %v5322_v22, 1  ;;  %v13151_v29 = vpop.f32.mrb[67].mxu0 }
 0x412   : > { %v13125_v41 = vpop.f32.mrb[51].mxu1  ;;  %v5342_v26 = vrot.slane %v5341_v45, 2  ;;  %v5866_v6 = vadd.f32 %v5865_v51, %v5864_v18  ;;  %v5900_v2 = vrot.slane %v5899_v46, 1  ;;  %v5885_v58 = vadd.f32 %v5884_v12, %v5883_v44  ;;  %16146 = vst [vmem:[#allocation50_spill] sm:$0xff] %v13151_v29  ;;  %v13153_v63 = vpop.eup %10557 }
 0x413   : > { %16140 = vst [vmem:[#allocation43_spill] sm:$0xff] %v13125_v41  ;;  %v5327_v40 = vmax.f32 %v5325_v15, %v5326_v16  ;;  %v5888_v5 = vsel %vm2105_vm8, %v13129_v4, 0.0  ;;  %v5923_v20 = vsel %vm2105_vm8, %v13139_v28, 0.0  ;;  %v5723_v53 = vmul.f32 1.442695, %v5646_v59 }
 0x414   : > { %v5346_v48 = vsel %vm2105_vm8, %v13137_v21, -inf  ;;  %v13163_v44 = vpop.eup %10559  ;;  %v5733_v51 = vmul.f32 1.442695, %v5651_v56  ;;  %v5303_v12 = vmax.f32 %v5301_v7, %v5302_v49  ;;  %v5308_v15 = vmax.f32 %v5306_v55, %v5307_v30 }
 0x415   : > { %16148 = vst [vmem:[#allocation51_spill] sm:$0xff] %v13163_v44  ;;  %v5332_v16 = vsel %vm2105_vm8, %v13143_v47, -inf  ;;  %v13169_v35 = vpop.eup %10561  ;;  %v5904_v4 = vadd.f32 %v5903_v33, %v5902_v57  ;;  %v5324_v28 = vmax.f32 %v5322_v22, %v5323_v0  ;;  %v5343_v59 = vmax.f32 %v5341_v45, %v5342_v26 }
 0x416   : > { %16150 = vst [vmem:[#allocation52_spill] sm:$0xff] %v13169_v35  ;;  %v5328_v31 = vrot.slane %v5327_v40, 2  ;;  %v13173_v62 = vpop.eup %10563  ;;  %v5886_v44 = vrot.slane %v5885_v58, 1  ;;  %v5889_v56 = vrot.slane %v5888_v5, 4  ;;  %v5347_v7 = vrot.slane %v5346_v48, 4 }
 0x417   : > { %v13149_v50 = vpop.f32.mrb[52].mxu1  ;;  %16152 = vst [vmem:[#allocation66_spill] sm:$0xff] %v13173_v62  ;;  %v5924_v55 = vrot.slane %v5923_v20, 4  ;;  %10569 = vpow2.f32 %v5723_v53  ;;  %v5333_v49 = vrot.slane %v5332_v16, 4  ;;  %v13177_v30 = vadd.f32 %v13022_v1, %v12786_v42 }
 0x418   : > { %16145 = vst [vmem:[#allocation44_spill] sm:$0xff] %v13149_v50  ;;  %v13161_v18 = vpop.f32.mrb[53].mxu1  ;;  %v13181_v22 = vpop.eup %10565  ;;  %v5909_v45 = vsel %vm2105_vm8, %v13169_v35, 0.0  ;;  %10571 = vpow2.f32 %v5733_v51  ;;  %v5309_v57 = vrot.slane %v5308_v15, 1  ;;  %v5905_v33 = vrot.slane %v5904_v4, 2 }
 0x419   : > { %16147 = vst [vmem:[#allocation9_spill] sm:$0xff] %v13161_v18  ;;  %v13167_v29 = vpop.f32.mrb[54].mxu1  ;;  %v5901_v18 = vadd.f32 %v5900_v2, %v5899_v46  ;;  %16154 = vst [vmem:[#allocation68_spill] sm:$0xff] %v13181_v22  ;;  %v5649_v46 = vsub.f32 %v13051_v37, %v5303_v12  ;;  %v5652_v0 = vsub.f32 %v13055_v61, %v5324_v28  ;;  %v5344_v53 = vrot.slane %v5343_v59, 1 }
 0x41a   : > { %16149 = vst [vmem:[#allocation10_spill] sm:$0xff] %v13167_v29  ;;  %v13171_v50 = vpop.f32.mrb[55].mxu1  ;;  %v13179_v29 = vpop.f32.mrb[68].mxu0  ;;  %v5329_v26 = vmax.f32 %v5327_v40, %v5328_v31  ;;  %10573 = vrcp.f32 %v5866_v6  ;;  %v5887_v2 = vadd.f32 %v5886_v44, %v5885_v58  ;;  %v5890_v1 = vadd.f32 %v5889_v56, %v5888_v5 }
 0x41b   : > { %16151 = vst [vmem:[#allocation65_spill] sm:$0xff] %v13171_v50  ;;  %16153 = vst [vmem:[#allocation67_spill] sm:$0xff] %v13179_v29  ;;  %v5348_v50 = vmax.f32 %v5346_v48, %v5347_v7  ;;  %v13189_v29 = vpop.eup %10567  ;;  %v5925_v54 = vadd.f32 %v5924_v55, %v5923_v20  ;;  %v5910_v41 = vrot.slane %v5909_v45, 4  ;;  %v5334_v35 = vmax.f32 %v5332_v16, %v5333_v49 }
 0x41c   : > { %v5367_v37 = vsel %vm2105_vm8, %v13177_v30, -inf  ;;  %10575 = vrcp.f32 %v5901_v18  ;;  %v5930_v31 = vsel %vm2105_vm8, %v13181_v22, 0.0  ;;  %v5729_v61 = vmul.f32 1.442695, %v5649_v46 }
 0x41d   : > { %v5310_v28 = vmax.f32 %v5308_v15, %v5309_v57  ;;  %v5906_v48 = vadd.f32 %v5905_v33, %v5904_v4  ;;  %v5735_v58 = vmul.f32 1.442695, %v5652_v0  ;;  %v5345_v40 = vmax.f32 %v5343_v59, %v5344_v53 }
 0x41e   : > { %v5330_v5 = vrot.slane %v5329_v26, 1  ;;  %10577 = vrcp.f32 %v5887_v2  ;;  %v5891_v44 = vrot.slane %v5890_v1, 2  ;;  %v5349_v12 = vrot.slane %v5348_v50, 2 }
 0x41f   : > { %v13187_v62 = vpop.f32.mrb[56].mxu1  ;;  %v5368_v16 = vrot.slane %v5367_v37, 4  ;;  %v5926_v56 = vrot.slane %v5925_v54, 2  ;;  %v5911_v7 = vadd.f32 %v5910_v41, %v5909_v45  ;;  %v5931_v18 = vrot.slane %v5930_v31, 4 }
 0x420   : > { %v13193_v51 = vpop.f32.mrb[57].mxu1  ;;  %v5335_v55 = vrot.slane %v5334_v35, 2  ;;  %10579 = vpow2.f32 %v5729_v61  ;;  %v5650_v49 = vsub.f32 %v13087_v9, %v5310_v28  ;;  %v5907_v46 = vrot.slane %v5906_v48, 1 }
 0x421   : > { %v13197_v6 = vpop.f32.mrb[58].mxu1  ;;  %v13202_v15 = vpop.eup %10569  ;;  %10581 = vpow2.f32 %v5735_v58  ;;  %v5655_v4 = vsub.f32 %v13098_v52, %v5345_v40  ;;  %v5331_v59 = vmax.f32 %v5329_v26, %v5330_v5  ;;  %v5892_v33 = vadd.f32 %v5891_v44, %v5890_v1 }
 0x422   : > { %v13199_v20 = vpop.f32.mrb[59].mxu1  ;;  %16156 = vst [vmem:[#allocation70_spill] sm:$0xff] %v13202_v15  ;;  %v13205_v57 = vpop.eup %10571  ;;  %v5350_v0 = vmax.f32 %v5348_v50, %v5349_v12  ;;  %v5369_v53 = vmax.f32 %v5367_v37, %v5368_v16  ;;  %v13209_v41 = vadd.f32 %v12786_v42, %v13024_v25  ;;  %v5927_v45 = vadd.f32 %v5926_v56, %v5925_v54 }
 0x423   : > { %16155 = vst [vmem:[#allocation69_spill] sm:$0xff] %v13199_v20  ;;  %16157 = vst [vmem:[#allocation71_spill] sm:$0xff] %v13205_v57  ;;  %v5912_v2 = vrot.slane %v5911_v7, 2  ;;  %v5932_v61 = vadd.f32 %v5931_v18, %v5930_v31  ;;  %v5336_v9 = vmax.f32 %v5334_v35, %v5335_v55  ;;  %v5916_v58 = vsel %vm2105_vm8, %v13202_v15, 0.0  ;;  %v13228_v37 = vpop.f32.mrb[69].mxu0  ;;  %v13253_v15 = vld [vmem:[%s12780_s20] sm:$0xff] }
 0x424   : > { %v13211_v28 = vpop.eup %10573  ;;  %v5731_v52 = vmul.f32 1.442695, %v5650_v49  ;;  %v5353_v26 = vsel %vm2105_vm8, %v13209_v41, -inf  ;;  %v13219_v50 = vadd.f32 %v13030_v14, %v12786_v42  ;;  %v5951_v25 = vsel %vm2105_vm8, %v13205_v57, 0.0  ;;  %16158 = vst [vmem:[#allocation72_spill] sm:$0xff] %v13228_v37  ;;  %v13232_v14 = vpop.f32.mrb[70].mxu0 }
 0x425   : > { %v5741_v54 = vmul.f32 1.442695, %v5655_v4  ;;  %v5653_v1 = vsub.f32 %v13123_v34, %v5331_v59  ;;  %v13226_v35 = vadd.f32 %v12786_v42, %v13034_v23  ;;  %v5908_v40 = vadd.f32 %v5907_v46, %v5906_v48  ;;  %16160 = vst [vmem:[#allocation74_spill] sm:$0xff] %v13232_v14  ;;  %v13236_v49 = vpop.f32.mrb[71].mxu0 }
 0x426   : > { %v13230_v31 = vpop.eup %10575  ;;  %v5893_v5 = vrot.slane %v5892_v33, 1  ;;  %v5351_v44 = vrot.slane %v5350_v0, 1  ;;  %v5370_v12 = vrot.slane %v5369_v53, 2  ;;  %v5928_v56 = vrot.slane %v5927_v45, 1  ;;  %16162 = vst [vmem:[#allocation76_spill] sm:$0xff] %v13236_v49 }
 0x427   : > { %16159 = vst [vmem:[#allocation73_spill] sm:$0xff] %v13230_v31  ;;  %v13234_v16 = vpop.f32.mrb[60].mxu1  ;;  %v5913_v18 = vadd.f32 %v5912_v2, %v5911_v7  ;;  %v5337_v55 = vrot.slane %v5336_v9, 1  ;;  %v5354_v34 = vrot.slane %v5353_v26, 4  ;;  %v5917_v4 = vrot.slane %v5916_v58, 4 }
 0x428   : > { %16161 = vst [vmem:[#allocation75_spill] sm:$0xff] %v13234_v16  ;;  %v13238_v42 = vpop.f32.mrb[61].mxu1  ;;  %v13240_v23 = vpop.eup %10577  ;;  %v5952_v48 = vrot.slane %v5951_v25, 4  ;;  %10583 = vpow2.f32 %v5731_v52  ;;  %v5374_v46 = vsel %vm2105_vm8, %v13219_v50, -inf  ;;  %v5933_v14 = vrot.slane %v5932_v61, 2 }
 0x429   : > { %16163 = vst [vmem:[#allocation77_spill] sm:$0xff] %v13238_v42  ;;  %16164 = vst [vmem:[#allocation78_spill] sm:$0xff] %v13240_v23  ;;  %v13244_v59 = vpop.f32.mrb[62].mxu1  ;;  %10585 = vpow2.f32 %v5741_v54  ;;  %v5737_v7 = vmul.f32 1.442695, %v5653_v1  ;;  %v5360_v2 = vsel %vm2105_vm8, %v13226_v35, -inf  ;;  %v5352_v57 = vmax.f32 %v5350_v0, %v5351_v44 }
 0x42a   : > { %16165 = vst [vmem:[#allocation79_spill] sm:$0xff] %v13244_v59  ;;  %v13248_v49 = vpop.f32.mrb[63].mxu1  ;;  %v13250_v37 = vpop.eup %10579  ;;  %10587 = vrcp.f32 %v5908_v40  ;;  %v5371_v22 = vmax.f32 %v5369_v53, %v5370_v12  ;;  %v13257_v52 = vadd.f32 %v13253_v15, %v13057_v38  ;;  %v5914_v54 = vrot.slane %v5913_v18, 1 }
 0x42b   : > { %16166 = vst [vmem:[#allocation80_spill] sm:$0xff] %v13248_v49  ;;  %16167 = vst [vmem:[#allocation81_spill] sm:$0xff] %v13250_v37  ;;  %v13259_v31 = vpop.eup %10581  ;;  %v5338_v1 = vmax.f32 %v5336_v9, %v5337_v55  ;;  %v5355_v59 = vmax.f32 %v5353_v26, %v5354_v34  ;;  %v5375_v42 = vrot.slane %v5374_v46, 4  ;;  %v5918_v16 = vadd.f32 %v5917_v4, %v5916_v58  ;;  %v13263_v0 = vpop.f32.mrb[72].mxu0 }
 0x42c   : > { %16168 = vst [vmem:[#allocation82_spill] sm:$0xff] %v13259_v31  ;;  %v5953_v23 = vadd.f32 %v5952_v48, %v5951_v25  ;;  %v5361_v49 = vrot.slane %v5360_v2, 4  ;;  %v5395_v40 = vsel %vm2105_vm8, %v13257_v52, -inf  ;;  %16169 = vst [vmem:[#allocation83_spill] sm:$0xff] %v13263_v0  ;;  %v5894_v53 = vadd.f32 %v5893_v5, %v5892_v33 }
 0x42d   : > { %v5929_v44 = vadd.f32 %v5928_v56, %v5927_v45  ;;  %v5934_v12 = vadd.f32 %v5933_v14, %v5932_v61  ;;  %10589 = vpow2.f32 %v5737_v7  ;;  %v5937_v38 = vsel %vm2105_vm8, %v13250_v37, 0.0 }
 0x42e   : > { %v5958_v9 = vsel %vm2105_vm8, %v13259_v31, 0.0  ;;  %v5656_v26 = vsub.f32 %v13137_v21, %v5352_v57  ;;  %v5372_v58 = vrot.slane %v5371_v22, 1  ;;  %v5654_v25 = vsub.f32 %v13143_v47, %v5338_v1 }
 0x42f   : > { %v5356_v55 = vrot.slane %v5355_v59, 2  ;;  %v5376_v34 = vmax.f32 %v5374_v46, %v5375_v42  ;;  %v5396_v4 = vrot.slane %v5395_v40, 4  ;;  %v5915_v48 = vadd.f32 %v5914_v54, %v5913_v18 }
 0x430   : > { %v5919_v0 = vrot.slane %v5918_v16, 2  ;;  %v5954_v33 = vrot.slane %v5953_v23, 2  ;;  %v5362_v45 = vmax.f32 %v5360_v2, %v5361_v49  ;;  %10591 = vrcp.f32 %v5894_v53 }
 0x431   : > { %v5938_v61 = vrot.slane %v5937_v38, 4  ;;  %v5959_v5 = vrot.slane %v5958_v9, 4  ;;  %v13273_v14 = vadd.f32 %v13253_v15, %v13059_v36  ;;  %10593 = vrcp.f32 %v5929_v44 }
 0x432   : > { %v13275_v56 = vpop.eup %10583  ;;  %v5935_v21 = vrot.slane %v5934_v12, 1  ;;  %v5743_v57 = vmul.f32 1.442695, %v5656_v26  ;;  %v5373_v47 = vmax.f32 %v5371_v22, %v5372_v58  ;;  %v5739_v42 = vmul.f32 1.442695, %v5654_v25 }
 0x433   : > { %16170 = vst [vmem:[#allocation84_spill] sm:$0xff] %v13275_v56  ;;  %v13277_v7 = vpop.eup %10585  ;;  %v5357_v18 = vmax.f32 %v5355_v59, %v5356_v55  ;;  %v5377_v46 = vrot.slane %v5376_v34, 2  ;;  %v5397_v54 = vmax.f32 %v5395_v40, %v5396_v4  ;;  %10595 = vrcp.f32 %v5915_v48 }
 0x434   : > { %16171 = vst [vmem:[#allocation85_spill] sm:$0xff] %v13277_v7  ;;  %v13279_v49 = vpop.eup %10587  ;;  %v5920_v2 = vadd.f32 %v5919_v0, %v5918_v16  ;;  %v5955_v1 = vadd.f32 %v5954_v33, %v5953_v23  ;;  %v5363_v53 = vrot.slane %v5362_v45, 2  ;;  %v5939_v36 = vadd.f32 %v5938_v61, %v5937_v38 }
 0x435   : > { %16172 = vst [vmem:[#allocation86_spill] sm:$0xff] %v13279_v49  ;;  %v5960_v31 = vadd.f32 %v5959_v5, %v5958_v9  ;;  %v5381_v44 = vsel %vm2105_vm8, %v13273_v14, -inf  ;;  %v13285_v22 = vadd.f32 %v13253_v15, %v13063_v43  ;;  %v5944_v59 = vsel %vm2105_vm8, %v13275_v56, 0.0 }
 0x436   : > { %v5979_v40 = vsel %vm2105_vm8, %v13277_v7, 0.0  ;;  %10597 = vpow2.f32 %v5743_v57  ;;  %v5659_v16 = vsub.f32 %v13177_v30, %v5373_v47  ;;  %v5358_v0 = vrot.slane %v5357_v18, 1 }
 0x437   : > { %v13292_v23 = vpop.eup %10589  ;;  %10599 = vpow2.f32 %v5739_v42  ;;  %v5378_v38 = vmax.f32 %v5376_v34, %v5377_v46  ;;  %v5398_v9 = vrot.slane %v5397_v54, 2  ;;  %v5921_v26 = vrot.slane %v5920_v2, 1 }
 0x438   : > { %16173 = vst [vmem:[#allocation87_spill] sm:$0xff] %v13292_v23  ;;  %v5956_v58 = vrot.slane %v5955_v1, 1  ;;  %v5364_v25 = vmax.f32 %v5362_v45, %v5363_v53  ;;  %v5382_v43 = vrot.slane %v5381_v44, 4  ;;  %v5940_v55 = vrot.slane %v5939_v36, 2 }
 0x439   : > { %v5945_v4 = vrot.slane %v5944_v59, 4  ;;  %v5980_v48 = vrot.slane %v5979_v40, 4  ;;  %v5402_v33 = vsel %vm2105_vm8, %v13285_v22, -inf  ;;  %v5936_v61 = vadd.f32 %v5935_v21, %v5934_v12 }
 0x43a   : > { %v5961_v5 = vrot.slane %v5960_v31, 2  ;;  %v5965_v30 = vsel %vm2105_vm8, %v13292_v23, 0.0  ;;  %v5749_v57 = vmul.f32 1.442695, %v5659_v16  ;;  %v13298_v47 = vpop.eup %10591  ;;  %v5359_v34 = vmax.f32 %v5357_v18, %v5358_v0 }
 0x43b   : > { %16174 = vst [vmem:[#allocation88_spill] sm:$0xff] %v13298_v47  ;;  %v5379_v42 = vrot.slane %v5378_v38, 1  ;;  %v5399_v46 = vmax.f32 %v5397_v54, %v5398_v9  ;;  %v13302_v45 = vadd.f32 %v13253_v15, %v13068_v32  ;;  %v13304_v53 = vpop.eup %10593  ;;  %v5922_v7 = vadd.f32 %v5921_v26, %v5920_v2 }
 0x43c   : > { %v5365_v37 = vrot.slane %v5364_v25, 1  ;;  %v5383_v56 = vmax.f32 %v5381_v44, %v5382_v43  ;;  %v5403_v12 = vrot.slane %v5402_v33, 4  ;;  %v5957_v21 = vadd.f32 %v5956_v58, %v5955_v1 }
 0x43d   : > { %v5941_v49 = vadd.f32 %v5940_v55, %v5939_v36  ;;  %v5946_v20 = vadd.f32 %v5945_v4, %v5944_v59  ;;  %v5981_v23 = vadd.f32 %v5980_v48, %v5979_v40  ;;  %v13306_v16 = vpop.eup %10595  ;;  %v5962_v47 = vadd.f32 %v5961_v5, %v5960_v31 }
 0x43e   : > { %v5966_v18 = vrot.slane %v5965_v30, 4  ;;  %10601 = vpow2.f32 %v5749_v57  ;;  %v5388_v54 = vsel %vm2105_vm8, %v13302_v45, -inf  ;;  %v5657_v32 = vsub.f32 %v13209_v41, %v5359_v34 }
 0x43f   : > { %10603 = vrcp.f32 %v5936_v61  ;;  %v5380_v0 = vmax.f32 %v5378_v38, %v5379_v42  ;;  %v5400_v2 = vrot.slane %v5399_v46, 1  ;;  %v5366_v1 = vmax.f32 %v5364_v25, %v5365_v37  ;;  %v13319_v38 = vpop.f32.mrb[73].mxu0 }
 0x440   : > { %v13311_v9 = vpop.eup %10597  ;;  %10605 = vrcp.f32 %v5922_v7  ;;  %v5384_v36 = vrot.slane %v5383_v56, 2  ;;  %v5404_v44 = vmax.f32 %v5402_v33, %v5403_v12  ;;  %v5942_v40 = vrot.slane %v5941_v49, 1  ;;  %16177 = vst [vmem:[#allocation91_spill] sm:$0xff] %v13319_v38  ;;  %v13324_v48 = vpop.f32.mrb[74].mxu0 }
 0x441   : > { %16175 = vst [vmem:[#allocation89_spill] sm:$0xff] %v13311_v9  ;;  %v13313_v59 = vpop.eup %10599  ;;  %v5947_v31 = vrot.slane %v5946_v20, 2  ;;  %v5982_v26 = vrot.slane %v5981_v23, 2  ;;  %v5389_v58 = vrot.slane %v5388_v54, 4  ;;  %10607 = vrcp.f32 %v5957_v21  ;;  %16178 = vst [vmem:[#allocation92_spill] sm:$0xff] %v13324_v48  ;;  %v13326_v33 = vpop.f32.mrb[64].mxu1 }
 0x442   : > { %16176 = vst [vmem:[#allocation90_spill] sm:$0xff] %v13313_v59  ;;  %v5963_v43 = vrot.slane %v5962_v47, 1  ;;  %v5967_v55 = vadd.f32 %v5966_v18, %v5965_v30  ;;  %v13317_v41 = vadd.f32 %v13253_v15, %v13089_v17  ;;  %v5986_v37 = vsel %vm2105_vm8, %v13311_v9, 0.0  ;;  %v13331_v57 = vpop.f32.mrb[75].mxu0  ;;  %v13333_v34 = vpop.f32.mrb[65].mxu1 }
 0x443   : > { %v5745_v7 = vmul.f32 1.442695, %v5657_v32  ;;  %v5660_v25 = vsub.f32 %v13219_v50, %v5380_v0  ;;  %v5401_v4 = vmax.f32 %v5399_v46, %v5400_v2  ;;  %v5972_v61 = vsel %vm2105_vm8, %v13313_v59, 0.0  ;;  %16179 = vst [vmem:[#allocation93_spill] sm:$0xff] %v13331_v57  ;;  %v13335_v46 = vpop.f32.mrb[66].mxu1 }
 0x444   : > { %v5658_v5 = vsub.f32 %v13226_v35, %v5366_v1  ;;  %v5385_v17 = vmax.f32 %v5383_v56, %v5384_v36  ;;  %v5405_v30 = vrot.slane %v5404_v44, 2  ;;  %v5943_v42 = vadd.f32 %v5942_v40, %v5941_v49  ;;  %v13344_v49 = vpop.f32.mrb[67].mxu1 }
 0x445   : > { %v5948_v12 = vadd.f32 %v5947_v31, %v5946_v20  ;;  %v5983_v21 = vadd.f32 %v5982_v26, %v5981_v23  ;;  %v5390_v50 = vmax.f32 %v5388_v54, %v5389_v58  ;;  %v5968_v18 = vrot.slane %v5967_v55, 2 }
 0x446   : > { %v5987_v32 = vrot.slane %v5986_v37, 4  ;;  %v5423_v0 = vsel %vm2105_vm8, %v13317_v41, -inf  ;;  %v13341_v35 = vadd.f32 %v13253_v15, %v13094_v11  ;;  %v5973_v56 = vrot.slane %v5972_v61, 4 }
 0x447   : > { %10609 = vpow2.f32 %v5745_v7  ;;  %v5751_v2 = vmul.f32 1.442695, %v5660_v25  ;;  %v5663_v1 = vsub.f32 %v13257_v52, %v5401_v4  ;;  %v5747_v23 = vmul.f32 1.442695, %v5658_v5  ;;  %v13354_v25 = vpop.f32.mrb[76].mxu0 }
 0x448   : > { %v13346_v20 = vpop.eup %10601  ;;  %v5386_v54 = vrot.slane %v5385_v17, 1  ;;  %v5406_v36 = vmax.f32 %v5404_v44, %v5405_v30  ;;  %v13350_v40 = vadd.f32 %v13253_v15, %v13100_v13  ;;  %v5964_v11 = vadd.f32 %v5963_v43, %v5962_v47  ;;  %16181 = vst [vmem:[#allocation95_spill] sm:$0xff] %v13354_v25 }
 0x449   : > { %16180 = vst [vmem:[#allocation94_spill] sm:$0xff] %v13346_v20  ;;  %v13352_v31 = vpop.eup %10603  ;;  %v5949_v26 = vrot.slane %v5948_v12, 1  ;;  %v5391_v58 = vrot.slane %v5390_v50, 2  ;;  %v5424_v7 = vrot.slane %v5423_v0, 4  ;;  %v5984_v4 = vrot.slane %v5983_v21, 1 }
 0x44a   : > { %v13356_v52 = vpop.eup %10605  ;;  %v5969_v57 = vadd.f32 %v5968_v18, %v5967_v55  ;;  %v5988_v48 = vadd.f32 %v5987_v32, %v5986_v37  ;;  %v5409_v44 = vsel %vm2105_vm8, %v13341_v35, -inf  ;;  %v5974_v5 = vadd.f32 %v5973_v56, %v5972_v61 }
 0x44b   : > { %v6007_v13 = vsel %vm2105_vm8, %v13346_v20, 0.0  ;;  %10611 = vpow2.f32 %v5751_v2  ;;  %v5757_v30 = vmul.f32 1.442695, %v5663_v1  ;;  %v13362_v47 = vpop.eup %10607  ;;  %v5387_v43 = vmax.f32 %v5385_v17, %v5386_v54 }
 0x44c   : > { %16182 = vst [vmem:[#allocation96_spill] sm:$0xff] %v13362_v47  ;;  %10613 = vpow2.f32 %v5747_v23  ;;  %v5407_v38 = vrot.slane %v5406_v36, 1  ;;  %v5430_v25 = vsel %vm2105_vm8, %v13350_v40, -inf  ;;  %v5392_v55 = vmax.f32 %v5390_v50, %v5391_v58  ;;  %v16200_v47 = vld [vmem:[#allocation13_spill] sm:$0xff] }
 0x44d   : > { %10615 = vrcp.f32 %v5943_v42  ;;  %v5425_v37 = vmax.f32 %v5423_v0, %v5424_v7  ;;  %v5410_v18 = vrot.slane %v5409_v44, 4  ;;  %v5950_v32 = vadd.f32 %v5949_v26, %v5948_v12 }
 0x44e   : > { %10617 = vrcp.f32 %v5964_v11  ;;  %v5985_v61 = vadd.f32 %v5984_v4, %v5983_v21  ;;  %v5431_v56 = vrot.slane %v5430_v25, 4  ;;  %v5970_v9 = vrot.slane %v5969_v57, 1 }
 0x44f   : > { %v6008_v20 = vrot.slane %v6007_v13, 4  ;;  %10619 = vpow2.f32 %v5757_v30  ;;  %v13368_v2 = vadd.f32 %v13253_v15, %v13104_v8  ;;  %v5989_v17 = vrot.slane %v5988_v48, 2 }
 0x450   : > { %v5975_v1 = vrot.slane %v5974_v5, 2  ;;  %v5661_v23 = vsub.f32 %v13273_v14, %v5387_v43  ;;  %v5408_v54 = vmax.f32 %v5406_v36, %v5407_v38  ;;  %v5393_v50 = vrot.slane %v5392_v55, 1 }
 0x451   : > { %v13371_v42 = vpop.eup %10609  ;;  %v5426_v0 = vrot.slane %v5425_v37, 2  ;;  %v5411_v11 = vmax.f32 %v5409_v44, %v5410_v18  ;;  %v5416_v12 = vsel %vm2105_vm8, %v13368_v2, -inf  ;;  %10621 = vrcp.f32 %v5950_v32 }
 0x452   : > { %16183 = vst [vmem:[#allocation97_spill] sm:$0xff] %v13371_v42  ;;  %v5432_v21 = vmax.f32 %v5430_v25, %v5431_v56  ;;  %v5417_v26 = vrot.slane %v5416_v12, 4  ;;  %10623 = vrcp.f32 %v5985_v61  ;;  %v5971_v58 = vadd.f32 %v5970_v9, %v5969_v57  ;;  %v13386_v57 = vpop.f32.mrb[77].mxu0 }
 0x453   : > { %v6009_v8 = vadd.f32 %v6008_v20, %v6007_v13  ;;  %v5990_v7 = vadd.f32 %v5989_v17, %v5988_v48  ;;  %v5976_v4 = vadd.f32 %v5975_v1, %v5974_v5  ;;  %v5993_v14 = vsel %vm2105_vm8, %v13371_v42, 0.0  ;;  %16186 = vst [vmem:[#allocation100_spill] sm:$0xff] %v13386_v57  ;;  %v13390_v13 = vpop.f32.mrb[78].mxu0 }
 0x454   : > { %v5664_v38 = vsub.f32 %v13285_v22, %v5408_v54  ;;  %v5753_v30 = vmul.f32 1.442695, %v5661_v23  ;;  %v5394_v44 = vmax.f32 %v5392_v55, %v5393_v50  ;;  %v5427_v43 = vmax.f32 %v5425_v37, %v5426_v0  ;;  %16188 = vst [vmem:[#allocation102_spill] sm:$0xff] %v13390_v13  ;;  %v13392_v55 = vpop.f32.mrb[68].mxu1 }
 0x455   : > { %v13378_v36 = vpop.eup %10611  ;;  %v5412_v18 = vrot.slane %v5411_v11, 2  ;;  %v5433_v25 = vrot.slane %v5432_v21, 2  ;;  %v5418_v32 = vmax.f32 %v5416_v12, %v5417_v26  ;;  %v6278_v9 = vmul.f32 %v13108_v39, %v12922_v60 }
 0x456   : > { %16184 = vst [vmem:[#allocation98_spill] sm:$0xff] %v13378_v36  ;;  %v13380_v59 = vpop.eup %10613  ;;  %v6280_v48 = vmul.f32 %v13153_v63, %v12941_v19  ;;  %10625 = vrcp.f32 %v5971_v58  ;;  %v6010_v22 = vrot.slane %v6009_v8, 2  ;;  %v5994_v5 = vrot.slane %v5993_v14, 4  ;;  %v13398_v19 = vpop.f32.mrb[79].mxu0 }
 0x457   : > { %16185 = vst [vmem:[#allocation99_spill] sm:$0xff] %v13380_v59  ;;  %v13388_v20 = vpop.eup %10615  ;;  %v5991_v61 = vrot.slane %v5990_v7, 1  ;;  %v6014_v60 = vsel %vm2105_vm8, %v13378_v36, 0.0  ;;  %v5759_v39 = vmul.f32 1.442695, %v5664_v38  ;;  %16190 = vst [vmem:[#allocation104_spill] sm:$0xff] %v13398_v19  ;;  %10627 = vpow2.f32 %v5753_v30 }
 0x458   : > { %16187 = vst [vmem:[#allocation101_spill] sm:$0xff] %v13388_v20  ;;  %v13394_v37 = vpop.eup %10617  ;;  %v9661_v56 = vpack.c.bf16 %v6280_v48, %v6278_v9  ;;  %v13400_v63 = vpop.f32.mrb[69].mxu1  ;;  %v6000_v1 = vsel %vm2105_vm8, %v13380_v59, 0.0  ;;  %v5662_v23 = vsub.f32 %v13302_v45, %v5394_v44  ;;  %v5413_v54 = vmax.f32 %v5411_v11, %v5412_v18  ;;  %v16201_v20 = vld [vmem:[#allocation66_spill] sm:$0xff] }
 0x459   : > { %16189 = vst [vmem:[#allocation103_spill] sm:$0xff] %v13394_v37  ;;  %v13402_v17 = vpop.eup %10619  ;;  %v13407_v50 = vpop.f32.mrb[70].mxu1  ;;  %v5977_v0 = vrot.slane %v5976_v4, 1  ;;  %v5428_v12 = vrot.slane %v5427_v43, 1  ;;  %v5434_v26 = vmax.f32 %v5432_v21, %v5433_v25  ;;  %v5419_v58 = vrot.slane %v5418_v32, 2 }
 0x45a   : > { %16191 = vst [vmem:[#allocation105_spill] sm:$0xff] %v13402_v17  ;;  %9560 = vmatmul.mubr.msk.bf16.gmra.mrb[80].mxu1 %vm2105_vm8, %v9661_v56  ;;  %v13410_v38 = vpop.f32.mrb[71].mxu1  ;;  %v6011_v9 = vadd.f32 %v6010_v22, %v6009_v8  ;;  %v5995_v48 = vadd.f32 %v5994_v5, %v5993_v14  ;;  %v6015_v19 = vrot.slane %v6014_v60, 4  ;;  %v13414_v13 = vadd.f32 %v13253_v15, %v13113_v10  ;;  %v13433_v25 = vpop.f32.mrb[80].mxu0 }
 0x45b   : > { %6785 = vmatprep.mubr.bf16.mxu1 %v15901_v3  ;;  %v13417_v45 = vpop.eup %10621  ;;  %v6001_v11 = vrot.slane %v6000_v1, 4  ;;  %v6035_v21 = vsel %vm2105_vm8, %v13402_v17, 0.0  ;;  %10629 = vpow2.f32 %v5759_v39  ;;  %v13423_v30 = vadd.f32 %v13253_v15, %v13117_v24  ;;  %16194 = vst [vmem:[#allocation108_spill] sm:$0xff] %v13433_v25 }
 0x45c   : > { %16192 = vst [vmem:[#allocation106_spill] sm:$0xff] %v13417_v45  ;;  %v13425_v8 = vpop.eup %10623  ;;  %v5755_v14 = vmul.f32 1.442695, %v5662_v23  ;;  %v5414_v44 = vrot.slane %v5413_v54, 1  ;;  %v5451_v10 = vsel %vm2105_vm8, %v13414_v13, -inf  ;;  %v13431_v18 = vadd.f32 %v13253_v15, %v13119_v27 }
 0x45d   : > { %16193 = vst [vmem:[#allocation107_spill] sm:$0xff] %v13425_v8  ;;  %v5992_v22 = vadd.f32 %v5991_v61, %v5990_v7  ;;  %v5429_v5 = vmax.f32 %v5427_v43, %v5428_v12  ;;  %v5435_v39 = vrot.slane %v5434_v26, 1  ;;  %v5420_v56 = vmax.f32 %v5418_v32, %v5419_v58  ;;  %v16196_v43 = vld [vmem:[#allocation43_spill] sm:$0xff] }
 0x45e   : > { %v5978_v57 = vadd.f32 %v5977_v0, %v5976_v4  ;;  %v5996_v24 = vrot.slane %v5995_v48, 2  ;;  %v6016_v17 = vadd.f32 %v6015_v19, %v6014_v60  ;;  %v5452_v36 = vrot.slane %v5451_v10, 4 }
 0x45f   : > { %v6012_v59 = vrot.slane %v6011_v9, 1  ;;  %v6002_v23 = vadd.f32 %v6001_v11, %v6000_v1  ;;  %v6036_v42 = vrot.slane %v6035_v21, 4  ;;  %v5437_v8 = vsel %vm2105_vm8, %v13423_v30, -inf }
 0x460   : > { %v13437_v37 = vpop.eup %10625  ;;  %10631 = vpow2.f32 %v5755_v14  ;;  %v5415_v27 = vmax.f32 %v5413_v54, %v5414_v44  ;;  %v5458_v7 = vsel %vm2105_vm8, %v13431_v18, -inf  ;;  %v13443_v32 = vadd.f32 %v13253_v15, %v16196_v43 }
 0x461   : > { %16195 = vst [vmem:[#allocation109_spill] sm:$0xff] %v13437_v37  ;;  %10633 = vrcp.f32 %v5992_v22  ;;  %v5667_v4 = vsub.f32 %v13317_v41, %v5429_v5  ;;  %v5436_v61 = vmax.f32 %v5434_v26, %v5435_v39  ;;  %v5421_v60 = vrot.slane %v5420_v56, 1  ;;  %v13446_v19 = vpop.eup %10627 }
 0x462   : > { %16197 = vst [vmem:[#allocation43_spill] sm:$0xff] %v13446_v19  ;;  %v5997_v1 = vadd.f32 %v5996_v24, %v5995_v48  ;;  %v6017_v0 = vrot.slane %v6016_v17, 2  ;;  %v5453_v12 = vmax.f32 %v5451_v10, %v5452_v36  ;;  %v5438_v58 = vrot.slane %v5437_v8, 4 }
 0x463   : > { %10635 = vrcp.f32 %v5978_v57  ;;  %v6003_v54 = vrot.slane %v6002_v23, 2  ;;  %v5459_v11 = vrot.slane %v5458_v7, 4  ;;  %v6013_v14 = vadd.f32 %v6012_v59, %v6011_v9 }
 0x464   : > { %v6037_v44 = vadd.f32 %v6036_v42, %v6035_v21  ;;  %v5665_v25 = vsub.f32 %v13341_v35, %v5415_v27  ;;  %v5444_v22 = vsel %vm2105_vm8, %v13443_v32, -inf  ;;  %v6021_v41 = vsel %vm2105_vm8, %v13446_v19, 0.0  ;;  %v16199_v35 = vld [vmem:[#allocation22_spill] sm:$0xff] }
 0x465   : > { %v13451_v43 = vpop.eup %10629  ;;  %v5765_v26 = vmul.f32 1.442695, %v5667_v4  ;;  %v5668_v48 = vsub.f32 %v13350_v40, %v5436_v61  ;;  %v5422_v36 = vmax.f32 %v5420_v56, %v5421_v60  ;;  %v5998_v10 = vrot.slane %v5997_v1, 1 }
 0x466   : > { %16198 = vst [vmem:[#allocation110_spill] sm:$0xff] %v13451_v43  ;;  %v6018_v57 = vadd.f32 %v6017_v0, %v6016_v17  ;;  %v5454_v5 = vrot.slane %v5453_v12, 2  ;;  %v5439_v39 = vmax.f32 %v5437_v8, %v5438_v58  ;;  %v6004_v59 = vadd.f32 %v6003_v54, %v6002_v23 }
 0x467   : > { %v5460_v42 = vmax.f32 %v5458_v7, %v5459_v11  ;;  %v5445_v9 = vrot.slane %v5444_v22, 4  ;;  %v6284_v21 = vmul.f32 %v13211_v28, %v16199_v35  ;;  %v6038_v24 = vrot.slane %v6037_v44, 2 }
 0x468   : > { %v6022_v27 = vrot.slane %v6021_v41, 4  ;;  %v5761_v37 = vmul.f32 1.442695, %v5665_v25  ;;  %v6282_v19 = vmul.f32 %v16201_v20, %v16200_v47  ;;  %v6042_v40 = vsel %vm2105_vm8, %v13451_v43, 0.0  ;;  %v16219_v43 = vld [vmem:[#allocation40_spill] sm:$0xff] }
 0x469   : > { %10637 = vpow2.f32 %v5765_v26  ;;  %v5767_v56 = vmul.f32 1.442695, %v5668_v48  ;;  %v5666_v17 = vsub.f32 %v13368_v2, %v5422_v36  ;;  %v5999_v23 = vadd.f32 %v5998_v10, %v5997_v1  ;;  %v16205_v26 = vld [vmem:[#allocation44_spill] sm:$0xff]  ;;  %v16206_v10 = vld [vmem:[#allocation9_spill] sm:$0xff] }
 0x46a   : > { %v13463_v8 = vpop.eup %10631  ;;  %v5455_v7 = vmax.f32 %v5453_v12, %v5454_v5  ;;  %v5440_v4 = vrot.slane %v5439_v39, 2  ;;  %v9662_v61 = vpack.c.bf16 %v6284_v21, %v6282_v19  ;;  %10639 = vrcp.f32 %v6013_v14 }
 0x46b   : > { %16202 = vst [vmem:[#allocation22_spill] sm:$0xff] %v13463_v8  ;;  %v13465_v28 = vpop.eup %10633  ;;  %v6019_v25 = vrot.slane %v6018_v57, 1  ;;  %v5461_v60 = vrot.slane %v5460_v42, 2  ;;  %v5446_v0 = vmax.f32 %v5444_v22, %v5445_v9  ;;  %v6005_v47 = vrot.slane %v6004_v59, 1 }
 0x46c   : > { %16203 = vst [vmem:[#allocation13_spill] sm:$0xff] %v13465_v28  ;;  %v6039_v20 = vadd.f32 %v6038_v24, %v6037_v44  ;;  %v6043_v58 = vrot.slane %v6042_v40, 4  ;;  %10641 = vpow2.f32 %v5761_v37  ;;  %9561 = vmatmul.mubr.msk.bf16.gmra.mrb[84].mxu1 %vm2105_vm8, %v9662_v61  ;;  %v6023_v2 = vadd.f32 %v6022_v27, %v6021_v41 }
 0x46d   : > { %v13468_v54 = vpop.eup %10635  ;;  %v6028_v1 = vsel %vm2105_vm8, %v13463_v8, 0.0  ;;  %10643 = vpow2.f32 %v5767_v56  ;;  %v5763_v19 = vmul.f32 1.442695, %v5666_v17  ;;  %6795 = vmatprep.mubr.bf16.mxu1 %v15901_v3  ;;  %v5456_v12 = vrot.slane %v5455_v7, 1  ;;  %v16208_v17 = vld [vmem:[#allocation10_spill] sm:$0xff]  ;;  %v16220_v8 = vld [vmem:[#allocation51_spill] sm:$0xff] }
 0x46e   : > { %16204 = vst [vmem:[#allocation66_spill] sm:$0xff] %v13468_v54  ;;  %10645 = vrcp.f32 %v5999_v23  ;;  %v5441_v11 = vmax.f32 %v5439_v39, %v5440_v4  ;;  %v6020_v14 = vadd.f32 %v6019_v25, %v6018_v57  ;;  %v5462_v22 = vmax.f32 %v5460_v42, %v5461_v60  ;;  %v13491_v60 = vpop.f32.mrb[81].mxu0 }
 0x46f   : > { %v5447_v44 = vrot.slane %v5446_v0, 2  ;;  %v13475_v37 = vadd.f32 %v13253_v15, %v16205_v26  ;;  %v6006_v48 = vadd.f32 %v6005_v47, %v6004_v59  ;;  %v6044_v36 = vadd.f32 %v6043_v58, %v6042_v40  ;;  %16209 = vst [vmem:[#allocation9_spill] sm:$0xff] %v13491_v60  ;;  %v16213_v26 = vld [vmem:[#allocation65_spill] sm:$0xff] }
 0x470   : > { %v6029_v41 = vrot.slane %v6028_v1, 4  ;;  %v13479_v5 = vadd.f32 %v13253_v15, %v16206_v10  ;;  %v6040_v9 = vrot.slane %v6039_v20, 1  ;;  %v6024_v35 = vrot.slane %v6023_v2, 2 }
 0x471   : > { %10647 = vpow2.f32 %v5763_v19  ;;  %v5479_v39 = vsel %vm2105_vm8, %v13475_v37, -inf  ;;  %v5457_v57 = vmax.f32 %v5455_v7, %v5456_v12  ;;  %v5442_v42 = vrot.slane %v5441_v11, 1  ;;  %v13497_v19 = vpop.f32.mrb[82].mxu0 }
 0x472   : > { %v5480_v21 = vrot.slane %v5479_v39, 4  ;;  %v5465_v24 = vsel %vm2105_vm8, %v13479_v5, -inf  ;;  %v5463_v59 = vrot.slane %v5462_v22, 1  ;;  %v5448_v40 = vmax.f32 %v5446_v0, %v5447_v44  ;;  %16211 = vst [vmem:[#allocation111_spill] sm:$0xff] %v13497_v19  ;;  %v13499_v0 = vpop.f32.mrb[72].mxu1 }
 0x473   : > { %v13485_v27 = vpop.eup %10637  ;;  %v5466_v56 = vrot.slane %v5465_v24, 4  ;;  %v13489_v23 = vadd.f32 %v13253_v15, %v16208_v17  ;;  %10649 = vrcp.f32 %v6020_v14  ;;  %v6045_v4 = vrot.slane %v6044_v36, 2  ;;  %v13511_v10 = vpop.f32.mrb[73].mxu1 }
 0x474   : > { %16207 = vst [vmem:[#allocation44_spill] sm:$0xff] %v13485_v27  ;;  %v6030_v61 = vadd.f32 %v6029_v41, %v6028_v1  ;;  %v5481_v25 = vmax.f32 %v5479_v39, %v5480_v21  ;;  %v13493_v7 = vpop.eup %10639  ;;  %10651 = vrcp.f32 %v6006_v48  ;;  %v6041_v44 = vadd.f32 %v6040_v9, %v6039_v20  ;;  %v13509_v48 = vpop.f32.mrb[83].mxu0 }
 0x475   : > { %16210 = vst [vmem:[#allocation10_spill] sm:$0xff] %v13493_v7  ;;  %v5467_v47 = vmax.f32 %v5465_v24, %v5466_v56  ;;  %v5486_v58 = vsel %vm2105_vm8, %v13489_v23, -inf  ;;  %v6063_v1 = vsel %vm2105_vm8, %v13485_v27, 0.0  ;;  %v5443_v14 = vmax.f32 %v5441_v11, %v5442_v42  ;;  %16214 = vst [vmem:[#allocation65_spill] sm:$0xff] %v13509_v48  ;;  %v13516_v20 = vpop.f32.mrb[74].mxu1  ;;  %v13536_v28 = vpop.f32.mrb[84].mxu0 }
 0x476   : > { %v13501_v12 = vpop.eup %10641  ;;  %v13507_v41 = vadd.f32 %v13253_v15, %v16213_v26  ;;  %v6025_v21 = vadd.f32 %v6024_v35, %v6023_v2  ;;  %v5671_v24 = vsub.f32 %v13414_v13, %v5457_v57  ;;  %v5464_v56 = vmax.f32 %v5462_v22, %v5463_v59  ;;  %16216 = vst [vmem:[#allocation114_spill] sm:$0xff] %v13516_v20  ;;  %v13520_v60 = vpop.f32.mrb[75].mxu1  ;;  %v16221_v2 = vld [vmem:[#allocation17_spill] sm:$0xff] }
 0x477   : > { %16212 = vst [vmem:[#allocation112_spill] sm:$0xff] %v13501_v12  ;;  %v13513_v39 = vpop.eup %10643  ;;  %v5449_v17 = vrot.slane %v5448_v40, 1  ;;  %v6046_v11 = vadd.f32 %v6045_v4, %v6044_v36  ;;  %v6031_v42 = vrot.slane %v6030_v61, 2  ;;  %v5482_v19 = vrot.slane %v5481_v25, 2  ;;  %16218 = vst [vmem:[#allocation116_spill] sm:$0xff] %v13520_v60 }
 0x478   : > { %16215 = vst [vmem:[#allocation113_spill] sm:$0xff] %v13513_v39  ;;  %v13518_v9 = vpop.eup %10645  ;;  %v5487_v26 = vrot.slane %v5486_v58, 4  ;;  %v6064_v48 = vrot.slane %v6063_v1, 4  ;;  %v5468_v27 = vrot.slane %v5467_v47, 2  ;;  %v6286_v7 = vmul.f32 %v16220_v8, %v16219_v43  ;;  %16223 = vst [vmem:[#allocation51_spill] sm:$0xff] %v13536_v28  ;;  %v16237_v28 = vld [vmem:[#allocation78_spill] sm:$0xff] }
 0x479   : > { %16217 = vst [vmem:[#allocation115_spill] sm:$0xff] %v13518_v9  ;;  %v6288_v13 = vmul.f32 %v13189_v29, %v16221_v2  ;;  %v6049_v22 = vsel %vm2105_vm8, %v13501_v12, 0.0  ;;  %v6070_v35 = vsel %vm2105_vm8, %v13513_v39, 0.0  ;;  %v5669_v36 = vsub.f32 %v13423_v30, %v5443_v14 }
 0x47a   : > { %v5472_v57 = vsel %vm2105_vm8, %v13507_v41, -inf  ;;  %v5773_v4 = vmul.f32 1.442695, %v5671_v24  ;;  %v5672_v9 = vsub.f32 %v13431_v18, %v5464_v56  ;;  %v5450_v43 = vmax.f32 %v5448_v40, %v5449_v17 }
 0x47b   : > { %v13533_v59 = vpop.eup %10647  ;;  %v9663_v8 = vpack.c.bf16 %v6288_v13, %v6286_v7  ;;  %10653 = vrcp.f32 %v6041_v44  ;;  %v6026_v29 = vrot.slane %v6025_v21, 1  ;;  %v5483_v2 = vmax.f32 %v5481_v25, %v5482_v19 }
 0x47c   : > { %16222 = vst [vmem:[#allocation40_spill] sm:$0xff] %v13533_v59  ;;  %v5488_v12 = vmax.f32 %v5486_v58, %v5487_v26  ;;  %v6047_v54 = vrot.slane %v6046_v11, 1  ;;  %v6032_v39 = vadd.f32 %v6031_v42, %v6030_v61  ;;  %v5469_v45 = vmax.f32 %v5467_v47, %v5468_v27 }
 0x47d   : > { %v5473_v30 = vrot.slane %v5472_v57, 4  ;;  %9562 = vmatmul.mubr.msk.bf16.gmra.mrb[88].mxu1 %vm2105_vm8, %v9663_v8  ;;  %v13539_v14 = vpop.eup %10649  ;;  %v6065_v60 = vadd.f32 %v6064_v48, %v6063_v1  ;;  %v6050_v24 = vrot.slane %v6049_v22, 4  ;;  %v6071_v20 = vrot.slane %v6070_v35, 4 }
 0x47e   : > { %v5769_v18 = vmul.f32 1.442695, %v5669_v36  ;;  %6805 = vmatprep.mubr.bf16.mxu1 %v15901_v3  ;;  %v13542_v40 = vpop.eup %10651  ;;  %10655 = vpow2.f32 %v5773_v4  ;;  %v5775_v7 = vmul.f32 1.442695, %v5672_v9  ;;  %v5670_v25 = vsub.f32 %v13443_v32, %v5450_v43 }
 0x47f   : > { %v13547_v27 = vadd.f32 %v13253_v15, %v13187_v62  ;;  %v6027_v61 = vadd.f32 %v6026_v29, %v6025_v21  ;;  %v6056_v47 = vsel %vm2105_vm8, %v13533_v59, 0.0  ;;  %v5484_v58 = vrot.slane %v5483_v2, 1 }
 0x480   : > { %v5489_v19 = vrot.slane %v5488_v12, 2  ;;  %v6033_v44 = vrot.slane %v6032_v39, 1  ;;  %v5470_v1 = vrot.slane %v5469_v45, 1  ;;  %v5474_v48 = vmax.f32 %v5472_v57, %v5473_v30 }
 0x481   : > { %v5507_v56 = vsel %vm2105_vm8, %v13547_v27, -inf  ;;  %v6066_v17 = vrot.slane %v6065_v60, 2  ;;  %v6051_v9 = vadd.f32 %v6050_v24, %v6049_v22  ;;  %v6072_v42 = vadd.f32 %v6071_v20, %v6070_v35  ;;  %v13572_v24 = vpop.f32.mrb[85].mxu0 }
 0x482   : > { %10657 = vpow2.f32 %v5769_v18  ;;  %v6057_v32 = vrot.slane %v6056_v47, 4  ;;  %v5771_v62 = vmul.f32 1.442695, %v5670_v25  ;;  %v13553_v26 = vadd.f32 %v6047_v54, %v6046_v11 }
 0x483   : > { %10659 = vpow2.f32 %v5775_v7  ;;  %v5485_v21 = vmax.f32 %v5483_v2, %v5484_v58  ;;  %v5490_v13 = vmax.f32 %v5488_v12, %v5489_v19  ;;  %v5508_v36 = vrot.slane %v5507_v56, 4  ;;  %v16225_v2 = vld [vmem:[#allocation69_spill] sm:$0xff] }
 0x484   : > { %10661 = vrcp.f32 %v6027_v61  ;;  %v13555_v4 = vadd.f32 %v6033_v44, %v6032_v39  ;;  %v5471_v43 = vmax.f32 %v5469_v45, %v5470_v1  ;;  %v5475_v57 = vrot.slane %v5474_v48, 2  ;;  %16226 = vst [vmem:[#allocation69_spill] sm:$0xff] %v13572_v24  ;;  %v16236_v24 = vld [vmem:[#allocation15_spill] sm:$0xff] }
 0x485   : > { %v13557_v8 = vpop.eup %10653  ;;  %v6067_v29 = vadd.f32 %v6066_v17, %v6065_v60  ;;  %v6052_v30 = vrot.slane %v6051_v9, 2  ;;  %v6073_v22 = vrot.slane %v6072_v42, 2  ;;  %v5509_v20 = vmax.f32 %v5507_v56, %v5508_v36 }
 0x486   : > { %16224 = vst [vmem:[#allocation17_spill] sm:$0xff] %v13557_v8  ;;  %v6058_v35 = vadd.f32 %v6057_v32, %v6056_v47  ;;  %10663 = vpow2.f32 %v5771_v62  ;;  %v13561_v54 = vadd.f32 %v13253_v15, %v13193_v51  ;;  %v13565_v12 = vadd.f32 %v13253_v15, %v13197_v6 }
 0x487   : > { %v5675_v39 = vsub.f32 %v13475_v37, %v5485_v21  ;;  %v5491_v45 = vrot.slane %v5490_v13, 1  ;;  %v5510_v11 = vrot.slane %v5509_v20, 2  ;;  %v13570_v60 = vadd.f32 %v13253_v15, %v16225_v2  ;;  %v13581_v37 = vpop.f32.mrb[86].mxu0 }
 0x488   : > { %v13574_v18 = vpop.eup %10655  ;;  %v5673_v7 = vsub.f32 %v13479_v5, %v5471_v43  ;;  %v5476_v51 = vmax.f32 %v5474_v48, %v5475_v57  ;;  %v5493_v25 = vsel %vm2105_vm8, %v13561_v54, -inf  ;;  %v5514_v6 = vsel %vm2105_vm8, %v13565_v12, -inf  ;;  %16228 = vst [vmem:[#allocation118_spill] sm:$0xff] %v13581_v37  ;;  %v13583_v19 = vpop.f32.mrb[87].mxu0 }
 0x489   : > { %16227 = vst [vmem:[#allocation117_spill] sm:$0xff] %v13574_v18  ;;  %v6053_v61 = vadd.f32 %v6052_v30, %v6051_v9  ;;  %v5511_v47 = vmax.f32 %v5509_v20, %v5510_v11  ;;  %v5494_v58 = vrot.slane %v5493_v25, 4  ;;  %v5515_v15 = vrot.slane %v5514_v6, 4  ;;  %16229 = vst [vmem:[#allocation119_spill] sm:$0xff] %v13583_v19  ;;  %v13591_v9 = vpop.f32.mrb[88].mxu0 }
 0x48a   : > { %v6068_v44 = vrot.slane %v6067_v29, 1  ;;  %v6074_v1 = vadd.f32 %v6073_v22, %v6072_v42  ;;  %v6059_v56 = vrot.slane %v6058_v35, 2  ;;  %v5500_v5 = vsel %vm2105_vm8, %v13570_v60, -inf  ;;  %16231 = vst [vmem:[#allocation121_spill] sm:$0xff] %v13591_v9  ;;  %v16233_v42 = vld [vmem:[#allocation2_spill] sm:$0xff]  ;;  %v16234_v22 = vld [vmem:[#allocation88_spill] sm:$0xff] }
 0x48b   : > { %v6091_v17 = vsel %vm2105_vm8, %v13574_v18, 0.0  ;;  %v5781_v32 = vmul.f32 1.442695, %v5675_v39  ;;  %v5495_v62 = vmax.f32 %v5493_v25, %v5494_v58  ;;  %v5516_v21 = vmax.f32 %v5514_v6, %v5515_v15  ;;  %v13597_v11 = vpop.f32.mrb[89].mxu0 }
 0x48c   : > { %v13587_v48 = vpop.eup %10657  ;;  %v5777_v43 = vmul.f32 1.442695, %v5673_v7  ;;  %v5492_v57 = vmax.f32 %v5490_v13, %v5491_v45  ;;  %v5477_v30 = vrot.slane %v5476_v51, 1  ;;  %v6292_v20 = vmul.f32 %v16234_v22, %v16233_v42  ;;  %16235 = vst [vmem:[#allocation2_spill] sm:$0xff] %v13597_v11  ;;  %v13601_v25 = vpop.f32.mrb[90].mxu0 }
 0x48d   : > { %16230 = vst [vmem:[#allocation120_spill] sm:$0xff] %v13587_v48  ;;  %v13593_v36 = vpop.eup %10659  ;;  %v5512_v2 = vrot.slane %v5511_v47, 1  ;;  %v5496_v19 = vrot.slane %v5495_v62, 2  ;;  %v5501_v37 = vrot.slane %v5500_v5, 4  ;;  %v6290_v39 = vmul.f32 %v16237_v28, %v16236_v24  ;;  %16238 = vst [vmem:[#allocation88_spill] sm:$0xff] %v13601_v25  ;;  %v13605_v45 = vpop.f32.mrb[91].mxu0 }
 0x48e   : > { %16232 = vst [vmem:[#allocation122_spill] sm:$0xff] %v13593_v36  ;;  %v13603_v6 = vpop.eup %10661  ;;  %v6054_v58 = vrot.slane %v6053_v61, 1  ;;  %v6075_v15 = vrot.slane %v6074_v1, 1  ;;  %v6092_v7 = vrot.slane %v6091_v17, 4  ;;  %v5517_v13 = vrot.slane %v5516_v21, 2  ;;  %16240 = vst [vmem:[#allocation78_spill] sm:$0xff] %v13605_v45 }
 0x48f   : > { %16239 = vst [vmem:[#allocation15_spill] sm:$0xff] %v13603_v6  ;;  %v6077_v42 = vsel %vm2105_vm8, %v13587_v48, 0.0  ;;  %v6098_v22 = vsel %vm2105_vm8, %v13593_v36, 0.0  ;;  %10665 = vpow2.f32 %v5781_v32  ;;  %v9664_v11 = vpack.c.bf16 %v6292_v20, %v6290_v39  ;;  %v13611_v9 = vpop.f32.mrb[92].mxu0 }
 0x490   : > { %16241 = vst [vmem:[#allocation123_spill] sm:$0xff] %v13611_v9  ;;  %v13613_v28 = vpop.eup %10663  ;;  %10667 = vpow2.f32 %v5777_v43  ;;  %v5676_v24 = vsub.f32 %v13489_v23, %v5492_v57  ;;  %v5478_v25 = vmax.f32 %v5476_v51, %v5477_v30  ;;  %v5497_v18 = vmax.f32 %v5495_v62, %v5496_v19  ;;  %v13616_v59 = vpop.f32.mrb[93].mxu0  ;;  %v13639_v30 = vld [vmem:[%s12780_s20] sm:$0xff] }
 0x491   : > { %16242 = vst [vmem:[#allocation124_spill] sm:$0xff] %v13613_v28  ;;  %16243 = vst [vmem:[#allocation125_spill] sm:$0xff] %v13616_v59  ;;  %v6069_v45 = vadd.f32 %v6068_v44, %v6067_v29  ;;  %v6060_v8 = vadd.f32 %v6059_v56, %v6058_v35  ;;  %v5513_v6 = vmax.f32 %v5511_v47, %v5512_v2  ;;  %9563 = vmatmul.mubr.msk.bf16.gmra.mrb[92].mxu1 %vm2105_vm8, %v9664_v11  ;;  %v13619_v36 = vpop.f32.mrb[94].mxu0  ;;  %v16250_v11 = vld [vmem:[#allocation75_spill] sm:$0xff]  ;;  %v16271_v59 = vld [vmem:[#allocation86_spill] sm:$0xff] }
 0x492   : > { %v5502_v48 = vmax.f32 %v5500_v5, %v5501_v37  ;;  %16244 = vst [vmem:[#allocation126_spill] sm:$0xff] %v13619_v36  ;;  %10669 = vrcp.f32 %v13553_v26  ;;  %v6055_v32 = vadd.f32 %v6054_v58, %v6053_v61  ;;  %v6078_v20 = vrot.slane %v6077_v42, 4  ;;  %6815 = vmatprep.mubr.bf16.mxu1 %v15901_v3  ;;  %v13623_v23 = vpop.f32.mrb[95].mxu0  ;;  %v16270_v36 = vld [vmem:[#allocation21_spill] sm:$0xff] }
 0x493   : > { %v5518_v39 = vmax.f32 %v5516_v21, %v5517_v13  ;;  %16245 = vst [vmem:[#allocation127_spill] sm:$0xff] %v13623_v23  ;;  %v6076_v51 = vadd.f32 %v6075_v15, %v6074_v1  ;;  %v6093_v19 = vadd.f32 %v6092_v7, %v6091_v17  ;;  %v6099_v62 = vrot.slane %v6098_v22, 4  ;;  %v13627_v35 = vpop.f32.mrb[96].mxu0 }
 0x494   : > { %v6084_v29 = vsel %vm2105_vm8, %v13613_v28, 0.0  ;;  %16246 = vst [vmem:[#allocation128_spill] sm:$0xff] %v13627_v35  ;;  %10671 = vrcp.f32 %v13555_v4  ;;  %v5783_v37 = vmul.f32 1.442695, %v5676_v24  ;;  %v5674_v26 = vsub.f32 %v13507_v41, %v5478_v25  ;;  %v13631_v47 = vpop.f32.mrb[97].mxu0  ;;  %v16269_v35 = vld [vmem:[#allocation73_spill] sm:$0xff] }
 0x495   : > { %v5498_v61 = vrot.slane %v5497_v18, 1  ;;  %16247 = vst [vmem:[#allocation129_spill] sm:$0xff] %v13631_v47  ;;  %10673 = vrcp.f32 %v6069_v45  ;;  %v6061_v44 = vrot.slane %v6060_v8, 1  ;;  %v5679_v1 = vsub.f32 %v13547_v27, %v5513_v6  ;;  %v13634_v5 = vpop.f32.mrb[98].mxu0  ;;  %v16268_v47 = vld [vmem:[#allocation5_spill] sm:$0xff] }
 0x496   : > { %v5503_v56 = vrot.slane %v5502_v48, 2  ;;  %16248 = vst [vmem:[#allocation130_spill] sm:$0xff] %v13634_v5  ;;  %10675 = vrcp.f32 %v6055_v32  ;;  %v6079_v17 = vadd.f32 %v6078_v20, %v6077_v42  ;;  %v6085_v21 = vrot.slane %v6084_v29, 4  ;;  %v13636_v57 = vpop.f32.mrb[99].mxu0 }
 0x497   : > { %v5519_v43 = vrot.slane %v5518_v39, 1  ;;  %16249 = vst [vmem:[#allocation131_spill] sm:$0xff] %v13636_v57  ;;  %10677 = vrcp.f32 %v6076_v51  ;;  %v6094_v4 = vrot.slane %v6093_v19, 2  ;;  %v6100_v41 = vadd.f32 %v6099_v62, %v6098_v22  ;;  %v13645_v25 = vpop.f32.mrb[100].mxu0 }
 0x498   : > { %v13643_v2 = vadd.f32 %v13639_v30, %v16250_v11  ;;  %16251 = vst [vmem:[#allocation75_spill] sm:$0xff] %v13645_v25  ;;  %10679 = vpow2.f32 %v5783_v37  ;;  %v5779_v27 = vmul.f32 1.442695, %v5674_v26  ;;  %v5499_v6 = vmax.f32 %v5497_v18, %v5498_v61  ;;  %v13647_v58 = vpop.f32.mrb[101].mxu0  ;;  %v16257_v61 = vld [vmem:[#allocation77_spill] sm:$0xff] }
 0x499   : > { %16252 = vst [vmem:[#allocation132_spill] sm:$0xff] %v13647_v58  ;;  %v13649_v15 = vpop.eup %10665  ;;  %v13651_v7 = vadd.f32 %v6061_v44, %v6060_v8  ;;  %v5789_v13 = vmul.f32 1.442695, %v5679_v1  ;;  %v5504_v45 = vmax.f32 %v5502_v48, %v5503_v56  ;;  %v13655_v22 = vpop.f32.mrb[102].mxu0  ;;  %v6080_v32 = vrot.slane %v6079_v17, 2  ;;  %v16258_v48 = vld [vmem:[#allocation79_spill] sm:$0xff] }
 0x49a   : > { %16253 = vst [vmem:[#allocation133_spill] sm:$0xff] %v13649_v15  ;;  %v5535_v42 = vsel %vm2105_vm8, %v13643_v2, -inf  ;;  %16254 = vst [vmem:[#allocation134_spill] sm:$0xff] %v13655_v22  ;;  %v13657_v24 = vpop.eup %10667  ;;  %v6086_v20 = vadd.f32 %v6085_v21, %v6084_v29  ;;  %v5520_v51 = vmax.f32 %v5518_v39, %v5519_v43  ;;  %v13659_v18 = vpop.f32.mrb[103].mxu0  ;;  %v6095_v37 = vadd.f32 %v6094_v4, %v6093_v19  ;;  %v16260_v19 = vld [vmem:[#allocation80_spill] sm:$0xff] }
 0x49b   : > { %16255 = vst [vmem:[#allocation135_spill] sm:$0xff] %v13657_v24  ;;  %v5536_v62 = vrot.slane %v5535_v42, 4  ;;  %16256 = vst [vmem:[#allocation136_spill] sm:$0xff] %v13659_v18  ;;  %v6101_v26 = vrot.slane %v6100_v41, 2  ;;  %v13663_v8 = vadd.f32 %v13639_v30, %v16257_v61  ;;  %v13667_v44 = vadd.f32 %v13639_v30, %v16258_v48  ;;  %v13669_v1 = vpop.f32.mrb[104].mxu0 }
 0x49c   : > { %16259 = vst [vmem:[#allocation77_spill] sm:$0xff] %v13669_v1  ;;  %v13671_v56 = vpop.eup %10669  ;;  %v6119_v39 = vsel %vm2105_vm8, %v13649_v15, 0.0  ;;  %10681 = vpow2.f32 %v5779_v27  ;;  %v5677_v29 = vsub.f32 %v13561_v54, %v5499_v6  ;;  %v13678_v21 = vadd.f32 %v13639_v30, %v16260_v19  ;;  %v13680_v43 = vpop.f32.mrb[105].mxu0 }
 0x49d   : > { %16261 = vst [vmem:[#allocation79_spill] sm:$0xff] %v13680_v43  ;;  %v6105_v4 = vsel %vm2105_vm8, %v13657_v24, 0.0  ;;  %10683 = vpow2.f32 %v5789_v13  ;;  %v5505_v11 = vrot.slane %v5504_v45, 1  ;;  %v5521_v61 = vsel %vm2105_vm8, %v13663_v8, -inf  ;;  %v13686_v48 = vpop.f32.mrb[106].mxu0 }
 0x49e   : > { %16262 = vst [vmem:[#allocation80_spill] sm:$0xff] %v13686_v48  ;;  %v13688_v1 = vpop.eup %10671  ;;  %v6081_v27 = vadd.f32 %v6080_v32, %v6079_v17  ;;  %v6087_v54 = vrot.slane %v6086_v20, 2  ;;  %v5680_v6 = vsub.f32 %v13565_v12, %v5520_v51  ;;  %v5537_v19 = vmax.f32 %v5535_v42, %v5536_v62  ;;  %v13691_v18 = vpop.f32.mrb[107].mxu0 }
 0x49f   : > { %16263 = vst [vmem:[#allocation137_spill] sm:$0xff] %v13691_v18  ;;  %v13693_v43 = vpop.eup %10673  ;;  %v6120_v22 = vrot.slane %v6119_v39, 4  ;;  %v5522_v58 = vrot.slane %v5521_v61, 4  ;;  %v5542_v13 = vsel %vm2105_vm8, %v13667_v44, -inf  ;;  %v5528_v25 = vsel %vm2105_vm8, %v13678_v21, -inf  ;;  %v13699_v48 = vpop.f32.mrb[108].mxu0 }
 0x4a0   : > { %16264 = vst [vmem:[#allocation138_spill] sm:$0xff] %v13693_v43  ;;  %16265 = vst [vmem:[#allocation139_spill] sm:$0xff] %v13699_v48  ;;  %v13701_v57 = vpop.eup %10675  ;;  %v6096_v17 = vrot.slane %v6095_v37, 1  ;;  %v6102_v32 = vadd.f32 %v6101_v26, %v6100_v41  ;;  %v6106_v12 = vrot.slane %v6105_v4, 4  ;;  %v5785_v42 = vmul.f32 1.442695, %v5677_v29 }
 0x4a1   : > { %v13703_v51 = vpop.f32.mrb[109].mxu0  ;;  %v13705_v62 = vpop.eup %10677  ;;  %v5506_v18 = vmax.f32 %v5504_v45, %v5505_v11  ;;  %v5523_v5 = vmax.f32 %v5521_v61, %v5522_v58  ;;  %v6294_v23 = vmul.f32 %v16269_v35, %v16268_v47  ;;  %v6296_v9 = vmul.f32 %v16271_v59, %v16270_v36 }
 0x4a2   : > { %16266 = vst [vmem:[#allocation140_spill] sm:$0xff] %v13703_v51  ;;  %16267 = vst [vmem:[#allocation141_spill] sm:$0xff] %v13705_v62  ;;  %v13711_v15 = vpop.f32.mrb[110].mxu0  ;;  %v13713_v48 = vpop.eup %10679  ;;  %v5791_v24 = vmul.f32 1.442695, %v5680_v6  ;;  %v5538_v41 = vrot.slane %v5537_v19, 2  ;;  %v6088_v62 = vadd.f32 %v6087_v54, %v6086_v20  ;;  %v6121_v45 = vadd.f32 %v6120_v22, %v6119_v39 }
 0x4a3   : > { %16272 = vst [vmem:[#allocation5_spill] sm:$0xff] %v13711_v15  ;;  %16273 = vst [vmem:[#allocation73_spill] sm:$0xff] %v13713_v48  ;;  %v5543_v26 = vrot.slane %v5542_v13, 4  ;;  %v5529_v29 = vrot.slane %v5528_v25, 4  ;;  %v13715_v28 = vpop.f32.mrb[111].mxu0  ;;  %v6082_v51 = vrot.slane %v6081_v27, 1  ;;  %v9665_v58 = vpack.c.bf16 %v6296_v9, %v6294_v23 }
 0x4a4   : > { %16274 = vst [vmem:[#allocation21_spill] sm:$0xff] %v13715_v28  ;;  %v13717_v11 = vpop.f32.mrb[112].mxu0  ;;  %v6097_v35 = vadd.f32 %v6096_v17, %v6095_v37  ;;  %v6103_v47 = vrot.slane %v6102_v32, 1  ;;  %v6107_v61 = vadd.f32 %v6106_v12, %v6105_v4  ;;  %10685 = vpow2.f32 %v5785_v42 }
 0x4a5   : > { %16275 = vst [vmem:[#allocation86_spill] sm:$0xff] %v13717_v11  ;;  %v13719_v59 = vpop.f32.mrb[113].mxu0  ;;  %v6126_v36 = vsel %vm2105_vm8, %v13713_v48, 0.0  ;;  %v5678_v6 = vsub.f32 %v13570_v60, %v5506_v18  ;;  %v5524_v15 = vrot.slane %v5523_v5, 2  ;;  %9564 = vmatmul.mubr.msk.bf16.gmra.mrb[96].mxu1 %vm2105_vm8, %v9665_v58  ;;  %v13727_v22 = vadd.f32 %v13639_v30, %v13326_v33 }
 0x4a6   : > { %16276 = vst [vmem:[#allocation142_spill] sm:$0xff] %v13719_v59  ;;  %v13729_v9 = vpop.f32.mrb[114].mxu0  ;;  %v13731_v23 = vpop.eup %10681  ;;  %10687 = vpow2.f32 %v5791_v24  ;;  %v5539_v20 = vmax.f32 %v5537_v19, %v5538_v41  ;;  %v5544_v37 = vmax.f32 %v5542_v13, %v5543_v26  ;;  %v5530_v39 = vmax.f32 %v5528_v25, %v5529_v29  ;;  %6825 = vmatprep.mubr.bf16.mxu1 %v15901_v3 }
 0x4a7   : > { %16277 = vst [vmem:[#allocation143_spill] sm:$0xff] %v13729_v9  ;;  %16278 = vst [vmem:[#allocation144_spill] sm:$0xff] %v13731_v23  ;;  %v13734_v4 = vpop.f32.mrb[115].mxu0  ;;  %v13736_v60 = vpop.eup %10683  ;;  %10689 = vrcp.f32 %v13651_v7  ;;  %v6083_v18 = vadd.f32 %v6082_v51, %v6081_v27  ;;  %v6089_v54 = vrot.slane %v6088_v62, 1  ;;  %v6122_v33 = vrot.slane %v6121_v45, 2 }
 0x4a8   : > { %16279 = vst [vmem:[#allocation145_spill] sm:$0xff] %v13734_v4  ;;  %16280 = vst [vmem:[#allocation146_spill] sm:$0xff] %v13736_v60  ;;  %v13739_v17 = vpop.f32.mrb[116].mxu0  ;;  %10691 = vrcp.f32 %v6097_v35  ;;  %v6104_v12 = vadd.f32 %v6103_v47, %v6102_v32  ;;  %v6108_v42 = vrot.slane %v6107_v61, 2  ;;  %v6127_v24 = vrot.slane %v6126_v36, 4 }
 0x4a9   : > { %16281 = vst [vmem:[#allocation147_spill] sm:$0xff] %v13739_v17  ;;  %v13741_v19 = vpop.f32.mrb[117].mxu0  ;;  %v6112_v25 = vsel %vm2105_vm8, %v13731_v23, 0.0  ;;  %v5787_v13 = vmul.f32 1.442695, %v5678_v6  ;;  %v5525_v41 = vmax.f32 %v5523_v5, %v5524_v15  ;;  %v5563_v26 = vsel %vm2105_vm8, %v13727_v22, -inf }
 0x4aa   : > { %16282 = vst [vmem:[#allocation148_spill] sm:$0xff] %v13741_v19  ;;  %v13747_v7 = vpop.f32.mrb[118].mxu0  ;;  %v6147_v27 = vsel %vm2105_vm8, %v13736_v60, 0.0  ;;  %v5540_v51 = vrot.slane %v5539_v20, 1  ;;  %v5545_v29 = vrot.slane %v5544_v37, 2  ;;  %v5531_v32 = vrot.slane %v5530_v39, 2 }
 0x4ab   : > { %16283 = vst [vmem:[#allocation149_spill] sm:$0xff] %v13747_v7  ;;  %v13751_v58 = vpop.f32.mrb[119].mxu0  ;;  %10693 = vrcp.f32 %v6083_v18  ;;  %v6090_v35 = vadd.f32 %v6089_v54, %v6088_v62  ;;  %v6123_v47 = vadd.f32 %v6122_v33, %v6121_v45  ;;  %v13755_v6 = vadd.f32 %v6108_v42, %v6107_v61 }
 0x4ac   : > { %16284 = vst [vmem:[#allocation150_spill] sm:$0xff] %v13751_v58  ;;  %v13753_v19 = vpop.f32.mrb[120].mxu0  ;;  %v6128_v5 = vadd.f32 %v6127_v24, %v6126_v36  ;;  %v6113_v15 = vrot.slane %v6112_v25, 4  ;;  %v5564_v17 = vrot.slane %v5563_v26, 4  ;;  %v6148_v4 = vrot.slane %v6147_v27, 4 }
 0x4ad   : > { %16285 = vst [vmem:[#allocation151_spill] sm:$0xff] %v13753_v19  ;;  %10695 = vpow2.f32 %v5787_v13  ;;  %v5526_v7 = vrot.slane %v5525_v41, 1  ;;  %v13759_v9 = vadd.f32 %v13639_v30, %v13333_v34  ;;  %v5541_v18 = vmax.f32 %v5539_v20, %v5540_v51  ;;  %v13768_v34 = vpop.f32.mrb[121].mxu0 }
 0x4ae   : > { %v13761_v59 = vpop.eup %10685  ;;  %10697 = vrcp.f32 %v6104_v12  ;;  %v5546_v62 = vmax.f32 %v5544_v37, %v5545_v29  ;;  %v5532_v45 = vmax.f32 %v5530_v39, %v5531_v32  ;;  %v6124_v54 = vrot.slane %v6123_v47, 1  ;;  %16288 = vst [vmem:[#allocation154_spill] sm:$0xff] %v13768_v34 }
 0x4af   : > { %16286 = vst [vmem:[#allocation152_spill] sm:$0xff] %v13761_v59  ;;  %10699 = vrcp.f32 %v6090_v35  ;;  %v5565_v61 = vmax.f32 %v5563_v26, %v5564_v17  ;;  %v6129_v42 = vrot.slane %v6128_v5, 2  ;;  %v6114_v24 = vadd.f32 %v6113_v15, %v6112_v25  ;;  %v13778_v17 = vpop.f32.mrb[122].mxu0 }
 0x4b0   : > { %v13763_v33 = vpop.eup %10687  ;;  %v5549_v13 = vsel %vm2105_vm8, %v13759_v9, -inf  ;;  %v6149_v12 = vadd.f32 %v6148_v4, %v6147_v27  ;;  %v6133_v20 = vsel %vm2105_vm8, %v13761_v59, 0.0  ;;  %v5527_v37 = vmax.f32 %v5525_v41, %v5526_v7  ;;  %16289 = vst [vmem:[#allocation155_spill] sm:$0xff] %v13778_v17  ;;  %v13787_v4 = vpop.f32.mrb[123].mxu0 }
 0x4b1   : > { %16287 = vst [vmem:[#allocation153_spill] sm:$0xff] %v13763_v33  ;;  %v13770_v19 = vpop.eup %10689  ;;  %v13776_v39 = vadd.f32 %v13639_v30, %v13335_v46  ;;  %v5683_v25 = vsub.f32 %v13643_v2, %v5541_v18  ;;  %v5547_v51 = vrot.slane %v5546_v62, 1  ;;  %v5533_v29 = vrot.slane %v5532_v45, 1  ;;  %16291 = vst [vmem:[#allocation157_spill] sm:$0xff] %v13787_v4  ;;  %v13793_v35 = vpop.f32.mrb[124].mxu0 }
 0x4b2   : > { %v13780_v26 = vpop.eup %10691  ;;  %v13785_v32 = vadd.f32 %v13639_v30, %v13344_v49  ;;  %v6154_v41 = vsel %vm2105_vm8, %v13763_v33, 0.0  ;;  %v5566_v7 = vrot.slane %v5565_v61, 2  ;;  %v5550_v46 = vrot.slane %v5549_v13, 4  ;;  %16292 = vst [vmem:[#allocation158_spill] sm:$0xff] %v13793_v35  ;;  %v13808_v43 = vpop.f32.mrb[125].mxu0 }
 0x4b3   : > { %16290 = vst [vmem:[#allocation156_spill] sm:$0xff] %v13780_v26  ;;  %v5570_v27 = vsel %vm2105_vm8, %v13776_v39, -inf  ;;  %v6125_v15 = vadd.f32 %v6124_v54, %v6123_v47  ;;  %v6130_v2 = vadd.f32 %v6129_v42, %v6128_v5  ;;  %v6115_v18 = vrot.slane %v6114_v24, 2  ;;  %v16294_v5 = vld [vmem:[#allocation52_spill] sm:$0xff]  ;;  %v16295_v42 = vld [vmem:[#allocation70_spill] sm:$0xff] }
 0x4b4   : > { %v5571_v36 = vrot.slane %v5570_v27, 4  ;;  %v6150_v49 = vrot.slane %v6149_v12, 2  ;;  %v6134_v34 = vrot.slane %v6133_v20, 4  ;;  %v5681_v4 = vsub.f32 %v13663_v8, %v5527_v37  ;;  %16296 = vst [vmem:[#allocation52_spill] sm:$0xff] %v13808_v43 }
 0x4b5   : > { %v13795_v17 = vpop.eup %10693  ;;  %v5556_v58 = vsel %vm2105_vm8, %v13785_v32, -inf  ;;  %v6155_v11 = vrot.slane %v6154_v41, 4  ;;  %v5797_v28 = vmul.f32 1.442695, %v5683_v25  ;;  %v5548_v33 = vmax.f32 %v5546_v62, %v5547_v51  ;;  %v13812_v51 = vpop.f32.mrb[126].mxu0 }
 0x4b6   : > { %16293 = vst [vmem:[#allocation159_spill] sm:$0xff] %v13795_v17  ;;  %v5534_v60 = vmax.f32 %v5532_v45, %v5533_v29  ;;  %v5567_v35 = vmax.f32 %v5565_v61, %v5566_v7  ;;  %v5551_v47 = vmax.f32 %v5549_v13, %v5550_v46  ;;  %v6298_v54 = vmul.f32 %v13306_v16, %v16294_v5 }
 0x4b7   : > { %v13800_v59 = vpop.eup %10695  ;;  %v6300_v48 = vmul.f32 %v13356_v52, %v16295_v42  ;;  %v6131_v8 = vrot.slane %v6130_v2, 1  ;;  %v6116_v37 = vadd.f32 %v6115_v18, %v6114_v24  ;;  %v5572_v26 = vmax.f32 %v5570_v27, %v5571_v36  ;;  %16297 = vst [vmem:[#allocation70_spill] sm:$0xff] %v13812_v51  ;;  %v13821_v24 = vpop.f32.mrb[127].mxu0  ;;  %v16340_v51 = vld [vmem:[#allocation109_spill] sm:$0xff] }
 0x4b8   : > { %v13806_v23 = vpop.eup %10697  ;;  %v5557_v17 = vrot.slane %v5556_v58, 4  ;;  %v6151_v45 = vadd.f32 %v6150_v49, %v6149_v12  ;;  %v6135_v25 = vadd.f32 %v6134_v34, %v6133_v20  ;;  %v5793_v61 = vmul.f32 1.442695, %v5681_v4  ;;  %16298 = vst [vmem:[#allocation160_spill] sm:$0xff] %v13821_v24 }
 0x4b9   : > { %v13810_v62 = vpop.eup %10699  ;;  %v9666_v13 = vpack.c.bf16 %v6300_v48, %v6298_v54  ;;  %v6140_v16 = vsel %vm2105_vm8, %v13800_v59, 0.0  ;;  %10701 = vpow2.f32 %v5797_v28  ;;  %v5684_v52 = vsub.f32 %v13667_v44, %v5548_v33  ;;  %v13825_v48 = vpop.f32.mrb[128].mxu0 }
 0x4ba   : > { %v13819_v36 = vadd.f32 %v13639_v30, %v13392_v55  ;;  %v6156_v29 = vadd.f32 %v6155_v11, %v6154_v41  ;;  %v5682_v12 = vsub.f32 %v13678_v21, %v5534_v60  ;;  %v5568_v34 = vrot.slane %v5567_v35, 1  ;;  %16299 = vst [vmem:[#allocation161_spill] sm:$0xff] %v13825_v48 }
 0x4bb   : > { %v5552_v20 = vrot.slane %v5551_v47, 2  ;;  %9565 = vmatmul.mubr.msk.bf16.gmra.mrb[100].mxu1 %vm2105_vm8, %v9666_v13  ;;  %10703 = vrcp.f32 %v6125_v15  ;;  %v16300_v28 = vrot.slane %v13755_v6, 1  ;;  %v5573_v33 = vrot.slane %v5572_v26, 2 }
 0x4bc   : > { %v5558_v4 = vmax.f32 %v5556_v58, %v5557_v17  ;;  %6835 = vmatprep.mubr.bf16.mxu1 %v15901_v3  ;;  %v6132_v55 = vadd.f32 %v6131_v8, %v6130_v2  ;;  %v6117_v7 = vrot.slane %v6116_v37, 1  ;;  %v6141_v11 = vrot.slane %v6140_v16, 4  ;;  %v13833_v17 = vpop.f32.mrb[129].mxu0 }
 0x4bd   : > { %v6111_v44 = vadd.f32 %v16300_v28, %v13755_v6  ;;  %10705 = vpow2.f32 %v5793_v61  ;;  %v6152_v21 = vrot.slane %v6151_v45, 1  ;;  %v6136_v60 = vrot.slane %v6135_v25, 2  ;;  %16301 = vst [vmem:[#allocation162_spill] sm:$0xff] %v13833_v17  ;;  %v13835_v42 = vpop.f32.mrb[130].mxu0 }
 0x4be   : > { %v5799_v41 = vmul.f32 1.442695, %v5684_v52  ;;  %v5591_v46 = vsel %vm2105_vm8, %v13819_v36, -inf  ;;  %v6157_v27 = vrot.slane %v6156_v29, 2  ;;  %v5795_v15 = vmul.f32 1.442695, %v5682_v12 }
 0x4bf   : > { %v5569_v18 = vmax.f32 %v5567_v35, %v5568_v34  ;;  %v5553_v49 = vmax.f32 %v5551_v47, %v5552_v20  ;;  %10707 = vrcp.f32 %v6111_v44  ;;  %v5574_v6 = vmax.f32 %v5572_v26, %v5573_v33  ;;  %16302 = vst [vmem:[#allocation163_spill] sm:$0xff] %v13835_v42  ;;  %v13837_v52 = vpop.f32.mrb[131].mxu0 }
 0x4c0   : > { %v5559_v5 = vrot.slane %v5558_v4, 2  ;;  %v5592_v58 = vrot.slane %v5591_v46, 4  ;;  %10709 = vrcp.f32 %v6132_v55  ;;  %v6118_v2 = vadd.f32 %v6117_v7, %v6116_v37  ;;  %16303 = vst [vmem:[#allocation164_spill] sm:$0xff] %v13837_v52  ;;  %v13840_v47 = vpop.f32.mrb[132].mxu0 }
 0x4c1   : > { %v6142_v54 = vadd.f32 %v6141_v11, %v6140_v16  ;;  %v6153_v8 = vadd.f32 %v6152_v21, %v6151_v45  ;;  %v6137_v61 = vadd.f32 %v6136_v60, %v6135_v25  ;;  %10711 = vpow2.f32 %v5799_v41  ;;  %16304 = vst [vmem:[#allocation165_spill] sm:$0xff] %v13840_v47 }
 0x4c2   : > { %v5593_v13 = vmax.f32 %v5591_v46, %v5592_v58  ;;  %v6158_v12 = vadd.f32 %v6157_v27, %v6156_v29  ;;  %10713 = vpow2.f32 %v5795_v15  ;;  %v5687_v35 = vsub.f32 %v13727_v22, %v5569_v18  ;;  %v13862_v46 = vpop.f32.mrb[133].mxu0 }
 0x4c3   : > { %v5554_v26 = vrot.slane %v5553_v49, 1  ;;  %v13842_v34 = vpop.eup %10701  ;;  %v5575_v20 = vrot.slane %v5574_v6, 1  ;;  %v5560_v37 = vmax.f32 %v5558_v4, %v5559_v5  ;;  %v13846_v45 = vadd.f32 %v13639_v30, %v13400_v63  ;;  %16305 = vst [vmem:[#allocation166_spill] sm:$0xff] %v13862_v46  ;;  %v13870_v58 = vpop.f32.mrb[134].mxu0 }
 0x4c4   : > { %v5594_v16 = vrot.slane %v5593_v13, 2  ;;  %10715 = vrcp.f32 %v6118_v2  ;;  %v6143_v25 = vrot.slane %v6142_v54, 2  ;;  %v13850_v29 = vadd.f32 %v13639_v30, %v13407_v50  ;;  %16306 = vst [vmem:[#allocation167_spill] sm:$0xff] %v13870_v58 }
 0x4c5   : > { %v13852_v28 = vpop.eup %10703  ;;  %10717 = vrcp.f32 %v6153_v8  ;;  %v6138_v22 = vrot.slane %v6137_v61, 1  ;;  %v5577_v33 = vsel %vm2105_vm8, %v13846_v45, -inf  ;;  %v6159_v55 = vrot.slane %v6158_v12, 1 }
 0x4c6   : > { %v5595_v44 = vmax.f32 %v5593_v13, %v5594_v16  ;;  %v6175_v63 = vsel %vm2105_vm8, %v13842_v34, 0.0  ;;  %v5805_v7 = vmul.f32 1.442695, %v5687_v35  ;;  %v5578_v11 = vrot.slane %v5577_v33, 4  ;;  %v13876_v35 = vpop.f32.mrb[135].mxu0 }
 0x4c7   : > { %v13856_v4 = vpop.eup %10705  ;;  %v5555_v21 = vmax.f32 %v5553_v49, %v5554_v26  ;;  %v5576_v60 = vmax.f32 %v5574_v6, %v5575_v20  ;;  %v5561_v50 = vrot.slane %v5560_v37, 1  ;;  %v5598_v41 = vsel %vm2105_vm8, %v13850_v29, -inf  ;;  %16307 = vst [vmem:[#allocation168_spill] sm:$0xff] %v13876_v35  ;;  %v13882_v16 = vpop.f32.mrb[136].mxu0 }
 0x4c8   : > { %v13864_v27 = vadd.f32 %v6143_v25, %v6142_v54  ;;  %v5579_v15 = vmax.f32 %v5577_v33, %v5578_v11  ;;  %v5599_v18 = vrot.slane %v5598_v41, 4  ;;  %v13868_v5 = vadd.f32 %v13639_v30, %v13410_v38  ;;  %16308 = vst [vmem:[#allocation169_spill] sm:$0xff] %v13882_v16 }
 0x4c9   : > { %v13872_v2 = vpop.eup %10707  ;;  %v6139_v49 = vadd.f32 %v6138_v22, %v6137_v61  ;;  %v6176_v6 = vrot.slane %v6175_v63, 4  ;;  %v6161_v8 = vsel %vm2105_vm8, %v13856_v4, 0.0  ;;  %v5596_v13 = vrot.slane %v5595_v44, 1 }
 0x4ca   : > { %v13878_v54 = vpop.eup %10709  ;;  %10719 = vpow2.f32 %v5805_v7  ;;  %v5580_v26 = vrot.slane %v5579_v15, 2  ;;  %v5600_v20 = vmax.f32 %v5598_v41, %v5599_v18  ;;  %v5584_v38 = vsel %vm2105_vm8, %v13868_v5, -inf  ;;  %v16309_v7 = vld [vmem:[#allocation47_spill] sm:$0xff]  ;;  %v16310_v18 = vld [vmem:[#allocation68_spill] sm:$0xff] }
 0x4cb   : > { %v13884_v25 = vpop.eup %10711  ;;  %v5685_v61 = vsub.f32 %v13759_v9, %v5555_v21  ;;  %v5688_v22 = vsub.f32 %v13776_v39, %v5576_v60  ;;  %v5562_v33 = vmax.f32 %v5560_v37, %v5561_v50  ;;  %v5585_v11 = vrot.slane %v5584_v38, 4 }
 0x4cc   : > { %v13888_v58 = vpop.eup %10713  ;;  %v5581_v35 = vmax.f32 %v5579_v15, %v5580_v26  ;;  %v5601_v46 = vrot.slane %v5600_v20, 2  ;;  %v6302_v41 = vmul.f32 %v13304_v53, %v16309_v7  ;;  %v6304_v47 = vmul.f32 %v13352_v31, %v16310_v18  ;;  %v13901_v31 = vpop.f32.mrb[137].mxu0 }
 0x4cd   : > { %v6160_v52 = vadd.f32 %v6159_v55, %v6158_v12  ;;  %v6145_v16 = vrot.slane %v13864_v27, 1  ;;  %v5597_v42 = vmax.f32 %v5595_v44, %v5596_v13  ;;  %v5586_v17 = vmax.f32 %v5584_v38, %v5585_v11  ;;  %16311 = vst [vmem:[#allocation47_spill] sm:$0xff] %v13901_v31 }
 0x4ce   : > { %v13895_v9 = vpop.eup %10715  ;;  %v6177_v39 = vadd.f32 %v6176_v6, %v6175_v63  ;;  %v5582_v37 = vrot.slane %v5581_v35, 1  ;;  %v5602_v21 = vmax.f32 %v5600_v20, %v5601_v46  ;;  %v9667_v60 = vpack.c.bf16 %v6304_v47, %v6302_v41  ;;  %v13907_v47 = vpop.f32.mrb[138].mxu0 }
 0x4cf   : > { %v13897_v50 = vpop.eup %10717  ;;  %v6162_v15 = vrot.slane %v6161_v8, 4  ;;  %v6182_v53 = vsel %vm2105_vm8, %v13884_v25, 0.0  ;;  %v5801_v26 = vmul.f32 1.442695, %v5685_v61  ;;  %v5587_v7 = vrot.slane %v5586_v17, 2  ;;  %16312 = vst [vmem:[#allocation68_spill] sm:$0xff] %v13907_v47 }
 0x4d0   : > { %10721 = vrcp.f32 %v6139_v49  ;;  %v6168_v12 = vsel %vm2105_vm8, %v13888_v58, 0.0  ;;  %v5807_v44 = vmul.f32 1.442695, %v5688_v22  ;;  %v5686_v55 = vsub.f32 %v13785_v32, %v5562_v33  ;;  %9566 = vmatmul.mubr.msk.bf16.gmra.mrb[104].mxu1 %vm2105_vm8, %v9667_v60  ;;  %v13915_v49 = vpop.f32.mrb[139].mxu0 }
 0x4d1   : > { %v5691_v63 = vsub.f32 %v13819_v36, %v5597_v42  ;;  %v5603_v46 = vrot.slane %v5602_v21, 1  ;;  %v5588_v6 = vmax.f32 %v5586_v17, %v5587_v7  ;;  %v13912_v13 = vadd.f32 %v13639_v30, %v13499_v0  ;;  %6845 = vmatprep.mubr.bf16.mxu1 %v15901_v3  ;;  %16313 = vst [vmem:[#allocation170_spill] sm:$0xff] %v13915_v49  ;;  %v13917_v61 = vpop.f32.mrb[140].mxu0 }
 0x4d2   : > { %10723 = vrcp.f32 %v6160_v52  ;;  %v6178_v20 = vrot.slane %v6177_v39, 2  ;;  %v6183_v38 = vrot.slane %v6182_v53, 4  ;;  %v5583_v32 = vmax.f32 %v5581_v35, %v5582_v37  ;;  %16314 = vst [vmem:[#allocation171_spill] sm:$0xff] %v13917_v61 }
 0x4d3   : > { %v6163_v22 = vadd.f32 %v6162_v15, %v6161_v8  ;;  %10725 = vpow2.f32 %v5801_v26  ;;  %v5589_v33 = vrot.slane %v5588_v6, 1  ;;  %v5619_v36 = vsel %vm2105_vm8, %v13912_v13, -inf }
 0x4d4   : > { %v13921_v17 = vpop.eup %10719  ;;  %v6169_v0 = vrot.slane %v6168_v12, 4  ;;  %10727 = vpow2.f32 %v5807_v44  ;;  %v5803_v42 = vmul.f32 1.442695, %v5686_v55  ;;  %v5813_v11 = vmul.f32 1.442695, %v5691_v63  ;;  %v13930_v44 = vpop.f32.mrb[141].mxu0 }
 0x4d5   : > { %16315 = vst [vmem:[#allocation172_spill] sm:$0xff] %v13921_v17  ;;  %v5604_v41 = vmax.f32 %v5602_v21, %v5603_v46  ;;  %v5590_v18 = vmax.f32 %v5588_v6, %v5589_v33  ;;  %v5620_v52 = vrot.slane %v5619_v36, 4  ;;  %v6146_v60 = vadd.f32 %v6145_v16, %v13864_v27  ;;  %16316 = vst [vmem:[#allocation173_spill] sm:$0xff] %v13930_v44  ;;  %v16317_v16 = vld [vmem:[#allocation114_spill] sm:$0xff] }
 0x4d6   : > { %v6179_v35 = vadd.f32 %v6178_v20, %v6177_v39  ;;  %v5689_v37 = vsub.f32 %v13846_v45, %v5583_v32  ;;  %v13927_v8 = vadd.f32 %v13639_v30, %v13511_v10  ;;  %v6164_v15 = vrot.slane %v6163_v22, 2  ;;  %v13940_v10 = vpop.f32.mrb[142].mxu0  ;;  %v16325_v44 = vld [vmem:[#allocation106_spill] sm:$0xff] }
 0x4d7   : > { %v6184_v26 = vadd.f32 %v6183_v38, %v6182_v53  ;;  %v5690_v7 = vsub.f32 %v13868_v5, %v5590_v18  ;;  %v5621_v61 = vmax.f32 %v5619_v36, %v5620_v52  ;;  %v6203_v21 = vsel %vm2105_vm8, %v13921_v17, 0.0  ;;  %16318 = vst [vmem:[#allocation114_spill] sm:$0xff] %v13940_v10  ;;  %v13943_v55 = vpop.f32.mrb[143].mxu0 }
 0x4d8   : > { %10729 = vpow2.f32 %v5803_v42  ;;  %v5605_v27 = vsel %vm2105_vm8, %v13927_v8, -inf  ;;  %v13938_v45 = vadd.f32 %v13639_v30, %v16317_v16  ;;  %v6170_v39 = vadd.f32 %v6169_v0, %v6168_v12  ;;  %16319 = vst [vmem:[#allocation174_spill] sm:$0xff] %v13943_v55  ;;  %v13949_v38 = vpop.f32.mrb[144].mxu0 }
 0x4d9   : > { %10731 = vpow2.f32 %v5813_v11  ;;  %v5692_v5 = vsub.f32 %v13850_v29, %v5604_v41  ;;  %v5622_v53 = vrot.slane %v5621_v61, 2  ;;  %v5809_v46 = vmul.f32 1.442695, %v5689_v37  ;;  %16320 = vst [vmem:[#allocation175_spill] sm:$0xff] %v13949_v38  ;;  %v16321_v41 = vld [vmem:[#allocation116_spill] sm:$0xff] }
 0x4da   : > { %v13945_v63 = vpop.eup %10721  ;;  %10733 = vrcp.f32 %v6146_v60  ;;  %v5606_v6 = vrot.slane %v5605_v27, 4  ;;  %v5626_v20 = vsel %vm2105_vm8, %v13938_v45, -inf  ;;  %v6180_v32 = vrot.slane %v6179_v35, 1 }
 0x4db   : > { %v6204_v33 = vrot.slane %v6203_v21, 4  ;;  %v5811_v36 = vmul.f32 1.442695, %v5690_v7  ;;  %v5623_v12 = vmax.f32 %v5621_v61, %v5622_v53  ;;  %v6185_v29 = vrot.slane %v6184_v26, 2 }
 0x4dc   : > { %v13951_v0 = vpop.eup %10723  ;;  %v5607_v42 = vmax.f32 %v5605_v27, %v5606_v6  ;;  %v5627_v11 = vrot.slane %v5626_v20, 4  ;;  %v13955_v18 = vadd.f32 %v13639_v30, %v16321_v41  ;;  %v6165_v60 = vadd.f32 %v6164_v15, %v6163_v22  ;;  %v13963_v30 = vpop.f32.mrb[145].mxu0  ;;  %v16324_v41 = vld [vmem:[#allocation84_spill] sm:$0xff] }
 0x4dd   : > { %v13957_v52 = vpop.eup %10725  ;;  %v6171_v37 = vrot.slane %v6170_v39, 2  ;;  %v5815_v16 = vmul.f32 1.442695, %v5692_v5  ;;  %v5624_v55 = vrot.slane %v5623_v12, 1  ;;  %10735 = vpow2.f32 %v5809_v46  ;;  %16323 = vst [vmem:[#allocation176_spill] sm:$0xff] %v13963_v30  ;;  %v13969_v46 = vpop.f32.mrb[146].mxu0 }
 0x4de   : > { %v13959_v38 = vpop.eup %10727  ;;  %v5608_v7 = vrot.slane %v5607_v42, 2  ;;  %v5628_v61 = vmax.f32 %v5626_v20, %v5627_v11  ;;  %v5612_v53 = vsel %vm2105_vm8, %v13955_v18, -inf  ;;  %v6205_v27 = vadd.f32 %v6204_v33, %v6203_v21  ;;  %16326 = vst [vmem:[#allocation84_spill] sm:$0xff] %v13969_v46  ;;  %v16328_v33 = vld [vmem:[#allocation101_spill] sm:$0xff] }
 0x4df   : > { %16322 = vst [vmem:[#allocation116_spill] sm:$0xff] %v13959_v38  ;;  %10737 = vpow2.f32 %v5811_v36  ;;  %v5625_v6 = vmax.f32 %v5623_v12, %v5624_v55  ;;  %v5613_v10 = vrot.slane %v5612_v53, 4  ;;  %v6189_v22 = vsel %vm2105_vm8, %v13957_v52, 0.0  ;;  %v16327_v55 = vld [vmem:[#allocation81_spill] sm:$0xff]  ;;  %v13976_v12 = vpop.f32.mrb[147].mxu0 }
 0x4e0   : > { %v5609_v15 = vmax.f32 %v5607_v42, %v5608_v7  ;;  %v5629_v5 = vrot.slane %v5628_v61, 2  ;;  %v6308_v49 = vmul.f32 %v16325_v44, %v16324_v41  ;;  %v6210_v20 = vsel %vm2105_vm8, %v13959_v38, 0.0  ;;  %16329 = vst [vmem:[#allocation106_spill] sm:$0xff] %v13976_v12 }
 0x4e1   : > { %10739 = vpow2.f32 %v5815_v16  ;;  %v5695_v21 = vsub.f32 %v13912_v13, %v5625_v6  ;;  %v6306_v36 = vmul.f32 %v16328_v33, %v16327_v55  ;;  %v6181_v42 = vadd.f32 %v6180_v32, %v6179_v35 }
 0x4e2   : > { %v13978_v11 = vpop.eup %10729  ;;  %v5610_v7 = vrot.slane %v5609_v15, 1  ;;  %v5630_v30 = vmax.f32 %v5628_v61, %v5629_v5  ;;  %v5614_v47 = vmax.f32 %v5612_v53, %v5613_v10  ;;  %v6166_v41 = vrot.slane %v6165_v60, 1 }
 0x4e3   : > { %v13980_v44 = vpop.eup %10731  ;;  %v6186_v46 = vadd.f32 %v6185_v29, %v6184_v26  ;;  %v5821_v31 = vmul.f32 1.442695, %v5695_v21  ;;  %v9668_v48 = vpack.c.bf16 %v6308_v49, %v6306_v36  ;;  %v6190_v13 = vrot.slane %v6189_v22, 4 }
 0x4e4   : > { %16330 = vst [vmem:[#allocation81_spill] sm:$0xff] %v13980_v44  ;;  %v13982_v16 = vpop.eup %10733  ;;  %v6211_v6 = vrot.slane %v6210_v20, 4  ;;  %v5611_v24 = vmax.f32 %v5609_v15, %v5610_v7  ;;  %v5631_v55 = vrot.slane %v5630_v30, 1  ;;  %v13984_v33 = vadd.f32 %v6171_v37, %v6170_v39 }
 0x4e5   : > { %v6206_v12 = vrot.slane %v6205_v27, 2  ;;  %10741 = vpow2.f32 %v5821_v31  ;;  %v5615_v35 = vrot.slane %v5614_v47, 2  ;;  %9567 = vmatmul.mubr.msk.bf16.gmra.mrb[108].mxu1 %vm2105_vm8, %v9668_v48  ;;  %v6196_v10 = vsel %vm2105_vm8, %v13978_v11, 0.0 }
 0x4e6   : > { %v6231_v26 = vsel %vm2105_vm8, %v13980_v44, 0.0  ;;  %v5693_v49 = vsub.f32 %v13927_v8, %v5611_v24  ;;  %v5632_v32 = vmax.f32 %v5630_v30, %v5631_v55  ;;  %6855 = vmatprep.mubr.bf16.mxu1 %v15901_v3  ;;  %10743 = vrcp.f32 %v6181_v42  ;;  %v16337_v55 = vld [vmem:[#allocation103_spill] sm:$0xff] }
 0x4e7   : > { %v6187_v29 = vrot.slane %v6186_v46, 1  ;;  %v5616_v39 = vmax.f32 %v5614_v47, %v5615_v35  ;;  %v13993_v37 = vpop.eup %10735  ;;  %v6191_v31 = vadd.f32 %v6190_v13, %v6189_v22  ;;  %v6212_v61 = vadd.f32 %v6211_v6, %v6210_v20  ;;  %v16334_v20 = vld [vmem:[#allocation71_spill] sm:$0xff]  ;;  %v16335_v13 = vld [vmem:[#allocation96_spill] sm:$0xff]  ;;  %v16336_v6 = vld [vmem:[#allocation82_spill] sm:$0xff] }
 0x4e8   : > { %16331 = vst [vmem:[#allocation101_spill] sm:$0xff] %v13993_v37  ;;  %v5817_v53 = vmul.f32 1.442695, %v5693_v49  ;;  %v5696_v48 = vsub.f32 %v13938_v45, %v5632_v32  ;;  %v6167_v5 = vadd.f32 %v6166_v41, %v6165_v60  ;;  %v6197_v21 = vrot.slane %v6196_v10, 4 }
 0x4e9   : > { %v13996_v15 = vpop.eup %10737  ;;  %v6232_v36 = vrot.slane %v6231_v26, 4  ;;  %v5617_v7 = vrot.slane %v5616_v39, 1  ;;  %v6173_v24 = vrot.slane %v13984_v33, 1  ;;  %v6207_v8 = vadd.f32 %v6206_v12, %v6205_v27 }
 0x4ea   : > { %16332 = vst [vmem:[#allocation177_spill] sm:$0xff] %v13996_v15  ;;  %10745 = vpow2.f32 %v5817_v53  ;;  %v5823_v30 = vmul.f32 1.442695, %v5696_v48  ;;  %v6217_v47 = vsel %vm2105_vm8, %v13993_v37, 0.0  ;;  %v6310_v45 = vmul.f32 %v16335_v13, %v16334_v20  ;;  %v16358_v37 = vld [vmem:[#allocation22_spill] sm:$0xff] }
 0x4eb   : > { %v13999_v42 = vpop.eup %10739  ;;  %v5618_v22 = vmax.f32 %v5616_v39, %v5617_v7  ;;  %v6312_v60 = vmul.f32 %v16337_v55, %v16336_v6  ;;  %v6192_v41 = vrot.slane %v6191_v31, 2  ;;  %v6213_v35 = vrot.slane %v6212_v61, 2  ;;  %v16339_v55 = vld [vmem:[#allocation87_spill] sm:$0xff] }
 0x4ec   : > { %16333 = vst [vmem:[#allocation178_spill] sm:$0xff] %v13999_v42  ;;  %v6224_v49 = vsel %vm2105_vm8, %v13996_v15, 0.0  ;;  %10747 = vpow2.f32 %v5823_v30  ;;  %v6198_v27 = vadd.f32 %v6197_v21, %v6196_v10  ;;  %v6233_v12 = vadd.f32 %v6232_v36, %v6231_v26  ;;  %v16341_v10 = vld [vmem:[#allocation90_spill] sm:$0xff]  ;;  %v16356_v15 = vld [vmem:[#allocation43_spill] sm:$0xff] }
 0x4ed   : > { %v5694_v32 = vsub.f32 %v13955_v18, %v5618_v22  ;;  %v9669_v53 = vpack.c.bf16 %v6312_v60, %v6310_v45  ;;  %10749 = vrcp.f32 %v6167_v5  ;;  %v6188_v48 = vadd.f32 %v6187_v29, %v6186_v46  ;;  %v16342_v26 = vld [vmem:[#allocation66_spill] sm:$0xff] }
 0x4ee   : > { %v6218_v39 = vrot.slane %v6217_v47, 4  ;;  %v6238_v7 = vsel %vm2105_vm8, %v13999_v42, 0.0  ;;  %v6225_v13 = vrot.slane %v6224_v49, 4  ;;  %v6314_v30 = vmul.f32 %v16340_v51, %v16339_v55  ;;  %v10493_v18 = vld [vmem:[%s15619_s8 + $0x40] sm:$0xff]  }
 0x4ef   : > { %v14012_v20 = vpop.eup %10741  ;;  %v5819_v6 = vmul.f32 1.442695, %v5694_v32  ;;  %9568 = vmatmul.mubr.msk.bf16.gmra.mrb[112].mxu1 %vm2105_vm8, %v9669_v53  ;;  %v6316_v21 = vmul.f32 %v16342_v26, %v16341_v10  ;;  %v10494_v46 = vld [vmem:[%s15619_s8] sm:$0xff]   ;;  %v6208_v29 = vrot.slane %v6207_v8, 1  ;;  %v6193_v5 = vadd.f32 %v6192_v41, %v6191_v31  ;;  %9939 = vmatprep.subr.bf16.mxu0 %v10493_v18  ;;  %v16343_v10 = vld [vmem:[#allocation85_spill] sm:$0xff]  ;;  %v16344_v26 = vld [vmem:[#allocation107_spill] sm:$0xff] }
 0x4f0   : > { %16338 = vst [vmem:[#allocation71_spill] sm:$0xff] %v14012_v20  ;;  %v6214_v36 = vadd.f32 %v6213_v35, %v6212_v61  ;;  %v6259_v22 = vsel %vm2105_vm8, %v14012_v20, 0.0  ;;  %6865 = vmatprep.mubr.bf16.mxu1 %v15901_v3  ;;  %v14028_v51 = vpop.eup %10743  ;;  %v6199_v45 = vrot.slane %v6198_v27, 2  ;;  %v6234_v60 = vrot.slane %v6233_v12, 2  ;;  %v16345_v31 = vld [vmem:[#allocation89_spill] sm:$0xff]  ;;  %9940 = vmatpush3.bf16.msra.mxu0 %v10494_v46 }
 0x4f1   : > { %v6239_v32 = vrot.slane %v6238_v7, 4  ;;  %v9670_v53 = vpack.c.bf16 %v6316_v21, %v6314_v30  ;;  %v6219_v55 = vadd.f32 %v6218_v39, %v6217_v47  ;;  %10751 = vpow2.f32 %v5819_v6  ;;  %v16346_v61 = vld [vmem:[#allocation13_spill] sm:$0xff] }
 0x4f2   : > { %v14032_v43 = vmul.f32 %v16344_v26, %v16343_v10  ;;  %v14036_v41 = vmul.f32 %v16346_v61, %v16345_v31  ;;  %10753 = vrcp.f32 %v6188_v48  ;;  %v6174_v35 = vadd.f32 %v6173_v24, %v13984_v33  ;;  %v16348_v10 = vld [vmem:[#allocation97_spill] sm:$0xff]  ;;  %v16349_v26 = vld [vmem:[#allocation115_spill] sm:$0xff]  ;;  %v14060_v61 = vpop.f32.mrb[76].mxu1 }
 0x4f3   : > { %v6226_v20 = vadd.f32 %v6225_v13, %v6224_v49  ;;  %v6260_v42 = vrot.slane %v6259_v22, 4  ;;  %v6209_v30 = vadd.f32 %v6208_v29, %v6207_v8  ;;  %v6194_v21 = vrot.slane %v6193_v5, 1  ;;  %v16350_v48 = vld [vmem:[#allocation99_spill] sm:$0xff] }
 0x4f4   : > { %v14039_v44 = vpop.eup %10745  ;;  %v6215_v47 = vrot.slane %v6214_v36, 1  ;;  %v9671_v39 = vpack.c.bf16 %v14036_v41, %v14032_v43  ;;  %v6240_v6 = vadd.f32 %v6239_v32, %v6238_v7  ;;  %v14047_v46 = vmul.f32 %v16349_v26, %v16348_v10 }
 0x4f5   : > { %16347 = vst [vmem:[#allocation96_spill] sm:$0xff] %v14039_v44  ;;  %v6245_v18 = vsel %vm2105_vm8, %v14039_v44, 0.0  ;;  %v14051_v33 = vmul.f32 %v13542_v40, %v16350_v48  ;;  %v6200_v8 = vadd.f32 %v6199_v45, %v6198_v27  ;;  %v6235_v49 = vadd.f32 %v6234_v60, %v6233_v12  ;;  %v16352_v27 = vld [vmem:[#allocation94_spill] sm:$0xff]  ;;  %v14073_v60 = vpop.f32.mrb[77].mxu1 }
 0x4f6   : > { %v14053_v24 = vpop.eup %10747  ;;  %v6220_v13 = vrot.slane %v6219_v55, 2  ;;  %v6246_v29 = vrot.slane %v6245_v18, 4  ;;  %v6227_v31 = vrot.slane %v6226_v20, 2  ;;  %v6261_v43 = vadd.f32 %v6260_v42, %v6259_v22  ;;  %v16353_v12 = vld [vmem:[#allocation10_spill] sm:$0xff]  ;;  %v14075_v48 = vpop.f32.mrb[78].mxu1 }
 0x4f7   : > { %16351 = vst [vmem:[#allocation82_spill] sm:$0xff] %v14053_v24  ;;  %v6266_v7 = vsel %vm2105_vm8, %v14053_v24, 0.0  ;;  %9569 = vmatmul.mubr.msk.bf16.gmra.mrb[116].mxu1 %vm2105_vm8, %v9670_v53  ;;  %v14062_v40 = vpop.eup %10749  ;;  %v14067_v45 = vmul.f32 %v16353_v12, %v16352_v27  ;;  %v16354_v42 = vld [vmem:[#allocation98_spill] sm:$0xff]  ;;  %10755 = vrcp.f32 %v6174_v35  ;;  %v6195_v53 = vadd.f32 %v6194_v21, %v6193_v5  ;;  %v14079_v44 = vpop.f32.mrb[79].mxu1 }
 0x4f8   : > { %v6247_v41 = vadd.f32 %v6246_v29, %v6245_v18  ;;  %v6267_v10 = vrot.slane %v6266_v7, 4  ;;  %6875 = vmatprep.mubr.bf16.mxu1 %v15901_v3  ;;  %v14071_v22 = vmul.f32 %v13539_v14, %v16354_v42  ;;  %v6241_v26 = vrot.slane %v6240_v6, 2  ;;  %16355 = vst [vmem:[#allocation103_spill] sm:$0xff] %v14079_v44  ;;  %v16357_v14 = vld [vmem:[#allocation15_spill] sm:$0xff] }
 0x4f9   : > { %v6201_v32 = vrot.slane %v6200_v8, 1  ;;  %v6236_v27 = vrot.slane %v6235_v49, 1  ;;  %v6221_v12 = vadd.f32 %v6220_v13, %v6219_v55  ;;  %v14083_v42 = vmul.f32 %v16357_v14, %v16356_v15 }
 0x4fa   : > { %v6248_v18 = vrot.slane %v6247_v41, 2  ;;  %v6268_v29 = vadd.f32 %v6267_v10, %v6266_v7  ;;  %v14087_v5 = vmul.f32 %v13688_v1, %v16358_v37  ;;  %10757 = vrcp.f32 %v6209_v30  ;;  %v16360_v1 = vld [vmem:[#allocation105_spill] sm:$0xff]  ;;  %v16362_v30 = vld [vmem:[#allocation110_spill] sm:$0xff] }
 0x4fb   : > { %v14089_v35 = vpop.eup %10751  ;;  %v6216_v21 = vadd.f32 %v6215_v47, %v6214_v36  ;;  %v6228_v7 = vadd.f32 %v6227_v31, %v6226_v20  ;;  %v6262_v10 = vrot.slane %v6261_v43, 2  ;;  %v6242_v24 = vadd.f32 %v6241_v26, %v6240_v6  ;;  %v16361_v37 = vld [vmem:[#allocation17_spill] sm:$0xff] }
 0x4fc   : > { %16359 = vst [vmem:[#allocation87_spill] sm:$0xff] %v14089_v35  ;;  %v14091_v38 = vpop.eup %10753  ;;  %v6269_v17 = vrot.slane %v6268_v29, 2  ;;  %v6252_v55 = vsel %vm2105_vm8, %v14089_v35, 0.0  ;;  %v6249_v13 = vadd.f32 %v6248_v18, %v6247_v41  ;;  %v14099_v44 = vmul.f32 %v16361_v37, %v16360_v1  ;;  %v16363_v37 = vld [vmem:[#allocation112_spill] sm:$0xff]  ;;  %v16370_v41 = vld [vmem:[#allocation159_spill] sm:$0xff] }
 0x4fd   : > { %v6253_v14 = vrot.slane %v6252_v55, 4  ;;  %v14103_v20 = vmul.f32 %v13671_v56, %v16362_v30  ;;  %10759 = vrcp.f32 %v6195_v53  ;;  %v6202_v36 = vadd.f32 %v6201_v32, %v6200_v8  ;;  %v16364_v8 = vld [vmem:[#allocation40_spill] sm:$0xff] }
 0x4fe   : > { %v6237_v47 = vadd.f32 %v6236_v27, %v6235_v49  ;;  %v6222_v6 = vrot.slane %v6221_v12, 1  ;;  %v6229_v31 = vrot.slane %v6228_v7, 1  ;;  %v6263_v26 = vadd.f32 %v6262_v10, %v6261_v43  ;;  %v16365_v10 = vld [vmem:[#allocation44_spill] sm:$0xff] }
 0x4ff   : > { %9570 = vmatmul.mubr.msk.bf16.gmra.mrb[120].mxu1 %vm2105_vm8, %v9671_v39  ;;  %v6254_v35 = vadd.f32 %v6253_v14, %v6252_v55  ;;  %v6243_v18 = vrot.slane %v6242_v24, 1  ;;  %v6270_v1 = vadd.f32 %v6269_v17, %v6268_v29  ;;  %v14111_v56 = vmul.f32 %v13701_v57, %v16363_v37  ;;  %v16366_v55 = vld [vmem:[#allocation138_spill] sm:$0xff]  ;;  %v16367_v17 = vld [vmem:[#allocation113_spill] sm:$0xff] }
 0x500   : > { %6885 = vmatprep.mubr.bf16.mxu1 %v15901_v3  ;;  %v14115_v49 = vmul.f32 %v13770_v19, %v16364_v8  ;;  %10761 = vrcp.f32 %v6216_v21  ;;  %v6250_v39 = vrot.slane %v6249_v13, 1  ;;  %v6223_v53 = vadd.f32 %v6222_v6, %v6221_v12  ;;  %v16368_v29 = vld [vmem:[#allocation141_spill] sm:$0xff] }
 0x501   : > { %v6255_v43 = vrot.slane %v6254_v35, 2  ;;  %v10756_v32 = vpop.eup %10755  ;;  %v14121_v14 = vmul.f32 %v16366_v55, %v16365_v10  ;;  %v14125_v57 = vmul.f32 %v16368_v29, %v16367_v17  ;;  %10763 = vrcp.f32 %v6202_v36  ;;  %v16369_v55 = vld [vmem:[#allocation120_spill] sm:$0xff]  ;;  %v14171_v29 = vld [vmem:[%s14155_s14] sm:$0xff] }
 0x502   : > { %v6230_v30 = vadd.f32 %v6229_v31, %v6228_v7  ;;  %v6264_v19 = vrot.slane %v6263_v26, 1  ;;  %10765 = vrcp.f32 %v6237_v47  ;;  %v6244_v21 = vadd.f32 %v6243_v18, %v6242_v24  ;;  %v16371_v17 = vld [vmem:[#allocation124_spill] sm:$0xff] }
 0x503   : > { %v6256_v37 = vadd.f32 %v6255_v43, %v6254_v35  ;;  %v6271_v8 = vrot.slane %v6270_v1, 1  ;;  %v9677_v12 = vpack.c.bf16 %v14125_v57, %v14121_v14  ;;  %v6251_v27 = vadd.f32 %v6250_v39, %v6249_v13  ;;  %v16373_v35 = vld [vmem:[#allocation117_spill] sm:$0xff]  ;;  %v16374_v36 = vld [vmem:[#allocation156_spill] sm:$0xff]  ;;  %v16375_v13 = vld [vmem:[#allocation122_spill] sm:$0xff] }
 0x504   : > { %v14130_v6 = vpop.eup %10757  ;;  %v14134_v15 = vmul.f32 %v16370_v41, %v16369_v55  ;;  %v14138_v7 = vmul.f32 %v13810_v62, %v16371_v17  ;;  %10767 = vrcp.f32 %v6223_v53  ;;  %v16372_v24 = vpack.c.bf16 %v14051_v33, %v14047_v46  ;;  %v16376_v39 = vld [vmem:[#allocation135_spill] sm:$0xff]  ;;  %v16377_v53 = vld [vmem:[#allocation144_spill] sm:$0xff]  ;;  %v16381_v55 = vld [vmem:[#allocation33_spill] sm:$0xff] }
 0x505   : > { %v6257_v10 = vrot.slane %v6256_v37, 1  ;;  %v14146_v47 = vmul.f32 %v16374_v36, %v16373_v35  ;;  %v14150_v31 = vmul.f32 %v13806_v23, %v16375_v13  ;;  %10769 = vrcp.f32 %v6230_v30  ;;  %v16378_v30 = vld [vmem:[#allocation133_spill] sm:$0xff] }
 0x506   : > { %v6265_v62 = vadd.f32 %v6264_v19, %v6263_v26  ;;  %v9678_v33 = vpack.c.bf16 %v14138_v7, %v14134_v15  ;;  %10771 = vrcp.f32 %v6244_v21  ;;  %v6272_v18 = vadd.f32 %v6271_v8, %v6270_v1  ;;  %v16379_v1 = vld [vmem:[#allocation73_spill] sm:$0xff]  ;;  %v14182_v21 = vld [vmem:[%s14155_s14 + $0x8] sm:$0xff]  ;;  %v16380_v8 = vld [vmem:[#allocation152_spill] sm:$0xff] }
 0x507   : > { %9571 = vmatmul.mubr.msk.bf16.gmra.mrb[124].mxu1 %vm2105_vm8, %v16372_v24  ;;  %v6258_v46 = vadd.f32 %v6257_v10, %v6256_v37  ;;  %v10760_v41 = vpop.eup %10759  ;;  %v9679_v23 = vpack.c.bf16 %v14150_v31, %v14146_v47  ;;  %10773 = vrcp.f32 %v6251_v27  ;;  %v14164_v43 = vmul.f32 %v13872_v2, %v16376_v39  ;;  %v16382_v35 = vld [vmem:[#allocation41_spill] sm:$0xff] }
 0x508   : > { %6895 = vmatprep.mubr.bf16.mxu1 %v15901_v3  ;;  %v14168_v26 = vmul.f32 %v13895_v9, %v16377_v53  ;;  %v14175_v19 = vmul.f32 %v13852_v28, %v16378_v30  ;;  %v14179_v37 = vmul.f32 %v13878_v54, %v16379_v1  ;;  %v14190_v10 = vmul.f32 %v13945_v63, %v16380_v8  ;;  %v16387_v53 = vld [vmem:[#allocation4_spill] sm:$0xff] }
 0x509   : > { %10775 = vrcp.f32 %v6258_v46  ;;  %v14194_v28 = vmul.f32 %v13982_v16, %v13800_v59  ;;  %v4671_v17 = vadd.f32 %v14171_v29, %v16381_v55  ;;  %v4672_v36 = vadd.f32 %v14182_v21, %v16382_v35  ;;  %v16385_v16 = vld [vmem:[#allocation153_spill] sm:$0xff] }
 0x50a   : > { %v10762_v27 = vpop.eup %10761  ;;  %10777 = vrcp.f32 %v6265_v62  ;;  %v9680_v2 = vpack.c.bf16 %v14168_v26, %v14164_v43  ;;  %v16383_v13 = vpack.c.bf16 %v14071_v22, %v14067_v45  ;;  %v16384_v62 = vld [vmem:[#allocation146_spill] sm:$0xff]  ;;  %v14212_v46 = vmul.f32 %v13951_v0, %v16385_v16  ;;  %v10496_v45 = vld [vmem:[%s15619_s8 + $0x8] sm:$0xff]   ;;  %v16386_v22 = vld [vmem:[#allocation49_spill] sm:$0xff] }
 0x50b   : > { %10779 = vrcp.f32 %v6272_v18  ;;  %v10764_v54 = vpop.eup %10763  ;;  %v14208_v59 = vmul.f32 %v13897_v50, %v16384_v62  ;;  %v10495_v18 = vld [vmem:[%s15619_s8 + $0x48] sm:$0xff]   ;;  %v4673_v39 = vadd.f32 %v14171_v29, %v16386_v22  ;;  %v4674_v30 = vadd.f32 %v14182_v21, %v16387_v53  ;;  %v16389_v62 = vld [vmem:[#allocation172_spill] sm:$0xff]  ;;  %v16391_v53 = vld [vmem:[#allocation101_spill] sm:$0xff] }
 0x50c   : > { %v10766_v24 = vpop.eup %10765  ;;  %v14227_v50 = vmul.f32 %v14062_v40, %v13856_v4  ;;  %v14230_v0 = vmul.f32 %v10756_v32, %v13888_v58  ;;  %v14236_v55 = vmul.f32 %v14028_v51, %v13842_v34  ;;  %v14240_v35 = vmul.f32 %v14091_v38, %v13884_v25  ;;  %9941 = vmatprep.subr.bf16.mxu0 %v10495_v18  ;;  %v16393_v25 = vld [vmem:[#allocation81_spill] sm:$0xff] }
 0x50d   : > { %v14248_v40 = vmul.f32 %v10764_v54, %v13978_v11  ;;  %v7086_v32 = vmul.f32 %v14060_v61, %v4671_v17  ;;  %v7087_v34 = vmul.f32 %v14073_v60, %v4672_v36  ;;  %9942 = vmatpush3.bf16.msra.mxu0 %v10496_v45  ;;  %v7088_v38 = vmul.f32 %v14075_v48, %v4673_v39  ;;  %v16390_v60 = vld [vmem:[#allocation116_spill] sm:$0xff]  ;;  %v16392_v39 = vld [vmem:[#allocation177_spill] sm:$0xff] }
 0x50e   : > { %v10768_v1 = vpop.eup %10767  ;;  %v14258_v16 = vmul.f32 %v14130_v6, %v16389_v62  ;;  %v14263_v17 = vmul.f32 %v10762_v27, %v16390_v60  ;;  %v14274_v58 = vmul.f32 %v10766_v24, %v16393_v25  ;;  %v16394_v60 = vpack.c.bf16 %v14087_v5, %v14083_v42  ;;  %v16396_v24 = vld [vmem:[#allocation96_spill] sm:$0xff] }
 0x50f   : > { %9572 = vmatmul.mubr.msk.bf16.gmra.mrb[128].mxu1 %vm2105_vm8, %v16383_v13  ;;  %v14243_v13 = vmul.f32 %v10760_v41, %v13957_v52  ;;  %v10770_v4 = vpop.eup %10769  ;;  %v16388_v52 = vld [vmem:[#allocation103_spill] sm:$0xff]  ;;  %v7214_v61 = vrot.slane %v7086_v32, 4  ;;  %v7220_v54 = vrot.slane %v7087_v34, 4  ;;  %v7226_v45 = vrot.slane %v7088_v38, 4 }
 0x510   : > { %6905 = vmatprep.mubr.bf16.mxu1 %v15901_v3  ;;  %v10772_v51 = vpop.eup %10771  ;;  %v7089_v41 = vmul.f32 %v16388_v52, %v4674_v30  ;;  %v14266_v48 = vmul.f32 %v10768_v1, %v16391_v53  ;;  %v14269_v30 = vmul.f32 %v10770_v4, %v16392_v39  ;;  %v16395_v39 = vld [vmem:[#allocation178_spill] sm:$0xff] }
 0x511   : > { %v10774_v18 = vpop.eup %10773  ;;  %v7215_v52 = vadd.f32 %v7214_v61, %v7086_v32  ;;  %v7221_v62 = vadd.f32 %v7220_v54, %v7087_v34  ;;  %v7227_v1 = vadd.f32 %v7226_v45, %v7088_v38  ;;  %v14283_v32 = vmul.f32 %v10772_v51, %v16395_v39  ;;  %v16397_v54 = vld [vmem:[#allocation87_spill] sm:$0xff]  ;;  %v16399_v39 = vld [vmem:[#allocation82_spill] sm:$0xff] }
 0x512   : > { %v7232_v22 = vrot.slane %v7089_v41, 4  ;;  %v14287_v25 = vmul.f32 %v10774_v18, %v16396_v24 }
 0x513   : > { %v10776_v36 = vpop.eup %10775  ;;  %v7216_v34 = vrot.slane %v7215_v52, 2  ;;  %v7222_v61 = vrot.slane %v7221_v62, 2  ;;  %v7228_v42 = vrot.slane %v7227_v1, 2 }
 0x514   : > { %v10778_v6 = vpop.eup %10777  ;;  %v7233_v53 = vadd.f32 %v7232_v22, %v7089_v41  ;;  %v14290_v11 = vmul.f32 %v10776_v36, %v16397_v54  ;;  %v16398_v41 = vld [vmem:[#allocation71_spill] sm:$0xff] }
 0x515   : > { %v10780_v27 = vpop.eup %10779  ;;  %v14295_v45 = vmul.f32 %v10778_v6, %v16398_v41  ;;  %v7217_v51 = vadd.f32 %v7216_v34, %v7215_v52  ;;  %v7223_v22 = vadd.f32 %v7222_v61, %v7221_v62  ;;  %v7229_v18 = vadd.f32 %v7228_v42, %v7227_v1  ;;  %v10497_v42 = vld [vmem:[%s15619_s8 + $0x50] sm:$0xff]  }
 0x516   : > { %v7234_v5 = vrot.slane %v7233_v53, 2  ;;  %v14300_v4 = vmul.f32 %v10780_v27, %v16399_v39  ;;  %v16400_v52 = vpack.c.bf16 %v14103_v20, %v14099_v44  ;;  %9943 = vmatprep.subr.bf16.mxu0 %v10497_v42 }
 0x517   : > { %9573 = vmatmul.mubr.msk.bf16.gmra.mrb[132].mxu1 %vm2105_vm8, %v16394_v60  ;;  %v9690_v60 = vpack.c.bf16 %v14290_v11, %v14287_v25  ;;  %v7218_v36 = vrot.slane %v7217_v51, 1  ;;  %v7224_v54 = vrot.slane %v7223_v22, 1  ;;  %v7230_v63 = vrot.slane %v7229_v18, 1  ;;  %v16446_v11 = vld [vmem:[#allocation39_spill] sm:$0xff] }
 0x518   : > { %6915 = vmatprep.mubr.bf16.mxu1 %v15901_v3  ;;  %v7235_v24 = vadd.f32 %v7234_v5, %v7233_v53  ;;  %v9691_v8 = vpack.c.bf16 %v14300_v4, %v14295_v45  ;;  %v10498_v5 = vld [vmem:[%s15619_s8 + $0x10] sm:$0xff]   ;;  %v14542_v25 = vadd.f32 %v14182_v21, %v16446_v11  ;;  %v16462_v4 = vld [vmem:[#allocation93_spill] sm:$0xff] }
 0x519   : > { %v7219_v9 = vadd.f32 %v7218_v36, %v7217_v51  ;;  %v7225_v6 = vadd.f32 %v7224_v54, %v7223_v22  ;;  %v7231_v62 = vadd.f32 %v7230_v63, %v7229_v18  ;;  %9944 = vmatpush3.bf16.msra.mxu0 %v10498_v5  ;;  %v16402_v22 = vld [vmem:[#allocation55_spill] sm:$0xff]  ;;  %v16403_v18 = vld [vmem:[#allocation28_spill] sm:$0xff] }
 0x51a   : > { %v7236_v38 = vrot.slane %v7235_v24, 1  ;;  %v4675_v39 = vadd.f32 %v14171_v29, %v16402_v22  ;;  %v16404_v54 = vld [vmem:[#allocation20_spill] sm:$0xff] }
 0x51b   : > { %v7982_v27 = vpack.c.bf16 %v7219_v9, %v7219_v9  ;;  %v7983_v1 = vpack.c.bf16 %v7225_v6, %v7225_v6  ;;  %v7984_v53 = vpack.c.bf16 %v7231_v62, %v7231_v62  ;;  %v4677_v6 = vadd.f32 %v14171_v29, %v16404_v54 }
 0x51c   : > { %v7237_v34 = vadd.f32 %v7236_v38, %v7235_v24  ;;  %v16401_v38 = vpack.c.bf16 %v14115_v49, %v14111_v56  ;;  %v4676_v24 = vadd.f32 %v14182_v21, %v16403_v18 }
 0x51d   : > { %v8277_v41 = vunpack.c.l.b16 %v7982_v27  ;;  %v8278_v44 = vunpack.c.l.b16 %v7983_v1  ;;  %v8279_v20 = vunpack.c.l.b16 %v7984_v53 }
 0x51e   : > { %v7985_v61 = vpack.c.bf16 %v7237_v34, %v7237_v34  ;;  %v16405_v34 = vld [vmem:[#allocation56_spill] sm:$0xff] }
 0x51f   : > { %9574 = vmatmul.mubr.msk.bf16.gmra.mrb[136].mxu1 %vm2105_vm8, %v16400_v52  ;;  %v8405_v63 = vsel %vm1639_vm1, %v8279_v20, %v8277_v41  ;;  %v4678_v27 = vadd.f32 %v14182_v21, %v16405_v34 }
 0x520   : > { %6925 = vmatprep.mubr.bf16.mxu1 %v15901_v3  ;;  %v8280_v51 = vunpack.c.l.b16 %v7985_v61 }
 0x522   : > { %v8412_v9 = vsel %vm1639_vm1, %v8280_v51, %v8278_v44 }
 0x527   : > { %9575 = vmatmul.mubr.msk.bf16.gmra.mrb[140].mxu1 %vm2105_vm8, %v16401_v38 }
 0x528   : > { %6935 = vmatprep.mubr.bf16.mxu1 %v15901_v3 }
 0x52d   : > { %v6777_v36 = vpop.f32.mrb[80].mxu1 }
 0x52e   : > { %v7090_v52 = vmul.f32 %v6777_v36, %v4675_v39  ;;  %v6779_v62 = vpop.f32.mrb[81].mxu1 }
 0x52f   : > { %v7091_v56 = vmul.f32 %v6779_v62, %v4676_v24  ;;  %v6781_v49 = vpop.f32.mrb[82].mxu1  ;;  %9576 = vmatmul.mubr.msk.bf16.gmra.mrb[144].mxu1 %vm2105_vm8, %v9677_v12 }
 0x530   : > { %v7238_v1 = vrot.slane %v7090_v52, 4  ;;  %v7092_v53 = vmul.f32 %v6781_v49, %v4677_v6  ;;  %v6783_v61 = vpop.f32.mrb[83].mxu1  ;;  %6945 = vmatprep.mubr.bf16.mxu1 %v15901_v3  ;;  %v10499_v49 = vld [vmem:[%s15619_s8 + $0x58] sm:$0xff]  }
 0x531   : > { %v7244_v42 = vrot.slane %v7091_v56, 4  ;;  %v7093_v5 = vmul.f32 %v6783_v61, %v4678_v27  ;;  %9945 = vmatprep.subr.bf16.mxu0 %v10499_v49 }
 0x532   : > { %v7239_v41 = vadd.f32 %v7238_v1, %v7090_v52  ;;  %v7250_v44 = vrot.slane %v7092_v53, 4  ;;  %v10500_v1 = vld [vmem:[%s15619_s8 + $0x18] sm:$0xff]  }
 0x533   : > { %v7245_v20 = vadd.f32 %v7244_v42, %v7091_v56  ;;  %v7256_v51 = vrot.slane %v7093_v5, 4  ;;  %9946 = vmatpush3.bf16.msra.mxu0 %v10500_v1 }
 0x534   : > { %v7240_v38 = vrot.slane %v7239_v41, 2  ;;  %v7251_v22 = vadd.f32 %v7250_v44, %v7092_v53 }
 0x535   : > { %v7246_v39 = vrot.slane %v7245_v20, 2  ;;  %v7257_v18 = vadd.f32 %v7256_v51, %v7093_v5  ;;  %v16406_v5 = vld [vmem:[#allocation6_spill] sm:$0xff]  ;;  %v16407_v51 = vld [vmem:[#allocation16_spill] sm:$0xff] }
 0x536   : > { %v7241_v24 = vadd.f32 %v7240_v38, %v7239_v41  ;;  %v7252_v36 = vrot.slane %v7251_v22, 2  ;;  %v4679_v41 = vadd.f32 %v14171_v29, %v16406_v5  ;;  %v4680_v38 = vadd.f32 %v14182_v21, %v16407_v51 }
 0x537   : > { %v7247_v54 = vadd.f32 %v7246_v39, %v7245_v20  ;;  %v7258_v6 = vrot.slane %v7257_v18, 2  ;;  %9577 = vmatmul.mubr.msk.bf16.gmra.mrb[148].mxu1 %vm2105_vm8, %v9678_v33 }
 0x538   : > { %v7242_v62 = vrot.slane %v7241_v24, 1  ;;  %v7253_v34 = vadd.f32 %v7252_v36, %v7251_v22  ;;  %6955 = vmatprep.mubr.bf16.mxu1 %v15901_v3 }
 0x539   : > { %v7248_v27 = vrot.slane %v7247_v54, 1  ;;  %v7259_v14 = vadd.f32 %v7258_v6, %v7257_v18 }
 0x53a   : > { %v7243_v57 = vadd.f32 %v7242_v62, %v7241_v24  ;;  %v7254_v12 = vrot.slane %v7253_v34, 1  ;;  %v16408_v24 = vld [vmem:[#allocation58_spill] sm:$0xff] }
 0x53b   : > { %v7249_v52 = vadd.f32 %v7248_v27, %v7247_v54  ;;  %v7260_v56 = vrot.slane %v7259_v14, 1  ;;  %v4681_v36 = vadd.f32 %v14171_v29, %v16408_v24  ;;  %v16409_v27 = vld [vmem:[#allocation8_spill] sm:$0xff] }
 0x53c   : > { %v7986_v53 = vpack.c.bf16 %v7243_v57, %v7243_v57  ;;  %v7255_v61 = vadd.f32 %v7254_v12, %v7253_v34 }
 0x53d   : > { %v7987_v42 = vpack.c.bf16 %v7249_v52, %v7249_v52  ;;  %v7261_v15 = vadd.f32 %v7260_v56, %v7259_v14  ;;  %v4682_v14 = vadd.f32 %v14182_v21, %v16409_v27 }
 0x53e   : > { %v8281_v7 = vunpack.c.l.b16 %v7986_v53  ;;  %v7988_v33 = vpack.c.bf16 %v7255_v61, %v7255_v61 }
 0x53f   : > { %v8282_v44 = vunpack.c.l.b16 %v7987_v42  ;;  %v7989_v20 = vpack.c.bf16 %v7261_v15, %v7261_v15  ;;  %v6787_v18 = vpop.f32.mrb[84].mxu1  ;;  %9578 = vmatmul.mubr.msk.bf16.gmra.mrb[152].mxu1 %vm2105_vm8, %v9679_v23 }
 0x540   : > { %v8406_v22 = vsel %vm1641_vm2, %v8281_v7, %v8405_v63  ;;  %v8283_v39 = vunpack.c.l.b16 %v7988_v33  ;;  %v7094_v62 = vmul.f32 %v6787_v18, %v4679_v41  ;;  %v6789_v34 = vpop.f32.mrb[85].mxu1  ;;  %6965 = vmatprep.mubr.bf16.mxu1 %v15901_v3 }
 0x541   : > { %v8413_v54 = vsel %vm1641_vm2, %v8282_v44, %v8412_v9  ;;  %v8284_v6 = vunpack.c.l.b16 %v7989_v20  ;;  %v7095_v57 = vmul.f32 %v6789_v34, %v4680_v38  ;;  %v6791_v12 = vpop.f32.mrb[86].mxu1  ;;  %v16410_v34 = vld [vmem:[#allocation14_spill] sm:$0xff] }
 0x542   : > { %v8407_v63 = vsel %vm1643_vm3, %v8283_v39, %v8406_v22  ;;  %v7262_v9 = vrot.slane %v7094_v62, 4  ;;  %v7096_v56 = vmul.f32 %v6791_v12, %v4681_v36  ;;  %v6793_v49 = vpop.f32.mrb[87].mxu1  ;;  %v4683_v27 = vadd.f32 %v14171_v29, %v16410_v34 }
 0x543   : > { %v8414_v52 = vsel %vm1643_vm3, %v8284_v6, %v8413_v54  ;;  %v7268_v1 = vrot.slane %v7095_v57, 4  ;;  %v7097_v53 = vmul.f32 %v6793_v49, %v4682_v14  ;;  %v16411_v14 = vld [vmem:[#allocation3_spill] sm:$0xff]  ;;  %v10502_v49 = vld [vmem:[%s15619_s8 + $0x20] sm:$0xff]  }
 0x544   : > { %v7263_v61 = vadd.f32 %v7262_v9, %v7094_v62  ;;  %v7274_v42 = vrot.slane %v7096_v56, 4 }
 0x545   : > { %v7269_v15 = vadd.f32 %v7268_v1, %v7095_v57  ;;  %v7280_v7 = vrot.slane %v7097_v53, 4  ;;  %v4684_v57 = vadd.f32 %v14182_v21, %v16411_v14  ;;  %v10503_v1 = vld [vmem:[%s15619_s8 + $0x68] sm:$0xff]   ;;  %v16415_v14 = vpack.c.bf16 %v14194_v28, %v14190_v10  ;;  %v10507_v10 = vld [vmem:[%s15619_s8 + $0x78] sm:$0xff]  }
 0x546   : > { %v7264_v47 = vrot.slane %v7263_v61, 2  ;;  %v7275_v31 = vadd.f32 %v7274_v42, %v7096_v56  ;;  %v16413_v42 = vpack.c.bf16 %v14179_v37, %v14175_v19  ;;  %v10504_v19 = vld [vmem:[%s15619_s8 + $0x28] sm:$0xff]  }
 0x547   : > { %v7270_v23 = vrot.slane %v7269_v15, 2  ;;  %v7281_v33 = vadd.f32 %v7280_v7, %v7097_v53  ;;  %9579 = vmatmul.mubr.msk.bf16.gmra.mrb[156].mxu1 %vm2105_vm8, %v9680_v2  ;;  %v10501_v2 = vld [vmem:[%s15619_s8 + $0x60] sm:$0xff]   ;;  %v16412_v53 = vld [vmem:[#allocation12_spill] sm:$0xff] }
 0x548   : > { %v7265_v5 = vadd.f32 %v7264_v47, %v7263_v61  ;;  %v7276_v41 = vrot.slane %v7275_v31, 2  ;;  %6975 = vmatprep.mubr.bf16.mxu1 %v15901_v3  ;;  %v4685_v61 = vadd.f32 %v14171_v29, %v16412_v53  ;;  %9947 = vmatprep.subr.bf16.mxu0 %v10501_v2 }
 0x549   : > { %v7271_v44 = vadd.f32 %v7270_v23, %v7269_v15  ;;  %v7282_v20 = vrot.slane %v7281_v33, 2  ;;  %v16414_v23 = vld [vmem:[#allocation18_spill] sm:$0xff]  ;;  %9948 = vmatpush3.bf16.msra.mxu0 %v10502_v49  ;;  %v10506_v49 = vld [vmem:[%s15619_s8 + $0x30] sm:$0xff]  }
 0x54a   : > { %v7266_v51 = vrot.slane %v7265_v5, 1  ;;  %v7277_v38 = vadd.f32 %v7276_v41, %v7275_v31  ;;  %9949 = vmatprep.subr.bf16.mxu0 %v10503_v1 }
 0x54b   : > { %v7272_v22 = vrot.slane %v7271_v44, 1  ;;  %v7283_v39 = vadd.f32 %v7282_v20, %v7281_v33  ;;  %v4686_v33 = vadd.f32 %v14182_v21, %v16414_v23 }
 0x54c   : > { %v7267_v18 = vadd.f32 %v7266_v51, %v7265_v5  ;;  %v7278_v24 = vrot.slane %v7277_v38, 1 }
 0x54d   : > { %v7273_v36 = vadd.f32 %v7272_v22, %v7271_v44  ;;  %v7284_v54 = vrot.slane %v7283_v39, 1  ;;  %9950 = vmatpush3.bf16.msra.mxu0 %v10504_v19 }
 0x54e   : > { %v7990_v6 = vpack.c.bf16 %v7267_v18, %v7267_v18  ;;  %v7279_v62 = vadd.f32 %v7278_v24, %v7277_v38 }
 0x54f   : > { %v7991_v43 = vpack.c.bf16 %v7273_v36, %v7273_v36  ;;  %v7285_v26 = vadd.f32 %v7284_v54, %v7283_v39  ;;  %9580 = vmatmul.mubr.msk.bf16.gmra.mrb[160].mxu1 %vm2105_vm8, %v16413_v42  ;;  %v10508_v42 = vld [vmem:[%s15619_s8 + $0x38] sm:$0xff]  }
 0x550   : > { %v8285_v12 = vunpack.c.l.b16 %v7990_v6  ;;  %v7992_v9 = vpack.c.bf16 %v7279_v62, %v7279_v62  ;;  %v6797_v56 = vpop.f32.mrb[88].mxu1  ;;  %6985 = vmatprep.mubr.bf16.mxu1 %v15901_v3 }
 0x551   : > { %v8286_v15 = vunpack.c.l.b16 %v7991_v43  ;;  %v7993_v7 = vpack.c.bf16 %v7285_v26, %v7285_v26  ;;  %v7098_v47 = vmul.f32 %v6797_v56, %v4683_v27  ;;  %v6799_v31 = vpop.f32.mrb[89].mxu1 }
 0x552   : > { %v8408_v5 = vsel %vm1645_vm4, %v8285_v12, %v8407_v63  ;;  %v8287_v41 = vunpack.c.l.b16 %v7992_v9  ;;  %v7099_v44 = vmul.f32 %v6799_v31, %v4684_v57  ;;  %v6801_v20 = vpop.f32.mrb[90].mxu1  ;;  %v10505_v12 = vld [vmem:[%s15619_s8 + $0x70] sm:$0xff]  }
 0x553   : > { %v8288_v37 = vunpack.c.l.b16 %v7993_v7  ;;  %v7286_v51 = vrot.slane %v7098_v47, 4  ;;  %v7100_v38 = vmul.f32 %v6801_v20, %v4685_v61  ;;  %v6803_v22 = vpop.f32.mrb[91].mxu1  ;;  %v8415_v39 = vsel %vm1645_vm4, %v8286_v15, %v8414_v52  ;;  %9951 = vmatprep.subr.bf16.mxu0 %v10505_v12 }
 0x554   : > { %v8409_v18 = vsel %vm1647_vm5, %v8287_v41, %v8408_v5  ;;  %v7292_v24 = vrot.slane %v7099_v44, 4  ;;  %v7101_v36 = vmul.f32 %v6803_v22, %v4686_v33  ;;  %9952 = vmatpush3.bf16.msra.mxu0 %v10506_v49 }
 0x555   : > { %v7287_v63 = vadd.f32 %v7286_v51, %v7098_v47  ;;  %v7298_v54 = vrot.slane %v7100_v38, 4  ;;  %v8416_v6 = vsel %vm1647_vm5, %v8288_v37, %v8415_v39  ;;  %9953 = vmatprep.subr.bf16.mxu0 %v10507_v10  ;;  %v16417_v39 = vld [vmem:[#allocation53_spill] sm:$0xff] }
 0x556   : > { %v7293_v62 = vadd.f32 %v7292_v24, %v7099_v44  ;;  %v7304_v34 = vrot.slane %v7101_v36, 4  ;;  %v16416_v44 = vpack.c.bf16 %v14212_v46, %v14208_v59  ;;  %v4687_v24 = vadd.f32 %v14171_v29, %v16417_v39 }
 0x557   : > { %v7288_v27 = vrot.slane %v7287_v63, 2  ;;  %v7299_v43 = vadd.f32 %v7298_v54, %v7100_v38  ;;  %9581 = vmatmul.mubr.msk.bf16.gmra.mrb[164].mxu1 %vm2105_vm8, %v16415_v14  ;;  %v16418_v54 = vld [vmem:[#allocation26_spill] sm:$0xff] }
 0x558   : > { %v7294_v26 = vrot.slane %v7293_v62, 2  ;;  %v7305_v2 = vadd.f32 %v7304_v34, %v7101_v36  ;;  %6995 = vmatprep.mubr.bf16.mxu1 %v15901_v3  ;;  %9954 = vmatpush3.bf16.msra.mxu0 %v10508_v42  ;;  %v4688_v59 = vadd.f32 %v14182_v21, %v16418_v54  ;;  %v16419_v34 = vld [vmem:[#allocation63_spill] sm:$0xff] }
 0x559   : > { %v7289_v52 = vadd.f32 %v7288_v27, %v7287_v63  ;;  %v7300_v57 = vrot.slane %v7299_v43, 2  ;;  %v4689_v27 = vadd.f32 %v14171_v29, %v16419_v34  ;;  %v16424_v34 = vld [vmem:[#allocation48_spill] sm:$0xff] }
 0x55a   : > { %v7295_v9 = vadd.f32 %v7294_v26, %v7293_v62  ;;  %v7306_v56 = vrot.slane %v7305_v2, 2 }
 0x55b   : > { %v7290_v28 = vrot.slane %v7289_v52, 1  ;;  %v7301_v1 = vadd.f32 %v7300_v57, %v7299_v43 }
 0x55c   : > { %v7296_v53 = vrot.slane %v7295_v9, 1  ;;  %v7307_v61 = vadd.f32 %v7306_v56, %v7305_v2  ;;  %v16420_v2 = vld [vmem:[#allocation25_spill] sm:$0xff]  ;;  %v16421_v56 = vpack.c.bf16 %v14230_v0, %v14227_v50  ;;  %v16422_v0 = vpack.c.bf16 %v14240_v35, %v14236_v55 }
 0x55d   : > { %v7291_v15 = vadd.f32 %v7290_v28, %v7289_v52  ;;  %v7302_v7 = vrot.slane %v7301_v1, 1  ;;  %v4690_v14 = vadd.f32 %v14182_v21, %v16420_v2 }
 0x55e   : > { %v7297_v47 = vadd.f32 %v7296_v53, %v7295_v9  ;;  %v7308_v31 = vrot.slane %v7307_v61, 1 }
 0x55f   : > { %v7994_v23 = vpack.c.bf16 %v7291_v15, %v7291_v15  ;;  %v7303_v33 = vadd.f32 %v7302_v7, %v7301_v1  ;;  %9582 = vmatmul.mubr.msk.bf16.gmra.mrb[168].mxu1 %vm2105_vm8, %v16416_v44 }
 0x560   : > { %v7995_v5 = vpack.c.bf16 %v7297_v47, %v7297_v47  ;;  %v7309_v41 = vadd.f32 %v7308_v31, %v7307_v61  ;;  %7005 = vmatprep.mubr.bf16.mxu1 %v15901_v3 }
 0x561   : > { %v8289_v20 = vunpack.c.l.b16 %v7994_v23  ;;  %v7996_v19 = vpack.c.bf16 %v7303_v33, %v7303_v33 }
 0x562   : > { %v8290_v37 = vunpack.c.l.b16 %v7995_v5  ;;  %v7997_v51 = vpack.c.bf16 %v7309_v41, %v7309_v41 }
 0x563   : > { %v8410_v38 = vsel %vm1649_vm6, %v8289_v20, %v8409_v18  ;;  %v8291_v22 = vunpack.c.l.b16 %v7996_v19 }
 0x564   : > { %v8292_v36 = vunpack.c.l.b16 %v7997_v51  ;;  %v8417_v63 = vsel %vm1649_vm6, %v8290_v37, %v8416_v6  ;;  %v6807_v62 = vpop.f32.mrb[92].mxu1 }
 0x565   : > { %v14426_v46 = vsel %vm1651_vm7, %v8291_v22, %v8410_v38  ;;  %v7102_v43 = vmul.f32 %v6807_v62, %v4687_v24  ;;  %v6809_v26 = vpop.f32.mrb[93].mxu1 }
 0x566   : > { %v14431_v18 = vsel %vm1651_vm7, %v8292_v36, %v8417_v63  ;;  %v7103_v52 = vmul.f32 %v6809_v26, %v4688_v59  ;;  %v6811_v6 = vpop.f32.mrb[94].mxu1  ;;  %v16423_v59 = vld [vmem:[#allocation29_spill] sm:$0xff] }
 0x567   : > { %v7310_v57 = vrot.slane %v7102_v43, 4  ;;  %v7104_v12 = vmul.f32 %v6811_v6, %v4689_v27  ;;  %v6813_v9 = vpop.f32.mrb[95].mxu1  ;;  %9583 = vmatmul.mubr.msk.bf16.gmra.mrb[172].mxu1 %vm2105_vm8, %v16421_v56  ;;  %v4691_v62 = vadd.f32 %v14171_v29, %v16423_v59  ;;  %v4692_v27 = vadd.f32 %v14182_v21, %v16424_v34  ;;  %v16427_v56 = vld [vmem:[#allocation57_spill] sm:$0xff] }
 0x568   : > { %v7316_v49 = vrot.slane %v7103_v52, 4  ;;  %v7105_v10 = vmul.f32 %v6813_v9, %v4690_v14  ;;  %7015 = vmatprep.mubr.bf16.mxu1 %v15901_v3 }
 0x569   : > { %v7311_v28 = vadd.f32 %v7310_v57, %v7102_v43  ;;  %v7322_v1 = vrot.slane %v7104_v12, 4  ;;  %v16425_v43 = vpack.c.bf16 %v14248_v40, %v14243_v13 }
 0x56a   : > { %v7317_v53 = vadd.f32 %v7316_v49, %v7103_v52  ;;  %v7328_v61 = vrot.slane %v7105_v10, 4  ;;  %v16426_v52 = vld [vmem:[#allocation30_spill] sm:$0xff]  ;;  %v4694_v49 = vadd.f32 %v14182_v21, %v16427_v56 }
 0x56b   : > { %v7312_v42 = vrot.slane %v7311_v28, 2  ;;  %v7323_v15 = vadd.f32 %v7322_v1, %v7104_v12  ;;  %v4693_v6 = vadd.f32 %v14171_v29, %v16426_v52  ;;  %v16430_v52 = vld [vmem:[#allocation37_spill] sm:$0xff] }
 0x56c   : > { %v7318_v7 = vrot.slane %v7317_v53, 2  ;;  %v7329_v47 = vadd.f32 %v7328_v61, %v7105_v10 }
 0x56d   : > { %v7313_v31 = vadd.f32 %v7312_v42, %v7311_v28  ;;  %v7324_v23 = vrot.slane %v7323_v15, 2 }
 0x56e   : > { %v7319_v33 = vadd.f32 %v7318_v7, %v7317_v53  ;;  %v7330_v5 = vrot.slane %v7329_v47, 2 }
 0x56f   : > { %v7314_v41 = vrot.slane %v7313_v31, 1  ;;  %v7325_v50 = vadd.f32 %v7324_v23, %v7323_v15  ;;  %9584 = vmatmul.mubr.msk.bf16.gmra.mrb[176].mxu1 %vm2105_vm8, %v16422_v0 }
 0x570   : > { %v7320_v44 = vrot.slane %v7319_v33, 1  ;;  %v7331_v20 = vadd.f32 %v7330_v5, %v7329_v47  ;;  %7025 = vmatprep.mubr.bf16.mxu1 %v15901_v3  ;;  %v16428_v5 = vpack.c.bf16 %v14263_v17, %v14258_v16  ;;  %v16429_v17 = vpack.c.bf16 %v14269_v30, %v14266_v48  ;;  %v16431_v30 = vld [vmem:[#allocation27_spill] sm:$0xff] }
 0x571   : > { %v7315_v19 = vadd.f32 %v7314_v41, %v7313_v31  ;;  %v7326_v37 = vrot.slane %v7325_v50, 1 }
 0x572   : > { %v7321_v51 = vadd.f32 %v7320_v44, %v7319_v33  ;;  %v7332_v38 = vrot.slane %v7331_v20, 1 }
 0x573   : > { %v7998_v22 = vpack.c.bf16 %v7315_v19, %v7315_v19  ;;  %v7327_v39 = vadd.f32 %v7326_v37, %v7325_v50 }
 0x574   : > { %v7999_v24 = vpack.c.bf16 %v7321_v51, %v7321_v51  ;;  %v7333_v36 = vadd.f32 %v7332_v38, %v7331_v20 }
 0x575   : > { %v8000_v63 = vpack.c.bf16 %v7327_v39, %v7327_v39  ;;  %v8293_v55 = vunpack.c.l.b16 %v7998_v22 }
 0x576   : > { %v8001_v54 = vpack.c.bf16 %v7333_v36, %v7333_v36  ;;  %v8294_v26 = vunpack.c.l.b16 %v7999_v24 }
 0x577   : > { %v8295_v35 = vunpack.c.l.b16 %v8000_v63  ;;  %9585 = vmatmul.mubr.msk.bf16.gmra.mrb[180].mxu1 %vm2105_vm8, %v16425_v43 }
 0x578   : > { %v8296_v2 = vunpack.c.l.b16 %v8001_v54  ;;  %v6817_v14 = vpop.f32.mrb[96].mxu1  ;;  %7035 = vmatprep.mubr.bf16.mxu1 %v15901_v3 }
 0x579   : > { %v8419_v57 = vsel %vm1639_vm1, %v8295_v35, %v8293_v55  ;;  %v7106_v12 = vmul.f32 %v6817_v14, %v4691_v62  ;;  %v6819_v9 = vpop.f32.mrb[97].mxu1 }
 0x57a   : > { %v8426_v10 = vsel %vm1639_vm1, %v8296_v2, %v8294_v26  ;;  %v7107_v13 = vmul.f32 %v6819_v9, %v4692_v27  ;;  %v6821_v40 = vpop.f32.mrb[98].mxu1 }
 0x57b   : > { %v7334_v28 = vrot.slane %v7106_v12, 4  ;;  %v7108_v1 = vmul.f32 %v6821_v40, %v4693_v6  ;;  %v6823_v53 = vpop.f32.mrb[99].mxu1  ;;  %v4695_v6 = vadd.f32 %v14171_v29, %v16430_v52 }
 0x57c   : > { %v7340_v61 = vrot.slane %v7107_v13, 4  ;;  %v7109_v42 = vmul.f32 %v6823_v53, %v4694_v49  ;;  %v16432_v49 = vld [vmem:[#allocation64_spill] sm:$0xff] }
 0x57d   : > { %v7335_v15 = vadd.f32 %v7334_v28, %v7106_v12  ;;  %v7346_v7 = vrot.slane %v7108_v1, 4  ;;  %v4696_v12 = vadd.f32 %v14182_v21, %v16431_v30  ;;  %v16445_v30 = vld [vmem:[#allocation61_spill] sm:$0xff] }
 0x57e   : > { %v7341_v47 = vadd.f32 %v7340_v61, %v7107_v13  ;;  %v7352_v31 = vrot.slane %v7109_v42, 4 }
 0x57f   : > { %v7336_v23 = vrot.slane %v7335_v15, 2  ;;  %v7347_v33 = vadd.f32 %v7346_v7, %v7108_v1  ;;  %9586 = vmatmul.mubr.msk.bf16.gmra.mrb[184].mxu1 %vm2105_vm8, %v16428_v5  ;;  %v16434_v1 = vpack.c.bf16 %v14283_v32, %v14274_v58  ;;  %v16436_v58 = vld [vmem:[#allocation23_spill] sm:$0xff] }
 0x580   : > { %v7342_v41 = vrot.slane %v7341_v47, 2  ;;  %v7353_v50 = vadd.f32 %v7352_v31, %v7109_v42  ;;  %7045 = vmatprep.mubr.bf16.mxu1 %v15901_v3  ;;  %v14497_v32 = vadd.f32 %v14182_v21, %v16436_v58  ;;  %v16454_v58 = vld [vmem:[#allocation50_spill] sm:$0xff] }
 0x581   : > { %v7337_v0 = vadd.f32 %v7336_v23, %v7335_v15  ;;  %v7348_v44 = vrot.slane %v7347_v33, 2 }
 0x582   : > { %v7343_v20 = vadd.f32 %v7342_v41, %v7341_v47  ;;  %v7354_v19 = vrot.slane %v7353_v50, 2 }
 0x583   : > { %v7338_v37 = vrot.slane %v7337_v0, 1  ;;  %v7349_v51 = vadd.f32 %v7348_v44, %v7347_v33 }
 0x584   : > { %v7344_v38 = vrot.slane %v7343_v20, 1  ;;  %v7355_v22 = vadd.f32 %v7354_v19, %v7353_v50  ;;  %v16435_v50 = vld [vmem:[#allocation59_spill] sm:$0xff]  ;;  %v16437_v19 = vld [vmem:[#allocation32_spill] sm:$0xff] }
 0x585   : > { %v7339_v39 = vadd.f32 %v7338_v37, %v7337_v0  ;;  %v7350_v24 = vrot.slane %v7349_v51, 1  ;;  %v14493_v0 = vadd.f32 %v14171_v29, %v16435_v50  ;;  %v14501_v37 = vadd.f32 %v14171_v29, %v16437_v19 }
 0x586   : > { %v7345_v36 = vadd.f32 %v7344_v38, %v7343_v20  ;;  %v7356_v63 = vrot.slane %v7355_v22, 1 }
 0x587   : > { %v8002_v54 = vpack.c.bf16 %v7339_v39, %v7339_v39  ;;  %v7351_v16 = vadd.f32 %v7350_v24, %v7349_v51  ;;  %9587 = vmatmul.mubr.msk.bf16.gmra.mrb[188].mxu1 %vm2105_vm8, %v16429_v17  ;;  %v16438_v51 = vld [vmem:[#allocation45_spill] sm:$0xff]  ;;  %v16439_v24 = vld [vmem:[#allocation36_spill] sm:$0xff] }
 0x588   : > { %v8003_v59 = vpack.c.bf16 %v7345_v36, %v7345_v36  ;;  %v7357_v62 = vadd.f32 %v7356_v63, %v7355_v22  ;;  %7055 = vmatprep.mubr.bf16.mxu1 %v15901_v3  ;;  %v14505_v38 = vadd.f32 %v14182_v21, %v16438_v51  ;;  %v14509_v36 = vadd.f32 %v14171_v29, %v16439_v24  ;;  %v16440_v63 = vld [vmem:[#allocation34_spill] sm:$0xff]  ;;  %v16455_v51 = vld [vmem:[#allocation67_spill] sm:$0xff] }
 0x589   : > { %v8297_v55 = vunpack.c.l.b16 %v8002_v54  ;;  %v8004_v35 = vpack.c.bf16 %v7351_v16, %v7351_v16  ;;  %v14513_v54 = vadd.f32 %v14182_v21, %v16440_v63 }
 0x58a   : > { %v8298_v34 = vunpack.c.l.b16 %v8003_v59  ;;  %v8005_v27 = vpack.c.bf16 %v7357_v62, %v7357_v62  ;;  %v16441_v59 = vld [vmem:[#allocation60_spill] sm:$0xff] }
 0x58b   : > { %v8420_v43 = vsel %vm1641_vm2, %v8297_v55, %v8419_v57  ;;  %v8299_v26 = vunpack.c.l.b16 %v8004_v35  ;;  %v4697_v57 = vadd.f32 %v14171_v29, %v16432_v49  ;;  %v14517_v62 = vadd.f32 %v14171_v29, %v16441_v59  ;;  %v16442_v55 = vld [vmem:[#allocation62_spill] sm:$0xff]  ;;  %v16447_v49 = vld [vmem:[#allocation7_spill] sm:$0xff] }
 0x58c   : > { %v8427_v2 = vsel %vm1641_vm2, %v8298_v34, %v8426_v10  ;;  %v8300_v14 = vunpack.c.l.b16 %v8005_v27  ;;  %v16433_v10 = vld [vmem:[#allocation31_spill] sm:$0xff]  ;;  %v14521_v35 = vadd.f32 %v14182_v21, %v16442_v55  ;;  %v16458_v55 = vld [vmem:[#allocation76_spill] sm:$0xff] }
 0x58d   : > { %v14475_v48 = vsel %vm1643_vm3, %v8299_v26, %v8420_v43  ;;  %v4698_v28 = vadd.f32 %v14182_v21, %v16433_v10  ;;  %v16443_v43 = vld [vmem:[#allocation38_spill] sm:$0xff] }
 0x58e   : > { %v14480_v9 = vsel %vm1643_vm3, %v8300_v14, %v8427_v2  ;;  %v6827_v56 = vpop.f32.mrb[100].mxu1  ;;  %v14529_v26 = vadd.f32 %v14171_v29, %v16443_v43  ;;  %v16444_v2 = vld [vmem:[#allocation35_spill] sm:$0xff] }
 0x58f   : > { %v7110_v13 = vmul.f32 %v6827_v56, %v4695_v6  ;;  %v6829_v40 = vpop.f32.mrb[101].mxu1  ;;  %9588 = vmatmul.mubr.msk.bf16.gmra.mrb[192].mxu1 %vm2105_vm8, %v16434_v1  ;;  %v14533_v14 = vadd.f32 %v14182_v21, %v16444_v2  ;;  %v16459_v2 = vld [vmem:[#allocation83_spill] sm:$0xff] }
 0x590   : > { %v7111_v53 = vmul.f32 %v6829_v40, %v4696_v12  ;;  %v6831_v61 = vpop.f32.mrb[102].mxu1  ;;  %7065 = vmatprep.mubr.bf16.mxu1 %v15901_v3  ;;  %v14538_v12 = vadd.f32 %v14171_v29, %v16445_v30 }
 0x591   : > { %v7358_v42 = vrot.slane %v7110_v13, 4  ;;  %v7112_v15 = vmul.f32 %v6831_v61, %v4697_v57  ;;  %v6833_v7 = vpop.f32.mrb[103].mxu1  ;;  %v14546_v57 = vadd.f32 %v14171_v29, %v16447_v49 }
 0x592   : > { %v7364_v47 = vrot.slane %v7111_v53, 4  ;;  %v7113_v31 = vmul.f32 %v6833_v7, %v4698_v28  ;;  %v16449_v28 = vld [vmem:[#allocation42_spill] sm:$0xff] }
 0x593   : > { %v7359_v23 = vadd.f32 %v7358_v42, %v7110_v13  ;;  %v7370_v33 = vrot.slane %v7112_v15, 4  ;;  %v16448_v13 = vld [vmem:[#allocation19_spill] sm:$0xff]  ;;  %v14554_v1 = vadd.f32 %v14171_v29, %v16449_v28  ;;  %v16451_v7 = vld [vmem:[#allocation46_spill] sm:$0xff]  ;;  %v16464_v28 = vld [vmem:[#allocation100_spill] sm:$0xff] }
 0x594   : > { %v7365_v5 = vadd.f32 %v7364_v47, %v7111_v53  ;;  %v7376_v41 = vrot.slane %v7113_v31, 4  ;;  %v14550_v40 = vadd.f32 %v14182_v21, %v16448_v13  ;;  %v16450_v53 = vld [vmem:[#allocation54_spill] sm:$0xff]  ;;  %v14562_v47 = vadd.f32 %v14171_v29, %v16451_v7  ;;  %v16466_v7 = vld [vmem:[#allocation104_spill] sm:$0xff] }
 0x595   : > { %v7360_v44 = vrot.slane %v7359_v23, 2  ;;  %v7371_v20 = vadd.f32 %v7370_v33, %v7112_v15  ;;  %v14558_v61 = vadd.f32 %v14182_v21, %v16450_v53  ;;  %v16465_v53 = vld [vmem:[#allocation102_spill] sm:$0xff] }
 0x596   : > { %v7366_v22 = vrot.slane %v7365_v5, 2  ;;  %v7377_v39 = vadd.f32 %v7376_v41, %v7113_v31  ;;  %v16452_v31 = vld [vmem:[#allocation24_spill] sm:$0xff]  ;;  %v16453_v41 = vld [vmem:[#allocation11_spill] sm:$0xff] }
 0x597   : > { %v7361_v16 = vadd.f32 %v7360_v44, %v7359_v23  ;;  %v7372_v17 = vrot.slane %v7371_v20, 2  ;;  %9589 = vmatmul.mubr.msk.bf16.gmra.mrb[196].mxu1 %vm2105_vm8, %v9690_v60  ;;  %v14566_v23 = vadd.f32 %v14182_v21, %v16452_v31  ;;  %v14570_v50 = vadd.f32 %v14171_v29, %v16453_v41 }
 0x598   : > { %v7367_v34 = vadd.f32 %v7366_v22, %v7365_v5  ;;  %v7378_v27 = vrot.slane %v7377_v39, 2  ;;  %7075 = vmatprep.mubr.bf16.mxu1 %v15901_v3  ;;  %v14574_v44 = vadd.f32 %v14182_v21, %v16454_v58  ;;  %v14578_v22 = vadd.f32 %v14171_v29, %v16455_v51 }
 0x599   : > { %v7362_v52 = vrot.slane %v7361_v16, 1  ;;  %v7373_v6 = vadd.f32 %v7372_v17, %v7371_v20  ;;  %v16457_v17 = vld [vmem:[#allocation74_spill] sm:$0xff]  ;;  %v14633_v31 = vadd.f32 %v14182_v21, %v16466_v7 }
 0x59a   : > { %v7368_v60 = vrot.slane %v7367_v34, 1  ;;  %v7379_v56 = vadd.f32 %v7378_v27, %v7377_v39  ;;  %v16456_v39 = vld [vmem:[#allocation72_spill] sm:$0xff]  ;;  %v14586_v59 = vadd.f32 %v14171_v29, %v16457_v17 }
 0x59b   : > { %v7363_v3 = vadd.f32 %v7362_v52, %v7361_v16  ;;  %v7374_v10 = vrot.slane %v7373_v6, 1  ;;  %v14582_v24 = vadd.f32 %v14182_v21, %v16456_v39  ;;  %v14598_v52 = vadd.f32 %v14171_v29, %v16459_v2  ;;  %v16470_v39 = vld [vmem:[#allocation65_spill] sm:$0xff] }
 0x59c   : > { %v7369_v42 = vadd.f32 %v7368_v60, %v7367_v34  ;;  %v7380_v15 = vrot.slane %v7379_v56, 1  ;;  %v14590_v34 = vadd.f32 %v14182_v21, %v16458_v55 }
 0x59d   : > { %v8006_v33 = vpack.c.bf16 %v7363_v3, %v7363_v3  ;;  %v7375_v5 = vadd.f32 %v7374_v10, %v7373_v6  ;;  %v16460_v6 = vld [vmem:[#allocation91_spill] sm:$0xff] }
 0x59e   : > { %v8007_v20 = vpack.c.bf16 %v7369_v42, %v7369_v42  ;;  %v7381_v19 = vadd.f32 %v7380_v15, %v7379_v56  ;;  %v14602_v30 = vadd.f32 %v14182_v21, %v16460_v6  ;;  %v16461_v56 = vld [vmem:[#allocation92_spill] sm:$0xff]  ;;  %v16463_v3 = vld [vmem:[#allocation95_spill] sm:$0xff]  ;;  %v14626_v42 = vadd.f32 %v14171_v29, %v16465_v53  ;;  %v16473_v6 = vld [vmem:[#allocation118_spill] sm:$0xff] }
 0x59f   : > { %v8301_v63 = vunpack.c.l.b16 %v8006_v33  ;;  %v8008_v16 = vpack.c.bf16 %v7375_v5, %v7375_v5  ;;  %9590 = vmatmul.mubr.msk.bf16.gmra.mrb[200].mxu1 %vm2105_vm8, %v9691_v8  ;;  %v14608_v49 = vadd.f32 %v14171_v29, %v16461_v56  ;;  %v14612_v8 = vadd.f32 %v14182_v21, %v16462_v4  ;;  %v16468_v5 = vld [vmem:[#allocation9_spill] sm:$0xff] }
 0x5a0   : > { %v8302_v27 = vunpack.c.l.b16 %v8007_v20  ;;  %v8009_v43 = vpack.c.bf16 %v7381_v19, %v7381_v19  ;;  %v14618_v10 = vadd.f32 %v14171_v29, %v16463_v3  ;;  %v14641_v41 = vadd.f32 %v14182_v21, %v16468_v5  ;;  %v16469_v19 = vld [vmem:[#allocation111_spill] sm:$0xff]  ;;  %v16477_v5 = vld [vmem:[#allocation88_spill] sm:$0xff] }
 0x5a1   : > { %v8422_v11 = vsel %vm1645_vm4, %v8301_v63, %v14475_v48  ;;  %v8303_v60 = vunpack.c.l.b16 %v8008_v16  ;;  %v14622_v48 = vadd.f32 %v14182_v21, %v16464_v28  ;;  %v14648_v51 = vadd.f32 %v14171_v29, %v16469_v19  ;;  %v16471_v16 = vld [vmem:[#allocation51_spill] sm:$0xff]  ;;  %v16478_v19 = vld [vmem:[#allocation78_spill] sm:$0xff] }
 0x5a2   : > { %v8304_v45 = vunpack.c.l.b16 %v8009_v43  ;;  %v8429_v13 = vsel %vm1645_vm4, %v8302_v27, %v14480_v9  ;;  %v16467_v9 = vld [vmem:[#allocation108_spill] sm:$0xff]  ;;  %v14652_v63 = vadd.f32 %v14182_v21, %v16470_v39  ;;  %v14656_v17 = vadd.f32 %v14171_v29, %v16471_v16  ;;  %v16472_v43 = vld [vmem:[#allocation69_spill] sm:$0xff] }
 0x5a3   : > { %v14629_v15 = vsel %vm1647_vm5, %v8303_v60, %v8422_v11  ;;  %v14637_v33 = vadd.f32 %v14171_v29, %v16467_v9  ;;  %v6837_v58 = vpop.f32.mrb[104].mxu1  ;;  %v14661_v2 = vadd.f32 %v14182_v21, %v16472_v43  ;;  %v14665_v11 = vadd.f32 %v14171_v29, %v16473_v6  ;;  %v16474_v60 = vld [vmem:[#allocation119_spill] sm:$0xff]  ;;  %v16482_v6 = vld [vmem:[#allocation125_spill] sm:$0xff] }
 0x5a4   : > { %v14644_v20 = vsel %vm1647_vm5, %v8304_v45, %v8429_v13  ;;  %v7114_v55 = vmul.f32 %v6837_v58, %v14493_v0  ;;  %v6839_v27 = vpop.f32.mrb[105].mxu1  ;;  %v14669_v56 = vadd.f32 %v14182_v21, %v16474_v60  ;;  %v16475_v13 = vld [vmem:[#allocation121_spill] sm:$0xff]  ;;  %v16476_v0 = vld [vmem:[#allocation2_spill] sm:$0xff]  ;;  %v14683_v58 = vadd.f32 %v14171_v29, %v16477_v5  ;;  %v16486_v5 = vld [vmem:[#allocation127_spill] sm:$0xff] }
 0x5a5   : > { %v7115_v4 = vmul.f32 %v6839_v27, %v14497_v32  ;;  %v6841_v45 = vpop.f32.mrb[106].mxu1  ;;  %v14674_v3 = vadd.f32 %v14171_v29, %v16475_v13  ;;  %v14678_v28 = vadd.f32 %v14182_v21, %v16476_v0  ;;  %v14687_v32 = vadd.f32 %v14182_v21, %v16478_v19  ;;  %v16480_v27 = vld [vmem:[#allocation123_spill] sm:$0xff]  ;;  %v16484_v13 = vld [vmem:[#allocation126_spill] sm:$0xff] }
 0x5a6   : > { %v7382_v53 = vrot.slane %v7114_v55, 4  ;;  %v7116_v7 = vmul.f32 %v6841_v45, %v14501_v37  ;;  %v6843_v9 = vpop.f32.mrb[107].mxu1  ;;  %v14692_v43 = vadd.f32 %v14171_v29, %v16480_v27  ;;  %v14696_v37 = vadd.f32 %v14182_v21, %v16482_v6  ;;  %v16488_v27 = vld [vmem:[#allocation128_spill] sm:$0xff] }
 0x5a7   : > { %16479 = vst [vmem:[#allocation109_spill] sm:$0xff] %v14687_v32  ;;  %v7388_v39 = vrot.slane %v7115_v4, 4  ;;  %v7117_v16 = vmul.f32 %v6843_v9, %v14505_v38  ;;  %v14700_v0 = vadd.f32 %v14171_v29, %v16484_v13  ;;  %v14704_v19 = vadd.f32 %v14182_v21, %v16486_v5  ;;  %v16490_v32 = vld [vmem:[#allocation129_spill] sm:$0xff] }
 0x5a8   : > { %16481 = vst [vmem:[#allocation90_spill] sm:$0xff] %v14692_v43  ;;  %16483 = vst [vmem:[#allocation66_spill] sm:$0xff] %v14696_v37  ;;  %v7383_v60 = vadd.f32 %v7382_v53, %v7114_v55  ;;  %v7394_v45 = vrot.slane %v7116_v7, 4  ;;  %v14708_v43 = vadd.f32 %v14171_v29, %v16488_v27  ;;  %v14712_v6 = vadd.f32 %v14182_v21, %v16490_v32  ;;  %v16492_v37 = vld [vmem:[#allocation130_spill] sm:$0xff]  ;;  %v16496_v27 = vld [vmem:[#allocation75_spill] sm:$0xff] }
 0x5a9   : > { %16485 = vst [vmem:[#allocation85_spill] sm:$0xff] %v14700_v0  ;;  %16487 = vst [vmem:[#allocation107_spill] sm:$0xff] %v14704_v19  ;;  %v7389_v38 = vadd.f32 %v7388_v39, %v7115_v4  ;;  %v7400_v9 = vrot.slane %v7117_v16, 4  ;;  %v14716_v13 = vadd.f32 %v14171_v29, %v16492_v37  ;;  %v16494_v0 = vld [vmem:[#allocation131_spill] sm:$0xff]  ;;  %v14723_v19 = vld [vmem:[%s14155_s14] sm:$0xff] }
 0x5aa   : > { %16489 = vst [vmem:[#allocation89_spill] sm:$0xff] %v14708_v43  ;;  %16491 = vst [vmem:[#allocation13_spill] sm:$0xff] %v14712_v6  ;;  %v7384_v55 = vrot.slane %v7383_v60, 2  ;;  %v7395_v53 = vadd.f32 %v7394_v45, %v7116_v7  ;;  %v14720_v5 = vadd.f32 %v14182_v21, %v16494_v0  ;;  %v14727_v43 = vadd.f32 %v14723_v19, %v16496_v27  ;;  %v16498_v32 = vld [vmem:[#allocation132_spill] sm:$0xff]  ;;  %v16500_v29 = vld [vmem:[#allocation134_spill] sm:$0xff] }
 0x5ab   : > { %16493 = vst [vmem:[#allocation97_spill] sm:$0xff] %v14716_v13  ;;  %v7390_v4 = vrot.slane %v7389_v38, 2  ;;  %v7401_v39 = vadd.f32 %v7400_v9, %v7117_v16  ;;  %v14731_v6 = vadd.f32 %v14182_v21, %v16498_v32  ;;  %v14735_v37 = vadd.f32 %v14723_v19, %v16500_v29  ;;  %v14738_v0 = vld [vmem:[%s14155_s14 + $0x8] sm:$0xff]  ;;  %v16504_v27 = vld [vmem:[#allocation77_spill] sm:$0xff]  ;;  %v16508_v29 = vld [vmem:[#allocation80_spill] sm:$0xff] }
 0x5ac   : > { %16495 = vst [vmem:[#allocation115_spill] sm:$0xff] %v14720_v5  ;;  %16497 = vst [vmem:[#allocation99_spill] sm:$0xff] %v14727_v43  ;;  %v7385_v7 = vadd.f32 %v7384_v55, %v7383_v60  ;;  %v7396_v45 = vrot.slane %v7395_v53, 2  ;;  %v16502_v5 = vld [vmem:[#allocation136_spill] sm:$0xff]  ;;  %v14746_v43 = vadd.f32 %v14723_v19, %v16504_v27  ;;  %v16506_v21 = vld [vmem:[#allocation79_spill] sm:$0xff] }
 0x5ad   : > { %16499 = vst [vmem:[#allocation94_spill] sm:$0xff] %v14731_v6  ;;  %16501 = vst [vmem:[#allocation10_spill] sm:$0xff] %v14735_v37  ;;  %v14742_v16 = vadd.f32 %v14738_v0, %v16502_v5  ;;  %v7391_v9 = vadd.f32 %v7390_v4, %v7389_v38  ;;  %v7402_v13 = vrot.slane %v7401_v39, 2  ;;  %v14750_v60 = vadd.f32 %v14738_v0, %v16506_v21  ;;  %v16510_v6 = vld [vmem:[#allocation137_spill] sm:$0xff] }
 0x5ae   : > { %16505 = vst [vmem:[#allocation43_spill] sm:$0xff] %v14746_v43  ;;  %v7386_v55 = vrot.slane %v7385_v7, 1  ;;  %v7397_v32 = vadd.f32 %v7396_v45, %v7395_v53  ;;  %v14754_v37 = vadd.f32 %v14723_v19, %v16508_v29  ;;  %v14758_v5 = vadd.f32 %v14738_v0, %v16510_v6  ;;  %v16514_v43 = vld [vmem:[#allocation140_spill] sm:$0xff]  ;;  %v16516_v45 = vld [vmem:[#allocation5_spill] sm:$0xff] }
 0x5af   : > { %16503 = vst [vmem:[#allocation98_spill] sm:$0xff] %v14742_v16  ;;  %16507 = vst [vmem:[#allocation15_spill] sm:$0xff] %v14750_v60  ;;  %v7392_v38 = vrot.slane %v7391_v9, 1  ;;  %v7403_v4 = vadd.f32 %v7402_v13, %v7401_v39  ;;  %v16512_v16 = vld [vmem:[#allocation139_spill] sm:$0xff]  ;;  %v14766_v21 = vadd.f32 %v14738_v0, %v16514_v43  ;;  %v14770_v29 = vadd.f32 %v14723_v19, %v16516_v45  ;;  %v16520_v39 = vld [vmem:[#allocation86_spill] sm:$0xff] }
 0x5b0   : > { %16509 = vst [vmem:[#allocation22_spill] sm:$0xff] %v14754_v37  ;;  %16511 = vst [vmem:[#allocation105_spill] sm:$0xff] %v14758_v5  ;;  %v14762_v27 = vadd.f32 %v14723_v19, %v16512_v16  ;;  %v7387_v60 = vadd.f32 %v7386_v55, %v7385_v7  ;;  %v7398_v53 = vrot.slane %v7397_v32, 1  ;;  %v16518_v37 = vld [vmem:[#allocation21_spill] sm:$0xff]  ;;  %v14778_v16 = vadd.f32 %v14723_v19, %v16520_v39 }
 0x5b1   : > { %16515 = vst [vmem:[#allocation110_spill] sm:$0xff] %v14766_v21  ;;  %16517 = vst [vmem:[#allocation112_spill] sm:$0xff] %v14770_v29  ;;  %v14774_v6 = vadd.f32 %v14738_v0, %v16518_v37  ;;  %v7393_v5 = vadd.f32 %v7392_v38, %v7391_v9  ;;  %v7404_v13 = vrot.slane %v7403_v4, 1  ;;  %v16524_v21 = vld [vmem:[#allocation143_spill] sm:$0xff]  ;;  %v16526_v29 = vld [vmem:[#allocation145_spill] sm:$0xff] }
 0x5b2   : > { %16513 = vst [vmem:[#allocation17_spill] sm:$0xff] %v14762_v27  ;;  %16521 = vst [vmem:[#allocation44_spill] sm:$0xff] %v14778_v16  ;;  %v16522_v27 = vld [vmem:[#allocation142_spill] sm:$0xff]  ;;  %v8010_v7 = vpack.c.bf16 %v7387_v60, %v7387_v60  ;;  %v7399_v55 = vadd.f32 %v7398_v53, %v7397_v32  ;;  %v14786_v45 = vadd.f32 %v14723_v19, %v16524_v21  ;;  %v16530_v16 = vld [vmem:[#allocation148_spill] sm:$0xff] }
 0x5b3   : > { %16519 = vst [vmem:[#allocation40_spill] sm:$0xff] %v14774_v6  ;;  %v14782_v43 = vadd.f32 %v14738_v0, %v16522_v27  ;;  %v14790_v37 = vadd.f32 %v14738_v0, %v16526_v29  ;;  %v8011_v9 = vpack.c.bf16 %v7393_v5, %v7393_v5  ;;  %v7405_v38 = vadd.f32 %v7404_v13, %v7403_v4  ;;  %v16528_v6 = vld [vmem:[#allocation147_spill] sm:$0xff]  ;;  %v16532_v53 = vld [vmem:[#allocation149_spill] sm:$0xff] }
 0x5b4   : > { %16525 = vst [vmem:[#allocation113_spill] sm:$0xff] %v14786_v45  ;;  %v14794_v39 = vadd.f32 %v14723_v19, %v16528_v6  ;;  %v14798_v27 = vadd.f32 %v14738_v0, %v16530_v16  ;;  %v8305_v60 = vunpack.c.l.b16 %v8010_v7  ;;  %v8012_v32 = vpack.c.bf16 %v7399_v55, %v7399_v55  ;;  %v16534_v45 = vld [vmem:[#allocation150_spill] sm:$0xff]  ;;  %v16536_v13 = vld [vmem:[#allocation151_spill] sm:$0xff] }
 0x5b5   : > { %16523 = vst [vmem:[#allocation138_spill] sm:$0xff] %v14782_v43  ;;  %16527 = vst [vmem:[#allocation141_spill] sm:$0xff] %v14790_v37  ;;  %v14802_v21 = vadd.f32 %v14723_v19, %v16532_v53  ;;  %v14806_v29 = vadd.f32 %v14738_v0, %v16534_v45  ;;  %v8306_v5 = vunpack.c.l.b16 %v8011_v9  ;;  %v8013_v4 = vpack.c.bf16 %v7405_v38, %v7405_v38  ;;  %v16540_v53 = vld [vmem:[#allocation155_spill] sm:$0xff]  ;;  %v16542_v45 = vld [vmem:[#allocation157_spill] sm:$0xff] }
 0x5b6   : > { %16529 = vst [vmem:[#allocation120_spill] sm:$0xff] %v14794_v39  ;;  %16531 = vst [vmem:[#allocation159_spill] sm:$0xff] %v14798_v27  ;;  %v14810_v6 = vadd.f32 %v14723_v19, %v16536_v13  ;;  %v16538_v39 = vld [vmem:[#allocation154_spill] sm:$0xff]  ;;  %v8424_v7 = vsel %vm1649_vm6, %v8305_v60, %v14629_v15  ;;  %v8307_v55 = vunpack.c.l.b16 %v8012_v32  ;;  %v14824_v9 = vadd.f32 %v14738_v0, %v16542_v45 }
 0x5b7   : > { %16533 = vst [vmem:[#allocation124_spill] sm:$0xff] %v14802_v21  ;;  %16535 = vst [vmem:[#allocation117_spill] sm:$0xff] %v14806_v29  ;;  %v14814_v16 = vadd.f32 %v14738_v0, %v16538_v39  ;;  %v14820_v21 = vadd.f32 %v14723_v19, %v16540_v53  ;;  %v8308_v38 = vunpack.c.l.b16 %v8013_v4  ;;  %v8431_v13 = vsel %vm1649_vm6, %v8306_v5, %v14644_v20  ;;  %v16548_v60 = vld [vmem:[#allocation70_spill] sm:$0xff] }
 0x5b8   : > { %16537 = vst [vmem:[#allocation156_spill] sm:$0xff] %v14810_v6  ;;  %16543 = vst [vmem:[#allocation144_spill] sm:$0xff] %v14824_v9  ;;  %v16544_v6 = vld [vmem:[#allocation158_spill] sm:$0xff]  ;;  %v14838_v32 = vadd.f32 %v14723_v19, %v16548_v60  ;;  %v8425_v53 = vsel %vm1651_vm7, %v8307_v55, %v8424_v7  ;;  %v6847_v45 = vpop.f32.mrb[108].mxu1  ;;  %v16550_v9 = vld [vmem:[#allocation160_spill] sm:$0xff] }
 0x5b9   : > { %16539 = vst [vmem:[#allocation122_spill] sm:$0xff] %v14814_v16  ;;  %16541 = vst [vmem:[#allocation135_spill] sm:$0xff] %v14820_v21  ;;  %v14830_v39 = vadd.f32 %v14723_v19, %v16544_v6  ;;  %v16546_v16 = vld [vmem:[#allocation52_spill] sm:$0xff]  ;;  %v14843_v4 = vadd.f32 %v14738_v0, %v16550_v9  ;;  %v7118_v20 = vmul.f32 %v6847_v45, %v14509_v36  ;;  %v6849_v5 = vpop.f32.mrb[109].mxu1  ;;  %v16554_v60 = vld [vmem:[#allocation162_spill] sm:$0xff] }
 0x5ba   : > { %v14834_v15 = vadd.f32 %v14738_v0, %v16546_v16  ;;  %16549 = vst [vmem:[#allocation152_spill] sm:$0xff] %v14838_v32  ;;  %v8432_v6 = vsel %vm1651_vm7, %v8308_v38, %v8431_v13  ;;  %v16552_v16 = vld [vmem:[#allocation161_spill] sm:$0xff]  ;;  %v14854_v32 = vadd.f32 %v14738_v0, %v16554_v60  ;;  %v7119_v7 = vmul.f32 %v6849_v5, %v14513_v54  ;;  %v6851_v55 = vpop.f32.mrb[110].mxu1  ;;  %v16558_v38 = vld [vmem:[#allocation164_spill] sm:$0xff]  ;;  %v16562_v54 = vld [vmem:[#allocation166_spill] sm:$0xff] }
 0x5bb   : > { %16545 = vst [vmem:[#allocation133_spill] sm:$0xff] %v14830_v39  ;;  %16551 = vst [vmem:[#allocation33_spill] sm:$0xff] %v14843_v4  ;;  %v8517_v39 = vpack.c.b16 %v8425_v53, %v14426_v46  ;;  %v8518_v9 = vpack.c.b16 %v8432_v6, %v14431_v18  ;;  %v16556_v4 = vld [vmem:[#allocation163_spill] sm:$0xff]  ;;  %v14864_v46 = vadd.f32 %v14738_v0, %v16558_v38  ;;  %v7406_v13 = vrot.slane %v7118_v20, 4  ;;  %v6853_v45 = vpop.f32.mrb[111].mxu1 }
 0x5bc   : > { %16547 = vst [vmem:[#allocation73_spill] sm:$0xff] %v14834_v15  ;;  %v14850_v15 = vadd.f32 %v14723_v19, %v16552_v16  ;;  %16555 = vst [vmem:[#allocation146_spill] sm:$0xff] %v14854_v32  ;;  %v14860_v36 = vadd.f32 %v14723_v19, %v16556_v4  ;;  %v7120_v53 = vmul.f32 %v6851_v55, %v14517_v62  ;;  %v16560_v16 = vld [vmem:[#allocation165_spill] sm:$0xff]  ;;  %v7412_v18 = vrot.slane %v7119_v7, 4  ;;  %v16564_v6 = vld [vmem:[#allocation167_spill] sm:$0xff] }
 0x5bd   : > { %16559 = vst [vmem:[#allocation49_spill] sm:$0xff] %v14864_v46  ;;  %v14869_v60 = vadd.f32 %v14723_v19, %v16560_v16  ;;  %v14873_v5 = vadd.f32 %v14738_v0, %v16562_v54  ;;  %v7121_v4 = vmul.f32 %v6853_v45, %v14521_v35  ;;  %8661 = vmatprep.mubr.bf16.mxu0 %v8518_v9  ;;  %v16566_v46 = vld [vmem:[#allocation168_spill] sm:$0xff]  ;;  %v16568_v16 = vld [vmem:[#allocation169_spill] sm:$0xff]  ;;  %v16570_v54 = vld [vmem:[#allocation47_spill] sm:$0xff] }
 0x5be   : > { %16553 = vst [vmem:[#allocation41_spill] sm:$0xff] %v14850_v15  ;;  %16557 = vst [vmem:[#allocation153_spill] sm:$0xff] %v14860_v36  ;;  %v14878_v38 = vadd.f32 %v14723_v19, %v16564_v6  ;;  %v14882_v62 = vadd.f32 %v14738_v0, %v16566_v46  ;;  %v7407_v55 = vadd.f32 %v7406_v13, %v7118_v20  ;;  %v7418_v36 = vrot.slane %v7120_v53, 4  ;;  %v16572_v45 = vld [vmem:[#allocation68_spill] sm:$0xff]  ;;  %v16576_v13 = vld [vmem:[#allocation171_spill] sm:$0xff] }
 0x5bf   : > { %16561 = vst [vmem:[#allocation4_spill] sm:$0xff] %v14869_v60  ;;  %16563 = vst [vmem:[#allocation103_spill] sm:$0xff] %v14873_v5  ;;  %8662 = vmatmul.mubr.bf16.vlgmr.msra.gmra.mrb[148].mxu0 %v8517_v39  ;;  %v14886_v60 = vadd.f32 %v14723_v19, %v16568_v16  ;;  %v14890_v5 = vadd.f32 %v14738_v0, %v16570_v54  ;;  %v7413_v35 = vadd.f32 %v7412_v18, %v7119_v7 }
 0x5c0   : > { %16565 = vst [vmem:[#allocation172_spill] sm:$0xff] %v14878_v38  ;;  %16567 = vst [vmem:[#allocation116_spill] sm:$0xff] %v14882_v62  ;;  %v7424_v9 = vrot.slane %v7121_v4, 4  ;;  %v14894_v6 = vadd.f32 %v14723_v19, %v16572_v45  ;;  %v16574_v38 = vld [vmem:[#allocation170_spill] sm:$0xff]  ;;  %v7408_v20 = vrot.slane %v7407_v55, 2  ;;  %v7419_v39 = vadd.f32 %v7418_v36, %v7120_v53  ;;  %v16584_v53 = vld [vmem:[#allocation175_spill] sm:$0xff] }
 0x5c1   : > { %16569 = vst [vmem:[#allocation101_spill] sm:$0xff] %v14886_v60  ;;  %16571 = vst [vmem:[#allocation177_spill] sm:$0xff] %v14890_v5  ;;  %v14898_v46 = vadd.f32 %v14738_v0, %v16574_v38  ;;  %v14902_v16 = vadd.f32 %v14723_v19, %v16576_v13  ;;  %v16578_v60 = vld [vmem:[#allocation173_spill] sm:$0xff]  ;;  %v7414_v7 = vrot.slane %v7413_v35, 2  ;;  %v16580_v5 = vld [vmem:[#allocation114_spill] sm:$0xff]  ;;  %v14918_v13 = vadd.f32 %v14723_v19, %v16584_v53 }
 0x5c2   : > { %16573 = vst [vmem:[#allocation81_spill] sm:$0xff] %v14894_v6  ;;  %v14906_v54 = vadd.f32 %v14738_v0, %v16578_v60  ;;  %v7425_v18 = vadd.f32 %v7424_v9, %v7121_v4  ;;  %v14910_v45 = vadd.f32 %v14723_v19, %v16580_v5  ;;  %v16582_v6 = vld [vmem:[#allocation174_spill] sm:$0xff]  ;;  %v7420_v36 = vrot.slane %v7419_v39, 2  ;;  %v6857_v9 = vpop.f32.mrb[112].mxu1  ;;  %v16588_v62 = vld [vmem:[#allocation84_spill] sm:$0xff] }
 0x5c3   : > { %16575 = vst [vmem:[#allocation178_spill] sm:$0xff] %v14898_v46  ;;  %16577 = vst [vmem:[#allocation96_spill] sm:$0xff] %v14902_v16  ;;  %v14914_v38 = vadd.f32 %v14738_v0, %v16582_v6  ;;  %v7409_v46 = vadd.f32 %v7408_v20, %v7407_v55  ;;  %v16586_v16 = vld [vmem:[#allocation176_spill] sm:$0xff]  ;;  %v14926_v5 = vadd.f32 %v14723_v19, %v16588_v62  ;;  %v6859_v20 = vpop.f32.mrb[113].mxu1 }
 0x5c4   : > { %16579 = vst [vmem:[#allocation87_spill] sm:$0xff] %v14906_v54  ;;  %16581 = vst [vmem:[#allocation71_spill] sm:$0xff] %v14910_v45  ;;  %v14922_v60 = vadd.f32 %v14738_v0, %v16586_v16  ;;  %v7415_v54 = vadd.f32 %v7414_v7, %v7413_v35  ;;  %v7426_v4 = vrot.slane %v7425_v18, 2  ;;  %v7421_v6 = vadd.f32 %v7420_v36, %v7419_v39  ;;  %v6861_v35 = vpop.f32.mrb[114].mxu1 }
 0x5c5   : > { %16583 = vst [vmem:[#allocation82_spill] sm:$0xff] %v14914_v38  ;;  %16585 = vst [vmem:[#allocation55_spill] sm:$0xff] %v14918_v13  ;;  %v7410_v45 = vrot.slane %v7409_v46, 1  ;;  %v7122_v55 = vmul.f32 %v6857_v9, %v14529_v26  ;;  %v16590_v38 = vld [vmem:[#allocation106_spill] sm:$0xff]  ;;  %v7123_v16 = vmul.f32 %v6859_v20, %v14533_v14  ;;  %v7124_v19 = vmul.f32 %v6861_v35, %v14538_v12  ;;  %v6863_v62 = vpop.f32.mrb[115].mxu1 }
 0x5c6   : > { %16587 = vst [vmem:[#allocation28_spill] sm:$0xff] %v14922_v60  ;;  %16589 = vst [vmem:[#allocation20_spill] sm:$0xff] %v14926_v5  ;;  %v14931_v53 = vadd.f32 %v14738_v0, %v16590_v38  ;;  %v7416_v13 = vrot.slane %v7415_v54, 1  ;;  %v7427_v32 = vadd.f32 %v7426_v4, %v7425_v18  ;;  %v7422_v60 = vrot.slane %v7421_v6, 1 }
 0x5c7   : > { %v7411_v7 = vadd.f32 %v7410_v45, %v7409_v46  ;;  %v7430_v15 = vrot.slane %v7122_v55, 4  ;;  %v7436_v36 = vrot.slane %v7123_v16, 4  ;;  %v7125_v26 = vmul.f32 %v6863_v62, %v14542_v25 }
 0x5c8   : > { %16591 = vst [vmem:[#allocation56_spill] sm:$0xff] %v14931_v53  ;;  %v7417_v5 = vadd.f32 %v7416_v13, %v7415_v54  ;;  %v7428_v39 = vrot.slane %v7427_v32, 1  ;;  %v7423_v21 = vadd.f32 %v7422_v60, %v7421_v6  ;;  %v7442_v38 = vrot.slane %v7124_v19, 4 }
 0x5c9   : > { %v8014_v9 = vpack.c.bf16 %v7411_v7, %v7411_v7  ;;  %v7431_v0 = vadd.f32 %v7430_v15, %v7122_v55  ;;  %v7437_v4 = vadd.f32 %v7436_v36, %v7123_v16  ;;  %v7448_v14 = vrot.slane %v7125_v26, 4 }
 0x5ca   : > { %v8015_v53 = vpack.c.bf16 %v7417_v5, %v7417_v5  ;;  %v7429_v18 = vadd.f32 %v7428_v39, %v7427_v32  ;;  %v8016_v46 = vpack.c.bf16 %v7423_v21, %v7423_v21  ;;  %v7443_v29 = vadd.f32 %v7442_v38, %v7124_v19  ;;  %v6867_v13 = vpop.f32.mrb[116].mxu1 }
 0x5cb   : > { %v8309_v20 = vunpack.c.l.b16 %v8014_v9  ;;  %v7432_v45 = vrot.slane %v7431_v0, 2  ;;  %v7438_v35 = vrot.slane %v7437_v4, 2  ;;  %v7449_v54 = vadd.f32 %v7448_v14, %v7125_v26  ;;  %v6869_v15 = vpop.f32.mrb[117].mxu1 }
 0x5cc   : > { %v8310_v27 = vunpack.c.l.b16 %v8015_v53  ;;  %v8017_v12 = vpack.c.bf16 %v7429_v18, %v7429_v18  ;;  %v8311_v37 = vunpack.c.l.b16 %v8016_v46  ;;  %v7444_v25 = vrot.slane %v7443_v29, 2  ;;  %v6871_v16 = vpop.f32.mrb[118].mxu1 }
 0x5cd   : > { %v7433_v43 = vadd.f32 %v7432_v45, %v7431_v0  ;;  %v7126_v60 = vmul.f32 %v6867_v13, %v14546_v57  ;;  %v7439_v5 = vadd.f32 %v7438_v35, %v7437_v4  ;;  %v7450_v32 = vrot.slane %v7449_v54, 2  ;;  %v6873_v62 = vpop.f32.mrb[119].mxu1 }
 0x5ce   : > { %v8312_v6 = vunpack.c.l.b16 %v8017_v12  ;;  %v7127_v55 = vmul.f32 %v6869_v15, %v14550_v40  ;;  %v8433_v21 = vsel %vm1639_vm1, %v8311_v37, %v8309_v20  ;;  %v7445_v53 = vadd.f32 %v7444_v25, %v7443_v29 }
 0x5cf   : > { %v7434_v7 = vrot.slane %v7433_v43, 1  ;;  %v7454_v19 = vrot.slane %v7126_v60, 4  ;;  %v7440_v36 = vrot.slane %v7439_v5, 1  ;;  %v7451_v26 = vadd.f32 %v7450_v32, %v7449_v54 }
 0x5d0   : > { %v8440_v39 = vsel %vm1639_vm1, %v8312_v6, %v8310_v27  ;;  %v7460_v9 = vrot.slane %v7127_v55, 4  ;;  %v7446_v57 = vrot.slane %v7445_v53, 1  ;;  %v7128_v18 = vmul.f32 %v6871_v16, %v14554_v1 }
 0x5d1   : > { %v7435_v0 = vadd.f32 %v7434_v7, %v7433_v43  ;;  %v7455_v38 = vadd.f32 %v7454_v19, %v7126_v60  ;;  %v7441_v4 = vadd.f32 %v7440_v36, %v7439_v5  ;;  %v7452_v14 = vrot.slane %v7451_v26, 1 }
 0x5d2   : > { %v7461_v40 = vadd.f32 %v7460_v9, %v7127_v55  ;;  %v7129_v46 = vmul.f32 %v6873_v62, %v14558_v61  ;;  %v7447_v20 = vadd.f32 %v7446_v57, %v7445_v53  ;;  %v7466_v45 = vrot.slane %v7128_v18, 4  ;;  %v6877_v54 = vpop.f32.mrb[120].mxu1 }
 0x5d3   : > { %v8018_v37 = vpack.c.bf16 %v7435_v0, %v7435_v0  ;;  %v7456_v29 = vrot.slane %v7455_v38, 2  ;;  %v8019_v12 = vpack.c.bf16 %v7441_v4, %v7441_v4  ;;  %v7453_v35 = vadd.f32 %v7452_v14, %v7451_v26  ;;  %v6879_v6 = vpop.f32.mrb[121].mxu1 }
 0x5d4   : > { %v7462_v27 = vrot.slane %v7461_v40, 2  ;;  %v7472_v13 = vrot.slane %v7129_v46, 4  ;;  %v8020_v43 = vpack.c.bf16 %v7447_v20, %v7447_v20  ;;  %v7467_v60 = vadd.f32 %v7466_v45, %v7128_v18  ;;  %v6881_v16 = vpop.f32.mrb[122].mxu1 }
 0x5d5   : > { %v8313_v25 = vunpack.c.l.b16 %v8018_v37  ;;  %v7457_v15 = vadd.f32 %v7456_v29, %v7455_v38  ;;  %v8314_v1 = vunpack.c.l.b16 %v8019_v12  ;;  %v8021_v5 = vpack.c.bf16 %v7453_v35, %v7453_v35  ;;  %v6883_v62 = vpop.f32.mrb[123].mxu1 }
 0x5d6   : > { %v7463_v32 = vadd.f32 %v7462_v27, %v7461_v40  ;;  %v7473_v55 = vadd.f32 %v7472_v13, %v7129_v46  ;;  %v8315_v7 = vunpack.c.l.b16 %v8020_v43  ;;  %v7468_v19 = vrot.slane %v7467_v60, 2 }
 0x5d7   : > { %v8434_v61 = vsel %vm1641_vm2, %v8313_v25, %v8433_v21  ;;  %v7458_v53 = vrot.slane %v7457_v15, 1  ;;  %v8441_v36 = vsel %vm1641_vm2, %v8314_v1, %v8440_v39  ;;  %v8316_v26 = vunpack.c.l.b16 %v8021_v5 }
 0x5d8   : > { %v7464_v9 = vrot.slane %v7463_v32, 1  ;;  %v7474_v0 = vrot.slane %v7473_v55, 2  ;;  %v14945_v57 = vsel %vm1643_vm3, %v8315_v7, %v8434_v61  ;;  %v7469_v18 = vadd.f32 %v7468_v19, %v7467_v60 }
 0x5d9   : > { %v7459_v38 = vadd.f32 %v7458_v53, %v7457_v15  ;;  %v7130_v4 = vmul.f32 %v6877_v54, %v14562_v47  ;;  %v14949_v14 = vsel %vm1643_vm3, %v8316_v26, %v8441_v36  ;;  %v7131_v46 = vmul.f32 %v6879_v6, %v14566_v23 }
 0x5da   : > { %v7465_v21 = vadd.f32 %v7464_v9, %v7463_v32  ;;  %v7475_v40 = vadd.f32 %v7474_v0, %v7473_v55  ;;  %v7470_v20 = vrot.slane %v7469_v18, 1  ;;  %v7132_v29 = vmul.f32 %v6881_v16, %v14570_v50  ;;  %v6887_v13 = vpop.f32.mrb[124].mxu1 }
 0x5db   : > { %v8022_v37 = vpack.c.bf16 %v7459_v38, %v7459_v38  ;;  %v7478_v39 = vrot.slane %v7130_v4, 4  ;;  %v7484_v35 = vrot.slane %v7131_v46, 4  ;;  %v7133_v27 = vmul.f32 %v6883_v62, %v14574_v44  ;;  %v6889_v15 = vpop.f32.mrb[125].mxu1 }
 0x5dc   : > { %v8023_v45 = vpack.c.bf16 %v7465_v21, %v7465_v21  ;;  %v7476_v12 = vrot.slane %v7475_v40, 1  ;;  %v7471_v47 = vadd.f32 %v7470_v20, %v7469_v18  ;;  %v7490_v43 = vrot.slane %v7132_v29, 4  ;;  %v6891_v5 = vpop.f32.mrb[126].mxu1 }
 0x5dd   : > { %v14954_v25 = vunpack.c.l.b16 %v8022_v37  ;;  %v7479_v54 = vadd.f32 %v7478_v39, %v7130_v4  ;;  %v7485_v6 = vadd.f32 %v7484_v35, %v7131_v46  ;;  %v7496_v1 = vrot.slane %v7133_v27, 4  ;;  %v6893_v61 = vpop.f32.mrb[127].mxu1 }
 0x5de   : > { %v14956_v60 = vunpack.c.l.b16 %v8023_v45  ;;  %v7477_v23 = vadd.f32 %v7476_v12, %v7475_v40  ;;  %v8024_v32 = vpack.c.bf16 %v7471_v47, %v7471_v47  ;;  %v7491_v55 = vadd.f32 %v7490_v43, %v7132_v29 }
 0x5df   : > { %v7480_v50 = vrot.slane %v7479_v54, 2  ;;  %v7134_v16 = vmul.f32 %v6887_v13, %v14578_v22  ;;  %v7486_v7 = vrot.slane %v7485_v6, 2  ;;  %v7497_v53 = vadd.f32 %v7496_v1, %v7133_v27 }
 0x5e0   : > { %v8025_v44 = vpack.c.bf16 %v7477_v23, %v7477_v23  ;;  %v7135_v19 = vmul.f32 %v6889_v15, %v14582_v24  ;;  %v14960_v62 = vunpack.c.l.b16 %v8024_v32  ;;  %v7492_v26 = vrot.slane %v7491_v55, 2 }
 0x5e1   : > { %v7481_v36 = vadd.f32 %v7480_v50, %v7479_v54  ;;  %v7502_v9 = vrot.slane %v7134_v16, 4  ;;  %v7487_v38 = vadd.f32 %v7486_v7, %v7485_v6  ;;  %v7498_v18 = vrot.slane %v7497_v53, 2 }
 0x5e2   : > { %v14962_v0 = vunpack.c.l.b16 %v8025_v44  ;;  %v7508_v4 = vrot.slane %v7135_v19, 4  ;;  %v7493_v40 = vadd.f32 %v7492_v26, %v7491_v55  ;;  %v7136_v22 = vmul.f32 %v6891_v5, %v14586_v59  ;;  %v6897_v29 = vpop.f32.mrb[128].mxu1 }
 0x5e3   : > { %v7482_v21 = vrot.slane %v7481_v36, 1  ;;  %v7503_v46 = vadd.f32 %v7502_v9, %v7134_v16  ;;  %v7488_v37 = vrot.slane %v7487_v38, 1  ;;  %v7499_v20 = vadd.f32 %v7498_v18, %v7497_v53  ;;  %v6899_v13 = vpop.f32.mrb[129].mxu1 }
 0x5e4   : > { %v7509_v39 = vadd.f32 %v7508_v4, %v7135_v19  ;;  %v7137_v24 = vmul.f32 %v6893_v61, %v14590_v34  ;;  %v7494_v12 = vrot.slane %v7493_v40, 1  ;;  %v7514_v27 = vrot.slane %v7136_v22, 4  ;;  %v6901_v23 = vpop.f32.mrb[130].mxu1 }
 0x5e5   : > { %v7483_v45 = vadd.f32 %v7482_v21, %v7481_v36  ;;  %v7504_v35 = vrot.slane %v7503_v46, 2  ;;  %v7489_v47 = vadd.f32 %v7488_v37, %v7487_v38  ;;  %v7500_v54 = vrot.slane %v7499_v20, 1  ;;  %v6903_v5 = vpop.f32.mrb[131].mxu1 }
 0x5e6   : > { %v7510_v43 = vrot.slane %v7509_v39, 2  ;;  %v7520_v15 = vrot.slane %v7137_v24, 4  ;;  %v7495_v1 = vadd.f32 %v7494_v12, %v7493_v40  ;;  %v7515_v59 = vadd.f32 %v7514_v27, %v7136_v22 }
 0x5e7   : > { %v8026_v6 = vpack.c.bf16 %v7483_v45, %v7483_v45  ;;  %v7505_v32 = vadd.f32 %v7504_v35, %v7503_v46  ;;  %v8027_v50 = vpack.c.bf16 %v7489_v47, %v7489_v47  ;;  %v7501_v55 = vadd.f32 %v7500_v54, %v7499_v20 }
 0x5e8   : > { %v7511_v16 = vadd.f32 %v7510_v43, %v7509_v39  ;;  %v7521_v34 = vadd.f32 %v7520_v15, %v7137_v24  ;;  %v8028_v44 = vpack.c.bf16 %v7495_v1, %v7495_v1  ;;  %v7516_v53 = vrot.slane %v7515_v59, 2 }
 0x5e9   : > { %v14966_v61 = vunpack.c.l.b16 %v8026_v6  ;;  %v7506_v7 = vrot.slane %v7505_v32, 1  ;;  %v14968_v19 = vunpack.c.l.b16 %v8027_v50  ;;  %v8029_v36 = vpack.c.bf16 %v7501_v55, %v7501_v55 }
 0x5ea   : > { %v7512_v26 = vrot.slane %v7511_v16, 1  ;;  %v7522_v9 = vrot.slane %v7521_v34, 2  ;;  %v14970_v38 = vunpack.c.l.b16 %v8028_v44  ;;  %v7517_v4 = vadd.f32 %v7516_v53, %v7515_v59  ;;  %v6907_v20 = vpop.f32.mrb[132].mxu1 }
 0x5eb   : > { %v7507_v18 = vadd.f32 %v7506_v7, %v7505_v32  ;;  %v7138_v21 = vmul.f32 %v6897_v29, %v14598_v52  ;;  %v14973_v40 = vunpack.c.l.b16 %v8029_v36  ;;  %v7139_v37 = vmul.f32 %v6899_v13, %v14602_v30  ;;  %v6909_v35 = vpop.f32.mrb[133].mxu1 }
 0x5ec   : > { %v7513_v46 = vadd.f32 %v7512_v26, %v7511_v16  ;;  %v7523_v22 = vadd.f32 %v7522_v9, %v7521_v34  ;;  %v7518_v24 = vrot.slane %v7517_v4, 1  ;;  %v7140_v12 = vmul.f32 %v6901_v23, %v14608_v49  ;;  %v6911_v15 = vpop.f32.mrb[134].mxu1 }
 0x5ed   : > { %v8030_v39 = vpack.c.bf16 %v7507_v18, %v7507_v18  ;;  %v7526_v45 = vrot.slane %v7138_v21, 4  ;;  %v7532_v54 = vrot.slane %v7139_v37, 4  ;;  %v7141_v43 = vmul.f32 %v6903_v5, %v14612_v8  ;;  %v6913_v32 = vpop.f32.mrb[135].mxu1 }
 0x5ee   : > { %v8031_v27 = vpack.c.bf16 %v7513_v46, %v7513_v46  ;;  %v7524_v47 = vrot.slane %v7523_v22, 1  ;;  %v7519_v29 = vadd.f32 %v7518_v24, %v7517_v4  ;;  %v7538_v1 = vrot.slane %v7140_v12, 4 }
 0x5ef   : > { %v8325_v52 = vunpack.c.l.b16 %v8030_v39  ;;  %v7527_v6 = vadd.f32 %v7526_v45, %v7138_v21  ;;  %v7533_v13 = vadd.f32 %v7532_v54, %v7139_v37  ;;  %v7544_v50 = vrot.slane %v7141_v43, 4 }
 0x5f0   : > { %v8326_v59 = vunpack.c.l.b16 %v8031_v27  ;;  %v7525_v30 = vadd.f32 %v7524_v47, %v7523_v22  ;;  %v8032_v55 = vpack.c.bf16 %v7519_v29, %v7519_v29  ;;  %v7539_v34 = vadd.f32 %v7538_v1, %v7140_v12 }
 0x5f1   : > { %v7528_v16 = vrot.slane %v7527_v6, 2  ;;  %v7142_v49 = vmul.f32 %v6907_v20, %v14618_v10  ;;  %v7534_v44 = vrot.slane %v7533_v13, 2  ;;  %v7545_v7 = vadd.f32 %v7544_v50, %v7141_v43 }
 0x5f2   : > { %v8033_v23 = vpack.c.bf16 %v7525_v30, %v7525_v30  ;;  %v7143_v8 = vmul.f32 %v6909_v35, %v14622_v48  ;;  %v8327_v5 = vunpack.c.l.b16 %v8032_v55  ;;  %v7540_v36 = vrot.slane %v7539_v34, 2  ;;  %v6917_v46 = vpop.f32.mrb[136].mxu1 }
 0x5f3   : > { %v7529_v53 = vadd.f32 %v7528_v16, %v7527_v6  ;;  %v7550_v26 = vrot.slane %v7142_v49, 4  ;;  %v7535_v18 = vadd.f32 %v7534_v44, %v7533_v13  ;;  %v7546_v4 = vrot.slane %v7545_v7, 2  ;;  %v6919_v10 = vpop.f32.mrb[137].mxu1 }
 0x5f4   : > { %v8328_v9 = vunpack.c.l.b16 %v8033_v23  ;;  %v7556_v21 = vrot.slane %v7143_v8, 4  ;;  %v8447_v22 = vsel %vm1639_vm1, %v8327_v5, %v8325_v52  ;;  %v7541_v39 = vadd.f32 %v7540_v36, %v7539_v34  ;;  %v6921_v35 = vpop.f32.mrb[138].mxu1 }
 0x5f5   : > { %v7530_v37 = vrot.slane %v7529_v53, 1  ;;  %v7551_v24 = vadd.f32 %v7550_v26, %v7142_v49  ;;  %v7536_v45 = vrot.slane %v7535_v18, 1  ;;  %v7547_v12 = vadd.f32 %v7546_v4, %v7545_v7  ;;  %v6923_v29 = vpop.f32.mrb[139].mxu1 }
 0x5f6   : > { %v8454_v20 = vsel %vm1639_vm1, %v8328_v9, %v8326_v59  ;;  %v7557_v48 = vadd.f32 %v7556_v21, %v7143_v8  ;;  %v7542_v47 = vrot.slane %v7541_v39, 1  ;;  %v7144_v43 = vmul.f32 %v6911_v15, %v14626_v42 }
 0x5f7   : > { %v7531_v27 = vadd.f32 %v7530_v37, %v7529_v53  ;;  %v7552_v54 = vrot.slane %v7551_v24, 2  ;;  %v7537_v6 = vadd.f32 %v7536_v45, %v7535_v18  ;;  %v7548_v1 = vrot.slane %v7547_v12, 1 }
 0x5f8   : > { %v7558_v30 = vrot.slane %v7557_v48, 2  ;;  %v7145_v52 = vmul.f32 %v6913_v32, %v14633_v31  ;;  %v7543_v50 = vadd.f32 %v7542_v47, %v7541_v39  ;;  %v7562_v16 = vrot.slane %v7144_v43, 4 }
 0x5f9   : > { %v8034_v13 = vpack.c.bf16 %v7531_v27, %v7531_v27  ;;  %v7553_v55 = vadd.f32 %v7552_v54, %v7551_v24  ;;  %v8035_v59 = vpack.c.bf16 %v7537_v6, %v7537_v6  ;;  %v7549_v34 = vadd.f32 %v7548_v1, %v7547_v12 }
 0x5fa   : > { %v7559_v49 = vadd.f32 %v7558_v30, %v7557_v48  ;;  %v7568_v23 = vrot.slane %v7145_v52, 4  ;;  %v8036_v7 = vpack.c.bf16 %v7543_v50, %v7543_v50  ;;  %v7563_v5 = vadd.f32 %v7562_v16, %v7144_v43  ;;  %v6927_v26 = vpop.f32.mrb[140].mxu1 }
 0x5fb   : > { %v8329_v44 = vunpack.c.l.b16 %v8034_v13  ;;  %v7554_v8 = vrot.slane %v7553_v55, 1  ;;  %v8330_v53 = vunpack.c.l.b16 %v8035_v59  ;;  %v8037_v42 = vpack.c.bf16 %v7549_v34, %v7549_v34  ;;  %v6929_v4 = vpop.f32.mrb[141].mxu1 }
 0x5fc   : > { %v7560_v15 = vrot.slane %v7559_v49, 1  ;;  %v7569_v36 = vadd.f32 %v7568_v23, %v7145_v52  ;;  %v8331_v31 = vunpack.c.l.b16 %v8036_v7  ;;  %v7564_v18 = vrot.slane %v7563_v5, 2  ;;  %v6931_v45 = vpop.f32.mrb[142].mxu1 }
 0x5fd   : > { %v8448_v9 = vsel %vm1641_vm2, %v8329_v44, %v8447_v22  ;;  %v7555_v32 = vadd.f32 %v7554_v8, %v7553_v55  ;;  %v8455_v21 = vsel %vm1641_vm2, %v8330_v53, %v8454_v20  ;;  %v8332_v37 = vunpack.c.l.b16 %v8037_v42  ;;  %v6933_v54 = vpop.f32.mrb[143].mxu1 }
 0x5fe   : > { %v7561_v39 = vadd.f32 %v7560_v15, %v7559_v49  ;;  %v7570_v24 = vrot.slane %v7569_v36, 2  ;;  %v14987_v12 = vsel %vm1643_vm3, %v8331_v31, %v8448_v9  ;;  %v7565_v27 = vadd.f32 %v7564_v18, %v7563_v5 }
 0x5ff   : > { %v8038_v48 = vpack.c.bf16 %v7555_v32, %v7555_v32  ;;  %v7146_v47 = vmul.f32 %v6917_v46, %v14637_v33  ;;  %v14991_v22 = vsel %vm1643_vm3, %v8332_v37, %v8455_v21  ;;  %v7147_v1 = vmul.f32 %v6919_v10, %v14641_v41 }
 0x600   : > { %v8039_v43 = vpack.c.bf16 %v7561_v39, %v7561_v39  ;;  %v7571_v6 = vadd.f32 %v7570_v24, %v7569_v36  ;;  %v7566_v30 = vrot.slane %v7565_v27, 1  ;;  %v7148_v13 = vmul.f32 %v6921_v35, %v14648_v51 }
 0x601   : > { %v14994_v20 = vunpack.c.l.b16 %v8038_v48  ;;  %v7574_v52 = vrot.slane %v7146_v47, 4  ;;  %v7580_v16 = vrot.slane %v7147_v1, 4  ;;  %v7149_v33 = vmul.f32 %v6923_v29, %v14652_v63 }
 0x602   : > { %v14997_v50 = vunpack.c.l.b16 %v8039_v43  ;;  %v7572_v55 = vrot.slane %v7571_v6, 1  ;;  %v7567_v46 = vadd.f32 %v7566_v30, %v7565_v27  ;;  %v7586_v34 = vrot.slane %v7148_v13, 4  ;;  %v6937_v7 = vpop.f32.mrb[144].mxu1 }
 0x603   : > { %v7575_v59 = vadd.f32 %v7574_v52, %v7146_v47  ;;  %v7150_v49 = vmul.f32 %v6927_v26, %v14656_v17  ;;  %v7581_v44 = vadd.f32 %v7580_v16, %v7147_v1  ;;  %v7592_v41 = vrot.slane %v7149_v33, 4  ;;  %v6939_v53 = vpop.f32.mrb[145].mxu1 }
 0x604   : > { %v7573_v23 = vadd.f32 %v7572_v55, %v7571_v6  ;;  %v7151_v10 = vmul.f32 %v6929_v4, %v14661_v2  ;;  %v8040_v8 = vpack.c.bf16 %v7567_v46, %v7567_v46  ;;  %v7587_v51 = vadd.f32 %v7586_v34, %v7148_v13  ;;  %v6941_v29 = vpop.f32.mrb[146].mxu1 }
 0x605   : > { %v7576_v5 = vrot.slane %v7575_v59, 2  ;;  %v7598_v35 = vrot.slane %v7150_v49, 4  ;;  %v7582_v15 = vrot.slane %v7581_v44, 2  ;;  %v7593_v36 = vadd.f32 %v7592_v41, %v7149_v33  ;;  %v6943_v32 = vpop.f32.mrb[147].mxu1 }
 0x606   : > { %v8041_v42 = vpack.c.bf16 %v7573_v23, %v7573_v23  ;;  %v7604_v63 = vrot.slane %v7151_v10, 4  ;;  %v15002_v9 = vunpack.c.l.b16 %v8040_v8  ;;  %v7588_v17 = vrot.slane %v7587_v51, 2 }
 0x607   : > { %v7577_v31 = vadd.f32 %v7576_v5, %v7575_v59  ;;  %v7599_v26 = vadd.f32 %v7598_v35, %v7150_v49  ;;  %v7583_v2 = vadd.f32 %v7582_v15, %v7581_v44  ;;  %v7594_v4 = vrot.slane %v7593_v36, 2 }
 0x608   : > { %v15004_v18 = vunpack.c.l.b16 %v8041_v42  ;;  %v7605_v21 = vadd.f32 %v7604_v63, %v7151_v10  ;;  %v7589_v39 = vadd.f32 %v7588_v17, %v7587_v51  ;;  %v7152_v48 = vmul.f32 %v6931_v45, %v14665_v11 }
 0x609   : > { %v7578_v37 = vrot.slane %v7577_v31, 1  ;;  %v7600_v24 = vrot.slane %v7599_v26, 2  ;;  %v7584_v27 = vrot.slane %v7583_v2, 1  ;;  %v7595_v47 = vadd.f32 %v7594_v4, %v7593_v36 }
 0x60a   : > { %v7606_v43 = vrot.slane %v7605_v21, 2  ;;  %v7153_v6 = vmul.f32 %v6933_v54, %v14669_v56  ;;  %v7590_v30 = vrot.slane %v7589_v39, 1  ;;  %v7610_v13 = vrot.slane %v7152_v48, 4  ;;  %v6947_v59 = vpop.f32.mrb[148].mxu1 }
 0x60b   : > { %v7579_v1 = vadd.f32 %v7578_v37, %v7577_v31  ;;  %v7601_v52 = vadd.f32 %v7600_v24, %v7599_v26  ;;  %v7585_v55 = vadd.f32 %v7584_v27, %v7583_v2  ;;  %v7596_v16 = vrot.slane %v7595_v47, 1  ;;  %v6949_v41 = vpop.f32.mrb[149].mxu1 }
 0x60c   : > { %v7607_v33 = vadd.f32 %v7606_v43, %v7605_v21  ;;  %v7616_v46 = vrot.slane %v7153_v6, 4  ;;  %v7591_v49 = vadd.f32 %v7590_v30, %v7589_v39  ;;  %v7611_v44 = vadd.f32 %v7610_v13, %v7152_v48  ;;  %v15008_v5 = vpop.f32.mrb[150].mxu1 }
 0x60d   : > { %v8042_v34 = vpack.c.bf16 %v7579_v1, %v7579_v1  ;;  %v7602_v23 = vrot.slane %v7601_v52, 1  ;;  %v8043_v11 = vpack.c.bf16 %v7585_v55, %v7585_v55  ;;  %v7597_v45 = vadd.f32 %v7596_v16, %v7595_v47  ;;  %v15012_v42 = vpop.f32.mrb[151].mxu1 }
 0x60e   : > { %v7608_v10 = vrot.slane %v7607_v33, 1  ;;  %v7617_v8 = vadd.f32 %v7616_v46, %v7153_v6  ;;  %v8044_v54 = vpack.c.bf16 %v7591_v49, %v7591_v49  ;;  %v7612_v35 = vrot.slane %v7611_v44, 2 }
 0x60f   : > { %v15010_v56 = vunpack.c.l.b16 %v8042_v34  ;;  %v7603_v51 = vadd.f32 %v7602_v23, %v7601_v52  ;;  %v15014_v15 = vunpack.c.l.b16 %v8043_v11  ;;  %v8045_v36 = vpack.c.bf16 %v7597_v45, %v7597_v45  ;;  %v16592_v52 = vld [vmem:[#allocation109_spill] sm:$0xff]  ;;  %v16594_v23 = vld [vmem:[#allocation66_spill] sm:$0xff] }
 0x610   : > { %v7609_v63 = vadd.f32 %v7608_v10, %v7607_v33  ;;  %v7618_v31 = vrot.slane %v7617_v8, 2  ;;  %v15016_v17 = vunpack.c.l.b16 %v8044_v54  ;;  %v7613_v2 = vadd.f32 %v7612_v35, %v7611_v44  ;;  %v16593_v33 = vld [vmem:[#allocation90_spill] sm:$0xff] }
 0x611   : > { %v8046_v26 = vpack.c.bf16 %v7603_v51, %v7603_v51  ;;  %v7154_v4 = vmul.f32 %v6937_v7, %v14674_v3  ;;  %v15019_v21 = vunpack.c.l.b16 %v8045_v36  ;;  %v7155_v24 = vmul.f32 %v6939_v53, %v14678_v28 }
 0x612   : > { %v8047_v37 = vpack.c.bf16 %v7609_v63, %v7609_v63  ;;  %v7619_v39 = vadd.f32 %v7618_v31, %v7617_v8  ;;  %v7614_v27 = vrot.slane %v7613_v2, 1  ;;  %v7156_v43 = vmul.f32 %v6941_v29, %v14683_v58  ;;  %v15024_v55 = vpop.f32.mrb[152].mxu1 }
 0x613   : > { %v8341_v48 = vunpack.c.l.b16 %v8046_v26  ;;  %v7622_v47 = vrot.slane %v7154_v4, 4  ;;  %v7628_v30 = vrot.slane %v7155_v24, 4  ;;  %v7157_v13 = vmul.f32 %v6943_v32, %v16592_v52  ;;  %v15027_v34 = vpop.f32.mrb[153].mxu1 }
 0x614   : > { %v8342_v6 = vunpack.c.l.b16 %v8047_v37  ;;  %v7620_v1 = vrot.slane %v7619_v39, 1  ;;  %v7615_v16 = vadd.f32 %v7614_v27, %v7613_v2  ;;  %v7634_v7 = vrot.slane %v7156_v43, 4  ;;  %v15030_v58 = vpop.f32.mrb[154].mxu1 }
 0x615   : > { %v7623_v3 = vadd.f32 %v7622_v47, %v7154_v4  ;;  %v7158_v46 = vmul.f32 %v6947_v59, %v16593_v33  ;;  %v7629_v53 = vadd.f32 %v7628_v30, %v7155_v24  ;;  %v7640_v49 = vrot.slane %v7157_v13, 4  ;;  %v15032_v10 = vpop.f32.mrb[155].mxu1 }
 0x616   : > { %v7621_v28 = vadd.f32 %v7620_v1, %v7619_v39  ;;  %v7159_v44 = vmul.f32 %v6949_v41, %v16594_v23  ;;  %v8048_v29 = vpack.c.bf16 %v7615_v16, %v7615_v16  ;;  %v7635_v45 = vadd.f32 %v7634_v7, %v7156_v43 }
 0x617   : > { %v7624_v11 = vrot.slane %v7623_v3, 2  ;;  %v7646_v32 = vrot.slane %v7158_v46, 4  ;;  %v7630_v54 = vrot.slane %v7629_v53, 2  ;;  %v7641_v51 = vadd.f32 %v7640_v49, %v7157_v13 }
 0x618   : > { %v8049_v8 = vpack.c.bf16 %v7621_v28, %v7621_v28  ;;  %v7652_v35 = vrot.slane %v7159_v44, 4  ;;  %v8343_v59 = vunpack.c.l.b16 %v8048_v29  ;;  %v7636_v63 = vrot.slane %v7635_v45, 2 }
 0x619   : > { %v7625_v36 = vadd.f32 %v7624_v11, %v7623_v3  ;;  %v7647_v31 = vadd.f32 %v7646_v32, %v7158_v46  ;;  %v7631_v2 = vadd.f32 %v7630_v54, %v7629_v53  ;;  %v7642_v4 = vrot.slane %v7641_v51, 2 }
 0x61a   : > { %v8344_v26 = vunpack.c.l.b16 %v8049_v8  ;;  %v7653_v41 = vadd.f32 %v7652_v35, %v7159_v44  ;;  %v8461_v37 = vsel %vm1639_vm1, %v8343_v59, %v8341_v48  ;;  %v7637_v24 = vadd.f32 %v7636_v63, %v7635_v45  ;;  %v15036_v52 = vpop.f32.mrb[156].mxu1 }
 0x61b   : > { %v7626_v39 = vrot.slane %v7625_v36, 1  ;;  %v7648_v27 = vrot.slane %v7647_v31, 2  ;;  %v7632_v43 = vrot.slane %v7631_v2, 1  ;;  %v7643_v1 = vadd.f32 %v7642_v4, %v7641_v51  ;;  %v15041_v33 = vpop.f32.mrb[157].mxu1 }
 0x61c   : > { %v8468_v47 = vsel %vm1639_vm1, %v8344_v26, %v8342_v6  ;;  %v7654_v30 = vrot.slane %v7653_v41, 2  ;;  %v7638_v16 = vrot.slane %v7637_v24, 1  ;;  %v8443_v7 = vsel %vm1645_vm4, %v14956_v60, %v14949_v14  ;;  %v15045_v53 = vpop.f32.mrb[158].mxu1 }
 0x61d   : > { %v7627_v13 = vadd.f32 %v7626_v39, %v7625_v36  ;;  %v7649_v3 = vadd.f32 %v7648_v27, %v7647_v31  ;;  %v7633_v48 = vadd.f32 %v7632_v43, %v7631_v2  ;;  %v7644_v46 = vrot.slane %v7643_v1, 1  ;;  %v15049_v11 = vpop.f32.mrb[159].mxu1 }
 0x61e   : > { %v7655_v28 = vadd.f32 %v7654_v30, %v7653_v41  ;;  %v8444_v6 = vsel %vm1647_vm5, %v14962_v0, %v8443_v7  ;;  %v7639_v23 = vadd.f32 %v7638_v16, %v7637_v24  ;;  %v8457_v0 = vsel %vm1645_vm4, %v14997_v50, %v14991_v22  ;;  %v16595_v24 = vld [vmem:[#allocation85_spill] sm:$0xff] }
 0x61f   : > { %v8050_v49 = vpack.c.bf16 %v7627_v13, %v7627_v13  ;;  %v7650_v44 = vrot.slane %v7649_v3, 1  ;;  %v8445_v29 = vsel %vm1649_vm6, %v14968_v19, %v8444_v6  ;;  %v8051_v45 = vpack.c.bf16 %v7633_v48, %v7633_v48 }
 0x620   : > { %v7645_v14 = vadd.f32 %v7644_v46, %v7643_v1  ;;  %v7656_v60 = vrot.slane %v7655_v28, 1  ;;  %v8446_v32 = vsel %vm1651_vm7, %v14973_v40, %v8445_v29  ;;  %v8052_v54 = vpack.c.bf16 %v7639_v23, %v7639_v23  ;;  %v16598_v46 = vld [vmem:[#allocation13_spill] sm:$0xff] }
 0x621   : > { %v8345_v8 = vunpack.c.l.b16 %v8050_v49  ;;  %v7651_v51 = vadd.f32 %v7650_v44, %v7649_v3  ;;  %v8346_v35 = vunpack.c.l.b16 %v8051_v45  ;;  %v8458_v19 = vsel %vm1647_vm5, %v15004_v18, %v8457_v0  ;;  %v16596_v3 = vld [vmem:[#allocation107_spill] sm:$0xff]  ;;  %v16599_v44 = vld [vmem:[#allocation97_spill] sm:$0xff] }
 0x622   : > { %v8053_v59 = vpack.c.bf16 %v7645_v14, %v7645_v14  ;;  %v7657_v36 = vadd.f32 %v7656_v60, %v7655_v28  ;;  %v8347_v31 = vunpack.c.l.b16 %v8052_v54  ;;  %v8459_v40 = vsel %vm1649_vm6, %v15014_v15, %v8458_v19  ;;  %v15064_v50 = vpop.f32.mrb[160].mxu1 }
 0x623   : > { %v8462_v63 = vsel %vm1641_vm2, %v8345_v8, %v8461_v37  ;;  %v8054_v26 = vpack.c.bf16 %v7651_v51, %v7651_v51  ;;  %v8469_v2 = vsel %vm1641_vm2, %v8346_v35, %v8468_v47  ;;  %v8460_v22 = vsel %vm1651_vm7, %v15019_v21, %v8459_v40  ;;  %v15073_v43 = vpop.f32.mrb[161].mxu1 }
 0x624   : > { %v8348_v4 = vunpack.c.l.b16 %v8053_v59  ;;  %v8055_v41 = vpack.c.bf16 %v7657_v36, %v7657_v36  ;;  %v15067_v39 = vsel %vm1643_vm3, %v8347_v31, %v8462_v63  ;;  %v8520_v37 = vpack.c.b16 %v8460_v22, %v8446_v32  ;;  %v15086_v30 = vpop.f32.mrb[162].mxu1 }
 0x625   : > { %v15069_v18 = vunpack.c.l.b16 %v8054_v26  ;;  %v7160_v27 = vmul.f32 %v15008_v5, %v16595_v24  ;;  %v8436_v21 = vsel %vm1645_vm4, %v14954_v25, %v14945_v57  ;;  %v8450_v1 = vsel %vm1645_vm4, %v14994_v20, %v14987_v12  ;;  %v15094_v48 = vpop.f32.mrb[163].mxu1  ;;  %v16597_v12 = vld [vmem:[#allocation89_spill] sm:$0xff] }
 0x626   : > { %v15076_v15 = vsel %vm1643_vm3, %v8348_v4, %v8469_v2  ;;  %v15078_v47 = vunpack.c.l.b16 %v8055_v41  ;;  %8669 = vmatprep.mubr.bf16.mxu0 %v8520_v37  ;;  %v8437_v5 = vsel %vm1647_vm5, %v14960_v62, %v8436_v21  ;;  %v8451_v16 = vsel %vm1647_vm5, %v15002_v9, %v8450_v1 }
 0x627   : > { %v7658_v13 = vrot.slane %v7160_v27, 4  ;;  %v7161_v7 = vmul.f32 %v15012_v42, %v16596_v3  ;;  %v8438_v57 = vsel %vm1649_vm6, %v14966_v61, %v8437_v5  ;;  %v8452_v25 = vsel %vm1649_vm6, %v15010_v56, %v8451_v16 }
 0x628   : > { %v7162_v20 = vmul.f32 %v15024_v55, %v16597_v12  ;;  %v7163_v62 = vmul.f32 %v15027_v34, %v16598_v46  ;;  %v8439_v9 = vsel %vm1651_vm7, %v14970_v38, %v8438_v57  ;;  %v8453_v42 = vsel %vm1651_vm7, %v15016_v17, %v8452_v25  ;;  %v16600_v55 = vld [vmem:[#allocation115_spill] sm:$0xff]  ;;  %v16602_v17 = vld [vmem:[#allocation94_spill] sm:$0xff] }
 0x629   : > { %v7659_v28 = vadd.f32 %v7658_v13, %v7160_v27  ;;  %v7664_v6 = vrot.slane %v7161_v7, 4  ;;  %v8519_v49 = vpack.c.b16 %v8453_v42, %v8439_v9  ;;  %v7164_v56 = vmul.f32 %v15030_v58, %v16599_v44  ;;  %v16601_v34 = vld [vmem:[#allocation99_spill] sm:$0xff] }
 0x62a   : > { %v7670_v23 = vrot.slane %v7162_v20, 4  ;;  %v7676_v61 = vrot.slane %v7163_v62, 4  ;;  %v7165_v14 = vmul.f32 %v15032_v10, %v16600_v55  ;;  %v7166_v60 = vmul.f32 %v15036_v52, %v16601_v34  ;;  %v15116_v51 = vpop.f32.mrb[164].mxu1 }
 0x62b   : > { %v7660_v29 = vrot.slane %v7659_v28, 2  ;;  %v7665_v45 = vadd.f32 %v7664_v6, %v7161_v7  ;;  %8670 = vmatmul.mubr.bf16.gmra.mrb[152].mxu0 %v8519_v49  ;;  %v7682_v8 = vrot.slane %v7164_v56, 4  ;;  %v7167_v54 = vmul.f32 %v15041_v33, %v16602_v17  ;;  %v15118_v36 = vpop.f32.mrb[165].mxu1 }
 0x62c   : > { %v7671_v38 = vadd.f32 %v7670_v23, %v7162_v20  ;;  %v7677_v32 = vadd.f32 %v7676_v61, %v7163_v62  ;;  %v7688_v58 = vrot.slane %v7165_v14, 4  ;;  %v7694_v59 = vrot.slane %v7166_v60, 4  ;;  %v15120_v52 = vpop.f32.mrb[166].mxu1 }
 0x62d   : > { %v7661_v0 = vadd.f32 %v7660_v29, %v7659_v28  ;;  %v7666_v35 = vrot.slane %v7665_v45, 2  ;;  %v7683_v63 = vadd.f32 %v7682_v8, %v7164_v56  ;;  %v7700_v31 = vrot.slane %v7167_v54, 4  ;;  %v15122_v41 = vpop.f32.mrb[167].mxu1 }
 0x62e   : > { %v7672_v19 = vrot.slane %v7671_v38, 2  ;;  %v7678_v10 = vrot.slane %v7677_v32, 2  ;;  %v7689_v2 = vadd.f32 %v7688_v58, %v7165_v14  ;;  %v7695_v4 = vadd.f32 %v7694_v59, %v7166_v60 }
 0x62f   : > { %v7662_v26 = vrot.slane %v7661_v0, 1  ;;  %v7667_v40 = vadd.f32 %v7666_v35, %v7665_v45  ;;  %v7684_v37 = vrot.slane %v7683_v63, 2  ;;  %v7701_v24 = vadd.f32 %v7700_v31, %v7167_v54 }
 0x630   : > { %v7673_v33 = vadd.f32 %v7672_v19, %v7671_v38  ;;  %v7679_v22 = vadd.f32 %v7678_v10, %v7677_v32  ;;  %v7690_v1 = vrot.slane %v7689_v2, 2  ;;  %v7696_v13 = vrot.slane %v7695_v4, 2  ;;  %v16603_v32 = vld [vmem:[#allocation10_spill] sm:$0xff] }
 0x631   : > { %v7663_v27 = vadd.f32 %v7662_v26, %v7661_v0  ;;  %v7668_v21 = vrot.slane %v7667_v40, 1  ;;  %v7685_v3 = vadd.f32 %v7684_v37, %v7683_v63  ;;  %v7702_v7 = vrot.slane %v7701_v24, 2  ;;  %v16604_v63 = vld [vmem:[#allocation98_spill] sm:$0xff] }
 0x632   : > { %v7674_v5 = vrot.slane %v7673_v33, 1  ;;  %v7680_v16 = vrot.slane %v7679_v22, 1  ;;  %v7691_v12 = vadd.f32 %v7690_v1, %v7689_v2  ;;  %v7697_v20 = vadd.f32 %v7696_v13, %v7695_v4  ;;  %v15124_v42 = vpop.f32.mrb[168].mxu1  ;;  %v16605_v2 = vld [vmem:[#allocation43_spill] sm:$0xff] }
 0x633   : > { %v8056_v57 = vpack.c.bf16 %v7663_v27, %v7663_v27  ;;  %v7669_v25 = vadd.f32 %v7668_v21, %v7667_v40  ;;  %v7686_v28 = vrot.slane %v7685_v3, 1  ;;  %v7703_v9 = vadd.f32 %v7702_v7, %v7701_v24  ;;  %v15128_v44 = vpop.f32.mrb[169].mxu1  ;;  %v16606_v4 = vld [vmem:[#allocation15_spill] sm:$0xff]  ;;  %v16608_v7 = vld [vmem:[#allocation105_spill] sm:$0xff] }
 0x634   : > { %v7675_v46 = vadd.f32 %v7674_v5, %v7673_v33  ;;  %v7681_v62 = vadd.f32 %v7680_v16, %v7679_v22  ;;  %v7692_v23 = vrot.slane %v7691_v12, 1  ;;  %v7698_v61 = vrot.slane %v7697_v20, 1  ;;  %v15130_v14 = vpop.f32.mrb[170].mxu1 }
 0x635   : > { %v15126_v6 = vunpack.c.l.b16 %v8056_v57  ;;  %v8057_v49 = vpack.c.bf16 %v7669_v25, %v7669_v25  ;;  %v7687_v45 = vadd.f32 %v7686_v28, %v7685_v3  ;;  %v7704_v55 = vrot.slane %v7703_v9, 1  ;;  %v15136_v17 = vpop.f32.mrb[171].mxu1  ;;  %v16609_v57 = vld [vmem:[#allocation17_spill] sm:$0xff]  ;;  %v16610_v28 = vld [vmem:[#allocation110_spill] sm:$0xff] }
 0x636   : > { %v8058_v56 = vpack.c.bf16 %v7675_v46, %v7675_v46  ;;  %v8059_v29 = vpack.c.bf16 %v7681_v62, %v7681_v62  ;;  %v7693_v60 = vadd.f32 %v7692_v23, %v7691_v12  ;;  %v7699_v38 = vadd.f32 %v7698_v61, %v7697_v20 }
 0x637   : > { %v15132_v34 = vunpack.c.l.b16 %v8057_v49  ;;  %v7168_v8 = vmul.f32 %v15045_v53, %v16603_v32  ;;  %v8060_v35 = vpack.c.bf16 %v7687_v45, %v7687_v45  ;;  %v7705_v58 = vadd.f32 %v7704_v55, %v7703_v9 }
 0x638   : > { %v15138_v54 = vunpack.c.l.b16 %v8058_v56  ;;  %v15140_v0 = vunpack.c.l.b16 %v8059_v29  ;;  %v8061_v59 = vpack.c.bf16 %v7693_v60, %v7693_v60  ;;  %v8062_v19 = vpack.c.bf16 %v7699_v38, %v7699_v38 }
 0x639   : > { %v7706_v10 = vrot.slane %v7168_v8, 4  ;;  %v7169_v31 = vmul.f32 %v15049_v11, %v16604_v63  ;;  %v15144_v26 = vunpack.c.l.b16 %v8060_v35  ;;  %v8063_v40 = vpack.c.bf16 %v7705_v58, %v7705_v58  ;;  %v16607_v11 = vld [vmem:[#allocation22_spill] sm:$0xff] }
 0x63a   : > { %v7170_v53 = vmul.f32 %v15064_v50, %v16605_v2  ;;  %v7171_v33 = vmul.f32 %v15073_v43, %v16606_v4  ;;  %v15150_v22 = vunpack.c.l.b16 %v8061_v59  ;;  %v15152_v37 = vunpack.c.l.b16 %v8062_v19  ;;  %v15158_v16 = vpop.f32.mrb[172].mxu1 }
 0x63b   : > { %v7707_v24 = vadd.f32 %v7706_v10, %v7168_v8  ;;  %v7712_v27 = vrot.slane %v7169_v31, 4  ;;  %v15154_v21 = vunpack.c.l.b16 %v8063_v40  ;;  %v7172_v5 = vmul.f32 %v15086_v30, %v16607_v11  ;;  %v15164_v12 = vpop.f32.mrb[173].mxu1 }
 0x63c   : > { %v7718_v1 = vrot.slane %v7170_v53, 4  ;;  %v7724_v13 = vrot.slane %v7171_v33, 4  ;;  %v7173_v43 = vmul.f32 %v15094_v48, %v16608_v7  ;;  %v7174_v25 = vmul.f32 %v15116_v51, %v16609_v57  ;;  %v15168_v49 = vpop.f32.mrb[174].mxu1 }
 0x63d   : > { %v7708_v3 = vrot.slane %v7707_v24, 2  ;;  %v7713_v50 = vadd.f32 %v7712_v27, %v7169_v31  ;;  %v7730_v62 = vrot.slane %v7172_v5, 4  ;;  %v7175_v9 = vmul.f32 %v15118_v36, %v16610_v28  ;;  %v15170_v29 = vpop.f32.mrb[175].mxu1 }
 0x63e   : > { %v7719_v20 = vadd.f32 %v7718_v1, %v7170_v53  ;;  %v7725_v46 = vadd.f32 %v7724_v13, %v7171_v33  ;;  %v7736_v61 = vrot.slane %v7173_v43, 4  ;;  %v7742_v56 = vrot.slane %v7174_v25, 4 }
 0x63f   : > { %v7709_v30 = vadd.f32 %v7708_v3, %v7707_v24  ;;  %v7714_v23 = vrot.slane %v7713_v50, 2  ;;  %v7731_v55 = vadd.f32 %v7730_v62, %v7172_v5  ;;  %v7748_v51 = vrot.slane %v7175_v9, 4 }
 0x640   : > { %v7720_v48 = vrot.slane %v7719_v20, 2  ;;  %v7726_v45 = vrot.slane %v7725_v46, 2  ;;  %v7737_v32 = vadd.f32 %v7736_v61, %v7173_v43  ;;  %v7743_v8 = vadd.f32 %v7742_v56, %v7174_v25 }
 0x641   : > { %v7710_v60 = vrot.slane %v7709_v30, 1  ;;  %v7715_v38 = vadd.f32 %v7714_v23, %v7713_v50  ;;  %v7732_v59 = vrot.slane %v7731_v55, 2  ;;  %v7749_v36 = vadd.f32 %v7748_v51, %v7175_v9 }
 0x642   : > { %v7721_v35 = vadd.f32 %v7720_v48, %v7719_v20  ;;  %v7727_v58 = vadd.f32 %v7726_v45, %v7725_v46  ;;  %v7738_v63 = vrot.slane %v7737_v32, 2  ;;  %v7744_v31 = vrot.slane %v7743_v8, 2  ;;  %v15172_v33 = vpop.f32.mrb[176].mxu1 }
 0x643   : > { %v7711_v19 = vadd.f32 %v7710_v60, %v7709_v30  ;;  %v7716_v10 = vrot.slane %v7715_v38, 1  ;;  %v7733_v53 = vadd.f32 %v7732_v59, %v7731_v55  ;;  %v7750_v4 = vrot.slane %v7749_v36, 2  ;;  %v15174_v11 = vpop.f32.mrb[177].mxu1 }
 0x644   : > { %v7722_v40 = vrot.slane %v7721_v35, 1  ;;  %v7728_v2 = vrot.slane %v7727_v58, 1  ;;  %v7739_v1 = vadd.f32 %v7738_v63, %v7737_v32  ;;  %v7745_v13 = vadd.f32 %v7744_v31, %v7743_v8  ;;  %v15176_v43 = vpop.f32.mrb[178].mxu1 }
 0x645   : > { %v8064_v24 = vpack.c.bf16 %v7711_v19, %v7711_v19  ;;  %v7717_v27 = vadd.f32 %v7716_v10, %v7715_v38  ;;  %v7734_v50 = vrot.slane %v7733_v53, 1  ;;  %v7751_v7 = vadd.f32 %v7750_v4, %v7749_v36  ;;  %v15178_v62 = vpop.f32.mrb[179].mxu1 }
 0x646   : > { %v7723_v5 = vadd.f32 %v7722_v40, %v7721_v35  ;;  %v7729_v3 = vadd.f32 %v7728_v2, %v7727_v58  ;;  %v7740_v20 = vrot.slane %v7739_v1, 1  ;;  %v7746_v46 = vrot.slane %v7745_v13, 1  ;;  %v16611_v58 = vld [vmem:[#allocation112_spill] sm:$0xff] }
 0x647   : > { %v8359_v57 = vunpack.c.l.b16 %v8064_v24  ;;  %v8065_v25 = vpack.c.bf16 %v7717_v27, %v7717_v27  ;;  %v7735_v30 = vadd.f32 %v7734_v50, %v7733_v53  ;;  %v7752_v23 = vrot.slane %v7751_v7, 1  ;;  %v16612_v53 = vld [vmem:[#allocation40_spill] sm:$0xff] }
 0x648   : > { %v8066_v28 = vpack.c.bf16 %v7723_v5, %v7723_v5  ;;  %v8067_v9 = vpack.c.bf16 %v7729_v3, %v7729_v3  ;;  %v7741_v48 = vadd.f32 %v7740_v20, %v7739_v1  ;;  %v7747_v45 = vadd.f32 %v7746_v46, %v7745_v13  ;;  %v16613_v27 = vld [vmem:[#allocation44_spill] sm:$0xff]  ;;  %v16614_v13 = vld [vmem:[#allocation138_spill] sm:$0xff] }
 0x649   : > { %v8475_v61 = vsel %vm1639_vm1, %v8359_v57, %v15152_v37  ;;  %v8360_v56 = vunpack.c.l.b16 %v8065_v25  ;;  %v8068_v60 = vpack.c.bf16 %v7735_v30, %v7735_v30  ;;  %v7753_v38 = vadd.f32 %v7752_v23, %v7751_v7  ;;  %v16615_v57 = vld [vmem:[#allocation113_spill] sm:$0xff]  ;;  %v16617_v30 = vld [vmem:[#allocation120_spill] sm:$0xff] }
 0x64a   : > { %v8361_v55 = vunpack.c.l.b16 %v8066_v28  ;;  %v8362_v51 = vunpack.c.l.b16 %v8067_v9  ;;  %v8069_v8 = vpack.c.bf16 %v7741_v48, %v7741_v48  ;;  %v8070_v35 = vpack.c.bf16 %v7747_v45, %v7747_v45  ;;  %v15188_v63 = vpop.f32.mrb[180].mxu1  ;;  %v16616_v9 = vld [vmem:[#allocation141_spill] sm:$0xff]  ;;  %v16618_v48 = vld [vmem:[#allocation159_spill] sm:$0xff] }
 0x64b   : > { %v8482_v32 = vsel %vm1639_vm1, %v8360_v56, %v15154_v21  ;;  %v7176_v59 = vmul.f32 %v15120_v52, %v16611_v58  ;;  %v8363_v37 = vunpack.c.l.b16 %v8068_v60  ;;  %v8071_v10 = vpack.c.bf16 %v7753_v38, %v7753_v38  ;;  %v15194_v4 = vpop.f32.mrb[181].mxu1 }
 0x64c   : > { %v8476_v36 = vsel %vm1641_vm2, %v8361_v55, %v8475_v61  ;;  %v8483_v19 = vsel %vm1641_vm2, %v8362_v51, %v8482_v32  ;;  %v8364_v31 = vunpack.c.l.b16 %v8069_v8  ;;  %v15190_v40 = vunpack.c.l.b16 %v8070_v35  ;;  %v15205_v3 = vpop.f32.mrb[182].mxu1 }
 0x64d   : > { %v7754_v2 = vrot.slane %v7176_v59, 4  ;;  %v7177_v21 = vmul.f32 %v15122_v41, %v16612_v53  ;;  %v15197_v24 = vsel %vm1643_vm3, %v8363_v37, %v8476_v36  ;;  %v15199_v52 = vunpack.c.l.b16 %v8071_v10  ;;  %v15212_v20 = vpop.f32.mrb[183].mxu1 }
 0x64e   : > { %v7178_v1 = vmul.f32 %v15124_v42, %v16613_v27  ;;  %v7179_v5 = vmul.f32 %v15128_v44, %v16614_v13  ;;  %v15208_v50 = vsel %vm1643_vm3, %v8364_v31, %v8483_v19  ;;  %v7180_v25 = vmul.f32 %v15130_v14, %v16615_v57 }
 0x64f   : > { %v7755_v7 = vadd.f32 %v7754_v2, %v7176_v59  ;;  %v7760_v41 = vrot.slane %v7177_v21, 4  ;;  %v7181_v42 = vmul.f32 %v15136_v17, %v16616_v9  ;;  %v7182_v44 = vmul.f32 %v15158_v16, %v16617_v30 }
 0x650   : > { %v7766_v46 = vrot.slane %v7178_v1, 4  ;;  %v7772_v28 = vrot.slane %v7179_v5, 4  ;;  %v7778_v56 = vrot.slane %v7180_v25, 4  ;;  %v7183_v45 = vmul.f32 %v15164_v12, %v16618_v48 }
 0x651   : > { %v7756_v23 = vrot.slane %v7755_v7, 2  ;;  %v7761_v61 = vadd.f32 %v7760_v41, %v7177_v21  ;;  %v7784_v60 = vrot.slane %v7181_v42, 4  ;;  %v7790_v14 = vrot.slane %v7182_v44, 4 }
 0x652   : > { %v7767_v55 = vadd.f32 %v7766_v46, %v7178_v1  ;;  %v7773_v51 = vadd.f32 %v7772_v28, %v7179_v5  ;;  %v7779_v8 = vadd.f32 %v7778_v56, %v7180_v25  ;;  %v7796_v35 = vrot.slane %v7183_v45, 4  ;;  %v15220_v19 = vpop.f32.mrb[184].mxu1 }
 0x653   : > { %v7757_v38 = vadd.f32 %v7756_v23, %v7755_v7  ;;  %v7762_v32 = vrot.slane %v7761_v61, 2  ;;  %v7785_v17 = vadd.f32 %v7784_v60, %v7181_v42  ;;  %v7791_v36 = vadd.f32 %v7790_v14, %v7182_v44  ;;  %v15222_v2 = vpop.f32.mrb[185].mxu1 }
 0x654   : > { %v7768_v58 = vrot.slane %v7767_v55, 2  ;;  %v7774_v59 = vrot.slane %v7773_v51, 2  ;;  %v7780_v10 = vrot.slane %v7779_v8, 2  ;;  %v7797_v31 = vadd.f32 %v7796_v35, %v7183_v45  ;;  %v15224_v1 = vpop.f32.mrb[186].mxu1 }
 0x655   : > { %v7758_v16 = vrot.slane %v7757_v38, 1  ;;  %v7763_v37 = vadd.f32 %v7762_v32, %v7761_v61  ;;  %v7786_v21 = vrot.slane %v7785_v17, 2  ;;  %v7792_v27 = vrot.slane %v7791_v36, 2  ;;  %v15226_v57 = vpop.f32.mrb[187].mxu1 }
 0x656   : > { %v7769_v12 = vadd.f32 %v7768_v58, %v7767_v55  ;;  %v7775_v53 = vadd.f32 %v7774_v59, %v7773_v51  ;;  %v7781_v7 = vadd.f32 %v7780_v10, %v7779_v8  ;;  %v7798_v41 = vrot.slane %v7797_v31, 2 }
 0x657   : > { %v7759_v13 = vadd.f32 %v7758_v16, %v7757_v38  ;;  %v7764_v5 = vrot.slane %v7763_v37, 1  ;;  %v7787_v28 = vadd.f32 %v7786_v21, %v7785_v17  ;;  %v7793_v9 = vadd.f32 %v7792_v27, %v7791_v36  ;;  %v16619_v16 = vld [vmem:[#allocation124_spill] sm:$0xff] }
 0x658   : > { %v7770_v25 = vrot.slane %v7769_v12, 1  ;;  %v7776_v46 = vrot.slane %v7775_v53, 1  ;;  %v7782_v44 = vrot.slane %v7781_v7, 1  ;;  %v7799_v23 = vadd.f32 %v7798_v41, %v7797_v31  ;;  %v16620_v41 = vld [vmem:[#allocation117_spill] sm:$0xff] }
 0x659   : > { %v8072_v42 = vpack.c.bf16 %v7759_v13, %v7759_v13  ;;  %v7765_v30 = vadd.f32 %v7764_v5, %v7763_v37  ;;  %v7788_v48 = vrot.slane %v7787_v28, 1  ;;  %v7794_v45 = vrot.slane %v7793_v9, 1 }
 0x65a   : > { %v7771_v61 = vadd.f32 %v7770_v25, %v7769_v12  ;;  %v7777_v56 = vadd.f32 %v7776_v46, %v7775_v53  ;;  %v7783_v60 = vadd.f32 %v7782_v44, %v7781_v7  ;;  %v7800_v14 = vrot.slane %v7799_v23, 1  ;;  %v15230_v58 = vpop.f32.mrb[188].mxu1 }
 0x65b   : > { %v15228_v55 = vunpack.c.l.b16 %v8072_v42  ;;  %v8073_v51 = vpack.c.bf16 %v7765_v30, %v7765_v30  ;;  %v7789_v8 = vadd.f32 %v7788_v48, %v7787_v28  ;;  %v7795_v35 = vadd.f32 %v7794_v45, %v7793_v9  ;;  %v15236_v10 = vpop.f32.mrb[189].mxu1  ;;  %v16621_v9 = vld [vmem:[#allocation156_spill] sm:$0xff]  ;;  %v16622_v30 = vld [vmem:[#allocation122_spill] sm:$0xff]  ;;  %v16623_v48 = vld [vmem:[#allocation135_spill] sm:$0xff] }
 0x65c   : > { %v8074_v38 = vpack.c.bf16 %v7771_v61, %v7771_v61  ;;  %v8075_v32 = vpack.c.bf16 %v7777_v56, %v7777_v56  ;;  %v8076_v17 = vpack.c.bf16 %v7783_v60, %v7783_v60  ;;  %v7801_v36 = vadd.f32 %v7800_v14, %v7799_v23  ;;  %v15242_v27 = vpop.f32.mrb[190].mxu1  ;;  %v16624_v60 = vld [vmem:[#allocation144_spill] sm:$0xff] }
 0x65d   : > { %v15232_v59 = vunpack.c.l.b16 %v8073_v51  ;;  %v7184_v37 = vmul.f32 %v15168_v49, %v16619_v16  ;;  %v8077_v53 = vpack.c.bf16 %v7789_v8, %v7789_v8  ;;  %v8078_v21 = vpack.c.bf16 %v7795_v35, %v7795_v35  ;;  %v15248_v46 = vpop.f32.mrb[191].mxu1 }
 0x65e   : > { %v15238_v31 = vunpack.c.l.b16 %v8074_v38  ;;  %v15240_v12 = vunpack.c.l.b16 %v8075_v32  ;;  %v15244_v13 = vunpack.c.l.b16 %v8076_v17  ;;  %v8079_v5 = vpack.c.bf16 %v7801_v36, %v7801_v36  ;;  %v16625_v38 = vld [vmem:[#allocation133_spill] sm:$0xff] }
 0x65f   : > { %v7802_v7 = vrot.slane %v7184_v37, 4  ;;  %v7185_v25 = vmul.f32 %v15170_v29, %v16620_v41  ;;  %v15250_v49 = vunpack.c.l.b16 %v8077_v53  ;;  %v15252_v28 = vunpack.c.l.b16 %v8078_v21  ;;  %v16626_v17 = vld [vmem:[#allocation73_spill] sm:$0xff] }
 0x660   : > { %v7186_v42 = vmul.f32 %v15172_v33, %v16621_v9  ;;  %v7187_v44 = vmul.f32 %v15174_v11, %v16622_v30  ;;  %v15258_v23 = vunpack.c.l.b16 %v8079_v5  ;;  %v7188_v45 = vmul.f32 %v15176_v43, %v16623_v48 }
 0x661   : > { %v7803_v61 = vadd.f32 %v7802_v7, %v7184_v37  ;;  %v7808_v56 = vrot.slane %v7185_v25, 4  ;;  %v7189_v14 = vmul.f32 %v15178_v62, %v16624_v60  ;;  %v7190_v32 = vmul.f32 %v15188_v63, %v16625_v38 }
 0x662   : > { %v7814_v29 = vrot.slane %v7186_v42, 4  ;;  %v7820_v51 = vrot.slane %v7187_v44, 4  ;;  %v7826_v35 = vrot.slane %v7188_v45, 4  ;;  %v7191_v11 = vmul.f32 %v15194_v4, %v16626_v17  ;;  %v15268_v21 = vpop.f32.mrb[192].mxu1 }
 0x663   : > { %v7804_v8 = vrot.slane %v7803_v61, 2  ;;  %v7809_v33 = vadd.f32 %v7808_v56, %v7185_v25  ;;  %v7832_v37 = vrot.slane %v7189_v14, 4  ;;  %v7838_v53 = vrot.slane %v7190_v32, 4  ;;  %16627 = vst [vmem:[#allocation6_spill] sm:$0xff] %v15268_v21  ;;  %v15270_v62 = vpop.f32.mrb[193].mxu1 }
 0x664   : > { %v7815_v36 = vadd.f32 %v7814_v29, %v7186_v42  ;;  %v7821_v16 = vadd.f32 %v7820_v51, %v7187_v44  ;;  %v7827_v7 = vadd.f32 %v7826_v35, %v7188_v45  ;;  %v7844_v41 = vrot.slane %v7191_v11, 4  ;;  %16628 = vst [vmem:[#allocation16_spill] sm:$0xff] %v15270_v62  ;;  %v15272_v56 = vpop.f32.mrb[194].mxu1 }
 0x665   : > { %v7805_v43 = vadd.f32 %v7804_v8, %v7803_v61  ;;  %v7810_v5 = vrot.slane %v7809_v33, 2  ;;  %v7833_v30 = vadd.f32 %v7832_v37, %v7189_v14  ;;  %v7839_v25 = vadd.f32 %v7838_v53, %v7190_v32  ;;  %16629 = vst [vmem:[#allocation58_spill] sm:$0xff] %v15272_v56  ;;  %v15274_v29 = vpop.f32.mrb[195].mxu1 }
 0x666   : > { %v7816_v9 = vrot.slane %v7815_v36, 2  ;;  %v7822_v63 = vrot.slane %v7821_v16, 2  ;;  %v7828_v42 = vrot.slane %v7827_v7, 2  ;;  %v7845_v44 = vadd.f32 %v7844_v41, %v7191_v11  ;;  %16630 = vst [vmem:[#allocation8_spill] sm:$0xff] %v15274_v29 }
 0x667   : > { %v7806_v48 = vrot.slane %v7805_v43, 1  ;;  %v7811_v4 = vadd.f32 %v7810_v5, %v7809_v33  ;;  %v7834_v61 = vrot.slane %v7833_v30, 2  ;;  %v7840_v38 = vrot.slane %v7839_v25, 2 }
 0x668   : > { %v7817_v51 = vadd.f32 %v7816_v9, %v7815_v36  ;;  %v7823_v60 = vadd.f32 %v7822_v63, %v7821_v16  ;;  %v7829_v35 = vadd.f32 %v7828_v42, %v7827_v7  ;;  %v7846_v17 = vrot.slane %v7845_v44, 2 }
 0x669   : > { %v7807_v45 = vadd.f32 %v7806_v48, %v7805_v43  ;;  %v7812_v8 = vrot.slane %v7811_v4, 1  ;;  %v7835_v14 = vadd.f32 %v7834_v61, %v7833_v30  ;;  %v7841_v32 = vadd.f32 %v7840_v38, %v7839_v25 }
 0x66a   : > { %v7818_v62 = vrot.slane %v7817_v51, 1  ;;  %v7824_v21 = vrot.slane %v7823_v60, 1  ;;  %v7830_v56 = vrot.slane %v7829_v35, 1  ;;  %v7847_v33 = vadd.f32 %v7846_v17, %v7845_v44  ;;  %v15276_v36 = vpop.f32.mrb[196].mxu1 }
 0x66b   : > { %v8080_v37 = vpack.c.bf16 %v7807_v45, %v7807_v45  ;;  %v7813_v53 = vadd.f32 %v7812_v8, %v7811_v4  ;;  %v7836_v41 = vrot.slane %v7835_v14, 1  ;;  %v7842_v29 = vrot.slane %v7841_v32, 1  ;;  %v15278_v7 = vpop.f32.mrb[197].mxu1 }
 0x66c   : > { %v7819_v5 = vadd.f32 %v7818_v62, %v7817_v51  ;;  %v7825_v11 = vadd.f32 %v7824_v21, %v7823_v60  ;;  %v7831_v43 = vadd.f32 %v7830_v56, %v7829_v35  ;;  %v7848_v63 = vrot.slane %v7847_v33, 1  ;;  %v15280_v61 = vpop.f32.mrb[198].mxu1 }
 0x66d   : > { %v8375_v16 = vunpack.c.l.b16 %v8080_v37  ;;  %v8081_v9 = vpack.c.bf16 %v7813_v53, %v7813_v53  ;;  %v7837_v30 = vadd.f32 %v7836_v41, %v7835_v14  ;;  %v7843_v25 = vadd.f32 %v7842_v29, %v7841_v32  ;;  %v15284_v51 = vpop.f32.mrb[199].mxu1  ;;  %v16631_v41 = vld [vmem:[#allocation152_spill] sm:$0xff] }
 0x66e   : > { %v8082_v48 = vpack.c.bf16 %v7819_v5, %v7819_v5  ;;  %v8083_v42 = vpack.c.bf16 %v7825_v11, %v7825_v11  ;;  %v8084_v4 = vpack.c.bf16 %v7831_v43, %v7831_v43  ;;  %v7849_v44 = vadd.f32 %v7848_v63, %v7847_v33 }
 0x66f   : > { %v8489_v62 = vsel %vm1639_vm1, %v8375_v16, %v15252_v28  ;;  %v8376_v21 = vunpack.c.l.b16 %v8081_v9  ;;  %v8085_v56 = vpack.c.bf16 %v7837_v30, %v7837_v30  ;;  %v8086_v45 = vpack.c.bf16 %v7843_v25, %v7843_v25  ;;  %v16633_v30 = vld [vmem:[#allocation41_spill] sm:$0xff] }
 0x670   : > { %v8377_v60 = vunpack.c.l.b16 %v8082_v48  ;;  %v8378_v38 = vunpack.c.l.b16 %v8083_v42  ;;  %v8379_v35 = vunpack.c.l.b16 %v8084_v4  ;;  %v8087_v17 = vpack.c.bf16 %v7849_v44, %v7849_v44  ;;  %v16635_v4 = vld [vmem:[#allocation153_spill] sm:$0xff] }
 0x671   : > { %v8496_v8 = vsel %vm1639_vm1, %v8376_v21, %v15258_v23  ;;  %v8471_v29 = vsel %vm1645_vm4, %v15078_v47, %v15076_v15  ;;  %v8380_v32 = vunpack.c.l.b16 %v8085_v56  ;;  %v15293_v37 = vunpack.c.l.b16 %v8086_v45  ;;  %v16634_v21 = vld [vmem:[#allocation146_spill] sm:$0xff]  ;;  %v16637_v56 = vld [vmem:[#allocation4_spill] sm:$0xff] }
 0x672   : > { %v8490_v28 = vsel %vm1641_vm2, %v8377_v60, %v8489_v62  ;;  %v8497_v14 = vsel %vm1641_vm2, %v8378_v38, %v8496_v8  ;;  %v15298_v33 = vunpack.c.l.b16 %v8087_v17  ;;  %v8472_v23 = vsel %vm1647_vm5, %v15132_v34, %v8471_v29  ;;  %v15314_v9 = vpop.f32.mrb[200].mxu1  ;;  %v16636_v38 = vld [vmem:[#allocation49_spill] sm:$0xff] }
 0x673   : > { %v15296_v53 = vsel %vm1643_vm3, %v8379_v35, %v8490_v28  ;;  %v8485_v5 = vsel %vm1645_vm4, %v15199_v52, %v15208_v50  ;;  %v15306_v15 = vsel %vm1643_vm3, %v8380_v32, %v8497_v14  ;;  %v8473_v47 = vsel %vm1649_vm6, %v15140_v0, %v8472_v23  ;;  %v16638_v35 = vld [vmem:[#allocation103_spill] sm:$0xff] }
 0x674   : > { %v8486_v11 = vsel %vm1647_vm5, %v15232_v59, %v8485_v5  ;;  %v7192_v16 = vmul.f32 %v15205_v3, %v16631_v41  ;;  %v8474_v34 = vsel %vm1651_vm7, %v15150_v22, %v8473_v47  ;;  %v8464_v50 = vsel %vm1645_vm4, %v15069_v18, %v15067_v39  ;;  %v15326_v59 = vpop.f32.mrb[201].mxu1 }
 0x675   : > { %v8487_v52 = vsel %vm1649_vm6, %v15240_v12, %v8486_v11  ;;  %v8478_v0 = vsel %vm1645_vm4, %v15190_v40, %v15197_v24  ;;  %v8465_v22 = vsel %vm1647_vm5, %v15126_v6, %v8464_v50  ;;  %v15334_v63 = vpop.f32.mrb[202].mxu1  ;;  %v16632_v40 = vld [vmem:[#allocation33_spill] sm:$0xff]  ;;  %v7194_v25 = vmul.f32 %v15220_v19, %v16633_v30 }
 0x676   : > { %v8488_v3 = vsel %vm1651_vm7, %v15250_v49, %v8487_v52  ;;  %v7850_v43 = vrot.slane %v7192_v16, 4  ;;  %v8479_v12 = vsel %vm1647_vm5, %v15228_v55, %v8478_v0  ;;  %v8466_v39 = vsel %vm1649_vm6, %v15138_v54, %v8465_v22  ;;  %v15342_v49 = vpop.f32.mrb[203].mxu1 }
 0x677   : > { %v8522_v48 = vpack.c.b16 %v8488_v3, %v8474_v34  ;;  %v8480_v18 = vsel %vm1649_vm6, %v15238_v31, %v8479_v12  ;;  %v7193_v24 = vmul.f32 %v15212_v20, %v16632_v40  ;;  %v8467_v6 = vsel %vm1651_vm7, %v15144_v26, %v8466_v39 }
 0x678   : > { %v7851_v42 = vadd.f32 %v7850_v43, %v7192_v16  ;;  %v8481_v55 = vsel %vm1651_vm7, %v15244_v13, %v8480_v18  ;;  %v7195_v31 = vmul.f32 %v15222_v2, %v16634_v21  ;;  %v7196_v20 = vmul.f32 %v15224_v1, %v16635_v4 }
 0x679   : > { %8677 = vmatprep.mubr.bf16.mxu0 %v8522_v48  ;;  %v8521_v54 = vpack.c.b16 %v8481_v55, %v8467_v6  ;;  %v7856_v62 = vrot.slane %v7193_v24, 4  ;;  %v7862_v60 = vrot.slane %v7194_v25, 4  ;;  %v7197_v26 = vmul.f32 %v15226_v57, %v16636_v38 }
 0x67a   : > { %v7852_v44 = vrot.slane %v7851_v42, 2  ;;  %v7198_v13 = vmul.f32 %v15230_v58, %v16637_v56  ;;  %v7868_v19 = vrot.slane %v7195_v31, 4  ;;  %v7874_v8 = vrot.slane %v7196_v20, 4  ;;  %v16639_v56 = vld [vmem:[#allocation172_spill] sm:$0xff] }
 0x67b   : > { %8678 = vmatmul.mubr.bf16.gmra.mrb[156].mxu0 %v8521_v54  ;;  %v7857_v45 = vadd.f32 %v7856_v62, %v7193_v24  ;;  %v7199_v17 = vmul.f32 %v15236_v10, %v16638_v35  ;;  %v7863_v2 = vadd.f32 %v7862_v60, %v7194_v25  ;;  %v7880_v28 = vrot.slane %v7197_v26, 4 }
 0x67c   : > { %v7853_v29 = vadd.f32 %v7852_v44, %v7851_v42  ;;  %v7886_v14 = vrot.slane %v7198_v13, 4  ;;  %v7869_v32 = vadd.f32 %v7868_v19, %v7195_v31  ;;  %v7875_v23 = vadd.f32 %v7874_v8, %v7196_v20 }
 0x67d   : > { %v7858_v1 = vrot.slane %v7857_v45, 2  ;;  %v7892_v5 = vrot.slane %v7199_v17, 4  ;;  %v7864_v57 = vrot.slane %v7863_v2, 2  ;;  %v7881_v11 = vadd.f32 %v7880_v28, %v7197_v26 }
 0x67e   : > { %v7854_v47 = vrot.slane %v7853_v29, 1  ;;  %v7887_v41 = vadd.f32 %v7886_v14, %v7198_v13  ;;  %v7870_v16 = vrot.slane %v7869_v32, 2  ;;  %v7876_v34 = vrot.slane %v7875_v23, 2 }
 0x67f   : > { %v7859_v58 = vadd.f32 %v7858_v1, %v7857_v45  ;;  %v7893_v52 = vadd.f32 %v7892_v5, %v7199_v17  ;;  %v7865_v0 = vadd.f32 %v7864_v57, %v7863_v2  ;;  %v7882_v3 = vrot.slane %v7881_v11, 2 }
 0x680   : > { %v7855_v50 = vadd.f32 %v7854_v47, %v7853_v29  ;;  %v7888_v10 = vrot.slane %v7887_v41, 2  ;;  %v7871_v22 = vadd.f32 %v7870_v16, %v7869_v32  ;;  %v7877_v12 = vadd.f32 %v7876_v34, %v7875_v23  ;;  %v16640_v23 = vld [vmem:[#allocation116_spill] sm:$0xff] }
 0x681   : > { %v7860_v43 = vrot.slane %v7859_v58, 1  ;;  %v7894_v48 = vrot.slane %v7893_v52, 2  ;;  %v7866_v18 = vrot.slane %v7865_v0, 1  ;;  %v7883_v40 = vadd.f32 %v7882_v3, %v7881_v11  ;;  %v16641_v11 = vld [vmem:[#allocation101_spill] sm:$0xff] }
 0x682   : > { %v8088_v39 = vpack.c.bf16 %v7855_v50, %v7855_v50  ;;  %v7889_v24 = vadd.f32 %v7888_v10, %v7887_v41  ;;  %v7872_v6 = vrot.slane %v7871_v22, 1  ;;  %v7878_v55 = vrot.slane %v7877_v12, 1  ;;  %v16642_v41 = vld [vmem:[#allocation6_spill] sm:$0xff]  ;;  %v16644_v50 = vld [vmem:[#allocation16_spill] sm:$0xff]  ;;  %v16645_v3 = vld [vmem:[#allocation81_spill] sm:$0xff] }
 0x683   : > { %v7861_v42 = vadd.f32 %v7860_v43, %v7859_v58  ;;  %v7895_v30 = vadd.f32 %v7894_v48, %v7893_v52  ;;  %v7867_v54 = vadd.f32 %v7866_v18, %v7865_v0  ;;  %v7884_v62 = vrot.slane %v7883_v40, 1  ;;  %v16643_v52 = vld [vmem:[#allocation177_spill] sm:$0xff]  ;;  %v16646_v10 = vld [vmem:[#allocation58_spill] sm:$0xff]  ;;  %v16649_v18 = vld [vmem:[#allocation96_spill] sm:$0xff] }
 0x684   : > { %v15360_v25 = vunpack.c.l.b16 %v8088_v39  ;;  %v7890_v21 = vrot.slane %v7889_v24, 1  ;;  %v7873_v4 = vadd.f32 %v7872_v6, %v7871_v22  ;;  %v7879_v20 = vadd.f32 %v7878_v55, %v7877_v12  ;;  %v16647_v48 = vld [vmem:[#allocation178_spill] sm:$0xff]  ;;  %v16650_v55 = vld [vmem:[#allocation87_spill] sm:$0xff] }
 0x685   : > { %v8089_v31 = vpack.c.bf16 %v7861_v42, %v7861_v42  ;;  %v7896_v44 = vrot.slane %v7895_v30, 1  ;;  %v8090_v60 = vpack.c.bf16 %v7867_v54, %v7867_v54  ;;  %v7885_v38 = vadd.f32 %v7884_v62, %v7883_v40 }
 0x686   : > { %v7891_v26 = vadd.f32 %v7890_v21, %v7889_v24  ;;  %v7200_v13 = vmul.f32 %v15242_v27, %v16639_v56  ;;  %v8091_v19 = vpack.c.bf16 %v7873_v4, %v7873_v4  ;;  %v8092_v8 = vpack.c.bf16 %v7879_v20, %v7879_v20 }
 0x687   : > { %v15364_v45 = vunpack.c.l.b16 %v8089_v31  ;;  %v7897_v35 = vadd.f32 %v7896_v44, %v7895_v30  ;;  %v15366_v17 = vunpack.c.l.b16 %v8090_v60  ;;  %v8093_v29 = vpack.c.bf16 %v7885_v38, %v7885_v38 }
 0x688   : > { %v8094_v2 = vpack.c.bf16 %v7891_v26, %v7891_v26  ;;  %v7898_v28 = vrot.slane %v7200_v13, 4  ;;  %v15368_v14 = vunpack.c.l.b16 %v8091_v19  ;;  %v15370_v1 = vunpack.c.l.b16 %v8092_v8 }
 0x689   : > { %v8095_v32 = vpack.c.bf16 %v7897_v35, %v7897_v35  ;;  %v7201_v5 = vmul.f32 %v15248_v46, %v16640_v23  ;;  %v15374_v47 = vunpack.c.l.b16 %v8093_v29  ;;  %v7202_v58 = vmul.f32 %v16642_v41, %v16641_v11  ;;  %v16648_v46 = vld [vmem:[#allocation8_spill] sm:$0xff] }
 0x68a   : > { %v8389_v27 = vunpack.c.l.b16 %v8094_v2  ;;  %v7899_v57 = vadd.f32 %v7898_v28, %v7200_v13  ;;  %v7203_v0 = vmul.f32 %v16644_v50, %v16643_v52  ;;  %v7204_v43 = vmul.f32 %v16646_v10, %v16645_v3 }
 0x68b   : > { %v15378_v16 = vunpack.c.l.b16 %v8095_v32  ;;  %v7904_v34 = vrot.slane %v7201_v5, 4  ;;  %v7910_v12 = vrot.slane %v7202_v58, 4  ;;  %v7205_v39 = vmul.f32 %v16648_v46, %v16647_v48 }
 0x68c   : > { %v7900_v22 = vrot.slane %v7899_v57, 2  ;;  %v7206_v40 = vmul.f32 %v15276_v36, %v16649_v18  ;;  %v7916_v42 = vrot.slane %v7203_v0, 4  ;;  %v7922_v6 = vrot.slane %v7204_v43, 4 }
 0x68d   : > { %v7905_v24 = vadd.f32 %v7904_v34, %v7201_v5  ;;  %v7207_v30 = vmul.f32 %v15278_v7, %v16650_v55  ;;  %v7911_v62 = vadd.f32 %v7910_v12, %v7202_v58  ;;  %v7928_v21 = vrot.slane %v7205_v39, 4 }
 0x68e   : > { %v7901_v54 = vadd.f32 %v7900_v22, %v7899_v57  ;;  %v7934_v31 = vrot.slane %v7206_v40, 4  ;;  %v7917_v20 = vadd.f32 %v7916_v42, %v7203_v0  ;;  %v7923_v44 = vadd.f32 %v7922_v6, %v7204_v43 }
 0x68f   : > { %v7906_v4 = vrot.slane %v7905_v24, 2  ;;  %v7940_v60 = vrot.slane %v7207_v30, 4  ;;  %v7912_v26 = vrot.slane %v7911_v62, 2  ;;  %v7929_v56 = vadd.f32 %v7928_v21, %v7205_v39 }
 0x690   : > { %v7902_v38 = vrot.slane %v7901_v54, 1  ;;  %v7935_v13 = vadd.f32 %v7934_v31, %v7206_v40  ;;  %v7918_v36 = vrot.slane %v7917_v20, 2  ;;  %v7924_v8 = vrot.slane %v7923_v44, 2 }
 0x691   : > { %v7907_v19 = vadd.f32 %v7906_v4, %v7905_v24  ;;  %v7941_v35 = vadd.f32 %v7940_v60, %v7207_v30  ;;  %v7913_v2 = vadd.f32 %v7912_v26, %v7911_v62  ;;  %v7930_v28 = vrot.slane %v7929_v56, 2  ;;  %v16651_v26 = vld [vmem:[#allocation71_spill] sm:$0xff] }
 0x692   : > { %v7903_v29 = vadd.f32 %v7902_v38, %v7901_v54  ;;  %v7936_v7 = vrot.slane %v7935_v13, 2  ;;  %v15390_v32 = vpop.f32.mrb[148].mxu0  ;;  %v7919_v5 = vadd.f32 %v7918_v36, %v7917_v20  ;;  %v7925_v57 = vadd.f32 %v7924_v8, %v7923_v44 }
 0x693   : > { %v7908_v23 = vrot.slane %v7907_v19, 1  ;;  %v7942_v11 = vrot.slane %v7941_v35, 2  ;;  %v15392_v41 = vpop.f32.mrb[149].mxu0  ;;  %v7914_v34 = vrot.slane %v7913_v2, 1  ;;  %v7931_v52 = vadd.f32 %v7930_v28, %v7929_v56  ;;  %v8702_v28 = vld [vmem:[%s15621_s10] sm:$0xff] }
 0x694   : > { %v8096_v58 = vpack.c.bf16 %v7903_v29, %v7903_v29  ;;  %v7937_v50 = vadd.f32 %v7936_v7, %v7935_v13  ;;  %v15394_v0 = vpop.f32.mrb[150].mxu0  ;;  %v7920_v10 = vrot.slane %v7919_v5, 1  ;;  %v7926_v43 = vrot.slane %v7925_v57, 1  ;;  %v8703_v7 = vld [vmem:[%s15621_s10 + $0x8] sm:$0xff] }
 0x695   : > { %v7909_v3 = vadd.f32 %v7908_v23, %v7907_v19  ;;  %v7943_v22 = vadd.f32 %v7942_v11, %v7941_v35  ;;  %v15396_v12 = vpop.f32.mrb[151].mxu0  ;;  %v7915_v46 = vadd.f32 %v7914_v34, %v7913_v2  ;;  %v7932_v39 = vrot.slane %v7931_v52, 1  ;;  %v16653_v34 = vld [vmem:[#allocation55_spill] sm:$0xff] }
 0x696   : > { %v8391_v48 = vunpack.c.l.b16 %v8096_v58  ;;  %v7938_v18 = vrot.slane %v7937_v50, 1  ;;  %v7921_v24 = vadd.f32 %v7920_v10, %v7919_v5  ;;  %v7927_v42 = vadd.f32 %v7926_v43, %v7925_v57  ;;  %v16652_v5 = vld [vmem:[#allocation82_spill] sm:$0xff]  ;;  %v16655_v43 = vld [vmem:[#allocation20_spill] sm:$0xff] }
 0x697   : > { %v8097_v40 = vpack.c.bf16 %v7909_v3, %v7909_v3  ;;  %v7944_v6 = vrot.slane %v7943_v22, 1  ;;  %v8098_v30 = vpack.c.bf16 %v7915_v46, %v7915_v46  ;;  %v7933_v54 = vadd.f32 %v7932_v39, %v7931_v52 }
 0x698   : > { %v8503_v55 = vsel %vm1639_vm1, %v8391_v48, %v8389_v27  ;;  %v7939_v62 = vadd.f32 %v7938_v18, %v7937_v50  ;;  %v8099_v31 = vpack.c.bf16 %v7921_v24, %v7921_v24  ;;  %v8100_v4 = vpack.c.bf16 %v7927_v42, %v7927_v42  ;;  %v16654_v50 = vld [vmem:[#allocation28_spill] sm:$0xff] }
 0x699   : > { %v8392_v21 = vunpack.c.l.b16 %v8097_v40  ;;  %v7945_v20 = vadd.f32 %v7944_v6, %v7943_v22  ;;  %v8393_v44 = vunpack.c.l.b16 %v8098_v30  ;;  %v8101_v60 = vpack.c.bf16 %v7933_v54, %v7933_v54  ;;  %v16656_v48 = vld [vmem:[#allocation56_spill] sm:$0xff] }
 0x69a   : > { %v8102_v38 = vpack.c.bf16 %v7939_v62, %v7939_v62  ;;  %v7208_v56 = vmul.f32 %v15280_v61, %v16651_v26  ;;  %v8394_v19 = vunpack.c.l.b16 %v8099_v31  ;;  %v8395_v36 = vunpack.c.l.b16 %v8100_v4 }
 0x69b   : > { %v8510_v13 = vsel %vm1639_vm1, %v8392_v21, %v15378_v16  ;;  %v8103_v8 = vpack.c.bf16 %v7945_v20, %v7945_v20  ;;  %v8504_v27 = vsel %vm1641_vm2, %v8393_v44, %v8503_v55  ;;  %v8396_v35 = vunpack.c.l.b16 %v8101_v60 }
 0x69c   : > { %v8397_v29 = vunpack.c.l.b16 %v8102_v38  ;;  %v7946_v2 = vrot.slane %v7208_v56, 4  ;;  %v8511_v61 = vsel %vm1641_vm2, %v8394_v19, %v8510_v13  ;;  %v8505_v16 = vsel %vm1643_vm3, %v8395_v36, %v8504_v27  ;;  %v8704_v27 = vld [vmem:[%s15621_s10 + $0x10] sm:$0xff] }
 0x69d   : > { %v8398_v23 = vunpack.c.l.b16 %v8103_v8  ;;  %v7209_v57 = vmul.f32 %v15284_v51, %v16652_v5  ;;  %v8512_v11 = vsel %vm1643_vm3, %v8396_v35, %v8511_v61  ;;  %v7210_v52 = vmul.f32 %v15314_v9, %v16653_v34 }
 0x69e   : > { %v7947_v58 = vadd.f32 %v7946_v2, %v7208_v56  ;;  %v7211_v3 = vmul.f32 %v15326_v59, %v16654_v50  ;;  %v7212_v22 = vmul.f32 %v15334_v63, %v16655_v43  ;;  %v7213_v46 = vmul.f32 %v15342_v49, %v16656_v48  ;;  %v8709_v43 = vld [vmem:[%s15621_s10 + $0x38] sm:$0xff] }
 0x69f   : > { %v7952_v10 = vrot.slane %v7209_v57, 4  ;;  %v15423_v39 = vpack.c.bf16 %v8703_v7, %v8702_v28  ;;  %v7958_v51 = vrot.slane %v7210_v52, 4  ;;  %v8499_v24 = vsel %vm1645_vm4, %v15298_v33, %v15306_v15  ;;  %v8706_v28 = vld [vmem:[%s15621_s10 + $0x20] sm:$0xff] }
 0x6a0   : > { %v7948_v18 = vrot.slane %v7947_v58, 2  ;;  %v7964_v40 = vrot.slane %v7211_v3, 4  ;;  %v7970_v42 = vrot.slane %v7212_v22, 4  ;;  %v7976_v6 = vrot.slane %v7213_v46, 4 }
 0x6a1   : > { %v7953_v9 = vadd.f32 %v7952_v10, %v7209_v57  ;;  %10368 = vmatprep.subr.bf16.mxu0 %v15423_v39  ;;  %v8500_v59 = vsel %vm1647_vm5, %v15364_v45, %v8499_v24  ;;  %v7959_v55 = vadd.f32 %v7958_v51, %v7210_v52  ;;  %v8513_v45 = vsel %vm1645_vm4, %v8398_v23, %v8512_v11  ;;  %v8708_v10 = vld [vmem:[%s15621_s10 + $0x30] sm:$0xff]  ;;  %v15475_v51 = vld [vmem:[%s15620_s9] ss:$0 sm:$0xff] }
 0x6a2   : > { %v7949_v63 = vadd.f32 %v7948_v18, %v7947_v58  ;;  %v7965_v49 = vadd.f32 %v7964_v40, %v7211_v3  ;;  %10370 = vmatpush3.bf16.msra.mxu0 %v15423_v39  ;;  %v8501_v30 = vsel %vm1649_vm6, %v15368_v14, %v8500_v59  ;;  %v7971_v62 = vadd.f32 %v7970_v42, %v7212_v22 }
 0x6a3   : > { %v7954_v54 = vrot.slane %v7953_v9, 2  ;;  %v7977_v21 = vadd.f32 %v7976_v6, %v7213_v46  ;;  %v15436_v33 = vsel %vm1651_vm7, %v15374_v47, %v8501_v30  ;;  %v7960_v31 = vrot.slane %v7959_v55, 2  ;;  %v8710_v30 = vld [vmem:[%s15621_s10 + $0x40] sm:$0xff] }
 0x6a4   : > { %v7950_v15 = vrot.slane %v7949_v63, 1  ;;  %v7966_v4 = vrot.slane %v7965_v49, 2  ;;  %v7972_v44 = vrot.slane %v7971_v62, 2  ;;  %v8492_v38 = vsel %vm1645_vm4, %v15293_v37, %v15296_v53  ;;  %v8705_v37 = vld [vmem:[%s15621_s10 + $0x18] sm:$0xff] }
 0x6a5   : > { %v7955_v20 = vadd.f32 %v7954_v54, %v7953_v9  ;;  %v7978_v60 = vrot.slane %v7977_v21, 2  ;;  %v7961_v26 = vadd.f32 %v7960_v31, %v7959_v55  ;;  %v8493_v13 = vsel %vm1647_vm5, %v15360_v25, %v8492_v38  ;;  %v8711_v54 = vld [vmem:[%s15621_s10 + $0x48] sm:$0xff]  ;;  %v8716_v38 = vld [vmem:[%s15621_s10 + $0x70] sm:$0xff] }
 0x6a6   : > { %v7951_v14 = vadd.f32 %v7950_v15, %v7949_v63  ;;  %v7967_v56 = vadd.f32 %v7966_v4, %v7965_v49  ;;  %v7973_v19 = vadd.f32 %v7972_v44, %v7971_v62  ;;  %v8494_v8 = vsel %vm1649_vm6, %v15366_v17, %v8493_v13  ;;  %v8707_v17 = vld [vmem:[%s15621_s10 + $0x28] sm:$0xff] }
 0x6a7   : > { %v7956_v47 = vrot.slane %v7955_v20, 1  ;;  %v7979_v36 = vadd.f32 %v7978_v60, %v7977_v21  ;;  %v7962_v35 = vrot.slane %v7961_v26, 1  ;;  %v8495_v25 = vsel %vm1651_vm7, %v15370_v1, %v8494_v8  ;;  %v8715_v44 = vld [vmem:[%s15621_s10 + $0x68] sm:$0xff] }
 0x6a8   : > { %v8104_v53 = vpack.c.bf16 %v7951_v14, %v7951_v14  ;;  %v7968_v2 = vrot.slane %v7967_v56, 1  ;;  %v7974_v61 = vrot.slane %v7973_v19, 1  ;;  %v8506_v5 = vsel %vm1645_vm4, %v8397_v29, %v8505_v16  ;;  %v8717_v14 = vld [vmem:[%s15621_s10 + $0x78] sm:$0xff] }
 0x6a9   : > { %v7957_v7 = vadd.f32 %v7956_v47, %v7955_v20  ;;  %v7980_v23 = vrot.slane %v7979_v36, 1  ;;  %v7963_v11 = vadd.f32 %v7962_v35, %v7961_v26  ;;  %v15461_v34 = vpack.c.bf16 %v8705_v37, %v8704_v27  ;;  %v8712_v20 = vld [vmem:[%s15621_s10 + $0x50] sm:$0xff] }
 0x6aa   : > { %v8399_v57 = vunpack.c.l.b16 %v8104_v53  ;;  %v7969_v58 = vadd.f32 %v7968_v2, %v7967_v56  ;;  %v7975_v1 = vadd.f32 %v7974_v61, %v7973_v19  ;;  %v10375_v3 = vpack.c.bf16 %v8707_v17, %v8706_v28  ;;  %v8719_v28 = vld [vmem:[%s15622_s11 + $0x8] sm:$0xff] }
 0x6ab   : > { %v8105_v52 = vpack.c.bf16 %v7957_v7, %v7957_v7  ;;  %v7981_v50 = vadd.f32 %v7980_v23, %v7979_v36  ;;  %v8106_v22 = vpack.c.bf16 %v7963_v11, %v7963_v11  ;;  %10372 = vmatprep.subr.bf16.mxu0 %v15461_v34  ;;  %v10379_v9 = vpack.c.bf16 %v8709_v43, %v8708_v10 }
 0x6ac   : > { %v8107_v48 = vpack.c.bf16 %v7969_v58, %v7969_v58  ;;  %v8507_v29 = vsel %vm1647_vm5, %v8399_v57, %v8506_v5  ;;  %v8108_v46 = vpack.c.bf16 %v7975_v1, %v7975_v1  ;;  %10374 = vmatpush3.bf16.msra.mxu0 %v15461_v34  ;;  %v9957_v42 = vadd.f32 %v15392_v41, %v15390_v32 }
 0x6ad   : > { %v8400_v16 = vunpack.c.l.b16 %v8105_v52  ;;  %v8109_v18 = vpack.c.bf16 %v7981_v50, %v7981_v50  ;;  %v8401_v40 = vunpack.c.l.b16 %v8106_v22  ;;  %10376 = vmatprep.subr.bf16.mxu0 %v10375_v3  ;;  %v9960_v32 = vadd.f32 %v15396_v12, %v15394_v0  ;;  %v8713_v0 = vld [vmem:[%s15621_s10 + $0x58] sm:$0xff] }
 0x6ae   : > { %v8402_v24 = vunpack.c.l.b16 %v8107_v48  ;;  %v8403_v6 = vunpack.c.l.b16 %v8108_v46  ;;  %v8664_v62 = vadd.f32 %v9957_v42, %v15475_v51  ;;  %v10387_v12 = vpack.c.bf16 %v8713_v0, %v8712_v20 }
 0x6af   : > { %v8404_v59 = vunpack.c.l.b16 %v8109_v18  ;;  %v8514_v63 = vsel %vm1647_vm5, %v8400_v16, %v8513_v45  ;;  %v8508_v49 = vsel %vm1649_vm6, %v8401_v40, %v8507_v29  ;;  %v10383_v45 = vpack.c.bf16 %v8711_v54, %v8710_v30 }
 0x6b0   : > { %v8515_v55 = vsel %vm1649_vm6, %v8402_v24, %v8514_v63  ;;  %v8509_v21 = vsel %vm1651_vm7, %v8403_v6, %v8508_v49  ;;  %10378 = vmatpush3.bf16.msra.mxu0 %v10375_v3  ;;  %v15494_v4 = vmax.f32 %v8664_v62, 0.0  ;;  %v10395_v26 = vpack.c.bf16 %v8717_v14, %v8716_v38 }
 0x6b1   : > { %v8516_v41 = vsel %vm1651_vm7, %v8404_v59, %v8515_v55  ;;  %v8523_v31 = vpack.c.b16 %v8509_v21, %v8495_v25  ;;  %10380 = vmatprep.subr.bf16.mxu0 %v10379_v9  ;;  %v8667_v56 = vadd.f32 %v9960_v32, %v15475_v51  ;;  %v8718_v25 = vld [vmem:[%s15622_s11] sm:$0xff] }
 0x6b2   : > { %v8524_v15 = vpack.c.b16 %v8516_v41, %v15436_v33  ;;  %v8714_v33 = vld [vmem:[%s15621_s10 + $0x60] sm:$0xff]  ;;  %v10431_v17 = vpack.c.bf16 %v8719_v28, %v8718_v25  ;;  %v8834_v40 = vmul.f32 %v15494_v4, %v15494_v4 }
 0x6b3   : > { %v10391_v60 = vpack.c.bf16 %v8715_v44, %v8714_v33  ;;  %v15516_v13 = vmax.f32 %v8667_v56, 0.0 }
 0x6b4   : > { %8685 = vmatprep.mubr.bf16.mxu0 %v8524_v15  ;;  %10382 = vmatpush3.bf16.msra.mxu0 %v10379_v9 }
 0x6b5   : > { %8686 = vmatmul.mubr.bf16.gmra.mrb[160].mxu0 %v8523_v31  ;;  %10384 = vmatprep.subr.bf16.mxu0 %v10383_v45  ;;  %v8835_v24 = vmul.f32 %v15516_v13, %v15516_v13 }
 0x6b6   : > { %10239 = vmatprep.mubr.f32.mxu0 %v15494_v4 }
 0x6b8   : > { %10386 = vmatpush3.bf16.msra.mxu0 %v10383_v45 }
 0x6b9   : > { %10388 = vmatprep.subr.bf16.mxu0 %v10387_v12 }
 0x6bc   : > { %10390 = vmatpush3.bf16.msra.mxu0 %v10387_v12 }
 0x6bd   : > { %10392 = vmatprep.subr.bf16.mxu0 %v10391_v60 }
 0x6c0   : > { %10394 = vmatpush3.bf16.msra.mxu0 %v10391_v60 }
 0x6c1   : > { %10396 = vmatprep.subr.bf16.mxu0 %v10395_v26 }
 0x6c4   : > { %10398 = vmatpush3.bf16.msra.mxu0 %v10395_v26 }
 0x6c5   : > { %10400 = vmatprep.subr.bf16.mxu0 %v15423_v39 }
 0x6c7   : > { %10240 = vmatmul.mubr.f32.vlgmr.msra.gmra.mrb[164].mxu0 %v15516_v13 }
 0x6c8   : > { %10402 = vmatpush3.bf16.msra.mxu0 %v15423_v39 }
 0x6c9   : > { %10404 = vmatprep.subr.bf16.mxu0 %v15461_v34 }
 0x6cc   : > { %10406 = vmatpush3.bf16.msra.mxu0 %v15461_v34 }
 0x6cd   : > { %10408 = vmatprep.subr.bf16.mxu0 %v10375_v3 }
 0x6d0   : > { %10410 = vmatpush3.bf16.msra.mxu0 %v10375_v3 }
 0x6d1   : > { %10412 = vmatprep.subr.bf16.mxu0 %v10379_v9 }
 0x6d4   : > { %10414 = vmatpush3.bf16.msra.mxu0 %v10379_v9 }
 0x6d5   : > { %10416 = vmatprep.subr.bf16.mxu0 %v10383_v45 }
 0x6d8   : > { %10418 = vmatpush3.bf16.msra.mxu0 %v10383_v45 }
 0x6d9   : > { %10420 = vmatprep.subr.bf16.mxu0 %v10387_v12 }
 0x6dc   : > { %10422 = vmatpush3.bf16.msra.mxu0 %v10387_v12 }
 0x6dd   : > { %10424 = vmatprep.subr.bf16.mxu0 %v10391_v60 }
 0x6e0   : > { %10426 = vmatpush3.bf16.msra.mxu0 %v10391_v60 }
 0x6e1   : > { %10428 = vmatprep.subr.bf16.mxu0 %v10395_v26 }
 0x6e4   : > { %10430 = vmatpush3.bf16.msra.mxu0 %v10395_v26 }
 0x6e5   : > { %10432 = vmatprep.subr.bf16.mxu0 %v10431_v17 }
 0x6fe   : > { %v9961_v47 = vpop.f32.mrb[152].mxu0 }
 0x6ff   : > { %v9962_v19 = vpop.f32.mrb[153].mxu0 }
 0x700   : > { %v9963_v36 = vadd.f32 %v9962_v19, %v9961_v47  ;;  %v9964_v39 = vpop.f32.mrb[154].mxu0 }
 0x701   : > { %v9965_v8 = vpop.f32.mrb[155].mxu0 }
 0x702   : > { %v8672_v27 = vadd.f32 %v9963_v36, %v15475_v51  ;;  %v9966_v37 = vadd.f32 %v9965_v8, %v9964_v39 }
 0x704   : > { %v15524_v53 = vmax.f32 %v8672_v27, 0.0  ;;  %v8675_v35 = vadd.f32 %v9966_v37, %v15475_v51 }
 0x706   : > { %v15527_v2 = vmax.f32 %v8675_v35, 0.0  ;;  %10242 = vmatprep.mubr.f32.mxu0 %v15524_v53  ;;  %v8836_v9 = vmul.f32 %v15524_v53, %v15524_v53 }
 0x708   : > { %10243 = vmatmul.mubr.f32.gmra.mrb[166].mxu0 %v15527_v2 }
 0x74e   : > { %v9967_v7 = vpop.f32.mrb[156].mxu0 }
 0x74f   : > { %v9968_v61 = vpop.f32.mrb[157].mxu0 }
 0x750   : > { %v9969_v23 = vadd.f32 %v9968_v61, %v9967_v7  ;;  %v9970_v5 = vpop.f32.mrb[158].mxu0 }
 0x751   : > { %v9971_v57 = vpop.f32.mrb[159].mxu0 }
 0x752   : > { %v8680_v11 = vadd.f32 %v9969_v23, %v15475_v51  ;;  %v9972_v58 = vadd.f32 %v9971_v57, %v9970_v5 }
 0x754   : > { %v15538_v34 = vmax.f32 %v8680_v11, 0.0  ;;  %v8683_v52 = vadd.f32 %v9972_v58, %v15475_v51 }
 0x756   : > { %v15541_v1 = vmax.f32 %v8683_v52, 0.0  ;;  %10245 = vmatprep.mubr.f32.mxu0 %v15538_v34  ;;  %v8838_v42 = vmul.f32 %v15538_v34, %v15538_v34 }
 0x758   : > { %10246 = vmatmul.mubr.f32.gmra.mrb[168].mxu0 %v15541_v1  ;;  %v8839_v6 = vmul.f32 %v15541_v1, %v15541_v1 }
 0x788   : > { %v9973_v50 = vpop.f32.mrb[160].mxu0 }
 0x789   : > { %v9974_v3 = vpop.f32.mrb[161].mxu0 }
 0x78a   : > { %v9975_v10 = vadd.f32 %v9974_v3, %v9973_v50  ;;  %v9976_v43 = vpop.f32.mrb[162].mxu0 }
 0x78b   : > { %v9977_v22 = vpop.f32.mrb[163].mxu0 }
 0x78c   : > { %v8688_v48 = vadd.f32 %v9975_v10, %v15475_v51  ;;  %v9978_v29 = vadd.f32 %v9977_v22, %v9976_v43 }
 0x78e   : > { %v15546_v16 = vmax.f32 %v8688_v48, 0.0  ;;  %v8691_v46 = vadd.f32 %v9978_v29, %v15475_v51  ;;  %v8837_v51 = vmul.f32 %v15527_v2, %v15527_v2 }
 0x790   : > { %v15549_v18 = vmax.f32 %v8691_v46, 0.0  ;;  %10248 = vmatprep.mubr.f32.mxu0 %v15546_v16  ;;  %v8840_v63 = vmul.f32 %v15546_v16, %v15546_v16 }
 0x792   : > { %10249 = vmatmul.mubr.f32.gmra.mrb[170].mxu0 %v15549_v18  ;;  %v8841_v30 = vmul.f32 %v15549_v18, %v15549_v18 }
 0x793   : > { %10283 = vmatprep.mubr.f32.mxu0 %v8834_v40 }
 0x796   : > { %10284 = vmatmul.mubr.f32.vlgmr.msra.gmra.mrb[172].mxu0 %v8835_v24 }
 0x797   : > { %10286 = vmatprep.mubr.f32.mxu0 %v8836_v9  ;;  %10434 = vmatpush3.bf16.msra.mxu0 %v10431_v17 }
 0x798   : > { %10436 = vmatprep.subr.bf16.mxu0 %v10431_v17 }
 0x79a   : > { %10287 = vmatmul.mubr.f32.gmra.mrb[174].mxu0 %v8837_v51  ;;  %v10241_v59 = vpop.f32.mrb[164].mxu0 }
 0x79b   : > { %10289 = vmatprep.mubr.f32.mxu0 %v8838_v42  ;;  %v8786_v55 = vpop.f32.mrb[165].mxu0  ;;  %v8827_v54 = vmul.f32 0.125, %v10241_v59 }
 0x79c   : > { %v8826_v49 = vmul.f32 0.125, %v8786_v55 }
 0x79d   : > { %v8956_v38 = vmul.f32 %v8827_v54, %v8827_v54 }
 0x79e   : > { %10290 = vmatmul.mubr.f32.gmra.mrb[176].mxu0 %v8839_v6  ;;  %v8955_v56 = vmul.f32 %v8826_v49, %v8826_v49 }
 0x79f   : > { %10292 = vmatprep.mubr.f32.mxu0 %v8840_v63 }
 0x7a2   : > { %10293 = vmatmul.mubr.f32.gmra.mrb[178].mxu0 %v8841_v30 }
 0x7a3   : > { %10299 = vmatprep.mubr.msk.f32.mxu0 %vm2105_vm8, %v8826_v49 }
 0x7a6   : > { %10300 = vmatmul.mubr.msk.f32.vlgmr.msra.gmra.mrb[180].mxu0 %vm2105_vm8, %v8827_v54 }
 0x7a7   : > { %10438 = vmatpush3.bf16.msra.mxu0 %v10431_v17 }
 0x7db   : > { %v10244_v62 = vpop.f32.mrb[166].mxu0 }
 0x7dc   : > { %v8796_v32 = vpop.f32.mrb[167].mxu0  ;;  %v8829_v21 = vmul.f32 0.125, %v10244_v62 }
 0x7dd   : > { %v8828_v41 = vmul.f32 0.125, %v8796_v32 }
 0x7de   : > { %v8958_v8 = vmul.f32 %v8829_v21, %v8829_v21 }
 0x7df   : > { %10302 = vmatprep.mubr.msk.f32.mxu0 %vm2105_vm8, %v8828_v41  ;;  %v8957_v25 = vmul.f32 %v8828_v41, %v8828_v41 }
 0x7e0   : > { %10303 = vmatmul.mubr.msk.f32.gmra.mrb[182].mxu0 %vm2105_vm8, %v8829_v21 }
 0x82b   : > { %v10247_v15 = vpop.f32.mrb[168].mxu0 }
 0x82c   : > { %v8806_v31 = vpop.f32.mrb[169].mxu0  ;;  %v8831_v20 = vmul.f32 0.125, %v10247_v15 }
 0x82d   : > { %v8830_v45 = vmul.f32 0.125, %v8806_v31 }
 0x82e   : > { %v8960_v11 = vmul.f32 %v8831_v20, %v8831_v20 }
 0x82f   : > { %10305 = vmatprep.mubr.msk.f32.mxu0 %vm2105_vm8, %v8830_v45  ;;  %v8959_v3 = vmul.f32 %v8830_v45, %v8830_v45 }
 0x830   : > { %10306 = vmatmul.mubr.msk.f32.gmra.mrb[184].mxu0 %vm2105_vm8, %v8831_v20 }
 0x865   : > { %v10250_v0 = vpop.f32.mrb[170].mxu0 }
 0x866   : > { %v8816_v12 = vpop.f32.mrb[171].mxu0  ;;  %v8833_v44 = vmul.f32 0.125, %v10250_v0 }
 0x867   : > { %v8832_v33 = vmul.f32 0.125, %v8816_v12 }
 0x868   : > { %v8962_v24 = vmul.f32 %v8833_v44, %v8833_v44 }
 0x869   : > { %v10285_v60 = vpop.f32.mrb[172].mxu0  ;;  %10308 = vmatprep.mubr.msk.f32.mxu0 %vm2105_vm8, %v8832_v33  ;;  %v8961_v6 = vmul.f32 %v8832_v33, %v8832_v33 }
 0x86a   : > { %v8948_v14 = vmul.f32 0.125, %v10285_v60  ;;  %v8908_v26 = vpop.f32.mrb[173].mxu0  ;;  %10309 = vmatmul.mubr.msk.f32.gmra.mrb[186].mxu0 %vm2105_vm8, %v8833_v44 }
 0x86b   : > { %v8947_v47 = vmul.f32 0.125, %v8908_v26 }
 0x86c   : > { %v8964_v19 = vsub.f32 %v8948_v14, %v8956_v38 }
 0x86d   : > { %v8963_v36 = vsub.f32 %v8947_v47, %v8955_v56  ;;  %v10288_v39 = vpop.f32.mrb[174].mxu0  ;;  %v10827_v56 = vmov 0.0  }
 0x86e   : > { %v8972_v27 = vmax.f32 %v8964_v19, 0.0  ;;  %v8950_v37 = vmul.f32 0.125, %v10288_v39  ;;  %v8918_v35 = vpop.f32.mrb[175].mxu0  ;;  %9273 = vst [vmem:[%s15589_s15] sm:$0x1] %v10827_v56 }
 0x86f   : > { %v8971_v28 = vmax.f32 %v8963_v36, 0.0  ;;  %v8949_v17 = vmul.f32 0.125, %v8918_v35 }
 0x870   : > { %v9109_v7 = vadd.f32 1e-05, %v8972_v27  ;;  %v8966_v61 = vsub.f32 %v8950_v37, %v8958_v8 }
 0x871   : > { %v9108_v23 = vadd.f32 1e-05, %v8971_v28  ;;  %v8965_v5 = vsub.f32 %v8949_v17, %v8957_v25  ;;  %v10291_v57 = vpop.f32.mrb[176].mxu0 }
 0x872   : > { %v8974_v58 = vmax.f32 %v8966_v61, 0.0  ;;  %v8952_v52 = vmul.f32 0.125, %v10291_v57  ;;  %v8928_v50 = vpop.f32.mrb[177].mxu0 }
 0x873   : > { %10781 = vrsqrt.f32 %v9108_v23  ;;  %v8973_v10 = vmax.f32 %v8965_v5, 0.0  ;;  %v8951_v43 = vmul.f32 0.125, %v8928_v50 }
 0x874   : > { %10783 = vrsqrt.f32 %v9109_v7  ;;  %v9111_v22 = vadd.f32 1e-05, %v8974_v58  ;;  %v8968_v48 = vsub.f32 %v8952_v52, %v8960_v11 }
 0x875   : > { %v9110_v29 = vadd.f32 1e-05, %v8973_v10  ;;  %v8967_v46 = vsub.f32 %v8951_v43, %v8959_v3  ;;  %v10294_v40 = vpop.f32.mrb[178].mxu0 }
 0x876   : > { %v8976_v9 = vmax.f32 %v8968_v48, 0.0  ;;  %v8954_v51 = vmul.f32 0.125, %v10294_v40  ;;  %v8938_v42 = vpop.f32.mrb[179].mxu0 }
 0x877   : > { %10785 = vrsqrt.f32 %v9110_v29  ;;  %v8975_v59 = vmax.f32 %v8967_v46, 0.0  ;;  %v8953_v63 = vmul.f32 0.125, %v8938_v42 }
 0x878   : > { %10787 = vrsqrt.f32 %v9111_v22  ;;  %v9113_v55 = vadd.f32 1e-05, %v8976_v9  ;;  %v8970_v49 = vsub.f32 %v8954_v51, %v8962_v24 }
 0x879   : > { %v9112_v30 = vadd.f32 1e-05, %v8975_v59  ;;  %v8969_v54 = vsub.f32 %v8953_v63, %v8961_v6  ;;  %v10301_v62 = vpop.f32.mrb[180].mxu0  ;;  %v9274_v63 = vld [vmem:[%s15589_s15] sm:$0x1] }
 0x87a   : > { %v8978_v32 = vmax.f32 %v8970_v49, 0.0  ;;  %v9069_v41 = vpop.f32.mrb[181].mxu0  ;;  %v9254_v8 = vsub.f32 %v15516_v13, %v10301_v62 }
 0x87b   : > { %10789 = vrsqrt.f32 %v9112_v30  ;;  %v8977_v21 = vmax.f32 %v8969_v54, 0.0  ;;  %v9253_v27 = vsub.f32 %v15494_v4, %v9069_v41 }
 0x87c   : > { %10791 = vrsqrt.f32 %v9113_v55  ;;  %v9115_v15 = vadd.f32 1e-05, %v8978_v32 }
 0x87d   : > { %v10782_v31 = vpop.eup %10781  ;;  %v9114_v45 = vadd.f32 1e-05, %v8977_v21 }
 0x87e   : > { %v10784_v20 = vpop.eup %10783  ;;  %10315 = vmatprep.mubr.msk.f32.mxu0 %vm2105_vm8, %v10782_v31 }
 0x87f   : > { %10793 = vrsqrt.f32 %v9114_v45  ;;  %10316 = vmatmul.mubr.msk.f32.vlgmr.msra.gmra.mrb[188].mxu0 %vm2105_vm8, %v10784_v20 }
 0x880   : > { %10795 = vrsqrt.f32 %v9115_v15 }
 0x881   : > { %v10786_v0 = vpop.eup %10785 }
 0x882   : > { %v10788_v12 = vpop.eup %10787  ;;  %10318 = vmatprep.mubr.msk.f32.mxu0 %vm2105_vm8, %v10786_v0 }
 0x883   : > { %10319 = vmatmul.mubr.msk.f32.gmra.mrb[190].mxu0 %vm2105_vm8, %v10788_v12 }
 0x885   : > { %v10790_v33 = vpop.eup %10789 }
 0x886   : > { %v10792_v44 = vpop.eup %10791  ;;  %10321 = vmatprep.mubr.msk.f32.mxu0 %vm2105_vm8, %v10790_v33 }
 0x887   : > { %10322 = vmatmul.mubr.msk.f32.gmra.mrb[192].mxu0 %vm2105_vm8, %v10792_v44 }
 0x889   : > { %v10794_v60 = vpop.eup %10793 }
 0x88a   : > { %v10796_v38 = vpop.eup %10795  ;;  %10324 = vmatprep.mubr.msk.f32.mxu0 %vm2105_vm8, %v10794_v60 }
 0x88b   : > { %10325 = vmatmul.mubr.msk.f32.gmra.mrb[194].mxu0 %vm2105_vm8, %v10796_v38 }
 0x8b3   : > { %v10304_v14 = vpop.f32.mrb[182].mxu0 }
 0x8b4   : > { %v9079_v26 = vpop.f32.mrb[183].mxu0  ;;  %v9256_v17 = vsub.f32 %v15527_v2, %v10304_v14 }
 0x8b5   : > { %v9255_v7 = vsub.f32 %v15524_v53, %v9079_v26 }
 0x903   : > { %v10307_v47 = vpop.f32.mrb[184].mxu0 }
 0x904   : > { %v9089_v19 = vpop.f32.mrb[185].mxu0  ;;  %v9258_v58 = vsub.f32 %v15541_v1, %v10307_v47 }
 0x905   : > { %v9257_v52 = vsub.f32 %v15538_v34, %v9089_v19 }
 0x93d   : > { %v10310_v36 = vpop.f32.mrb[186].mxu0 }
 0x93e   : > { %v9099_v39 = vpop.f32.mrb[187].mxu0  ;;  %v9260_v2 = vsub.f32 %v15549_v18, %v10310_v36 }
 0x93f   : > { %v9259_v53 = vsub.f32 %v15546_v16, %v9099_v39 }
 0x952   : > { %v10317_v37 = vpop.f32.mrb[188].mxu0 }
 0x953   : > { %v9262_v35 = vmul.f32 %v10317_v37, %v9254_v8  ;;  %v9214_v25 = vpop.f32.mrb[189].mxu0 }
 0x954   : > { %v9261_v28 = vmul.f32 %v9253_v27, %v9214_v25 }
 0x956   : > { %v9275_v61 = vadd.f32 %v9262_v35, %v9261_v28  ;;  %v10320_v23 = vpop.f32.mrb[190].mxu0 }
 0x957   : > { %v9264_v5 = vmul.f32 %v10320_v23, %v9256_v17  ;;  %v9224_v57 = vpop.f32.mrb[191].mxu0 }
 0x958   : > { %v9263_v11 = vmul.f32 %v9255_v7, %v9224_v57 }
 0x95a   : > { %v9276_v13 = vadd.f32 %v9275_v61, %v9263_v11  ;;  %v10323_v50 = vpop.f32.mrb[192].mxu0 }
 0x95b   : > { %v9266_v4 = vmul.f32 %v10323_v50, %v9258_v58  ;;  %v9234_v3 = vpop.f32.mrb[193].mxu0 }
 0x95c   : > { %v9265_v10 = vmul.f32 %v9257_v52, %v9234_v3  ;;  %v9277_v43 = vadd.f32 %v9276_v13, %v9264_v5 }
 0x95e   : > { %v9278_v22 = vadd.f32 %v9277_v43, %v9265_v10  ;;  %v10326_v48 = vpop.f32.mrb[194].mxu0 }
 0x95f   : > { %v9268_v29 = vmul.f32 %v10326_v48, %v9260_v2  ;;  %v9244_v46 = vpop.f32.mrb[195].mxu0 }
 0x960   : > { %v9267_v40 = vmul.f32 %v9259_v53, %v9244_v46  ;;  %v9279_v1 = vadd.f32 %v9278_v22, %v9266_v4 }
 0x962   : > { %v9280_v24 = vadd.f32 %v9279_v1, %v9267_v40 }
 0x964   : > { %v9281_v34 = vadd.f32 %v9280_v24, %v9268_v29 }
 0x966   : > { %v9282_v9 = vrot.slane %v9281_v34, 4 }
 0x968   : > { %v9283_v51 = vadd.f32 %v9282_v9, %v9281_v34 }
 0x96a   : > { %v9284_v42 = vrot.slane %v9283_v51, 2 }
 0x96c   : > { %v9285_v6 = vadd.f32 %v9284_v42, %v9283_v51 }
 0x96e   : > { %v9286_v59 = vrot.slane %v9285_v6, 1 }
 0x970   : > { %v9287_v55 = vadd.f32 %v9286_v59, %v9285_v6 }
 0x972   : > { %v9288_v49 = vadd.f32 %v9287_v55, %v9274_v63 }
 0x974   : > { %9289 = vst [vmem:[%s15589_s15] sm:$0x1] %v9288_v49 }
 0x975 PF: > { %s22_s23 = sadd.s32 1, %s10823_s23   ;;  %s16657_s21 = smov %s10819_s22 }
 0x976   : > { %p19_p5 = scmp.ge.s32.totalorder %s22_s23, 4   ;;  %s16658_s22 = smov %s16660_s24 }
 0x978   :  { %21 = sbr.rel (!%p19_p5) target bundleno = 2 (0x2), region = 108 }

</bundles_post_ra>
